<compile_context>
chip_gen: v7x
topology: tpu7x:2x2x1
jax: 0.10.0
libtpu: 0.0.40
codegen_flags: <defaults>
</compile_context>

<pallas_src>
import functools

import jax
import jax.numpy as jnp
from jax.experimental import pallas as pl
from jax.experimental.pallas import tpu as pltpu


# Static layer config: (out_ch, in_ch (None -> raw_acc_in_ch), kernel, stride)
_LAYER_CFG = (
    (512, None, 3, 3),   # raw_conv_1
    (512, 512, 3, 3),    # raw_conv_2
    (512, 512, 3, 3),    # raw_conv_3
    (128, 512, 3, 2),    # raw_conv_4
    (128, 128, 3, 2),    # raw_conv_5
    (512, 128, 3, 1),    # raw_conv_6
)

_VMEM_LIMIT = 32 * 1024 * 1024     # safe on v5e/v6e (128 MiB) and v7x (64 MiB)


def _conv_out_len(l_in, k, s):
    return (l_in - k) // s + 1


def _selection_matrices(t_out, t_in, k, stride, dtype=jnp.bfloat16):
    """sel[j] @ act == act[j::stride][:t_out] — exact 0/1 row gather (MXU-friendly)."""
    rows = jnp.arange(t_out, dtype=jnp.int32)[:, None]
    cols = jnp.arange(t_in, dtype=jnp.int32)[None, :]
    taps = [(cols == stride * rows + j).astype(dtype) for j in range(k)]
    return jnp.stack(taps, axis=0)                       # (K, T_out, T_in)


# ---------------------------------------------------------------------------
# Fused Pallas kernel: conv_2 .. conv_6 (+ bias + ReLU each), one batch
# element per grid step.  Weights / biases / selections stay VMEM-resident
# (constant index maps); inter-layer activations never leave VMEM.
# ---------------------------------------------------------------------------
def _fused_tail_kernel(strides, x_ref, *refs):
    o_ref = refs[-1]
    layer_refs = refs[:-1]
    n_layers = len(layer_refs) // 3

    act = x_ref[0]                                       # (T1, C1) bf16
    for li in range(n_layers):
        w_ref = layer_refs[3 * li + 0]                   # (K, Cin, Cout)   bf16
        b_ref = layer_refs[3 * li + 1]                   # (1, Cout)        f32
        s_ref = layer_refs[3 * li + 2]                   # (K, T_out, T_in) bf16
        stride = strides[li]
        k_taps, _cin, cout = w_ref.shape
        t_out = s_ref.shape[1]

        a_bf = act.astype(jnp.bfloat16)
        acc = jnp.zeros((t_out, cout), jnp.float32)
        for k in range(k_taps):                          # in-kernel im2col: per-tap dots
            if stride == 1:
                rows = a_bf[k:k + t_out, :]              # contiguous tap window
            else:
                rows = jnp.dot(                          # strided row gather on the MXU
                    s_ref[k], a_bf,
                    preferred_element_type=jnp.float32).astype(jnp.bfloat16)
            acc = acc + jnp.dot(rows, w_ref[k],
                                preferred_element_type=jnp.float32)
        out = jnp.maximum(acc + b_ref[...], 0.0)         # bias + ReLU, f32

        if li == n_layers - 1:
            o_ref[0] = out.astype(o_ref.dtype)
        else:
            act = out                                    # stays f32, stays in VMEM
    # nn.Dropout (after conv_3 and conv_6) is identity in eval mode: no-op.


def _fused_tail(h_bf16, tail_params, tail_strides):
    """h_bf16: (N, T1, C1) bf16; tail_params: [(w_taps, bias2d, sel), ...]."""
    n, t1, c1 = h_bf16.shape
    t_final = tail_params[-1][2].shape[1]
    c_final = tail_params[-1][0].shape[2]

    inputs = [h_bf16]
    in_specs = [pl.BlockSpec((1, t1, c1), lambda i: (i, 0, 0))]
    flops = 0
    bytes_accessed = h_bf16.size * 2 + n * t_final * c_final * 4
    for (w_taps, bias2d, sel) in tail_params:
        inputs += [w_taps, bias2d, sel]
        in_specs += [
            pl.BlockSpec(w_taps.shape, lambda i: (0, 0, 0)),   # weights resident
            pl.BlockSpec(bias2d.shape, lambda i: (0, 0)),      # bias resident
            pl.BlockSpec(sel.shape, lambda i: (0, 0, 0)),      # selections resident
        ]
        k_taps, cin, cout = w_taps.shape
        _, t_out, t_in = sel.shape
        flops += 2 * n * k_taps * (t_out * t_in * cin + t_out * cin * cout)
        bytes_accessed += (w_taps.size + sel.size) * 2 + bias2d.size * 4

    kernel = functools.partial(_fused_tail_kernel, tail_strides)
    return pl.pallas_call(
        kernel,
        out_shape=jax.ShapeDtypeStruct((n, t_final, c_final), jnp.float32),
        grid=(n,),
        in_specs=in_specs,
        out_specs=pl.BlockSpec((1, t_final, c_final), lambda i: (i, 0, 0)),
        compiler_params=pltpu.CompilerParams(
            dimension_semantics=("parallel",),        # batch axis -> v7x megacore
            vmem_limit_bytes=_VMEM_LIMIT),
        cost_estimate=pl.CostEstimate(
            flops=flops, transcendentals=0, bytes_accessed=bytes_accessed),
    )(*inputs)


# ---------------------------------------------------------------------------
# Parameters (deterministic, PyTorch-like fan-in init) + forward pass
# ---------------------------------------------------------------------------
def init_params(raw_acc_in_ch=3, seed=0):
    key = jax.random.PRNGKey(seed)
    params = []
    in_ch = raw_acc_in_ch
    for (out_ch, cfg_in, k, _stride) in _LAYER_CFG:
        cin = in_ch if cfg_in is None else cfg_in
        key, kw, kb = jax.random.split(key, 3)
        bound = float(1.0 / (cin * k) ** 0.5)
        w = jax.random.uniform(kw, (out_ch, cin, k), jnp.float32, -bound, bound)
        b = jax.random.uniform(kb, (out_ch,), jnp.float32, -bound, bound)
        params.append((w, b))
        in_ch = out_ch
    return params


@jax.jit
def raw_acc_feature_extraction(acc_x_ncl, params):
    """Eval-mode forward.  acc_x_ncl: (N, C_in, L) f32 -> (N, 512, L_out) f32."""
    x = jnp.transpose(acc_x_ncl, (0, 2, 1))                    # NCL -> NLC, f32
    n, l_in, _ = x.shape

    # --- raw_conv_1: Cin*K = 9 -> negligible FLOPs, badly shaped for the MXU;
    # keep it on XLA.  stride == kernel, so im2col is a pure metadata reshape.
    w1, b1 = params[0]
    cout1, cin1, k1 = w1.shape
    s1 = _LAYER_CFG[0][3]
    t1 = _conv_out_len(l_in, k1, s1)
    a1 = x[:, : t1 * k1, :].reshape(n, t1, k1 * cin1)          # K-major / C-minor
    w1mat = w1.transpose(2, 1, 0).reshape(k1 * cin1, cout1)    # (K*Cin, Cout)
    h = jax.nn.relu(jnp.einsum("ntk,kc->ntc", a1, w1mat) + b1[None, None, :])
    h = h.astype(jnp.bfloat16)                                 # (N, T1, 512)

    # --- raw_conv_2 .. raw_conv_6: one fused Pallas kernel.
    tail_params = []
    t_in = t1
    for (w, b), (cout, _cin, k, stride) in zip(params[1:], _LAYER_CFG[1:]):
        t_out = _conv_out_len(t_in, k, stride)
        tail_params.append((
            w.transpose(2, 1, 0).astype(jnp.bfloat16),         # (K, Cin, Cout)
            b.reshape(1, cout).astype(jnp.float32),            # (1, Cout)
            _selection_matrices(t_out, t_in, k, stride),       # (K, T_out, T_in)
        ))
        t_in = t_out
    tail_strides = tuple(cfg[3] for cfg in _LAYER_CFG[1:])

    out = _fused_tail(h, tail_params, tail_strides)            # (N, T_out6, 512) f32
    return jnp.transpose(out, (0, 2, 1))                       # NLC -> NCL


def _reference_forward(acc_x_ncl, params):
    """Pure-XLA f32 reference matching PyTorch Conv1d + ReLU semantics."""
    x = acc_x_ncl
    for (w, b), (_oc, _ic, _k, stride) in zip(params, _LAYER_CFG):
        x = jax.lax.conv_general_dilated(
            x, w, window_strides=(stride,), padding="VALID",
            dimension_numbers=("NCH", "OIH", "NCH"))
        x = jax.nn.relu(x + b[None, :, None])
    return x


if __name__ == "__main__":
    N, C_IN, L = 2, 3, 486   # small length surviving all strided convs -> L_out = 1
    key = jax.random.PRNGKey(0)
    acc_x = jax.random.normal(key, (N, C_IN, L), jnp.float32)

    params = init_params(raw_acc_in_ch=C_IN, seed=0)
    out = jax.block_until_ready(raw_acc_feature_extraction(acc_x, params))

    assert out.shape == (N, 512, 1), out.shape
    assert out.dtype == jnp.float32

    # Numerical check vs. a pure-XLA f32 reference.  Only the MXU operands are
    # bf16 (activations/weights); accumulation and inter-layer activations are
    # f32, so the tolerance is tightened vs. the previous version.
    ref = jax.block_until_ready(_reference_forward(acc_x, params))
    rel_err = float(jnp.max(jnp.abs(out - ref)) / (jnp.max(jnp.abs(ref)) + 1e-6))
    assert rel_err < 0.05, f"rel_err={rel_err}"

    print("KERNEL_OK")
</pallas_src>

<mosaic_0001>
module attributes {stable_mosaic.version = 11 : i64} {
  func.func @_fused_tail_kernel(%arg0: i32, %arg1: memref<1x162x512xbf16, #tpu.memory_space<vmem>>, %arg2: memref<3x512x512xbf16, #tpu.memory_space<vmem>>, %arg3: memref<1x512xf32, #tpu.memory_space<vmem>>, %arg4: memref<3x54x162xbf16, #tpu.memory_space<vmem>>, %arg5: memref<3x512x512xbf16, #tpu.memory_space<vmem>>, %arg6: memref<1x512xf32, #tpu.memory_space<vmem>>, %arg7: memref<3x18x54xbf16, #tpu.memory_space<vmem>>, %arg8: memref<3x512x128xbf16, #tpu.memory_space<vmem>>, %arg9: memref<1x128xf32, #tpu.memory_space<vmem>>, %arg10: memref<3x8x18xbf16, #tpu.memory_space<vmem>>, %arg11: memref<3x128x128xbf16, #tpu.memory_space<vmem>>, %arg12: memref<1x128xf32, #tpu.memory_space<vmem>>, %arg13: memref<3x3x8xbf16, #tpu.memory_space<vmem>>, %arg14: memref<3x128x512xbf16, #tpu.memory_space<vmem>>, %arg15: memref<1x512xf32, #tpu.memory_space<vmem>>, %arg16: memref<3x1x3xbf16, #tpu.memory_space<vmem>>, %arg17: memref<1x1x512xf32, #tpu.memory_space<vmem>>) attributes {dimension_semantics = [#tpu.dimension_semantics<parallel>], iteration_bounds = array<i64: 2>, scalar_prefetch = 0 : i64, scratch_operands = 0 : i64, tpu.core_type = #tpu.core_type<tc>, window_params = [{transform_indices = @transform_0, window_bounds = array<i64: 1, 162, 512>}, {pipeline_mode = #tpu.pipeline_mode<synchronous>, transform_indices = @transform_1, window_bounds = array<i64: 3, 512, 512>}, {pipeline_mode = #tpu.pipeline_mode<synchronous>, transform_indices = @transform_2, window_bounds = array<i64: 1, 512>}, {pipeline_mode = #tpu.pipeline_mode<synchronous>, transform_indices = @transform_3, window_bounds = array<i64: 3, 54, 162>}, {pipeline_mode = #tpu.pipeline_mode<synchronous>, transform_indices = @transform_4, window_bounds = array<i64: 3, 512, 512>}, {pipeline_mode = #tpu.pipeline_mode<synchronous>, transform_indices = @transform_5, window_bounds = array<i64: 1, 512>}, {pipeline_mode = #tpu.pipeline_mode<synchronous>, transform_indices = @transform_6, window_bounds = array<i64: 3, 18, 54>}, {pipeline_mode = #tpu.pipeline_mode<synchronous>, transform_indices = @transform_7, window_bounds = array<i64: 3, 512, 128>}, {pipeline_mode = #tpu.pipeline_mode<synchronous>, transform_indices = @transform_8, window_bounds = array<i64: 1, 128>}, {pipeline_mode = #tpu.pipeline_mode<synchronous>, transform_indices = @transform_9, window_bounds = array<i64: 3, 8, 18>}, {pipeline_mode = #tpu.pipeline_mode<synchronous>, transform_indices = @transform_10, window_bounds = array<i64: 3, 128, 128>}, {pipeline_mode = #tpu.pipeline_mode<synchronous>, transform_indices = @transform_11, window_bounds = array<i64: 1, 128>}, {pipeline_mode = #tpu.pipeline_mode<synchronous>, transform_indices = @transform_12, window_bounds = array<i64: 3, 3, 8>}, {pipeline_mode = #tpu.pipeline_mode<synchronous>, transform_indices = @transform_13, window_bounds = array<i64: 3, 128, 512>}, {pipeline_mode = #tpu.pipeline_mode<synchronous>, transform_indices = @transform_14, window_bounds = array<i64: 1, 512>}, {pipeline_mode = #tpu.pipeline_mode<synchronous>, transform_indices = @transform_15, window_bounds = array<i64: 3, 1, 3>}, {transform_indices = @transform_16, window_bounds = array<i64: 1, 1, 512>}]} {
    %c0 = arith.constant 0 : index
    %c0_0 = arith.constant 0 : index
    %c0_1 = arith.constant 0 : index
    %0 = vector.load %arg1[%c0, %c0_0, %c0_1] : memref<1x162x512xbf16, #tpu.memory_space<vmem>>, vector<1x162x512xbf16>
    %1 = vector.shape_cast %0 : vector<1x162x512xbf16> to vector<162x512xbf16>
    %cst = arith.constant 0.000000e+00 : f32
    %2 = vector.broadcast %cst : f32 to vector<54x512xf32>
    %c0_2 = arith.constant 0 : index
    %c0_3 = arith.constant 0 : index
    %c0_4 = arith.constant 0 : index
    %3 = vector.load %arg4[%c0_2, %c0_3, %c0_4] : memref<3x54x162xbf16, #tpu.memory_space<vmem>>, vector<1x54x162xbf16>
    %4 = vector.shape_cast %3 : vector<1x54x162xbf16> to vector<54x162xbf16>
    %cst_5 = arith.constant dense<0.000000e+00> : vector<54x512xf32>
    %5 = tpu.matmul %4, %1, %cst_5 {dimension_numbers = #tpu.dot_dimension_numbers<[1], [0], [0], [1], [0, 0, 1, 1], [], []>} : vector<54x162xbf16>, vector<162x512xbf16>, vector<54x512xf32> -> vector<54x512xf32>
    %6 = arith.truncf %5 : vector<54x512xf32> to vector<54x512xbf16>
    %c0_6 = arith.constant 0 : index
    %c0_7 = arith.constant 0 : index
    %c0_8 = arith.constant 0 : index
    %7 = vector.load %arg2[%c0_6, %c0_7, %c0_8] : memref<3x512x512xbf16, #tpu.memory_space<vmem>>, vector<1x512x512xbf16>
    %8 = vector.shape_cast %7 : vector<1x512x512xbf16> to vector<512x512xbf16>
    %cst_9 = arith.constant dense<0.000000e+00> : vector<54x512xf32>
    %9 = tpu.matmul %6, %8, %cst_9 {dimension_numbers = #tpu.dot_dimension_numbers<[1], [0], [0], [1], [0, 0, 1, 1], [], []>} : vector<54x512xbf16>, vector<512x512xbf16>, vector<54x512xf32> -> vector<54x512xf32>
    %10 = arith.addf %2, %9 : vector<54x512xf32>
    %c1 = arith.constant 1 : index
    %c0_10 = arith.constant 0 : index
    %c0_11 = arith.constant 0 : index
    %11 = vector.load %arg4[%c1, %c0_10, %c0_11] : memref<3x54x162xbf16, #tpu.memory_space<vmem>>, vector<1x54x162xbf16>
    %12 = vector.shape_cast %11 : vector<1x54x162xbf16> to vector<54x162xbf16>
    %cst_12 = arith.constant dense<0.000000e+00> : vector<54x512xf32>
    %13 = tpu.matmul %12, %1, %cst_12 {dimension_numbers = #tpu.dot_dimension_numbers<[1], [0], [0], [1], [0, 0, 1, 1], [], []>} : vector<54x162xbf16>, vector<162x512xbf16>, vector<54x512xf32> -> vector<54x512xf32>
    %14 = arith.truncf %13 : vector<54x512xf32> to vector<54x512xbf16>
    %c1_13 = arith.constant 1 : index
    %c0_14 = arith.constant 0 : index
    %c0_15 = arith.constant 0 : index
    %15 = vector.load %arg2[%c1_13, %c0_14, %c0_15] : memref<3x512x512xbf16, #tpu.memory_space<vmem>>, vector<1x512x512xbf16>
    %16 = vector.shape_cast %15 : vector<1x512x512xbf16> to vector<512x512xbf16>
    %cst_16 = arith.constant dense<0.000000e+00> : vector<54x512xf32>
    %17 = tpu.matmul %14, %16, %cst_16 {dimension_numbers = #tpu.dot_dimension_numbers<[1], [0], [0], [1], [0, 0, 1, 1], [], []>} : vector<54x512xbf16>, vector<512x512xbf16>, vector<54x512xf32> -> vector<54x512xf32>
    %18 = arith.addf %10, %17 : vector<54x512xf32>
    %c2 = arith.constant 2 : index
    %c0_17 = arith.constant 0 : index
    %c0_18 = arith.constant 0 : index
    %19 = vector.load %arg4[%c2, %c0_17, %c0_18] : memref<3x54x162xbf16, #tpu.memory_space<vmem>>, vector<1x54x162xbf16>
    %20 = vector.shape_cast %19 : vector<1x54x162xbf16> to vector<54x162xbf16>
    %cst_19 = arith.constant dense<0.000000e+00> : vector<54x512xf32>
    %21 = tpu.matmul %20, %1, %cst_19 {dimension_numbers = #tpu.dot_dimension_numbers<[1], [0], [0], [1], [0, 0, 1, 1], [], []>} : vector<54x162xbf16>, vector<162x512xbf16>, vector<54x512xf32> -> vector<54x512xf32>
    %22 = arith.truncf %21 : vector<54x512xf32> to vector<54x512xbf16>
    %c2_20 = arith.constant 2 : index
    %c0_21 = arith.constant 0 : index
    %c0_22 = arith.constant 0 : index
    %23 = vector.load %arg2[%c2_20, %c0_21, %c0_22] : memref<3x512x512xbf16, #tpu.memory_space<vmem>>, vector<1x512x512xbf16>
    %24 = vector.shape_cast %23 : vector<1x512x512xbf16> to vector<512x512xbf16>
    %cst_23 = arith.constant dense<0.000000e+00> : vector<54x512xf32>
    %25 = tpu.matmul %22, %24, %cst_23 {dimension_numbers = #tpu.dot_dimension_numbers<[1], [0], [0], [1], [0, 0, 1, 1], [], []>} : vector<54x512xbf16>, vector<512x512xbf16>, vector<54x512xf32> -> vector<54x512xf32>
    %26 = arith.addf %18, %25 : vector<54x512xf32>
    %c0_24 = arith.constant 0 : index
    %c0_25 = arith.constant 0 : index
    %27 = vector.load %arg3[%c0_24, %c0_25] : memref<1x512xf32, #tpu.memory_space<vmem>>, vector<1x512xf32>
    %28 = vector.broadcast %27 : vector<1x512xf32> to vector<54x512xf32>
    %29 = arith.addf %26, %28 : vector<54x512xf32>
    %cst_26 = arith.constant 0.000000e+00 : f32
    %30 = vector.broadcast %cst_26 : f32 to vector<54x512xf32>
    %31 = arith.maximumf %29, %30 : vector<54x512xf32>
    %32 = arith.truncf %31 : vector<54x512xf32> to vector<54x512xbf16>
    %cst_27 = arith.constant 0.000000e+00 : f32
    %33 = vector.broadcast %cst_27 : f32 to vector<18x512xf32>
    %c0_28 = arith.constant 0 : index
    %c0_29 = arith.constant 0 : index
    %c0_30 = arith.constant 0 : index
    %34 = vector.load %arg7[%c0_28, %c0_29, %c0_30] : memref<3x18x54xbf16, #tpu.memory_space<vmem>>, vector<1x18x54xbf16>
    %35 = vector.shape_cast %34 : vector<1x18x54xbf16> to vector<18x54xbf16>
    %cst_31 = arith.constant dense<0.000000e+00> : vector<18x512xf32>
    %36 = tpu.matmul %35, %32, %cst_31 {dimension_numbers = #tpu.dot_dimension_numbers<[1], [0], [0], [1], [0, 0, 1, 1], [], []>} : vector<18x54xbf16>, vector<54x512xbf16>, vector<18x512xf32> -> vector<18x512xf32>
    %37 = arith.truncf %36 : vector<18x512xf32> to vector<18x512xbf16>
    %c0_32 = arith.constant 0 : index
    %c0_33 = arith.constant 0 : index
    %c0_34 = arith.constant 0 : index
    %38 = vector.load %arg5[%c0_32, %c0_33, %c0_34] : memref<3x512x512xbf16, #tpu.memory_space<vmem>>, vector<1x512x512xbf16>
    %39 = vector.shape_cast %38 : vector<1x512x512xbf16> to vector<512x512xbf16>
    %cst_35 = arith.constant dense<0.000000e+00> : vector<18x512xf32>
    %40 = tpu.matmul %37, %39, %cst_35 {dimension_numbers = #tpu.dot_dimension_numbers<[1], [0], [0], [1], [0, 0, 1, 1], [], []>} : vector<18x512xbf16>, vector<512x512xbf16>, vector<18x512xf32> -> vector<18x512xf32>
    %41 = arith.addf %33, %40 : vector<18x512xf32>
    %c1_36 = arith.constant 1 : index
    %c0_37 = arith.constant 0 : index
    %c0_38 = arith.constant 0 : index
    %42 = vector.load %arg7[%c1_36, %c0_37, %c0_38] : memref<3x18x54xbf16, #tpu.memory_space<vmem>>, vector<1x18x54xbf16>
    %43 = vector.shape_cast %42 : vector<1x18x54xbf16> to vector<18x54xbf16>
    %cst_39 = arith.constant dense<0.000000e+00> : vector<18x512xf32>
    %44 = tpu.matmul %43, %32, %cst_39 {dimension_numbers = #tpu.dot_dimension_numbers<[1], [0], [0], [1], [0, 0, 1, 1], [], []>} : vector<18x54xbf16>, vector<54x512xbf16>, vector<18x512xf32> -> vector<18x512xf32>
    %45 = arith.truncf %44 : vector<18x512xf32> to vector<18x512xbf16>
    %c1_40 = arith.constant 1 : index
    %c0_41 = arith.constant 0 : index
    %c0_42 = arith.constant 0 : index
    %46 = vector.load %arg5[%c1_40, %c0_41, %c0_42] : memref<3x512x512xbf16, #tpu.memory_space<vmem>>, vector<1x512x512xbf16>
    %47 = vector.shape_cast %46 : vector<1x512x512xbf16> to vector<512x512xbf16>
    %cst_43 = arith.constant dense<0.000000e+00> : vector<18x512xf32>
    %48 = tpu.matmul %45, %47, %cst_43 {dimension_numbers = #tpu.dot_dimension_numbers<[1], [0], [0], [1], [0, 0, 1, 1], [], []>} : vector<18x512xbf16>, vector<512x512xbf16>, vector<18x512xf32> -> vector<18x512xf32>
    %49 = arith.addf %41, %48 : vector<18x512xf32>
    %c2_44 = arith.constant 2 : index
    %c0_45 = arith.constant 0 : index
    %c0_46 = arith.constant 0 : index
    %50 = vector.load %arg7[%c2_44, %c0_45, %c0_46] : memref<3x18x54xbf16, #tpu.memory_space<vmem>>, vector<1x18x54xbf16>
    %51 = vector.shape_cast %50 : vector<1x18x54xbf16> to vector<18x54xbf16>
    %cst_47 = arith.constant dense<0.000000e+00> : vector<18x512xf32>
    %52 = tpu.matmul %51, %32, %cst_47 {dimension_numbers = #tpu.dot_dimension_numbers<[1], [0], [0], [1], [0, 0, 1, 1], [], []>} : vector<18x54xbf16>, vector<54x512xbf16>, vector<18x512xf32> -> vector<18x512xf32>
    %53 = arith.truncf %52 : vector<18x512xf32> to vector<18x512xbf16>
    %c2_48 = arith.constant 2 : index
    %c0_49 = arith.constant 0 : index
    %c0_50 = arith.constant 0 : index
    %54 = vector.load %arg5[%c2_48, %c0_49, %c0_50] : memref<3x512x512xbf16, #tpu.memory_space<vmem>>, vector<1x512x512xbf16>
    %55 = vector.shape_cast %54 : vector<1x512x512xbf16> to vector<512x512xbf16>
    %cst_51 = arith.constant dense<0.000000e+00> : vector<18x512xf32>
    %56 = tpu.matmul %53, %55, %cst_51 {dimension_numbers = #tpu.dot_dimension_numbers<[1], [0], [0], [1], [0, 0, 1, 1], [], []>} : vector<18x512xbf16>, vector<512x512xbf16>, vector<18x512xf32> -> vector<18x512xf32>
    %57 = arith.addf %49, %56 : vector<18x512xf32>
    %c0_52 = arith.constant 0 : index
    %c0_53 = arith.constant 0 : index
    %58 = vector.load %arg6[%c0_52, %c0_53] : memref<1x512xf32, #tpu.memory_space<vmem>>, vector<1x512xf32>
    %59 = vector.broadcast %58 : vector<1x512xf32> to vector<18x512xf32>
    %60 = arith.addf %57, %59 : vector<18x512xf32>
    %cst_54 = arith.constant 0.000000e+00 : f32
    %61 = vector.broadcast %cst_54 : f32 to vector<18x512xf32>
    %62 = arith.maximumf %60, %61 : vector<18x512xf32>
    %63 = arith.truncf %62 : vector<18x512xf32> to vector<18x512xbf16>
    %cst_55 = arith.constant 0.000000e+00 : f32
    %64 = vector.broadcast %cst_55 : f32 to vector<8x128xf32>
    %c0_56 = arith.constant 0 : index
    %c0_57 = arith.constant 0 : index
    %c0_58 = arith.constant 0 : index
    %65 = vector.load %arg10[%c0_56, %c0_57, %c0_58] : memref<3x8x18xbf16, #tpu.memory_space<vmem>>, vector<1x8x18xbf16>
    %66 = vector.shape_cast %65 : vector<1x8x18xbf16> to vector<8x18xbf16>
    %cst_59 = arith.constant dense<0.000000e+00> : vector<8x512xf32>
    %67 = tpu.matmul %66, %63, %cst_59 {dimension_numbers = #tpu.dot_dimension_numbers<[1], [0], [0], [1], [0, 0, 1, 1], [], []>} : vector<8x18xbf16>, vector<18x512xbf16>, vector<8x512xf32> -> vector<8x512xf32>
    %68 = arith.truncf %67 : vector<8x512xf32> to vector<8x512xbf16>
    %c0_60 = arith.constant 0 : index
    %c0_61 = arith.constant 0 : index
    %c0_62 = arith.constant 0 : index
    %69 = vector.load %arg8[%c0_60, %c0_61, %c0_62] : memref<3x512x128xbf16, #tpu.memory_space<vmem>>, vector<1x512x128xbf16>
    %70 = vector.shape_cast %69 : vector<1x512x128xbf16> to vector<512x128xbf16>
    %cst_63 = arith.constant dense<0.000000e+00> : vector<8x128xf32>
    %71 = tpu.matmul %68, %70, %cst_63 {dimension_numbers = #tpu.dot_dimension_numbers<[1], [0], [0], [1], [0, 0, 1, 1], [], []>} : vector<8x512xbf16>, vector<512x128xbf16>, vector<8x128xf32> -> vector<8x128xf32>
    %72 = arith.addf %64, %71 : vector<8x128xf32>
    %c1_64 = arith.constant 1 : index
    %c0_65 = arith.constant 0 : index
    %c0_66 = arith.constant 0 : index
    %73 = vector.load %arg10[%c1_64, %c0_65, %c0_66] : memref<3x8x18xbf16, #tpu.memory_space<vmem>>, vector<1x8x18xbf16>
    %74 = vector.shape_cast %73 : vector<1x8x18xbf16> to vector<8x18xbf16>
    %cst_67 = arith.constant dense<0.000000e+00> : vector<8x512xf32>
    %75 = tpu.matmul %74, %63, %cst_67 {dimension_numbers = #tpu.dot_dimension_numbers<[1], [0], [0], [1], [0, 0, 1, 1], [], []>} : vector<8x18xbf16>, vector<18x512xbf16>, vector<8x512xf32> -> vector<8x512xf32>
    %76 = arith.truncf %75 : vector<8x512xf32> to vector<8x512xbf16>
    %c1_68 = arith.constant 1 : index
    %c0_69 = arith.constant 0 : index
    %c0_70 = arith.constant 0 : index
    %77 = vector.load %arg8[%c1_68, %c0_69, %c0_70] : memref<3x512x128xbf16, #tpu.memory_space<vmem>>, vector<1x512x128xbf16>
    %78 = vector.shape_cast %77 : vector<1x512x128xbf16> to vector<512x128xbf16>
    %cst_71 = arith.constant dense<0.000000e+00> : vector<8x128xf32>
    %79 = tpu.matmul %76, %78, %cst_71 {dimension_numbers = #tpu.dot_dimension_numbers<[1], [0], [0], [1], [0, 0, 1, 1], [], []>} : vector<8x512xbf16>, vector<512x128xbf16>, vector<8x128xf32> -> vector<8x128xf32>
    %80 = arith.addf %72, %79 : vector<8x128xf32>
    %c2_72 = arith.constant 2 : index
    %c0_73 = arith.constant 0 : index
    %c0_74 = arith.constant 0 : index
    %81 = vector.load %arg10[%c2_72, %c0_73, %c0_74] : memref<3x8x18xbf16, #tpu.memory_space<vmem>>, vector<1x8x18xbf16>
    %82 = vector.shape_cast %81 : vector<1x8x18xbf16> to vector<8x18xbf16>
    %cst_75 = arith.constant dense<0.000000e+00> : vector<8x512xf32>
    %83 = tpu.matmul %82, %63, %cst_75 {dimension_numbers = #tpu.dot_dimension_numbers<[1], [0], [0], [1], [0, 0, 1, 1], [], []>} : vector<8x18xbf16>, vector<18x512xbf16>, vector<8x512xf32> -> vector<8x512xf32>
    %84 = arith.truncf %83 : vector<8x512xf32> to vector<8x512xbf16>
    %c2_76 = arith.constant 2 : index
    %c0_77 = arith.constant 0 : index
    %c0_78 = arith.constant 0 : index
    %85 = vector.load %arg8[%c2_76, %c0_77, %c0_78] : memref<3x512x128xbf16, #tpu.memory_space<vmem>>, vector<1x512x128xbf16>
    %86 = vector.shape_cast %85 : vector<1x512x128xbf16> to vector<512x128xbf16>
    %cst_79 = arith.constant dense<0.000000e+00> : vector<8x128xf32>
    %87 = tpu.matmul %84, %86, %cst_79 {dimension_numbers = #tpu.dot_dimension_numbers<[1], [0], [0], [1], [0, 0, 1, 1], [], []>} : vector<8x512xbf16>, vector<512x128xbf16>, vector<8x128xf32> -> vector<8x128xf32>
    %88 = arith.addf %80, %87 : vector<8x128xf32>
    %c0_80 = arith.constant 0 : index
    %c0_81 = arith.constant 0 : index
    %89 = vector.load %arg9[%c0_80, %c0_81] : memref<1x128xf32, #tpu.memory_space<vmem>>, vector<1x128xf32>
    %90 = vector.broadcast %89 : vector<1x128xf32> to vector<8x128xf32>
    %91 = arith.addf %88, %90 : vector<8x128xf32>
    %cst_82 = arith.constant 0.000000e+00 : f32
    %92 = vector.broadcast %cst_82 : f32 to vector<8x128xf32>
    %93 = arith.maximumf %91, %92 : vector<8x128xf32>
    %94 = arith.truncf %93 : vector<8x128xf32> to vector<8x128xbf16>
    %cst_83 = arith.constant 0.000000e+00 : f32
    %95 = vector.broadcast %cst_83 : f32 to vector<3x128xf32>
    %c0_84 = arith.constant 0 : index
    %c0_85 = arith.constant 0 : index
    %c0_86 = arith.constant 0 : index
    %96 = vector.load %arg13[%c0_84, %c0_85, %c0_86] : memref<3x3x8xbf16, #tpu.memory_space<vmem>>, vector<1x3x8xbf16>
    %97 = vector.shape_cast %96 : vector<1x3x8xbf16> to vector<3x8xbf16>
    %cst_87 = arith.constant dense<0.000000e+00> : vector<3x128xf32>
    %98 = tpu.matmul %97, %94, %cst_87 {dimension_numbers = #tpu.dot_dimension_numbers<[1], [0], [0], [1], [0, 0, 1, 1], [], []>} : vector<3x8xbf16>, vector<8x128xbf16>, vector<3x128xf32> -> vector<3x128xf32>
    %99 = arith.truncf %98 : vector<3x128xf32> to vector<3x128xbf16>
    %c0_88 = arith.constant 0 : index
    %c0_89 = arith.constant 0 : index
    %c0_90 = arith.constant 0 : index
    %100 = vector.load %arg11[%c0_88, %c0_89, %c0_90] : memref<3x128x128xbf16, #tpu.memory_space<vmem>>, vector<1x128x128xbf16>
    %101 = vector.shape_cast %100 : vector<1x128x128xbf16> to vector<128x128xbf16>
    %cst_91 = arith.constant dense<0.000000e+00> : vector<3x128xf32>
    %102 = tpu.matmul %99, %101, %cst_91 {dimension_numbers = #tpu.dot_dimension_numbers<[1], [0], [0], [1], [0, 0, 1, 1], [], []>} : vector<3x128xbf16>, vector<128x128xbf16>, vector<3x128xf32> -> vector<3x128xf32>
    %103 = arith.addf %95, %102 : vector<3x128xf32>
    %c1_92 = arith.constant 1 : index
    %c0_93 = arith.constant 0 : index
    %c0_94 = arith.constant 0 : index
    %104 = vector.load %arg13[%c1_92, %c0_93, %c0_94] : memref<3x3x8xbf16, #tpu.memory_space<vmem>>, vector<1x3x8xbf16>
    %105 = vector.shape_cast %104 : vector<1x3x8xbf16> to vector<3x8xbf16>
    %cst_95 = arith.constant dense<0.000000e+00> : vector<3x128xf32>
    %106 = tpu.matmul %105, %94, %cst_95 {dimension_numbers = #tpu.dot_dimension_numbers<[1], [0], [0], [1], [0, 0, 1, 1], [], []>} : vector<3x8xbf16>, vector<8x128xbf16>, vector<3x128xf32> -> vector<3x128xf32>
    %107 = arith.truncf %106 : vector<3x128xf32> to vector<3x128xbf16>
    %c1_96 = arith.constant 1 : index
    %c0_97 = arith.constant 0 : index
    %c0_98 = arith.constant 0 : index
    %108 = vector.load %arg11[%c1_96, %c0_97, %c0_98] : memref<3x128x128xbf16, #tpu.memory_space<vmem>>, vector<1x128x128xbf16>
    %109 = vector.shape_cast %108 : vector<1x128x128xbf16> to vector<128x128xbf16>
    %cst_99 = arith.constant dense<0.000000e+00> : vector<3x128xf32>
    %110 = tpu.matmul %107, %109, %cst_99 {dimension_numbers = #tpu.dot_dimension_numbers<[1], [0], [0], [1], [0, 0, 1, 1], [], []>} : vector<3x128xbf16>, vector<128x128xbf16>, vector<3x128xf32> -> vector<3x128xf32>
    %111 = arith.addf %103, %110 : vector<3x128xf32>
    %c2_100 = arith.constant 2 : index
    %c0_101 = arith.constant 0 : index
    %c0_102 = arith.constant 0 : index
    %112 = vector.load %arg13[%c2_100, %c0_101, %c0_102] : memref<3x3x8xbf16, #tpu.memory_space<vmem>>, vector<1x3x8xbf16>
    %113 = vector.shape_cast %112 : vector<1x3x8xbf16> to vector<3x8xbf16>
    %cst_103 = arith.constant dense<0.000000e+00> : vector<3x128xf32>
    %114 = tpu.matmul %113, %94, %cst_103 {dimension_numbers = #tpu.dot_dimension_numbers<[1], [0], [0], [1], [0, 0, 1, 1], [], []>} : vector<3x8xbf16>, vector<8x128xbf16>, vector<3x128xf32> -> vector<3x128xf32>
    %115 = arith.truncf %114 : vector<3x128xf32> to vector<3x128xbf16>
    %c2_104 = arith.constant 2 : index
    %c0_105 = arith.constant 0 : index
    %c0_106 = arith.constant 0 : index
    %116 = vector.load %arg11[%c2_104, %c0_105, %c0_106] : memref<3x128x128xbf16, #tpu.memory_space<vmem>>, vector<1x128x128xbf16>
    %117 = vector.shape_cast %116 : vector<1x128x128xbf16> to vector<128x128xbf16>
    %cst_107 = arith.constant dense<0.000000e+00> : vector<3x128xf32>
    %118 = tpu.matmul %115, %117, %cst_107 {dimension_numbers = #tpu.dot_dimension_numbers<[1], [0], [0], [1], [0, 0, 1, 1], [], []>} : vector<3x128xbf16>, vector<128x128xbf16>, vector<3x128xf32> -> vector<3x128xf32>
    %119 = arith.addf %111, %118 : vector<3x128xf32>
    %c0_108 = arith.constant 0 : index
    %c0_109 = arith.constant 0 : index
    %120 = vector.load %arg12[%c0_108, %c0_109] : memref<1x128xf32, #tpu.memory_space<vmem>>, vector<1x128xf32>
    %121 = vector.broadcast %120 : vector<1x128xf32> to vector<3x128xf32>
    %122 = arith.addf %119, %121 : vector<3x128xf32>
    %cst_110 = arith.constant 0.000000e+00 : f32
    %123 = vector.broadcast %cst_110 : f32 to vector<3x128xf32>
    %124 = arith.maximumf %122, %123 : vector<3x128xf32>
    %125 = arith.truncf %124 : vector<3x128xf32> to vector<3x128xbf16>
    %cst_111 = arith.constant 0.000000e+00 : f32
    %126 = vector.broadcast %cst_111 : f32 to vector<1x512xf32>
    %127 = vector.extract_strided_slice %125 {offsets = [0, 0], sizes = [1, 128], strides = [1, 1]} : vector<3x128xbf16> to vector<1x128xbf16>
    %c0_112 = arith.constant 0 : index
    %c0_113 = arith.constant 0 : index
    %c0_114 = arith.constant 0 : index
    %128 = vector.load %arg14[%c0_112, %c0_113, %c0_114] : memref<3x128x512xbf16, #tpu.memory_space<vmem>>, vector<1x128x512xbf16>
    %129 = vector.shape_cast %128 : vector<1x128x512xbf16> to vector<128x512xbf16>
    %cst_115 = arith.constant dense<0.000000e+00> : vector<1x512xf32>
    %130 = tpu.matmul %127, %129, %cst_115 {dimension_numbers = #tpu.dot_dimension_numbers<[1], [0], [0], [1], [0, 0, 1, 1], [], []>} : vector<1x128xbf16>, vector<128x512xbf16>, vector<1x512xf32> -> vector<1x512xf32>
    %131 = arith.addf %126, %130 : vector<1x512xf32>
    %132 = vector.extract_strided_slice %125 {offsets = [1, 0], sizes = [1, 128], strides = [1, 1]} : vector<3x128xbf16> to vector<1x128xbf16>
    %c1_116 = arith.constant 1 : index
    %c0_117 = arith.constant 0 : index
    %c0_118 = arith.constant 0 : index
    %133 = vector.load %arg14[%c1_116, %c0_117, %c0_118] : memref<3x128x512xbf16, #tpu.memory_space<vmem>>, vector<1x128x512xbf16>
    %134 = vector.shape_cast %133 : vector<1x128x512xbf16> to vector<128x512xbf16>
    %cst_119 = arith.constant dense<0.000000e+00> : vector<1x512xf32>
    %135 = tpu.matmul %132, %134, %cst_119 {dimension_numbers = #tpu.dot_dimension_numbers<[1], [0], [0], [1], [0, 0, 1, 1], [], []>} : vector<1x128xbf16>, vector<128x512xbf16>, vector<1x512xf32> -> vector<1x512xf32>
    %136 = arith.addf %131, %135 : vector<1x512xf32>
    %137 = vector.extract_strided_slice %125 {offsets = [2, 0], sizes = [1, 128], strides = [1, 1]} : vector<3x128xbf16> to vector<1x128xbf16>
    %c2_120 = arith.constant 2 : index
    %c0_121 = arith.constant 0 : index
    %c0_122 = arith.constant 0 : index
    %138 = vector.load %arg14[%c2_120, %c0_121, %c0_122] : memref<3x128x512xbf16, #tpu.memory_space<vmem>>, vector<1x128x512xbf16>
    %139 = vector.shape_cast %138 : vector<1x128x512xbf16> to vector<128x512xbf16>
    %cst_123 = arith.constant dense<0.000000e+00> : vector<1x512xf32>
    %140 = tpu.matmul %137, %139, %cst_123 {dimension_numbers = #tpu.dot_dimension_numbers<[1], [0], [0], [1], [0, 0, 1, 1], [], []>} : vector<1x128xbf16>, vector<128x512xbf16>, vector<1x512xf32> -> vector<1x512xf32>
    %141 = arith.addf %136, %140 : vector<1x512xf32>
    %c0_124 = arith.constant 0 : index
    %c0_125 = arith.constant 0 : index
    %142 = vector.load %arg15[%c0_124, %c0_125] : memref<1x512xf32, #tpu.memory_space<vmem>>, vector<1x512xf32>
    %143 = arith.addf %141, %142 : vector<1x512xf32>
    %cst_126 = arith.constant 0.000000e+00 : f32
    %144 = vector.broadcast %cst_126 : f32 to vector<1x512xf32>
    %145 = arith.maximumf %143, %144 : vector<1x512xf32>
    %c0_127 = arith.constant 0 : index
    %c0_128 = arith.constant 0 : index
    %c0_129 = arith.constant 0 : index
    %146 = vector.load %arg17[%c0_127, %c0_128, %c0_129] : memref<1x1x512xf32, #tpu.memory_space<vmem>>, vector<1x1x512xf32>
    %147 = vector.shape_cast %146 : vector<1x1x512xf32> to vector<1x512xf32>
    %148 = vector.shape_cast %145 : vector<1x512xf32> to vector<1x1x512xf32>
    tpu.vector_store %arg17[%c0_127, %c0_128, %c0_129], %148 {strides = array<i32>} : memref<1x1x512xf32, #tpu.memory_space<vmem>>, vector<1x1x512xf32>,
    return
  }
  func.func @transform_0(%arg0: i32) -> (i32, i32, i32) {
    %c0_i32 = arith.constant 0 : i32
    %c0_i32_0 = arith.constant 0 : i32
    %c0_i32_1 = arith.constant 0 : i32
    return %arg0, %c0_i32, %c0_i32_0 : i32, i32, i32
  }
  func.func @transform_1(%arg0: i32) -> (i32, i32, i32) {
    %c0_i32 = arith.constant 0 : i32
    %c0_i32_0 = arith.constant 0 : i32
    %c0_i32_1 = arith.constant 0 : i32
    %c0_i32_2 = arith.constant 0 : i32
    return %c0_i32, %c0_i32_0, %c0_i32_1 : i32, i32, i32
  }
  func.func @transform_2(%arg0: i32) -> (i32, i32) {
    %c0_i32 = arith.constant 0 : i32
    %c0_i32_0 = arith.constant 0 : i32
    %c0_i32_1 = arith.constant 0 : i32
    return %c0_i32, %c0_i32_0 : i32, i32
  }
  func.func @transform_3(%arg0: i32) -> (i32, i32, i32) {
    %c0_i32 = arith.constant 0 : i32
    %c0_i32_0 = arith.constant 0 : i32
    %c0_i32_1 = arith.constant 0 : i32
    %c0_i32_2 = arith.constant 0 : i32
    return %c0_i32, %c0_i32_0, %c0_i32_1 : i32, i32, i32
  }
  func.func @transform_4(%arg0: i32) -> (i32, i32, i32) {
    %c0_i32 = arith.constant 0 : i32
    %c0_i32_0 = arith.constant 0 : i32
    %c0_i32_1 = arith.constant 0 : i32
    %c0_i32_2 = arith.constant 0 : i32
    return %c0_i32, %c0_i32_0, %c0_i32_1 : i32, i32, i32
  }
  func.func @transform_5(%arg0: i32) -> (i32, i32) {
    %c0_i32 = arith.constant 0 : i32
    %c0_i32_0 = arith.constant 0 : i32
    %c0_i32_1 = arith.constant 0 : i32
    return %c0_i32, %c0_i32_0 : i32, i32
  }
  func.func @transform_6(%arg0: i32) -> (i32, i32, i32) {
    %c0_i32 = arith.constant 0 : i32
    %c0_i32_0 = arith.constant 0 : i32
    %c0_i32_1 = arith.constant 0 : i32
    %c0_i32_2 = arith.constant 0 : i32
    return %c0_i32, %c0_i32_0, %c0_i32_1 : i32, i32, i32
  }
  func.func @transform_7(%arg0: i32) -> (i32, i32, i32) {
    %c0_i32 = arith.constant 0 : i32
    %c0_i32_0 = arith.constant 0 : i32
    %c0_i32_1 = arith.constant 0 : i32
    %c0_i32_2 = arith.constant 0 : i32
    return %c0_i32, %c0_i32_0, %c0_i32_1 : i32, i32, i32
  }
  func.func @transform_8(%arg0: i32) -> (i32, i32) {
    %c0_i32 = arith.constant 0 : i32
    %c0_i32_0 = arith.constant 0 : i32
    %c0_i32_1 = arith.constant 0 : i32
    return %c0_i32, %c0_i32_0 : i32, i32
  }
  func.func @transform_9(%arg0: i32) -> (i32, i32, i32) {
    %c0_i32 = arith.constant 0 : i32
    %c0_i32_0 = arith.constant 0 : i32
    %c0_i32_1 = arith.constant 0 : i32
    %c0_i32_2 = arith.constant 0 : i32
    return %c0_i32, %c0_i32_0, %c0_i32_1 : i32, i32, i32
  }
  func.func @transform_10(%arg0: i32) -> (i32, i32, i32) {
    %c0_i32 = arith.constant 0 : i32
    %c0_i32_0 = arith.constant 0 : i32
    %c0_i32_1 = arith.constant 0 : i32
    %c0_i32_2 = arith.constant 0 : i32
    return %c0_i32, %c0_i32_0, %c0_i32_1 : i32, i32, i32
  }
  func.func @transform_11(%arg0: i32) -> (i32, i32) {
    %c0_i32 = arith.constant 0 : i32
    %c0_i32_0 = arith.constant 0 : i32
    %c0_i32_1 = arith.constant 0 : i32
    return %c0_i32, %c0_i32_0 : i32, i32
  }
  func.func @transform_12(%arg0: i32) -> (i32, i32, i32) {
    %c0_i32 = arith.constant 0 : i32
    %c0_i32_0 = arith.constant 0 : i32
    %c0_i32_1 = arith.constant 0 : i32
    %c0_i32_2 = arith.constant 0 : i32
    return %c0_i32, %c0_i32_0, %c0_i32_1 : i32, i32, i32
  }
  func.func @transform_13(%arg0: i32) -> (i32, i32, i32) {
    %c0_i32 = arith.constant 0 : i32
    %c0_i32_0 = arith.constant 0 : i32
    %c0_i32_1 = arith.constant 0 : i32
    %c0_i32_2 = arith.constant 0 : i32
    return %c0_i32, %c0_i32_0, %c0_i32_1 : i32, i32, i32
  }
  func.func @transform_14(%arg0: i32) -> (i32, i32) {
    %c0_i32 = arith.constant 0 : i32
    %c0_i32_0 = arith.constant 0 : i32
    %c0_i32_1 = arith.constant 0 : i32
    return %c0_i32, %c0_i32_0 : i32, i32
  }
  func.func @transform_15(%arg0: i32) -> (i32, i32, i32) {
    %c0_i32 = arith.constant 0 : i32
    %c0_i32_0 = arith.constant 0 : i32
    %c0_i32_1 = arith.constant 0 : i32
    %c0_i32_2 = arith.constant 0 : i32
    return %c0_i32, %c0_i32_0, %c0_i32_1 : i32, i32, i32
  }
  func.func @transform_16(%arg0: i32) -> (i32, i32, i32) {
    %c0_i32 = arith.constant 0 : i32
    %c0_i32_0 = arith.constant 0 : i32
    %c0_i32_1 = arith.constant 0 : i32
    return %arg0, %c0_i32, %c0_i32_0 : i32, i32, i32
  }
}

</mosaic_0001>

<bundles_post_ra>
// kernel: raw_acc_feature_extraction.1
= control target key start
LH: loop header
LB: loop body
LE: loop exit
PB: predicated region body
PF: predicated region fallthrough
CT: control target
= control target key end

     0   :  { %s18903_s0 = inlined_call_operand.vmem [shape: bf16[2,162,512], index: 0, kind: input, shape index: {}]   ;;  %s18904_s1 = inlined_call_operand.vmem [shape: bf16[3,512,512], index: 1, kind: input, shape index: {}]   ;;  %s18905_s2 = inlined_call_operand.vmem [shape: f32[1,512], index: 2, kind: input, shape index: {}]   ;;  %s18906_s3 = inlined_call_operand.vmem [shape: bf16[3,54,162], index: 3, kind: input, shape index: {}]   ;;  %s18907_s4 = inlined_call_operand.vmem [shape: bf16[3,512,512], index: 4, kind: input, shape index: {}]   ;;  %s18908_s5 = inlined_call_operand.vmem [shape: f32[1,512], index: 5, kind: input, shape index: {}]   ;;  %s18909_s6 = inlined_call_operand.vmem [shape: bf16[3,18,54], index: 6, kind: input, shape index: {}]   ;;  %s18910_s7 = inlined_call_operand.vmem [shape: bf16[3,512,128], index: 7, kind: input, shape index: {}]   ;;  %s18911_s8 = inlined_call_operand.vmem [shape: f32[1,128], index: 8, kind: input, shape index: {}]   ;;  %s18912_s9 = inlined_call_operand.vmem [shape: bf16[3,8,18], index: 9, kind: input, shape index: {}]   ;;  %s18913_s10 = inlined_call_operand.vmem [shape: bf16[3,128,128], index: 10, kind: input, shape index: {}]   ;;  %s18914_s11 = inlined_call_operand.vmem [shape: f32[1,128], index: 11, kind: input, shape index: {}]   ;;  %s18915_s12 = inlined_call_operand.vmem [shape: bf16[3,3,8], index: 12, kind: input, shape index: {}]   ;;  %s18916_s13 = inlined_call_operand.vmem [shape: bf16[3,128,512], index: 13, kind: input, shape index: {}]   ;;  %s18917_s14 = inlined_call_operand.vmem [shape: f32[1,512], index: 14, kind: input, shape index: {}]   ;;  %s18918_s15 = inlined_call_operand.vmem [shape: bf16[3,1,3], index: 15, kind: input, shape index: {}]   ;;  %s18919_s16 = inlined_call_operand.hbm [shape: f32[2,1,512], index: 16, kind: output, shape index: {}]  }
   0x1   :  { %18925 = sst [smem:[#allocation10_spill]] %s18903_s0 }
   0x2   :  { %21 = vsyncpa [#allocation3], 0 }
   0x3   :  { %23 = vsyncpa [#allocation3 + $0x1], 0  ;;  %s14881_s21 = smov 0   ;;  %s14883_s22 = smov 0  }
   0x4   :  { %s14885_s23 = smov 0   ;;  %s14887_s24 = smov 0  }
   0x5 LB: > { %18926 = sst [smem:[#allocation5_spill]] %s14777_s21  ;;  %s14902_s15 = sadd.s32 4294967295, %s14789_s24   ;;  %s14789_s24 = sphi %s14887_s24, %s18936_s24   ;;  %s14785_s23 = sphi %s14885_s23, %s18938_s23   ;;  %s14781_s22 = sphi %s14883_s22, %s18940_s22   ;;  %s14777_s21 = sphi %s14881_s21, %s18939_s21  }
   0x6   : > { %18927 = sst [smem:[#allocation6_spill]] %s14785_s23  ;;  %s10826_s25 = sadd.s32 4294967294, %s14789_s24  }
   0x7   : > { %s14906_s26 = sadd.s32 1, %s14789_s24   ;;  %s377_s27 = sadd.s32 1, %s14785_s23 }
   0x8   : > { %18928 = sst [smem:[#allocation7_spill]] %s14906_s26  ;;  %s374_s28 = ssub.s32 %s14789_s24, %s14906_s26 }
   0x9   : > { %p387_p0 = scmp.ne.s32.totalorder %s14785_s23, %s14781_s22  ;;  %p375_p1 = scmp.eq.s32.totalorder %s374_s28, 0 }
   0xa   : > { %p388_p2 = scmp.eq.s32.totalorder %s14902_s15, 1  ;;  %p393_p3 = scmp.ne.s32.totalorder %s14781_s22, %s14777_s21 }
   0xb   : > { %p394_p4 = scmp.eq.s32.totalorder %s10826_s25, 1  ;;  %p10829_p7 = scmp.ge.s32.totalorder %s14789_s24, 1 }
   0xc   : > { %s14917_s29 = scalar_select %p375_p1, %s14785_s23, %s377_s27  }
   0xd   : > { %p14919_p5 = por %p388_p2, %p387_p0  ;;  %p14923_p6 = por %p394_p4, %p393_p3 }
   0xe   : > { %18929 = sst [smem:[#allocation8_spill]] %s14917_s29  ;;  %p465_p8 = scmp.lt.s32.totalorder %s14789_s24, 3 }
   0xf   : > { %s18931_s0 = scalar_select %p14923_p6, 1, 0 }
  0x10   : > { %p466_p9 = pnand %p10829_p7, %p465_p8 }
  0x11   : > { %18932 = sst [smem:[#allocation9_spill]] %s18931_s0  ;;  %p515_p10 = scmp.lt.s32.totalorder (!%p466_p9), %s14902_s15, 1  ;;  %v13202_v0 = vld [vmem:[%s18906_s3 + $0x4] ss:$8 sps:$4 sm:$0xff] (!%p466_p9)   ;;  %vm813_vm0 = vcmask (!%p466_p9), 277504   ;;  %vm826_vm1 = vcmask (!%p466_p9), 1040384  }
  0x12   : > { %469 = sbr.rel (%p466_p9) target bundleno = 3757 (0xead), region = 84  ;;  %10885 = vmatprep.mubr.msk.bf16.mxu0 (!%p466_p9), %vm813_vm0, %v13202_v0  ;;  %10890 = vmatprep.mubr.msk.bf16.mxu1 (!%p466_p9), %vm813_vm0, %v13202_v0  ;;  %s18933_s28 = sld [smem:[#allocation10_spill]] (!%p466_p9)  ;;  %v13200_v41 = vld [vmem:[%s18906_s3] ss:$8 sps:$4 sm:$0xff] (!%p466_p9)   ;;  %v13203_v43 = vld [vmem:[%s18906_s3 + $0x14] ss:$8 sps:$4 sm:$0xff] (!%p466_p9)  }
  0x13   : > { %v13205_v48 = vld [vmem:[%s18906_s3 + $0x10] ss:$8 sps:$4 sm:$0xff] (!%p466_p9)   ;;  %v13212_v49 = vld [vmem:[%s18906_s3 + $0x24] ss:$8 sps:$4 sm:$0xff] (!%p466_p9)   ;;  %v13214_v54 = vld [vmem:[%s18906_s3 + $0x20] ss:$8 sps:$4 sm:$0xff] (!%p466_p9)  }
  0x14   : > { %v569_v52 = vld [vmem:[%s18906_s3 + $0x30] sm:$0x77] (!%p466_p9)  ;;  %v13234_v56 = vld [vmem:[%s18906_s3 + $0x3c] ss:$8 sps:$4 sm:$0xff] (!%p466_p9)   ;;  %v13232_v59 = vld [vmem:[%s18906_s3 + $0x38] ss:$8 sps:$4 sm:$0xff] (!%p466_p9)  }
  0x15   : > { %v10839_v55 = vcombine.high (!%p466_p9), %v569_v52, %v569_v52  ;;  %v10838_v57 = vcombine.low (!%p466_p9), %v569_v52, %v569_v52  ;;  %v13256_v58 = vld [vmem:[%s18904_s1 + $0x404] ss:$16 sps:$4 sm:$0xff] (!%p466_p9)   ;;  %v13254_v61 = vld [vmem:[%s18904_s1 + $0x400] ss:$16 sps:$4 sm:$0xff] (!%p466_p9)   ;;  %v13323_v52 = vld [vmem:[%s18904_s1 + $0x568] ss:$16 sps:$4 sm:$0xff] (!%p466_p9)  }
  0x16   : > { %v13246_v60 = vld [vmem:[%s18906_s3 + $0x4c] ss:$8 sps:$4 sm:$0xff] (!%p466_p9)   ;;  %v13260_v63 = vld [vmem:[%s18904_s1 + $0x420] ss:$16 sps:$4 sm:$0xff] (!%p466_p9)   ;;  %vm4717_vm2 = vcmask (!%p466_p9), 1042432   ;;  %vm4710_vm3 = vcmask (!%p466_p9), 441344  }
  0x17   : > { %v13262_v62 = vld [vmem:[%s18904_s1 + $0x424] ss:$16 sps:$4 sm:$0xff] (!%p466_p9)   ;;  %vm8081_vm4 = vcmask (!%p466_p9), 146432   ;;  %vm14793_vm5 = vmmov (!%p466_p9), 0   ;;  %vm9391_vm6 = vcmask (!%p466_p9), 1043456   ;;  %vm9387_vm7 = vcmask (!%p466_p9), 64512  }
  0x18   : > { %v13268_v0 = vld [vmem:[%s18904_s1 + $0x444] ss:$16 sps:$4 sm:$0xff] (!%p466_p9)   ;;  %s512_s27 = sand.u32 (!%p466_p9), 1, %s14781_s22  }
  0x19   : > { %s516_s19 = scalar_select %p515_p10, %s14902_s15, 1 }
  0x1a   : > { %s10830_s23 = sshll.u32 %s512_s27, 2 }
  0x1b   : > { %s13124_s20 = smul.u32 336, %s516_s19 }
  0x1d   : > { %s14939_s29 = scalar_lea.vmem %s18933_s28, %s13124_s20  ;;  %s514_s28 = scalar_lea.vmem [#allocation2], %s10830_s23 }
  0x1e   : > { %v14942_v1 = vld [vmem:[%s14939_s29 + $0x4] ss:$16 sps:$4 sm:$0xff]   ;;  %v14945_v2 = vld [vmem:[%s14939_s29] ss:$16 sps:$4 sm:$0xff]   ;;  %v14979_v11 = vld [vmem:[%s14939_s29 + $0xc] ss:$16 sps:$4 sm:$0xff]  }
  0x1f   : > { %839 = vmatprep.subr.bf16.mxu0 %v14942_v1  ;;  %v14949_v3 = vld [vmem:[%s14939_s29 + $0x24] ss:$16 sps:$4 sm:$0xff]   ;;  %v14953_v4 = vld [vmem:[%s14939_s29 + $0x20] ss:$16 sps:$4 sm:$0xff]   ;;  %v14982_v12 = vld [vmem:[%s14939_s29 + $0x8] ss:$16 sps:$4 sm:$0xff]   ;;  %910 = vmatprep.subr.bf16.mxu1 %v14979_v11 }
  0x20   : > { %840 = vmatpush1.bf16.msra.mxu0 %v14945_v2  ;;  %v14957_v5 = vld [vmem:[%s14939_s29 + $0x44] ss:$16 sps:$4 sm:$0xff]   ;;  %v14961_v6 = vld [vmem:[%s14939_s29 + $0x40] ss:$16 sps:$4 sm:$0xff]   ;;  %v14986_v13 = vld [vmem:[%s14939_s29 + $0x2c] ss:$16 sps:$4 sm:$0xff]   ;;  %911 = vmatpush1.bf16.msra.mxu1 %v14982_v12 }
  0x21   : > { %841 = vmatprep.subr.bf16.mxu0 %v14949_v3  ;;  %v14965_v7 = vld [vmem:[%s14939_s29 + $0x64] ss:$16 sps:$4 sm:$0xff]   ;;  %v14969_v8 = vld [vmem:[%s14939_s29 + $0x60] ss:$16 sps:$4 sm:$0xff]   ;;  %v14995_v15 = vld [vmem:[%s14939_s29 + $0x28] ss:$16 sps:$4 sm:$0xff]   ;;  %912 = vmatprep.subr.bf16.mxu1 %v14986_v13 }
  0x22   : > { %v14973_v9 = vld [vmem:[%s14939_s29 + $0x84] ss:$16 sps:$4 sm:$0xff]   ;;  %v14976_v10 = vld [vmem:[%s14939_s29 + $0x80] ss:$16 sps:$4 sm:$0xff]   ;;  %v14999_v16 = vld [vmem:[%s14939_s29 + $0x4c] ss:$16 sps:$4 sm:$0xff]  }
  0x23   : > { %v14990_v14 = vld [vmem:[%s14939_s29 + $0xa4] ss:$16 sps:$4 sm:$0xff]   ;;  %v15003_v17 = vld [vmem:[%s14939_s29 + $0xa0] ss:$16 sps:$4 sm:$0xff]   ;;  %v15011_v19 = vld [vmem:[%s14939_s29 + $0x48] ss:$16 sps:$4 sm:$0xff]  }
  0x24   : > { %842 = vmatpush1.bf16.msra.mxu0 %v14953_v4  ;;  %v15007_v18 = vld [vmem:[%s14939_s29 + $0xc4] ss:$16 sps:$4 sm:$0xff]   ;;  %913 = vmatpush1.bf16.msra.mxu1 %v14995_v15  ;;  %v15015_v20 = vld [vmem:[%s14939_s29 + $0x6c] ss:$16 sps:$4 sm:$0xff]   ;;  %v15019_v21 = vld [vmem:[%s14939_s29 + $0xc0] ss:$16 sps:$4 sm:$0xff]  }
  0x25   : > { %843 = vmatprep.subr.bf16.mxu0 %v14957_v5  ;;  %914 = vmatprep.subr.bf16.mxu1 %v14999_v16  ;;  %v15023_v22 = vld [vmem:[%s14939_s29 + $0xe4] ss:$16 sps:$4 sm:$0xff]   ;;  %v15027_v23 = vld [vmem:[%s14939_s29 + $0x68] ss:$16 sps:$4 sm:$0xff]   ;;  %v15031_v24 = vld [vmem:[%s14939_s29 + $0x8c] ss:$16 sps:$4 sm:$0xff]  }
  0x26   : > { %v15035_v25 = vld [vmem:[%s14939_s29 + $0xe0] ss:$16 sps:$4 sm:$0xff]   ;;  %v15039_v26 = vld [vmem:[%s14939_s29 + $0x104] ss:$16 sps:$4 sm:$0xff]   ;;  %v15043_v27 = vld [vmem:[%s14939_s29 + $0x88] ss:$16 sps:$4 sm:$0xff]  }
  0x27   : > { %v15047_v28 = vld [vmem:[%s14939_s29 + $0xac] ss:$16 sps:$4 sm:$0xff]   ;;  %v15051_v29 = vld [vmem:[%s14939_s29 + $0x100] ss:$16 sps:$4 sm:$0xff]   ;;  %v15055_v30 = vld [vmem:[%s14939_s29 + $0x124] ss:$16 sps:$4 sm:$0xff]  }
  0x28   : > { %844 = vmatpush1.bf16.msra.mxu0 %v14961_v6  ;;  %915 = vmatpush1.bf16.msra.mxu1 %v15011_v19  ;;  %v561_v31 = vld [vmem:[%s14939_s29 + $0x140] sm:$0x11]  ;;  %v15060_v32 = vld [vmem:[%s14939_s29 + $0xa8] ss:$16 sps:$4 sm:$0xff]   ;;  %v15064_v33 = vld [vmem:[%s14939_s29 + $0xcc] ss:$16 sps:$4 sm:$0xff]  }
  0x29   : > { %845 = vmatprep.subr.bf16.mxu0 %v14965_v7  ;;  %916 = vmatprep.subr.bf16.mxu1 %v15015_v20  ;;  %v15068_v34 = vld [vmem:[%s14939_s29 + $0x120] ss:$16 sps:$4 sm:$0xff]   ;;  %v15071_v35 = vcombine.high %v561_v31, %v561_v31  ;;  %v10880_v36 = vcombine.low %v561_v31, %v561_v31  ;;  %v15075_v37 = vld [vmem:[%s14939_s29 + $0xc8] ss:$16 sps:$4 sm:$0xff]   ;;  %v15079_v38 = vld [vmem:[%s14939_s29 + $0xec] ss:$16 sps:$4 sm:$0xff]  }
  0x2a   : > { %v15083_v39 = vld [vmem:[%s14939_s29 + $0xe8] ss:$16 sps:$4 sm:$0xff]   ;;  %v15094_v42 = vld [vmem:[%s14939_s29 + $0x10c] ss:$16 sps:$4 sm:$0xff]   ;;  %s10767_s17 = sshll.u32 %s514_s28, 4  ;;  %s10753_s20 = scalar_lea.sflag [#allocation3], %s512_s27  ;;  %s18863_s17 = int_to_ptr.vmem [resolvable:$true] %s10767_s17 }
  0x2b   : > { %v15088_v40 = vsel %vm826_vm1, %v10880_v36, 0  ;;  %v15103_v44 = vld [vmem:[%s14939_s29 + $0x108] ss:$16 sps:$4 sm:$0xff]   ;;  %v15107_v45 = vld [vmem:[%s14939_s29 + $0x12c] ss:$16 sps:$4 sm:$0xff]   ;;  %s14727_s26 = scalar_lea.vmem %s18863_s17, 64 }
  0x2c   : > { %846 = vmatpush1.bf16.msra.mxu0 %v14969_v8  ;;  %917 = vmatpush1.bf16.msra.mxu1 %v15027_v23  ;;  %v562_v46 = vld [vmem:[%s14939_s29 + $0x148] sm:$0x11]  ;;  %v13302_v36 = vld [vmem:[%s18904_s1 + $0x500] ss:$16 sps:$4 sm:$0xff]   ;;  %p14728_p11 = scmp.ne.s32.totalorder %s18863_s17, %s14727_s26 }
  0x2d   : > { %847 = vmatprep.subr.bf16.mxu0 %v14973_v9  ;;  %918 = vmatprep.subr.bf16.mxu1 %v15031_v24  ;;  %v15115_v47 = vld [vmem:[%s14939_s29 + $0x128] ss:$16 sps:$4 sm:$0xff]   ;;  %v15126_v50 = vcombine.high %v562_v46, %v562_v46  ;;  %v10882_v51 = vcombine.low %v562_v46, %v562_v46  ;;  %v13301_v31 = vld [vmem:[%s18904_s1 + $0x4ec] ss:$16 sps:$4 sm:$0xff]  }
  0x2e   : > { %v13319_v46 = vld [vmem:[%s18904_s1 + $0x54c] ss:$16 sps:$4 sm:$0xff]   ;;  %p14729_p12 = pnand %p14728_p11, %p14919_p5 }
  0x2f   : > { %v15137_v53 = vsel %vm826_vm1, %v10882_v51, 0  ;;  %v13320_v51 = vld [vmem:[%s18904_s1 + $0x560] ss:$16 sps:$4 sm:$0xff]  }
  0x30   : > { %848 = vmatpush1.bf16.msra.mxu0 %v14976_v10  ;;  %919 = vmatpush1.bf16.msra.mxu1 %v15043_v27  ;;  %p14730_p13 = pneg %p14729_p12 }
  0x31   : > { %849 = vmatprep.subr.bf16.mxu0 %v14990_v14  ;;  %920 = vmatprep.subr.bf16.mxu1 %v15047_v28 }
  0x34   : > { %850 = vmatpush1.bf16.msra.mxu0 %v15003_v17  ;;  %921 = vmatpush1.bf16.msra.mxu1 %v15060_v32 }
  0x35   : > { %851 = vmatprep.subr.bf16.mxu0 %v15007_v18  ;;  %922 = vmatprep.subr.bf16.mxu1 %v15064_v33 }
  0x38   : > { %852 = vmatpush1.bf16.msra.mxu0 %v15019_v21  ;;  %923 = vmatpush1.bf16.msra.mxu1 %v15075_v37 }
  0x39   : > { %853 = vmatprep.subr.bf16.mxu0 %v15023_v22  ;;  %924 = vmatprep.subr.bf16.mxu1 %v15079_v38 }
  0x3c   : > { %854 = vmatpush1.bf16.msra.mxu0 %v15035_v25  ;;  %925 = vmatpush1.bf16.msra.mxu1 %v15083_v39 }
  0x3d   : > { %855 = vmatprep.subr.bf16.mxu0 %v15039_v26  ;;  %926 = vmatprep.subr.bf16.mxu1 %v15094_v42 }
  0x40   : > { %856 = vmatpush1.bf16.msra.mxu0 %v15051_v29  ;;  %927 = vmatpush1.bf16.msra.mxu1 %v15103_v44 }
  0x41   : > { %857 = vmatprep.subr.bf16.mxu0 %v15055_v30  ;;  %928 = vmatprep.subr.bf16.mxu1 %v15107_v45 }
  0x44   : > { %858 = vmatpush1.bf16.msra.mxu0 %v15068_v34  ;;  %929 = vmatpush1.bf16.msra.mxu1 %v15115_v47 }
  0x45   : > { %10884 = vmatprep.subr.msk.bf16.mxu0 %vm826_vm1, %v15071_v35  ;;  %10889 = vmatprep.subr.msk.bf16.mxu1 %vm826_vm1, %v15126_v50 }
  0x48   : > { %860 = vmatpush1.bf16.msra.mxu0 %v15088_v40  ;;  %931 = vmatpush1.bf16.msra.mxu1 %v15137_v53 }
  0x49   : > { %1178 = vmatprep.subr.bf16.mxu0 %v14942_v1  ;;  %1249 = vmatprep.subr.bf16.mxu1 %v14979_v11  ;;  %v13248_v1 = vld [vmem:[%s18906_s3 + $0x48] ss:$8 sps:$4 sm:$0xff]  }
  0x4b   : > { %872 = vmatmul.mubr.bf16.vlgmr.msra.gmra.mrb[0].mxu0 %v13200_v41  ;;  %943 = vmatmul.mubr.bf16.vlgmr.msra.gmra.mrb[0].mxu1 %v13200_v41  ;;  %v13313_v41 = vld [vmem:[%s18904_s1 + $0x52c] ss:$16 sps:$4 sm:$0xff]  }
  0x4c   : > { %1179 = vmatpush1.bf16.msra.mxu0 %v14945_v2  ;;  %10886 = vmatprep.mubr.msk.bf16.mxu0 %vm813_vm0, %v13203_v43  ;;  %v13249_v2 = vld [vmem:[%s18906_s3 + $0x5c] ss:$8 sps:$4 sm:$0xff]  }
  0x4d   : > { %1180 = vmatprep.subr.bf16.mxu0 %v14949_v3  ;;  %1250 = vmatpush1.bf16.msra.mxu1 %v14982_v12  ;;  %v13266_v3 = vld [vmem:[%s18904_s1 + $0x440] ss:$16 sps:$4 sm:$0xff]   ;;  %v13263_v12 = vld [vmem:[%s18904_s1 + $0x428] ss:$16 sps:$4 sm:$0xff]  }
  0x4e   : > { %10891 = vmatprep.mubr.msk.bf16.mxu1 %vm813_vm0, %v13203_v43  ;;  %1251 = vmatprep.subr.bf16.mxu1 %v14986_v13  ;;  %v13271_v13 = vld [vmem:[%s18904_s1 + $0x44c] ss:$16 sps:$4 sm:$0xff]   ;;  %v13311_v43 = vld [vmem:[%s18904_s1 + $0x528] ss:$16 sps:$4 sm:$0xff]  }
  0x50   : > { %1181 = vmatpush1.bf16.msra.mxu0 %v14953_v4  ;;  %v13274_v4 = vld [vmem:[%s18904_s1 + $0x464] ss:$16 sps:$4 sm:$0xff]  }
  0x51   : > { %1182 = vmatprep.subr.bf16.mxu0 %v14957_v5  ;;  %1252 = vmatpush1.bf16.msra.mxu1 %v14995_v15  ;;  %v13259_v5 = vld [vmem:[%s18904_s1 + $0x40c] ss:$16 sps:$4 sm:$0xff]  }
  0x52   : > { %1253 = vmatprep.subr.bf16.mxu1 %v14999_v16  ;;  %v13277_v15 = vld [vmem:[%s18904_s1 + $0x46c] ss:$16 sps:$4 sm:$0xff]  }
  0x53   : > { %882 = vmatmul.mubr.bf16.gmra.mrb[4].mxu0 %v13205_v48  ;;  %953 = vmatmul.mubr.bf16.gmra.mrb[4].mxu1 %v13205_v48  ;;  %v13322_v48 = vld [vmem:[%s18904_s1 + $0x564] ss:$16 sps:$4 sm:$0xff]  }
  0x54   : > { %1183 = vmatpush1.bf16.msra.mxu0 %v14961_v6  ;;  %10887 = vmatprep.mubr.msk.bf16.mxu0 %vm813_vm0, %v13212_v49  ;;  %v13272_v6 = vld [vmem:[%s18904_s1 + $0x460] ss:$16 sps:$4 sm:$0xff]  }
  0x55   : > { %1184 = vmatprep.subr.bf16.mxu0 %v14965_v7  ;;  %1254 = vmatpush1.bf16.msra.mxu1 %v15011_v19  ;;  %v10900_v7 = vld [vmem:[%s18906_s3 + $0x68] sm:$0x77] }
  0x56   : > { %10892 = vmatprep.mubr.msk.bf16.mxu1 %vm813_vm0, %v13212_v49  ;;  %1255 = vmatprep.subr.bf16.mxu1 %v15015_v20  ;;  %v10908_v11 = vcombine.high %v10900_v7, %v10900_v7  ;;  %v10907_v16 = vcombine.low %v10900_v7, %v10900_v7  ;;  %v13283_v19 = vld [vmem:[%s18904_s1 + $0x48c] ss:$16 sps:$4 sm:$0xff]   ;;  %v13278_v20 = vld [vmem:[%s18904_s1 + $0x480] ss:$16 sps:$4 sm:$0xff]  }
  0x57   : > { %v13325_v49 = vld [vmem:[%s18904_s1 + $0x56c] ss:$16 sps:$4 sm:$0xff]  }
  0x58   : > { %1185 = vmatpush1.bf16.msra.mxu0 %v14969_v8  ;;  %v13257_v8 = vld [vmem:[%s18904_s1 + $0x408] ss:$16 sps:$4 sm:$0xff]   ;;  %v13355_v7 = vld [vmem:[%s18904_s1 + $0x60c] ss:$16 sps:$4 sm:$0xff]  }
  0x59   : > { %1186 = vmatprep.subr.bf16.mxu0 %v14973_v9  ;;  %1256 = vmatpush1.bf16.msra.mxu1 %v15027_v23  ;;  %v13251_v9 = vld [vmem:[%s18906_s3 + $0x58] ss:$8 sps:$4 sm:$0xff]   ;;  %v13286_v23 = vld [vmem:[%s18904_s1 + $0x4a4] ss:$16 sps:$4 sm:$0xff]  }
  0x5a   : > { %1257 = vmatprep.subr.bf16.mxu1 %v15031_v24  ;;  %v13287_v24 = vld [vmem:[%s18904_s1 + $0x4a8] ss:$16 sps:$4 sm:$0xff]  }
  0x5b   : > { %892 = vmatmul.mubr.bf16.gmra.mrb[8].mxu0 %v13214_v54  ;;  %963 = vmatmul.mubr.bf16.gmra.mrb[8].mxu1 %v13214_v54  ;;  %v13328_v54 = vld [vmem:[%s18904_s1 + $0x584] ss:$16 sps:$4 sm:$0xff]  }
  0x5c   : > { %1187 = vmatpush1.bf16.msra.mxu0 %v14976_v10  ;;  %10888 = vmatprep.mubr.msk.bf16.mxu0 %vm813_vm0, %v10839_v55  ;;  %v13265_v10 = vld [vmem:[%s18904_s1 + $0x42c] ss:$16 sps:$4 sm:$0xff]  }
  0x5d   : > { %1188 = vmatprep.subr.bf16.mxu0 %v14990_v14  ;;  %1258 = vmatpush1.bf16.msra.mxu1 %v15043_v27  ;;  %v13269_v14 = vld [vmem:[%s18904_s1 + $0x448] ss:$16 sps:$4 sm:$0xff]   ;;  %v13295_v27 = vld [vmem:[%s18904_s1 + $0x4cc] ss:$16 sps:$4 sm:$0xff]  }
  0x5e   : > { %10893 = vmatprep.mubr.msk.bf16.mxu1 %vm813_vm0, %v10839_v55  ;;  %1259 = vmatprep.subr.bf16.mxu1 %v15047_v28  ;;  %v13290_v28 = vld [vmem:[%s18904_s1 + $0x4c0] ss:$16 sps:$4 sm:$0xff]  }
  0x5f   : > { %v13326_v55 = vld [vmem:[%s18904_s1 + $0x580] ss:$16 sps:$4 sm:$0xff]  }
  0x60   : > { %1189 = vmatpush1.bf16.msra.mxu0 %v15003_v17  ;;  %v13275_v17 = vld [vmem:[%s18904_s1 + $0x468] ss:$16 sps:$4 sm:$0xff]  }
  0x61   : > { %1190 = vmatprep.subr.bf16.mxu0 %v15007_v18  ;;  %1260 = vmatpush1.bf16.msra.mxu1 %v15060_v32  ;;  %v13280_v18 = vld [vmem:[%s18904_s1 + $0x484] ss:$16 sps:$4 sm:$0xff]   ;;  %v13296_v32 = vld [vmem:[%s18904_s1 + $0x4e0] ss:$16 sps:$4 sm:$0xff]  }
  0x62   : > { %1261 = vmatprep.subr.bf16.mxu1 %v15064_v33  ;;  %v13299_v33 = vld [vmem:[%s18904_s1 + $0x4e8] ss:$16 sps:$4 sm:$0xff]  }
  0x63   : > { %902 = vmatmul.mubr.bf16.gmra.mrb[12].mxu0 %v10838_v57  ;;  %973 = vmatmul.mubr.bf16.gmra.mrb[12].mxu1 %v10838_v57  ;;  %v13329_v57 = vld [vmem:[%s18904_s1 + $0x588] ss:$16 sps:$4 sm:$0xff]  }
  0x64   : > { %1191 = vmatpush1.bf16.msra.mxu0 %v15019_v21  ;;  %10910 = vmatprep.mubr.msk.bf16.mxu0 %vm813_vm0, %v13234_v56  ;;  %v13281_v21 = vld [vmem:[%s18904_s1 + $0x488] ss:$16 sps:$4 sm:$0xff]  }
  0x65   : > { %1192 = vmatprep.subr.bf16.mxu0 %v15023_v22  ;;  %1262 = vmatpush1.bf16.msra.mxu1 %v15075_v37  ;;  %v13284_v22 = vld [vmem:[%s18904_s1 + $0x4a0] ss:$16 sps:$4 sm:$0xff]   ;;  %v13307_v37 = vld [vmem:[%s18904_s1 + $0x50c] ss:$16 sps:$4 sm:$0xff]  }
  0x66   : > { %10915 = vmatprep.mubr.msk.bf16.mxu1 %vm813_vm0, %v13234_v56  ;;  %1263 = vmatprep.subr.bf16.mxu1 %v15079_v38  ;;  %v13305_v38 = vld [vmem:[%s18904_s1 + $0x508] ss:$16 sps:$4 sm:$0xff]   ;;  %v13331_v56 = vld [vmem:[%s18904_s1 + $0x58c] ss:$16 sps:$4 sm:$0xff]  }
  0x68   : > { %1193 = vmatpush1.bf16.msra.mxu0 %v15035_v25  ;;  %v13289_v25 = vld [vmem:[%s18904_s1 + $0x4ac] ss:$16 sps:$4 sm:$0xff]  }
  0x69   : > { %1194 = vmatprep.subr.bf16.mxu0 %v15039_v26  ;;  %1264 = vmatpush1.bf16.msra.mxu1 %v15083_v39  ;;  %v13292_v26 = vld [vmem:[%s18904_s1 + $0x4c4] ss:$16 sps:$4 sm:$0xff]  }
  0x6a   : > { %1265 = vmatprep.subr.bf16.mxu1 %v15094_v42  ;;  %v13310_v39 = vld [vmem:[%s18904_s1 + $0x524] ss:$16 sps:$4 sm:$0xff]   ;;  %v13308_v42 = vld [vmem:[%s18904_s1 + $0x520] ss:$16 sps:$4 sm:$0xff]  }
  0x6c   : > { %1195 = vmatpush1.bf16.msra.mxu0 %v15051_v29  ;;  %v13293_v29 = vld [vmem:[%s18904_s1 + $0x4c8] ss:$16 sps:$4 sm:$0xff]  }
  0x6d   : > { %1196 = vmatprep.subr.bf16.mxu0 %v15055_v30  ;;  %1266 = vmatpush1.bf16.msra.mxu1 %v15103_v44  ;;  %v13298_v30 = vld [vmem:[%s18904_s1 + $0x4e4] ss:$16 sps:$4 sm:$0xff]  }
  0x6e   : > { %1267 = vmatprep.subr.bf16.mxu1 %v15107_v45  ;;  %v13316_v44 = vld [vmem:[%s18904_s1 + $0x544] ss:$16 sps:$4 sm:$0xff]   ;;  %v13314_v45 = vld [vmem:[%s18904_s1 + $0x540] ss:$16 sps:$4 sm:$0xff]  }
  0x70   : > { %1197 = vmatpush1.bf16.msra.mxu0 %v15068_v34  ;;  %v13304_v34 = vld [vmem:[%s18904_s1 + $0x504] ss:$16 sps:$4 sm:$0xff]  }
  0x71   : > { %10909 = vmatprep.subr.msk.bf16.mxu0 %vm826_vm1, %v15071_v35  ;;  %1268 = vmatpush1.bf16.msra.mxu1 %v15115_v47  ;;  %v13317_v47 = vld [vmem:[%s18904_s1 + $0x548] ss:$16 sps:$4 sm:$0xff]  }
  0x72   : > { %10914 = vmatprep.subr.msk.bf16.mxu1 %vm826_vm1, %v15126_v50 }
  0x74   : > { %1199 = vmatpush1.bf16.msra.mxu0 %v15088_v40 }
  0x75   : > { %2105 = vmatprep.subr.bf16.mxu0 %v13256_v58  ;;  %1270 = vmatpush1.bf16.msra.mxu1 %v15137_v53  ;;  %v13334_v58 = vld [vmem:[%s18904_s1 + $0x5a4] ss:$16 sps:$4 sm:$0xff]  }
  0x76   : > { %2247 = vmatprep.subr.bf16.mxu1 %v13259_v5  ;;  %v13347_v5 = vld [vmem:[%s18904_s1 + $0x5e8] ss:$16 sps:$4 sm:$0xff]  }
  0x77   : > { %1211 = vmatmul.mubr.bf16.vlgmr.msra.gmra.mrb[16].mxu0 %v13232_v59 }
  0x78   : > { %10911 = vmatprep.mubr.msk.bf16.mxu0 %vm813_vm0, %v13246_v60  ;;  %2106 = vmatpush1.bf16.msra.mxu0 %v13254_v61  ;;  %v13335_v61 = vld [vmem:[%s18904_s1 + $0x5a8] ss:$16 sps:$4 sm:$0xff]  }
  0x79   : > { %2107 = vmatprep.subr.bf16.mxu0 %v13262_v62  ;;  %1282 = vmatmul.mubr.bf16.vlgmr.msra.gmra.mrb[16].mxu1 %v13232_v59  ;;  %v13337_v59 = vld [vmem:[%s18904_s1 + $0x5ac] ss:$16 sps:$4 sm:$0xff]   ;;  %v13340_v62 = vld [vmem:[%s18904_s1 + $0x5c4] ss:$16 sps:$4 sm:$0xff]  }
  0x7a   : > { %10916 = vmatprep.mubr.msk.bf16.mxu1 %vm813_vm0, %v13246_v60  ;;  %2248 = vmatpush1.bf16.msra.mxu1 %v13257_v8  ;;  %v13332_v60 = vld [vmem:[%s18904_s1 + $0x5a0] ss:$16 sps:$4 sm:$0xff]  }
  0x7b   : > { %2249 = vmatprep.subr.bf16.mxu1 %v13265_v10 }
  0x7c   : > { %2108 = vmatpush1.bf16.msra.mxu0 %v13260_v63  ;;  %v13343_v63 = vld [vmem:[%s18904_s1 + $0x5cc] ss:$16 sps:$4 sm:$0xff]  }
  0x7d   : > { %2109 = vmatprep.subr.bf16.mxu0 %v13268_v0  ;;  %v13338_v0 = vld [vmem:[%s18904_s1 + $0x5c0] ss:$16 sps:$4 sm:$0xff]  }
  0x7e   : > { %2250 = vmatpush1.bf16.msra.mxu1 %v13263_v12 }
  0x7f   : > { %1221 = vmatmul.mubr.bf16.gmra.mrb[20].mxu0 %v13248_v1  ;;  %2251 = vmatprep.subr.bf16.mxu1 %v13271_v13 }
  0x80   : > { %10912 = vmatprep.mubr.msk.bf16.mxu0 %vm813_vm0, %v13249_v2  ;;  %2110 = vmatpush1.bf16.msra.mxu0 %v13266_v3  ;;  %v13349_v3 = vld [vmem:[%s18904_s1 + $0x5ec] ss:$16 sps:$4 sm:$0xff]  }
  0x81   : > { %2111 = vmatprep.subr.bf16.mxu0 %v13274_v4  ;;  %1292 = vmatmul.mubr.bf16.gmra.mrb[20].mxu1 %v13248_v1  ;;  %v13341_v1 = vld [vmem:[%s18904_s1 + $0x5c8] ss:$16 sps:$4 sm:$0xff]   ;;  %v13344_v4 = vld [vmem:[%s18904_s1 + $0x5e0] ss:$16 sps:$4 sm:$0xff]  }
  0x82   : > { %10917 = vmatprep.mubr.msk.bf16.mxu1 %vm813_vm0, %v13249_v2  ;;  %2252 = vmatpush1.bf16.msra.mxu1 %v13269_v14  ;;  %v13346_v2 = vld [vmem:[%s18904_s1 + $0x5e4] ss:$16 sps:$4 sm:$0xff]  }
  0x83   : > { %2253 = vmatprep.subr.bf16.mxu1 %v13277_v15 }
  0x84   : > { %2112 = vmatpush1.bf16.msra.mxu0 %v13272_v6  ;;  %v13352_v6 = vld [vmem:[%s18904_s1 + $0x604] ss:$16 sps:$4 sm:$0xff]  }
  0x85   : > { %2113 = vmatprep.subr.bf16.mxu0 %v13280_v18 }
  0x86   : > { %2254 = vmatpush1.bf16.msra.mxu1 %v13275_v17 }
  0x87   : > { %1231 = vmatmul.mubr.bf16.gmra.mrb[24].mxu0 %v13251_v9  ;;  %2255 = vmatprep.subr.bf16.mxu1 %v13283_v19 }
  0x88   : > { %10913 = vmatprep.mubr.msk.bf16.mxu0 %vm813_vm0, %v10908_v11  ;;  %2114 = vmatpush1.bf16.msra.mxu0 %v13278_v20 }
  0x89   : > { %1302 = vmatmul.mubr.bf16.gmra.mrb[24].mxu1 %v13251_v9  ;;  %2115 = vmatprep.subr.bf16.mxu0 %v13286_v23 }
  0x8a   : > { %10918 = vmatprep.mubr.msk.bf16.mxu1 %vm813_vm0, %v10908_v11  ;;  %2256 = vmatpush1.bf16.msra.mxu1 %v13281_v21 }
  0x8b   : > { %2257 = vmatprep.subr.bf16.mxu1 %v13289_v25 }
  0x8c   : > { %2116 = vmatpush1.bf16.msra.mxu0 %v13284_v22 }
  0x8d   : > { %2117 = vmatprep.subr.bf16.mxu0 %v13292_v26 }
  0x8e   : > { %2258 = vmatpush1.bf16.msra.mxu1 %v13287_v24 }
  0x8f   : > { %1241 = vmatmul.mubr.bf16.gmra.mrb[28].mxu0 %v10907_v16  ;;  %2259 = vmatprep.subr.bf16.mxu1 %v13295_v27 }
  0x90   : > { %2118 = vmatpush1.bf16.msra.mxu0 %v13290_v28 }
  0x91   : > { %1312 = vmatmul.mubr.bf16.gmra.mrb[28].mxu1 %v10907_v16  ;;  %2119 = vmatprep.subr.bf16.mxu0 %v13298_v30 }
  0x92   : > { %2260 = vmatpush1.bf16.msra.mxu1 %v13293_v29 }
  0x93   : > { %2261 = vmatprep.subr.bf16.mxu1 %v13301_v31 }
  0x94   : > { %2120 = vmatpush1.bf16.msra.mxu0 %v13296_v32 }
  0x95   : > { %2121 = vmatprep.subr.bf16.mxu0 %v13304_v34 }
  0x96   : > { %2262 = vmatpush1.bf16.msra.mxu1 %v13299_v33 }
  0x97   : > { %2263 = vmatprep.subr.bf16.mxu1 %v13307_v37 }
  0x98   : > { %2122 = vmatpush1.bf16.msra.mxu0 %v13302_v36 }
  0x99   : > { %2123 = vmatprep.subr.bf16.mxu0 %v13310_v39 }
  0x9a   : > { %2264 = vmatpush1.bf16.msra.mxu1 %v13305_v38 }
  0x9b   : > { %2265 = vmatprep.subr.bf16.mxu1 %v13313_v41 }
  0x9c   : > { %2124 = vmatpush1.bf16.msra.mxu0 %v13308_v42 }
  0x9d   : > { %2125 = vmatprep.subr.bf16.mxu0 %v13316_v44 }
  0x9e   : > { %2266 = vmatpush1.bf16.msra.mxu1 %v13311_v43 }
  0x9f   : > { %2267 = vmatprep.subr.bf16.mxu1 %v13319_v46 }
  0xa0   : > { %2126 = vmatpush1.bf16.msra.mxu0 %v13314_v45 }
  0xa1   : > { %2127 = vmatprep.subr.bf16.mxu0 %v13322_v48 }
  0xa2   : > { %2268 = vmatpush1.bf16.msra.mxu1 %v13317_v47 }
  0xa3   : > { %2269 = vmatprep.subr.bf16.mxu1 %v13325_v49 }
  0xa4   : > { %2128 = vmatpush1.bf16.msra.mxu0 %v13320_v51 }
  0xa5   : > { %2129 = vmatprep.subr.bf16.mxu0 %v13328_v54 }
  0xa6   : > { %2270 = vmatpush1.bf16.msra.mxu1 %v13323_v52 }
  0xa7   : > { %2271 = vmatprep.subr.bf16.mxu1 %v13331_v56 }
  0xa8   : > { %2130 = vmatpush1.bf16.msra.mxu0 %v13326_v55 }
  0xa9   : > { %2131 = vmatprep.subr.bf16.mxu0 %v13334_v58 }
  0xaa   : > { %2272 = vmatpush1.bf16.msra.mxu1 %v13329_v57 }
  0xab   : > { %2273 = vmatprep.subr.bf16.mxu1 %v13337_v59  ;;  %v13350_v59 = vld [vmem:[%s18904_s1 + $0x600] ss:$16 sps:$4 sm:$0xff]  }
  0xac   : > { %2132 = vmatpush1.bf16.msra.mxu0 %v13332_v60  ;;  %v13353_v60 = vld [vmem:[%s18904_s1 + $0x608] ss:$16 sps:$4 sm:$0xff]  }
  0xad   : > { %2133 = vmatprep.subr.bf16.mxu0 %v13340_v62 }
  0xae   : > { %2274 = vmatpush1.bf16.msra.mxu1 %v13335_v61 }
  0xaf   : > { %2275 = vmatprep.subr.bf16.mxu1 %v13343_v63  ;;  %v13358_v63 = vld [vmem:[%s18904_s1 + $0x624] ss:$16 sps:$4 sm:$0xff]  }
  0xb0   : > { %2134 = vmatpush1.bf16.msra.mxu0 %v13338_v0  ;;  %v13361_v0 = vld [vmem:[%s18904_s1 + $0x62c] ss:$16 sps:$4 sm:$0xff]  }
  0xb1   : > { %2135 = vmatprep.subr.bf16.mxu0 %v13346_v2  ;;  %v13356_v2 = vld [vmem:[%s18904_s1 + $0x620] ss:$16 sps:$4 sm:$0xff]  }
  0xb2   : > { %2276 = vmatpush1.bf16.msra.mxu1 %v13341_v1 }
  0xb3   : > { %2277 = vmatprep.subr.bf16.mxu1 %v13349_v3  ;;  %v13359_v3 = vld [vmem:[%s18904_s1 + $0x628] ss:$16 sps:$4 sm:$0xff]  }
  0xb4   : > { %2136 = vmatpush1.bf16.msra.mxu0 %v13344_v4  ;;  %v13364_v4 = vld [vmem:[%s18904_s1 + $0x644] ss:$16 sps:$4 sm:$0xff]  }
  0xb5   : > { %2176 = vmatprep.subr.bf16.mxu0 %v13352_v6 }
  0xb6   : > { %2278 = vmatpush1.bf16.msra.mxu1 %v13347_v5  ;;  %v13367_v5 = vld [vmem:[%s18904_s1 + $0x64c] ss:$16 sps:$4 sm:$0xff]  }
  0xb7   : > { %2318 = vmatprep.subr.bf16.mxu1 %v13355_v7 }
 0x11e   : > { %v873_v8 = vpop.f32.mrb[0].mxu0  ;;  %v944_v20 = vpop.f32.mrb[0].mxu1 }
 0x11f   : > { %v875_v9 = vpop.f32.mrb[1].mxu0  ;;  %v946_v21 = vpop.f32.mrb[1].mxu1 }
 0x120   : > { %v877_v10 = vpop.f32.mrb[2].mxu0  ;;  %v948_v23 = vpop.f32.mrb[2].mxu1 }
 0x121   : > { %v15416_v11 = vpack.c.bf16 %v877_v10, %v873_v8  ;;  %v879_v12 = vpop.f32.mrb[3].mxu0  ;;  %v15424_v25 = vpack.c.bf16 %v948_v23, %v944_v20  ;;  %v950_v26 = vpop.f32.mrb[3].mxu1  ;;  %v13362_v8 = vld [vmem:[%s18904_s1 + $0x640] ss:$16 sps:$4 sm:$0xff]  }
 0x122   : > { %v15418_v13 = vpack.c.bf16 %v879_v12, %v875_v9  ;;  %v15426_v28 = vpack.c.bf16 %v950_v26, %v946_v21  ;;  %v13365_v9 = vld [vmem:[%s18904_s1 + $0x648] ss:$16 sps:$4 sm:$0xff]   ;;  %v13370_v12 = vld [vmem:[%s18904_s1 + $0x664] ss:$16 sps:$4 sm:$0xff]   ;;  %v13368_v21 = vld [vmem:[%s18904_s1 + $0x660] ss:$16 sps:$4 sm:$0xff]  }
 0x123   : > { %v13379_v26 = vld [vmem:[%s18904_s1 + $0x68c] ss:$16 sps:$4 sm:$0xff]  }
 0x126   : > { %v883_v14 = vpop.f32.mrb[4].mxu0  ;;  %v954_v32 = vpop.f32.mrb[4].mxu1 }
 0x127   : > { %v885_v15 = vpop.f32.mrb[5].mxu0  ;;  %v956_v33 = vpop.f32.mrb[5].mxu1 }
 0x128   : > { %v887_v16 = vpop.f32.mrb[6].mxu0  ;;  %v958_v36 = vpop.f32.mrb[6].mxu1 }
 0x129   : > { %v15420_v17 = vpack.c.bf16 %v887_v16, %v883_v14  ;;  %v889_v18 = vpop.f32.mrb[7].mxu0  ;;  %v15436_v38 = vpack.c.bf16 %v958_v36, %v954_v32  ;;  %v960_v39 = vpop.f32.mrb[7].mxu1  ;;  %v13373_v14 = vld [vmem:[%s18904_s1 + $0x66c] ss:$16 sps:$4 sm:$0xff]  }
 0x12a   : > { %v15422_v19 = vpack.c.bf16 %v889_v18, %v885_v15  ;;  %v15438_v42 = vpack.c.bf16 %v960_v39, %v956_v33  ;;  %v13374_v39 = vld [vmem:[%s18904_s1 + $0x680] ss:$16 sps:$4 sm:$0xff]  }
 0x12e   : > { %v893_v22 = vpop.f32.mrb[8].mxu0  ;;  %v964_v44 = vpop.f32.mrb[8].mxu1 }
 0x12f   : > { %v895_v24 = vpop.f32.mrb[9].mxu0  ;;  %v966_v45 = vpop.f32.mrb[9].mxu1 }
 0x130   : > { %v897_v27 = vpop.f32.mrb[10].mxu0  ;;  %v968_v46 = vpop.f32.mrb[10].mxu1 }
 0x131   : > { %v15428_v29 = vpack.c.bf16 %v897_v27, %v893_v22  ;;  %v899_v30 = vpop.f32.mrb[11].mxu0  ;;  %v15440_v47 = vpack.c.bf16 %v968_v46, %v964_v44  ;;  %v970_v48 = vpop.f32.mrb[11].mxu1  ;;  %v13371_v22 = vld [vmem:[%s18904_s1 + $0x668] ss:$16 sps:$4 sm:$0xff]   ;;  %v13385_v46 = vld [vmem:[%s18904_s1 + $0x6ac] ss:$16 sps:$4 sm:$0xff]  }
 0x132   : > { %v15430_v31 = vpack.c.bf16 %v899_v30, %v895_v24  ;;  %v15442_v49 = vpack.c.bf16 %v970_v48, %v966_v45  ;;  %v13376_v24 = vld [vmem:[%s18904_s1 + $0x684] ss:$16 sps:$4 sm:$0xff]  }
 0x133   : > { %v13382_v45 = vld [vmem:[%s18904_s1 + $0x6a4] ss:$16 sps:$4 sm:$0xff]  }
 0x136   : > { %v15432_v34 = vpop.f32.mrb[12].mxu0  ;;  %v15444_v51 = vpop.f32.mrb[12].mxu1 }
 0x137   : > { %v15434_v37 = vpop.f32.mrb[13].mxu0  ;;  %v15446_v52 = vpop.f32.mrb[13].mxu1 }
 0x138   : > { %v907_v41 = vpop.f32.mrb[14].mxu0  ;;  %v978_v54 = vpop.f32.mrb[14].mxu1 }
 0x139   : > { %v908_v43 = vpop.f32.mrb[15].mxu0  ;;  %v979_v55 = vpop.f32.mrb[15].mxu1  ;;  %v13377_v41 = vld [vmem:[%s18904_s1 + $0x688] ss:$16 sps:$4 sm:$0xff]  }
 0x14a   : > { %v1212_v56 = vpop.f32.mrb[16].mxu0 }
 0x14b   : > { %v1214_v57 = vpop.f32.mrb[17].mxu0 }
 0x14c   : > { %v1216_v58 = vpop.f32.mrb[18].mxu0  ;;  %v1283_v20 = vpop.f32.mrb[16].mxu1 }
 0x14d   : > { %v1320_v61 = vpack.c.bf16 %v1216_v58, %v1212_v56  ;;  %v1218_v62 = vpop.f32.mrb[19].mxu0  ;;  %v1285_v23 = vpop.f32.mrb[17].mxu1  ;;  %v13383_v58 = vld [vmem:[%s18904_s1 + $0x6a8] ss:$16 sps:$4 sm:$0xff]  }
 0x14e   : > { %v1321_v1 = vpack.c.bf16 %v1218_v62, %v1214_v57  ;;  %v1287_v30 = vpop.f32.mrb[18].mxu1  ;;  %v13380_v57 = vld [vmem:[%s18904_s1 + $0x6a0] ss:$16 sps:$4 sm:$0xff]  }
 0x14f   : > { %v15496_v33 = vpack.c.bf16 %v1287_v30, %v1283_v20  ;;  %v1289_v36 = vpop.f32.mrb[19].mxu1  ;;  %v13400_v20 = vld [vmem:[%s18904_s1 + $0x704] ss:$16 sps:$4 sm:$0xff]  }
 0x150   : > { %2137 = vmatprep.mubr.bf16.mxu0 %v1321_v1  ;;  %2279 = vmatprep.mubr.bf16.mxu1 %v1321_v1  ;;  %v1323_v44 = vpack.c.bf16 %v1289_v36, %v1285_v23  ;;  %v13409_v36 = vld [vmem:[%s18904_s1 + $0x72c] ss:$16 sps:$4 sm:$0xff]  }
 0x151   : > { %2138 = vmatmul.mubr.bf16.vlgmr.msra.gmra.mrb[32].mxu0 %v1320_v61  ;;  %2280 = vmatmul.mubr.bf16.vlgmr.msra.gmra.mrb[32].mxu1 %v1320_v61  ;;  %v13391_v61 = vld [vmem:[%s18904_s1 + $0x6cc] ss:$16 sps:$4 sm:$0xff]  }
 0x152   : > { %2177 = vmatpush1.bf16.msra.mxu0 %v13350_v59  ;;  %2319 = vmatpush1.bf16.msra.mxu1 %v13353_v60  ;;  %v1222_v6 = vpop.f32.mrb[20].mxu0  ;;  %v13388_v60 = vld [vmem:[%s18904_s1 + $0x6c4] ss:$16 sps:$4 sm:$0xff]  }
 0x153   : > { %2178 = vmatprep.subr.bf16.mxu0 %v13358_v63  ;;  %2320 = vmatprep.subr.bf16.mxu1 %v13361_v0  ;;  %v1224_v7 = vpop.f32.mrb[21].mxu0 }
 0x154   : > { %v1226_v10 = vpop.f32.mrb[22].mxu0  ;;  %v1293_v56 = vpop.f32.mrb[20].mxu1 }
 0x155   : > { %v1324_v15 = vpack.c.bf16 %v1226_v10, %v1222_v6  ;;  %v1228_v16 = vpop.f32.mrb[23].mxu0  ;;  %v1295_v59 = vpop.f32.mrb[21].mxu1 }
 0x156   : > { %2179 = vmatpush1.bf16.msra.mxu0 %v13356_v2  ;;  %2321 = vmatpush1.bf16.msra.mxu1 %v13359_v3  ;;  %v1325_v18 = vpack.c.bf16 %v1228_v16, %v1224_v7  ;;  %v1297_v63 = vpop.f32.mrb[22].mxu1  ;;  %v13386_v3 = vld [vmem:[%s18904_s1 + $0x6c0] ss:$16 sps:$4 sm:$0xff]   ;;  %v13395_v16 = vld [vmem:[%s18904_s1 + $0x6e8] ss:$16 sps:$4 sm:$0xff]  }
 0x157   : > { %2180 = vmatprep.subr.bf16.mxu0 %v13364_v4  ;;  %2322 = vmatprep.subr.bf16.mxu1 %v13367_v5  ;;  %v15522_v1 = vpack.c.bf16 %v1297_v63, %v1293_v56  ;;  %v1299_v2 = vpop.f32.mrb[23].mxu1  ;;  %v13389_v4 = vld [vmem:[%s18904_s1 + $0x6c8] ss:$16 sps:$4 sm:$0xff]   ;;  %v13422_v63 = vld [vmem:[%s18904_s1 + $0x780] ss:$16 sps:$4 sm:$0xff]  }
 0x158   : > { %2147 = vmatprep.mubr.bf16.mxu0 %v1325_v18  ;;  %2289 = vmatprep.mubr.bf16.mxu1 %v1325_v18  ;;  %v15530_v7 = vpack.c.bf16 %v1299_v2, %v1295_v59  ;;  %v13413_v56 = vld [vmem:[%s18904_s1 + $0x748] ss:$16 sps:$4 sm:$0xff]   ;;  %v13416_v59 = vld [vmem:[%s18904_s1 + $0x760] ss:$16 sps:$4 sm:$0xff]   ;;  %v13430_v2 = vld [vmem:[%s18904_s1 + $0x7a4] ss:$16 sps:$4 sm:$0xff]  }
 0x159   : > { %2148 = vmatmul.mubr.bf16.gmra.mrb[36].mxu0 %v1324_v15  ;;  %2290 = vmatmul.mubr.bf16.gmra.mrb[36].mxu1 %v1324_v15  ;;  %v13392_v15 = vld [vmem:[%s18904_s1 + $0x6e0] ss:$16 sps:$4 sm:$0xff]  }
 0x15a   : > { %2181 = vmatpush1.bf16.msra.mxu0 %v13362_v8  ;;  %2323 = vmatpush1.bf16.msra.mxu1 %v13365_v9  ;;  %v1232_v27 = vpop.f32.mrb[24].mxu0  ;;  %v13394_v8 = vld [vmem:[%s18904_s1 + $0x6e4] ss:$16 sps:$4 sm:$0xff]   ;;  %v13397_v9 = vld [vmem:[%s18904_s1 + $0x6ec] ss:$16 sps:$4 sm:$0xff]  }
 0x15b   : > { %2182 = vmatprep.subr.bf16.mxu0 %v13370_v12  ;;  %2324 = vmatprep.subr.bf16.mxu1 %v13373_v14  ;;  %v1234_v32 = vpop.f32.mrb[25].mxu0 }
 0x15c   : > { %v1236_v43 = vpop.f32.mrb[26].mxu0  ;;  %v1303_v14 = vpop.f32.mrb[24].mxu1 }
 0x15d   : > { %v1328_v48 = vpack.c.bf16 %v1236_v43, %v1232_v27  ;;  %v1238_v54 = vpop.f32.mrb[27].mxu0  ;;  %v1305_v18 = vpop.f32.mrb[25].mxu1  ;;  %v13401_v27 = vld [vmem:[%s18904_s1 + $0x708] ss:$16 sps:$4 sm:$0xff]  }
 0x15e   : > { %2183 = vmatpush1.bf16.msra.mxu0 %v13368_v21  ;;  %2325 = vmatpush1.bf16.msra.mxu1 %v13371_v22  ;;  %v1329_v55 = vpack.c.bf16 %v1238_v54, %v1234_v32  ;;  %v13403_v21 = vld [vmem:[%s18904_s1 + $0x70c] ss:$16 sps:$4 sm:$0xff]   ;;  %v1307_v22 = vpop.f32.mrb[26].mxu1  ;;  %v13406_v32 = vld [vmem:[%s18904_s1 + $0x724] ss:$16 sps:$4 sm:$0xff]  }
 0x15f   : > { %2184 = vmatprep.subr.bf16.mxu0 %v13376_v24  ;;  %2326 = vmatprep.subr.bf16.mxu1 %v13379_v26  ;;  %v15550_v23 = vpack.c.bf16 %v1307_v22, %v1303_v14  ;;  %v1309_v24 = vpop.f32.mrb[27].mxu1  ;;  %v13398_v26 = vld [vmem:[%s18904_s1 + $0x700] ss:$16 sps:$4 sm:$0xff]   ;;  %v13445_v14 = vld [vmem:[%s18904_s1 + $0x7ec] ss:$16 sps:$4 sm:$0xff]  }
 0x160   : > { %2157 = vmatprep.mubr.bf16.mxu0 %v1329_v55  ;;  %2299 = vmatprep.mubr.bf16.mxu1 %v1329_v55  ;;  %v15558_v30 = vpack.c.bf16 %v1309_v24, %v1305_v18  ;;  %v13410_v55 = vld [vmem:[%s18904_s1 + $0x740] ss:$16 sps:$4 sm:$0xff]   ;;  %v13448_v18 = vld [vmem:[%s18904_s1 + $0x4] ss:$16 sps:$4 sm:$0xff]   ;;  %v13449_v22 = vld [vmem:[%s18904_s1 + $0x8] ss:$16 sps:$4 sm:$0xff]  }
 0x161   : > { %2158 = vmatmul.mubr.bf16.gmra.mrb[40].mxu0 %v1328_v48  ;;  %2300 = vmatmul.mubr.bf16.gmra.mrb[40].mxu1 %v1328_v48  ;;  %v13454_v24 = vld [vmem:[%s18904_s1 + $0x24] ss:$16 sps:$4 sm:$0xff]  }
 0x162   : > { %2185 = vmatpush1.bf16.msra.mxu0 %v13374_v39  ;;  %2327 = vmatpush1.bf16.msra.mxu1 %v13377_v41  ;;  %v1242_v62 = vpop.f32.mrb[28].mxu0  ;;  %v13404_v39 = vld [vmem:[%s18904_s1 + $0x720] ss:$16 sps:$4 sm:$0xff]   ;;  %v13407_v41 = vld [vmem:[%s18904_s1 + $0x728] ss:$16 sps:$4 sm:$0xff]  }
 0x163   : > { %2186 = vmatprep.subr.bf16.mxu0 %v13382_v45  ;;  %2328 = vmatprep.subr.bf16.mxu1 %v13385_v46  ;;  %v1244_v0 = vpop.f32.mrb[29].mxu0  ;;  %v1332_v10 = vpack.c.bf16 %v1242_v62, %v1242_v62  ;;  %v13415_v45 = vld [vmem:[%s18904_s1 + $0x74c] ss:$16 sps:$4 sm:$0xff]  }
 0x164   : > { %v1333_v5 = vpack.c.bf16 %v1244_v0, %v1244_v0  ;;  %v1246_v6 = vpop.f32.mrb[30].mxu0  ;;  %v15572_v43 = vpop.f32.mrb[28].mxu1  ;;  %v13427_v62 = vld [vmem:[%s18904_s1 + $0x78c] ss:$16 sps:$4 sm:$0xff]   ;;  %v13425_v0 = vld [vmem:[%s18904_s1 + $0x788] ss:$16 sps:$4 sm:$0xff]  }
 0x165   : > { %v1247_v12 = vpop.f32.mrb[31].mxu0  ;;  %v15580_v46 = vpop.f32.mrb[29].mxu1  ;;  %v13436_v6 = vld [vmem:[%s18904_s1 + $0x7c4] ss:$16 sps:$4 sm:$0xff]  }
 0x166   : > { %2187 = vmatpush1.bf16.msra.mxu0 %v13380_v57  ;;  %2329 = vmatpush1.bf16.msra.mxu1 %v13383_v58  ;;  %v1317_v48 = vpop.f32.mrb[30].mxu1  ;;  %v13418_v57 = vld [vmem:[%s18904_s1 + $0x764] ss:$16 sps:$4 sm:$0xff]   ;;  %v13421_v58 = vld [vmem:[%s18904_s1 + $0x76c] ss:$16 sps:$4 sm:$0xff]  }
 0x167   : > { %2188 = vmatprep.subr.bf16.mxu0 %v13388_v60  ;;  %2330 = vmatprep.subr.bf16.mxu1 %v13391_v61  ;;  %v1318_v54 = vpop.f32.mrb[31].mxu1  ;;  %v13419_v60 = vld [vmem:[%s18904_s1 + $0x768] ss:$16 sps:$4 sm:$0xff]   ;;  %v13424_v61 = vld [vmem:[%s18904_s1 + $0x784] ss:$16 sps:$4 sm:$0xff]  }
 0x168   : > { %2167 = vmatprep.mubr.bf16.mxu0 %v1333_v5  ;;  %2309 = vmatprep.mubr.bf16.mxu1 %v1333_v5  ;;  %v13431_v5 = vld [vmem:[%s18904_s1 + $0x7a8] ss:$16 sps:$4 sm:$0xff]   ;;  %v13442_v12 = vld [vmem:[%s18904_s1 + $0x7e4] ss:$16 sps:$4 sm:$0xff]  }
 0x169   : > { %2168 = vmatmul.mubr.bf16.gmra.mrb[44].mxu0 %v1332_v10  ;;  %2310 = vmatmul.mubr.bf16.gmra.mrb[44].mxu1 %v1332_v10  ;;  %v13437_v10 = vld [vmem:[%s18904_s1 + $0x7c8] ss:$16 sps:$4 sm:$0xff]   ;;  %v13472_v54 = vld [vmem:[%s18904_s1 + $0x84] ss:$16 sps:$4 sm:$0xff]  }
 0x16a   : > { %2189 = vmatpush1.bf16.msra.mxu0 %v13386_v3  ;;  %2331 = vmatpush1.bf16.msra.mxu1 %v13389_v4  ;;  %v13433_v3 = vld [vmem:[%s18904_s1 + $0x7ac] ss:$16 sps:$4 sm:$0xff]   ;;  %v13428_v4 = vld [vmem:[%s18904_s1 + $0x7a0] ss:$16 sps:$4 sm:$0xff]   ;;  %v13467_v48 = vld [vmem:[%s18904_s1 + $0x68] ss:$16 sps:$4 sm:$0xff]  }
 0x16b   : > { %2190 = vmatprep.subr.bf16.mxu0 %v13394_v8  ;;  %2332 = vmatprep.subr.bf16.mxu1 %v13397_v9  ;;  %v13439_v8 = vld [vmem:[%s18904_s1 + $0x7cc] ss:$16 sps:$4 sm:$0xff]   ;;  %v13434_v9 = vld [vmem:[%s18904_s1 + $0x7c0] ss:$16 sps:$4 sm:$0xff]  }
 0x16c   : > { %2208 = vmatprep.mubr.bf16.mxu0 %v1323_v44  ;;  %2350 = vmatprep.mubr.bf16.mxu1 %v1323_v44  ;;  %v13412_v44 = vld [vmem:[%s18904_s1 + $0x744] ss:$16 sps:$4 sm:$0xff]  }
 0x16e   : > { %2191 = vmatpush1.bf16.msra.mxu0 %v13392_v15  ;;  %2333 = vmatpush1.bf16.msra.mxu1 %v13395_v16  ;;  %v13440_v15 = vld [vmem:[%s18904_s1 + $0x7e0] ss:$16 sps:$4 sm:$0xff]   ;;  %v13443_v16 = vld [vmem:[%s18904_s1 + $0x7e8] ss:$16 sps:$4 sm:$0xff]  }
 0x16f   : > { %2192 = vmatprep.subr.bf16.mxu0 %v13400_v20  ;;  %2334 = vmatprep.subr.bf16.mxu1 %v13403_v21  ;;  %v13451_v20 = vld [vmem:[%s18904_s1 + $0xc] ss:$16 sps:$4 sm:$0xff]   ;;  %v13446_v21 = vld [vmem:[%s18904_s1] ss:$16 sps:$4 sm:$0xff]  }
 0x172   : > { %2193 = vmatpush1.bf16.msra.mxu0 %v13398_v26  ;;  %2335 = vmatpush1.bf16.msra.mxu1 %v13401_v27  ;;  %v13457_v26 = vld [vmem:[%s18904_s1 + $0x2c] ss:$16 sps:$4 sm:$0xff]   ;;  %v13452_v27 = vld [vmem:[%s18904_s1 + $0x20] ss:$16 sps:$4 sm:$0xff]  }
 0x173   : > { %2194 = vmatprep.subr.bf16.mxu0 %v13406_v32  ;;  %2336 = vmatprep.subr.bf16.mxu1 %v13409_v36  ;;  %v13455_v32 = vld [vmem:[%s18904_s1 + $0x28] ss:$16 sps:$4 sm:$0xff]   ;;  %v13460_v36 = vld [vmem:[%s18904_s1 + $0x44] ss:$16 sps:$4 sm:$0xff]  }
 0x176   : > { %2195 = vmatpush1.bf16.msra.mxu0 %v13404_v39  ;;  %2337 = vmatpush1.bf16.msra.mxu1 %v13407_v41  ;;  %v13463_v39 = vld [vmem:[%s18904_s1 + $0x4c] ss:$16 sps:$4 sm:$0xff]   ;;  %v13461_v41 = vld [vmem:[%s18904_s1 + $0x48] ss:$16 sps:$4 sm:$0xff]  }
 0x177   : > { %2196 = vmatprep.subr.bf16.mxu0 %v13412_v44  ;;  %2338 = vmatprep.subr.bf16.mxu1 %v13415_v45  ;;  %v13466_v44 = vld [vmem:[%s18904_s1 + $0x64] ss:$16 sps:$4 sm:$0xff]   ;;  %v13469_v45 = vld [vmem:[%s18904_s1 + $0x6c] ss:$16 sps:$4 sm:$0xff]  }
 0x17a   : > { %2197 = vmatpush1.bf16.msra.mxu0 %v13410_v55  ;;  %2339 = vmatpush1.bf16.msra.mxu1 %v13413_v56  ;;  %v13475_v55 = vld [vmem:[%s18904_s1 + $0x8c] ss:$16 sps:$4 sm:$0xff]   ;;  %v13473_v56 = vld [vmem:[%s18904_s1 + $0x88] ss:$16 sps:$4 sm:$0xff]  }
 0x17b   : > { %2198 = vmatprep.subr.bf16.mxu0 %v13418_v57  ;;  %2340 = vmatprep.subr.bf16.mxu1 %v13421_v58  ;;  %v13478_v57 = vld [vmem:[%s18904_s1 + $0xa4] ss:$16 sps:$4 sm:$0xff]   ;;  %v13481_v58 = vld [vmem:[%s18904_s1 + $0xac] ss:$16 sps:$4 sm:$0xff]  }
 0x17e   : > { %2199 = vmatpush1.bf16.msra.mxu0 %v13416_v59  ;;  %2341 = vmatpush1.bf16.msra.mxu1 %v13419_v60  ;;  %v13476_v59 = vld [vmem:[%s18904_s1 + $0xa0] ss:$16 sps:$4 sm:$0xff]   ;;  %v13479_v60 = vld [vmem:[%s18904_s1 + $0xa8] ss:$16 sps:$4 sm:$0xff]  }
 0x17f   : > { %2200 = vmatprep.subr.bf16.mxu0 %v13424_v61  ;;  %2342 = vmatprep.subr.bf16.mxu1 %v13427_v62  ;;  %v13484_v61 = vld [vmem:[%s18904_s1 + $0xc4] ss:$16 sps:$4 sm:$0xff]   ;;  %v13482_v62 = vld [vmem:[%s18904_s1 + $0xc0] ss:$16 sps:$4 sm:$0xff]  }
 0x182   : > { %2201 = vmatpush1.bf16.msra.mxu0 %v13422_v63  ;;  %2343 = vmatpush1.bf16.msra.mxu1 %v13425_v0  ;;  %v13485_v63 = vld [vmem:[%s18904_s1 + $0xc8] ss:$16 sps:$4 sm:$0xff]   ;;  %v13490_v0 = vld [vmem:[%s18904_s1 + $0xe4] ss:$16 sps:$4 sm:$0xff]  }
 0x183   : > { %2202 = vmatprep.subr.bf16.mxu0 %v13430_v2  ;;  %2344 = vmatprep.subr.bf16.mxu1 %v13433_v3  ;;  %v13493_v2 = vld [vmem:[%s18904_s1 + $0xec] ss:$16 sps:$4 sm:$0xff]   ;;  %v13491_v3 = vld [vmem:[%s18904_s1 + $0xe8] ss:$16 sps:$4 sm:$0xff]  }
 0x186   : > { %2203 = vmatpush1.bf16.msra.mxu0 %v13428_v4  ;;  %2345 = vmatpush1.bf16.msra.mxu1 %v13431_v5  ;;  %v13496_v4 = vld [vmem:[%s18904_s1 + $0x104] ss:$16 sps:$4 sm:$0xff]   ;;  %v13499_v5 = vld [vmem:[%s18904_s1 + $0x10c] ss:$16 sps:$4 sm:$0xff]  }
 0x187   : > { %2204 = vmatprep.subr.bf16.mxu0 %v13436_v6  ;;  %2346 = vmatprep.subr.bf16.mxu1 %v13439_v8  ;;  %v13494_v6 = vld [vmem:[%s18904_s1 + $0x100] ss:$16 sps:$4 sm:$0xff]   ;;  %v13497_v8 = vld [vmem:[%s18904_s1 + $0x108] ss:$16 sps:$4 sm:$0xff]  }
 0x18a   : > { %2205 = vmatpush1.bf16.msra.mxu0 %v13434_v9  ;;  %2347 = vmatpush1.bf16.msra.mxu1 %v13437_v10  ;;  %v13502_v9 = vld [vmem:[%s18904_s1 + $0x124] ss:$16 sps:$4 sm:$0xff]   ;;  %v13505_v10 = vld [vmem:[%s18904_s1 + $0x12c] ss:$16 sps:$4 sm:$0xff]  }
 0x18b   : > { %2206 = vmatprep.subr.bf16.mxu0 %v13442_v12  ;;  %2348 = vmatprep.subr.bf16.mxu1 %v13445_v14  ;;  %v13503_v12 = vld [vmem:[%s18904_s1 + $0x128] ss:$16 sps:$4 sm:$0xff]   ;;  %v13508_v14 = vld [vmem:[%s18904_s1 + $0x144] ss:$16 sps:$4 sm:$0xff]  }
 0x18e   : > { %2207 = vmatpush1.bf16.msra.mxu0 %v13440_v15  ;;  %2349 = vmatpush1.bf16.msra.mxu1 %v13443_v16  ;;  %v13511_v15 = vld [vmem:[%s18904_s1 + $0x14c] ss:$16 sps:$4 sm:$0xff]   ;;  %v13506_v16 = vld [vmem:[%s18904_s1 + $0x140] ss:$16 sps:$4 sm:$0xff]  }
 0x18f   : > { %3029 = vmatprep.subr.bf16.mxu0 %v13448_v18  ;;  %3171 = vmatprep.subr.bf16.mxu1 %v13451_v20  ;;  %v13509_v18 = vld [vmem:[%s18904_s1 + $0x148] ss:$16 sps:$4 sm:$0xff]   ;;  %v13514_v20 = vld [vmem:[%s18904_s1 + $0x164] ss:$16 sps:$4 sm:$0xff]  }
 0x191   : > { %2209 = vmatmul.mubr.bf16.vlgmr.msra.gmra.mrb[32].mxu0 %v15496_v33  ;;  %2351 = vmatmul.mubr.bf16.vlgmr.msra.gmra.mrb[32].mxu1 %v15496_v33  ;;  %v13458_v33 = vld [vmem:[%s18904_s1 + $0x40] ss:$16 sps:$4 sm:$0xff]  }
 0x192   : > { %3030 = vmatpush1.bf16.msra.mxu0 %v13446_v21  ;;  %3172 = vmatpush1.bf16.msra.mxu1 %v13449_v22  ;;  %v13517_v21 = vld [vmem:[%s18904_s1 + $0x16c] ss:$16 sps:$4 sm:$0xff]   ;;  %v13512_v22 = vld [vmem:[%s18904_s1 + $0x160] ss:$16 sps:$4 sm:$0xff]  }
 0x193   : > { %3031 = vmatprep.subr.bf16.mxu0 %v13454_v24  ;;  %3173 = vmatprep.subr.bf16.mxu1 %v13457_v26  ;;  %v13515_v24 = vld [vmem:[%s18904_s1 + $0x168] ss:$16 sps:$4 sm:$0xff]   ;;  %v13520_v26 = vld [vmem:[%s18904_s1 + $0x184] ss:$16 sps:$4 sm:$0xff]  }
 0x194   : > { %2218 = vmatprep.mubr.bf16.mxu0 %v15530_v7  ;;  %2360 = vmatprep.mubr.bf16.mxu1 %v15530_v7  ;;  %v13464_v7 = vld [vmem:[%s18904_s1 + $0x60] ss:$16 sps:$4 sm:$0xff]  }
 0x196   : > { %3032 = vmatpush1.bf16.msra.mxu0 %v13452_v27  ;;  %3174 = vmatpush1.bf16.msra.mxu1 %v13455_v32  ;;  %v13518_v27 = vld [vmem:[%s18904_s1 + $0x180] ss:$16 sps:$4 sm:$0xff]   ;;  %v13523_v32 = vld [vmem:[%s18904_s1 + $0x18c] ss:$16 sps:$4 sm:$0xff]  }
 0x197   : > { %3033 = vmatprep.subr.bf16.mxu0 %v13460_v36  ;;  %3175 = vmatprep.subr.bf16.mxu1 %v13463_v39  ;;  %v13521_v36 = vld [vmem:[%s18904_s1 + $0x188] ss:$16 sps:$4 sm:$0xff]   ;;  %v13526_v39 = vld [vmem:[%s18904_s1 + $0x1a4] ss:$16 sps:$4 sm:$0xff]  }
 0x199   : > { %2219 = vmatmul.mubr.bf16.gmra.mrb[36].mxu0 %v15522_v1  ;;  %2361 = vmatmul.mubr.bf16.gmra.mrb[36].mxu1 %v15522_v1  ;;  %v13470_v1 = vld [vmem:[%s18904_s1 + $0x80] ss:$16 sps:$4 sm:$0xff]  }
 0x19a   : > { %3034 = vmatpush1.bf16.msra.mxu0 %v13458_v33  ;;  %3176 = vmatpush1.bf16.msra.mxu1 %v13461_v41  ;;  %v13524_v33 = vld [vmem:[%s18904_s1 + $0x1a0] ss:$16 sps:$4 sm:$0xff]   ;;  %v13529_v41 = vld [vmem:[%s18904_s1 + $0x1ac] ss:$16 sps:$4 sm:$0xff]  }
 0x19b   : > { %3035 = vmatprep.subr.bf16.mxu0 %v13466_v44  ;;  %3177 = vmatprep.subr.bf16.mxu1 %v13469_v45  ;;  %v13527_v44 = vld [vmem:[%s18904_s1 + $0x1a8] ss:$16 sps:$4 sm:$0xff]   ;;  %v13532_v45 = vld [vmem:[%s18904_s1 + $0x1c4] ss:$16 sps:$4 sm:$0xff]  }
 0x19c   : > { %2228 = vmatprep.mubr.bf16.mxu0 %v15558_v30  ;;  %2370 = vmatprep.mubr.bf16.mxu1 %v15558_v30  ;;  %v1335_v30 = vpack.c.bf16 %v15580_v46, %v15580_v46  ;;  %v13487_v46 = vld [vmem:[%s18904_s1 + $0xcc] ss:$16 sps:$4 sm:$0xff]  }
 0x19e   : > { %3036 = vmatpush1.bf16.msra.mxu0 %v13464_v7  ;;  %3178 = vmatpush1.bf16.msra.mxu1 %v13467_v48  ;;  %v13535_v7 = vld [vmem:[%s18904_s1 + $0x1cc] ss:$16 sps:$4 sm:$0xff]   ;;  %v13530_v48 = vld [vmem:[%s18904_s1 + $0x1c0] ss:$16 sps:$4 sm:$0xff]  }
 0x19f   : > { %3037 = vmatprep.subr.bf16.mxu0 %v13472_v54  ;;  %3179 = vmatprep.subr.bf16.mxu1 %v13475_v55  ;;  %v13533_v54 = vld [vmem:[%s18904_s1 + $0x1c8] ss:$16 sps:$4 sm:$0xff]   ;;  %v13538_v55 = vld [vmem:[%s18904_s1 + $0x1e4] ss:$16 sps:$4 sm:$0xff]  }
 0x1a1   : > { %2229 = vmatmul.mubr.bf16.gmra.mrb[40].mxu0 %v15550_v23  ;;  %2371 = vmatmul.mubr.bf16.gmra.mrb[40].mxu1 %v15550_v23  ;;  %v1334_v23 = vpack.c.bf16 %v15572_v43, %v15572_v43  ;;  %v13488_v43 = vld [vmem:[%s18904_s1 + $0xe0] ss:$16 sps:$4 sm:$0xff]  }
 0x1a2   : > { %3038 = vmatpush1.bf16.msra.mxu0 %v13470_v1  ;;  %3180 = vmatpush1.bf16.msra.mxu1 %v13473_v56  ;;  %v13536_v1 = vld [vmem:[%s18904_s1 + $0x1e0] ss:$16 sps:$4 sm:$0xff]   ;;  %v13541_v56 = vld [vmem:[%s18904_s1 + $0x1ec] ss:$16 sps:$4 sm:$0xff]  }
 0x1a3   : > { %3039 = vmatprep.subr.bf16.mxu0 %v13478_v57  ;;  %3181 = vmatprep.subr.bf16.mxu1 %v13481_v58  ;;  %v13539_v57 = vld [vmem:[%s18904_s1 + $0x1e8] ss:$16 sps:$4 sm:$0xff]   ;;  %v13544_v58 = vld [vmem:[%s18904_s1 + $0x204] ss:$16 sps:$4 sm:$0xff]  }
 0x1a4   : > { %2238 = vmatprep.mubr.bf16.mxu0 %v1335_v30  ;;  %2380 = vmatprep.mubr.bf16.mxu1 %v1335_v30  ;;  %v13547_v30 = vld [vmem:[%s18904_s1 + $0x20c] ss:$16 sps:$4 sm:$0xff]  }
 0x1a6   : > { %3040 = vmatpush1.bf16.msra.mxu0 %v13476_v59  ;;  %3182 = vmatpush1.bf16.msra.mxu1 %v13479_v60  ;;  %v13542_v59 = vld [vmem:[%s18904_s1 + $0x200] ss:$16 sps:$4 sm:$0xff]   ;;  %v13545_v60 = vld [vmem:[%s18904_s1 + $0x208] ss:$16 sps:$4 sm:$0xff]  }
 0x1a7   : > { %3041 = vmatprep.subr.bf16.mxu0 %v13484_v61  ;;  %3183 = vmatprep.subr.bf16.mxu1 %v13487_v46  ;;  %v13550_v61 = vld [vmem:[%s18904_s1 + $0x224] ss:$16 sps:$4 sm:$0xff]   ;;  %v13553_v46 = vld [vmem:[%s18904_s1 + $0x22c] ss:$16 sps:$4 sm:$0xff]  }
 0x1a9   : > { %2239 = vmatmul.mubr.bf16.gmra.mrb[48].mxu0 %v1334_v23  ;;  %2381 = vmatmul.mubr.bf16.gmra.mrb[48].mxu1 %v1334_v23  ;;  %v13551_v23 = vld [vmem:[%s18904_s1 + $0x228] ss:$16 sps:$4 sm:$0xff]  }
 0x1aa   : > { %3042 = vmatpush1.bf16.msra.mxu0 %v13482_v62  ;;  %3061 = vmatprep.mubr.bf16.mxu0 %v15418_v13  ;;  %v13548_v62 = vld [vmem:[%s18904_s1 + $0x220] ss:$16 sps:$4 sm:$0xff]  }
 0x1ab   : > { %3184 = vmatpush1.bf16.msra.mxu1 %v13485_v63  ;;  %3203 = vmatprep.mubr.bf16.mxu1 %v15418_v13  ;;  %v13500_v13 = vld [vmem:[%s18904_s1 + $0x120] ss:$16 sps:$4 sm:$0xff]   ;;  %v13556_v63 = vld [vmem:[%s18904_s1 + $0x244] ss:$16 sps:$4 sm:$0xff]  }
 0x1ac   : > { %3043 = vmatprep.subr.bf16.mxu0 %v13490_v0  ;;  %3185 = vmatprep.subr.bf16.mxu1 %v13493_v2  ;;  %v13559_v0 = vld [vmem:[%s18904_s1 + $0x24c] ss:$16 sps:$4 sm:$0xff]   ;;  %v13557_v2 = vld [vmem:[%s18904_s1 + $0x248] ss:$16 sps:$4 sm:$0xff]  }
 0x1ae   : > { %3044 = vmatpush1.bf16.msra.mxu0 %v13488_v43  ;;  %v13562_v43 = vld [vmem:[%s18904_s1 + $0x264] ss:$16 sps:$4 sm:$0xff]  }
 0x1af   : > { %3186 = vmatpush1.bf16.msra.mxu1 %v13491_v3  ;;  %3045 = vmatprep.subr.bf16.mxu0 %v13496_v4  ;;  %v13560_v3 = vld [vmem:[%s18904_s1 + $0x260] ss:$16 sps:$4 sm:$0xff]   ;;  %v13563_v4 = vld [vmem:[%s18904_s1 + $0x268] ss:$16 sps:$4 sm:$0xff]  }
 0x1b0   : > { %3187 = vmatprep.subr.bf16.mxu1 %v13499_v5  ;;  %v13568_v5 = vld [vmem:[%s18904_s1 + $0x284] ss:$16 sps:$4 sm:$0xff]  }
 0x1b2   : > { %3046 = vmatpush1.bf16.msra.mxu0 %v13494_v6  ;;  %v13571_v6 = vld [vmem:[%s18904_s1 + $0x28c] ss:$16 sps:$4 sm:$0xff]  }
 0x1b3   : > { %3188 = vmatpush1.bf16.msra.mxu1 %v13497_v8  ;;  %3047 = vmatprep.subr.bf16.mxu0 %v13502_v9  ;;  %v13569_v8 = vld [vmem:[%s18904_s1 + $0x288] ss:$16 sps:$4 sm:$0xff]   ;;  %v13574_v9 = vld [vmem:[%s18904_s1 + $0x2a4] ss:$16 sps:$4 sm:$0xff]  }
 0x1b4   : > { %3189 = vmatprep.subr.bf16.mxu1 %v13505_v10  ;;  %v994_v10 = vpack.c.bf16 %v15434_v37, %v15434_v37  ;;  %v13580_v37 = vld [vmem:[%s18904_s1 + $0x2c4] ss:$16 sps:$4 sm:$0xff]  }
 0x1b6   : > { %3048 = vmatpush1.bf16.msra.mxu0 %v13500_v13  ;;  %v13572_v13 = vld [vmem:[%s18904_s1 + $0x2a0] ss:$16 sps:$4 sm:$0xff]  }
 0x1b7   : > { %3190 = vmatpush1.bf16.msra.mxu1 %v13503_v12  ;;  %3049 = vmatprep.subr.bf16.mxu0 %v13508_v14  ;;  %v13575_v12 = vld [vmem:[%s18904_s1 + $0x2a8] ss:$16 sps:$4 sm:$0xff]   ;;  %v13583_v14 = vld [vmem:[%s18904_s1 + $0x2cc] ss:$16 sps:$4 sm:$0xff]  }
 0x1b8   : > { %3191 = vmatprep.subr.bf16.mxu1 %v13511_v15  ;;  %v13581_v15 = vld [vmem:[%s18904_s1 + $0x2c8] ss:$16 sps:$4 sm:$0xff]  }
 0x1ba   : > { %3050 = vmatpush1.bf16.msra.mxu0 %v13506_v16  ;;  %v13586_v16 = vld [vmem:[%s18904_s1 + $0x2e4] ss:$16 sps:$4 sm:$0xff]  }
 0x1bb   : > { %3192 = vmatpush1.bf16.msra.mxu1 %v13509_v18  ;;  %3051 = vmatprep.subr.bf16.mxu0 %v13514_v20  ;;  %v993_v18 = vpack.c.bf16 %v15432_v34, %v15432_v34  ;;  %v13589_v20 = vld [vmem:[%s18904_s1 + $0x2ec] ss:$16 sps:$4 sm:$0xff]   ;;  %v13587_v34 = vld [vmem:[%s18904_s1 + $0x2e8] ss:$16 sps:$4 sm:$0xff]  }
 0x1bc   : > { %3193 = vmatprep.subr.bf16.mxu1 %v13517_v21  ;;  %v13584_v21 = vld [vmem:[%s18904_s1 + $0x2e0] ss:$16 sps:$4 sm:$0xff]  }
 0x1be   : > { %3052 = vmatpush1.bf16.msra.mxu0 %v13512_v22  ;;  %v13592_v22 = vld [vmem:[%s18904_s1 + $0x304] ss:$16 sps:$4 sm:$0xff]  }
 0x1bf   : > { %3194 = vmatpush1.bf16.msra.mxu1 %v13515_v24  ;;  %3053 = vmatprep.subr.bf16.mxu0 %v13520_v26  ;;  %v13595_v24 = vld [vmem:[%s18904_s1 + $0x30c] ss:$16 sps:$4 sm:$0xff]   ;;  %v13590_v26 = vld [vmem:[%s18904_s1 + $0x300] ss:$16 sps:$4 sm:$0xff]  }
 0x1c0   : > { %3195 = vmatprep.subr.bf16.mxu1 %v13523_v32  ;;  %v13598_v32 = vld [vmem:[%s18904_s1 + $0x324] ss:$16 sps:$4 sm:$0xff]  }
 0x1c2   : > { %3054 = vmatpush1.bf16.msra.mxu0 %v13518_v27  ;;  %v13593_v27 = vld [vmem:[%s18904_s1 + $0x308] ss:$16 sps:$4 sm:$0xff]  }
 0x1c3   : > { %3196 = vmatpush1.bf16.msra.mxu1 %v13521_v36  ;;  %3055 = vmatprep.subr.bf16.mxu0 %v13526_v39  ;;  %v13596_v36 = vld [vmem:[%s18904_s1 + $0x320] ss:$16 sps:$4 sm:$0xff]   ;;  %v13599_v39 = vld [vmem:[%s18904_s1 + $0x328] ss:$16 sps:$4 sm:$0xff]  }
 0x1c4   : > { %3197 = vmatprep.subr.bf16.mxu1 %v13529_v41  ;;  %v13607_v41 = vld [vmem:[%s18904_s1 + $0x34c] ss:$16 sps:$4 sm:$0xff]  }
 0x1c6   : > { %3056 = vmatpush1.bf16.msra.mxu0 %v13524_v33  ;;  %v13604_v33 = vld [vmem:[%s18904_s1 + $0x344] ss:$16 sps:$4 sm:$0xff]  }
 0x1c7   : > { %3198 = vmatpush1.bf16.msra.mxu1 %v13527_v44  ;;  %3057 = vmatprep.subr.bf16.mxu0 %v13532_v45  ;;  %v13602_v44 = vld [vmem:[%s18904_s1 + $0x340] ss:$16 sps:$4 sm:$0xff]   ;;  %v13605_v45 = vld [vmem:[%s18904_s1 + $0x348] ss:$16 sps:$4 sm:$0xff]  }
 0x1c8   : > { %3199 = vmatprep.subr.bf16.mxu1 %v13535_v7  ;;  %v13610_v7 = vld [vmem:[%s18904_s1 + $0x364] ss:$16 sps:$4 sm:$0xff]  }
 0x1ca   : > { %3058 = vmatpush1.bf16.msra.mxu0 %v13530_v48  ;;  %v13613_v48 = vld [vmem:[%s18904_s1 + $0x36c] ss:$16 sps:$4 sm:$0xff]  }
 0x1cb   : > { %3200 = vmatpush1.bf16.msra.mxu1 %v13533_v54  ;;  %3059 = vmatprep.subr.bf16.mxu0 %v13538_v55  ;;  %v13608_v54 = vld [vmem:[%s18904_s1 + $0x360] ss:$16 sps:$4 sm:$0xff]   ;;  %v13611_v55 = vld [vmem:[%s18904_s1 + $0x368] ss:$16 sps:$4 sm:$0xff]  }
 0x1cc   : > { %3201 = vmatprep.subr.bf16.mxu1 %v13541_v56  ;;  %v13619_v56 = vld [vmem:[%s18904_s1 + $0x38c] ss:$16 sps:$4 sm:$0xff]  }
 0x1ce   : > { %3060 = vmatpush1.bf16.msra.mxu0 %v13536_v1  ;;  %v13616_v1 = vld [vmem:[%s18904_s1 + $0x384] ss:$16 sps:$4 sm:$0xff]  }
 0x1cf   : > { %3202 = vmatpush1.bf16.msra.mxu1 %v13539_v57  ;;  %3100 = vmatprep.subr.bf16.mxu0 %v13544_v58  ;;  %v13614_v57 = vld [vmem:[%s18904_s1 + $0x380] ss:$16 sps:$4 sm:$0xff]   ;;  %v13617_v58 = vld [vmem:[%s18904_s1 + $0x388] ss:$16 sps:$4 sm:$0xff]  }
 0x1d0   : > { %3242 = vmatprep.subr.bf16.mxu1 %v13547_v30  ;;  %v13622_v30 = vld [vmem:[%s18904_s1 + $0x3a4] ss:$16 sps:$4 sm:$0xff]  }
 0x1d1   : > { %3062 = vmatmul.mubr.bf16.vlgmr.msra.gmra.mrb[32].mxu0 %v15416_v11 }
 0x1d2   : > { %3204 = vmatmul.mubr.bf16.vlgmr.msra.gmra.mrb[32].mxu1 %v15416_v11  ;;  %3071 = vmatprep.mubr.bf16.mxu0 %v15422_v19  ;;  %v13554_v11 = vld [vmem:[%s18904_s1 + $0x240] ss:$16 sps:$4 sm:$0xff]  }
 0x1d3   : > { %3101 = vmatpush1.bf16.msra.mxu0 %v13542_v59  ;;  %3213 = vmatprep.mubr.bf16.mxu1 %v15422_v19  ;;  %v13565_v19 = vld [vmem:[%s18904_s1 + $0x26c] ss:$16 sps:$4 sm:$0xff]  }
 0x1d4   : > { %3243 = vmatpush1.bf16.msra.mxu1 %v13545_v60  ;;  %3102 = vmatprep.subr.bf16.mxu0 %v13550_v61  ;;  %v13625_v59 = vld [vmem:[%s18904_s1 + $0x3ac] ss:$16 sps:$4 sm:$0xff]   ;;  %v13620_v60 = vld [vmem:[%s18904_s1 + $0x3a0] ss:$16 sps:$4 sm:$0xff]   ;;  %v13623_v61 = vld [vmem:[%s18904_s1 + $0x3a8] ss:$16 sps:$4 sm:$0xff]  }
 0x1d5   : > { %3244 = vmatprep.subr.bf16.mxu1 %v13553_v46  ;;  %v13628_v46 = vld [vmem:[%s18904_s1 + $0x3c4] ss:$16 sps:$4 sm:$0xff]  }
 0x1d7   : > { %3103 = vmatpush1.bf16.msra.mxu0 %v13548_v62  ;;  %v13631_v62 = vld [vmem:[%s18904_s1 + $0x3cc] ss:$16 sps:$4 sm:$0xff]  }
 0x1d8   : > { %3245 = vmatpush1.bf16.msra.mxu1 %v13551_v23  ;;  %3104 = vmatprep.subr.bf16.mxu0 %v13556_v63  ;;  %v13626_v23 = vld [vmem:[%s18904_s1 + $0x3c0] ss:$16 sps:$4 sm:$0xff]   ;;  %v13629_v63 = vld [vmem:[%s18904_s1 + $0x3c8] ss:$16 sps:$4 sm:$0xff]  }
 0x1d9   : > { %3072 = vmatmul.mubr.bf16.gmra.mrb[36].mxu0 %v15420_v17  ;;  %3246 = vmatprep.subr.bf16.mxu1 %v13559_v0  ;;  %v13634_v0 = vld [vmem:[%s18904_s1 + $0x3e4] ss:$16 sps:$4 sm:$0xff]  }
 0x1da   : > { %3214 = vmatmul.mubr.bf16.gmra.mrb[36].mxu1 %v15420_v17  ;;  %3081 = vmatprep.mubr.bf16.mxu0 %v15430_v31  ;;  %v13566_v17 = vld [vmem:[%s18904_s1 + $0x280] ss:$16 sps:$4 sm:$0xff]  }
 0x1db   : > { %3105 = vmatpush1.bf16.msra.mxu0 %v13554_v11  ;;  %3223 = vmatprep.mubr.bf16.mxu1 %v15430_v31  ;;  %v13577_v31 = vld [vmem:[%s18904_s1 + $0x2ac] ss:$16 sps:$4 sm:$0xff]  }
 0x1dc   : > { %3247 = vmatpush1.bf16.msra.mxu1 %v13557_v2  ;;  %3106 = vmatprep.subr.bf16.mxu0 %v13562_v43  ;;  %v13637_v11 = vld [vmem:[%s18904_s1 + $0x3ec] ss:$16 sps:$4 sm:$0xff]   ;;  %v13632_v2 = vld [vmem:[%s18904_s1 + $0x3e0] ss:$16 sps:$4 sm:$0xff]   ;;  %v13635_v43 = vld [vmem:[%s18904_s1 + $0x3e8] ss:$16 sps:$4 sm:$0xff]  }
 0x1dd   : > { %3248 = vmatprep.subr.bf16.mxu1 %v13565_v19  ;;  %v14687_v19 = vld [vmem:[%s14939_s29 + $0x4] ss:$16 sps:$4 sm:$0xff]  }
 0x1df   : > { %3107 = vmatpush1.bf16.msra.mxu0 %v13560_v3  ;;  %v14688_v3 = vld [vmem:[%s14939_s29 + $0xc] ss:$16 sps:$4 sm:$0xff]  }
 0x1e0   : > { %3249 = vmatpush1.bf16.msra.mxu1 %v13563_v4  ;;  %3108 = vmatprep.subr.bf16.mxu0 %v13568_v5  ;;  %v14689_v4 = vld [vmem:[%s14939_s29] ss:$16 sps:$4 sm:$0xff]   ;;  %v14690_v5 = vld [vmem:[%s14939_s29 + $0x24] ss:$16 sps:$4 sm:$0xff]  }
 0x1e1   : > { %3082 = vmatmul.mubr.bf16.gmra.mrb[40].mxu0 %v15428_v29  ;;  %3250 = vmatprep.subr.bf16.mxu1 %v13571_v6  ;;  %v14691_v6 = vld [vmem:[%s14939_s29 + $0x8] ss:$16 sps:$4 sm:$0xff]  }
 0x1e2   : > { %3224 = vmatmul.mubr.bf16.gmra.mrb[40].mxu1 %v15428_v29  ;;  %3091 = vmatprep.mubr.bf16.mxu0 %v994_v10  ;;  %v13578_v29 = vld [vmem:[%s18904_s1 + $0x2c0] ss:$16 sps:$4 sm:$0xff]  }
 0x1e3   : > { %3109 = vmatpush1.bf16.msra.mxu0 %v13566_v17  ;;  %3233 = vmatprep.mubr.bf16.mxu1 %v994_v10  ;;  %v14692_v17 = vld [vmem:[%s14939_s29 + $0x2c] ss:$16 sps:$4 sm:$0xff]   ;;  %v14698_v10 = vld [vmem:[%s14939_s29 + $0x64] ss:$16 sps:$4 sm:$0xff]  }
 0x1e4   : > { %3251 = vmatpush1.bf16.msra.mxu1 %v13569_v8  ;;  %3110 = vmatprep.subr.bf16.mxu0 %v13574_v9  ;;  %v14693_v8 = vld [vmem:[%s14939_s29 + $0x20] ss:$16 sps:$4 sm:$0xff]   ;;  %v14694_v9 = vld [vmem:[%s14939_s29 + $0x44] ss:$16 sps:$4 sm:$0xff]  }
 0x1e5   : > { %3252 = vmatprep.subr.bf16.mxu1 %v13577_v31  ;;  %v14697_v31 = vld [vmem:[%s14939_s29 + $0x40] ss:$16 sps:$4 sm:$0xff]  }
 0x1e7   : > { %3111 = vmatpush1.bf16.msra.mxu0 %v13572_v13  ;;  %v14699_v13 = vld [vmem:[%s14939_s29 + $0x48] ss:$16 sps:$4 sm:$0xff]  }
 0x1e8   : > { %3253 = vmatpush1.bf16.msra.mxu1 %v13575_v12  ;;  %3112 = vmatprep.subr.bf16.mxu0 %v13580_v37  ;;  %v14700_v12 = vld [vmem:[%s14939_s29 + $0x6c] ss:$16 sps:$4 sm:$0xff]   ;;  %v14701_v37 = vld [vmem:[%s14939_s29 + $0x60] ss:$16 sps:$4 sm:$0xff]  }
 0x1e9   : > { %3092 = vmatmul.mubr.bf16.gmra.mrb[52].mxu0 %v993_v18  ;;  %3254 = vmatprep.subr.bf16.mxu1 %v13583_v14  ;;  %v14702_v14 = vld [vmem:[%s14939_s29 + $0x84] ss:$16 sps:$4 sm:$0xff]  }
 0x1ea   : > { %3234 = vmatmul.mubr.bf16.gmra.mrb[52].mxu1 %v993_v18  ;;  %3132 = vmatprep.mubr.bf16.mxu0 %v15426_v28  ;;  %v14708_v18 = vld [vmem:[%s14939_s29 + $0xac] ss:$16 sps:$4 sm:$0xff]  }
 0x1eb   : > { %3113 = vmatpush1.bf16.msra.mxu0 %v13578_v29  ;;  %3274 = vmatprep.mubr.bf16.mxu1 %v15426_v28  ;;  %v13601_v28 = vld [vmem:[%s18904_s1 + $0x32c] ss:$16 sps:$4 sm:$0xff]  }
 0x1ec   : > { %3255 = vmatpush1.bf16.msra.mxu1 %v13581_v15  ;;  %3114 = vmatprep.subr.bf16.mxu0 %v13586_v16  ;;  %v14704_v29 = vld [vmem:[%s14939_s29 + $0x8c] ss:$16 sps:$4 sm:$0xff]   ;;  %v14705_v15 = vld [vmem:[%s14939_s29 + $0x80] ss:$16 sps:$4 sm:$0xff]   ;;  %v14707_v16 = vld [vmem:[%s14939_s29 + $0x88] ss:$16 sps:$4 sm:$0xff]  }
 0x1ed   : > { %3256 = vmatprep.subr.bf16.mxu1 %v13589_v20  ;;  %v13640_v20 = vld [vmem:[%s18906_s3 + $0x74] ss:$8 sps:$4 sm:$0xff]  }
 0x1ef   : > { %3115 = vmatpush1.bf16.msra.mxu0 %v13584_v21  ;;  %v14709_v21 = vld [vmem:[%s14939_s29 + $0xa0] ss:$16 sps:$4 sm:$0xff]  }
 0x1f0   : > { %3257 = vmatpush1.bf16.msra.mxu1 %v13587_v34  ;;  %3116 = vmatprep.subr.bf16.mxu0 %v13592_v22  ;;  %v14710_v34 = vld [vmem:[%s14939_s29 + $0xc4] ss:$16 sps:$4 sm:$0xff]   ;;  %v14711_v22 = vld [vmem:[%s14939_s29 + $0xa8] ss:$16 sps:$4 sm:$0xff]  }
 0x1f1   : > { %3258 = vmatprep.subr.bf16.mxu1 %v13595_v24  ;;  %v14712_v24 = vld [vmem:[%s14939_s29 + $0xcc] ss:$16 sps:$4 sm:$0xff]  }
 0x1f3   : > { %3117 = vmatpush1.bf16.msra.mxu0 %v13590_v26  ;;  %v14713_v26 = vld [vmem:[%s14939_s29 + $0xc0] ss:$16 sps:$4 sm:$0xff]  }
 0x1f4   : > { %3259 = vmatpush1.bf16.msra.mxu1 %v13593_v27  ;;  %3118 = vmatprep.subr.bf16.mxu0 %v13598_v32  ;;  %v14715_v27 = vld [vmem:[%s14939_s29 + $0xc8] ss:$16 sps:$4 sm:$0xff]   ;;  %v14716_v32 = vld [vmem:[%s14939_s29 + $0xec] ss:$16 sps:$4 sm:$0xff]  }
 0x1f5   : > { %3260 = vmatprep.subr.bf16.mxu1 %v13601_v28  ;;  %v14717_v28 = vld [vmem:[%s14939_s29 + $0xe0] ss:$16 sps:$4 sm:$0xff]  }
 0x1f7   : > { %3119 = vmatpush1.bf16.msra.mxu0 %v13596_v36  ;;  %v14718_v36 = vld [vmem:[%s14939_s29 + $0x104] ss:$16 sps:$4 sm:$0xff]  }
 0x1f8   : > { %3261 = vmatpush1.bf16.msra.mxu1 %v13599_v39  ;;  %3120 = vmatprep.subr.bf16.mxu0 %v13604_v33  ;;  %v14719_v39 = vld [vmem:[%s14939_s29 + $0xe8] ss:$16 sps:$4 sm:$0xff]   ;;  %v14720_v33 = vld [vmem:[%s14939_s29 + $0x10c] ss:$16 sps:$4 sm:$0xff]  }
 0x1f9   : > { %3262 = vmatprep.subr.bf16.mxu1 %v13607_v41  ;;  %v14721_v41 = vld [vmem:[%s14939_s29 + $0x100] ss:$16 sps:$4 sm:$0xff]  }
 0x1fb   : > { %3121 = vmatpush1.bf16.msra.mxu0 %v13602_v44  ;;  %v14722_v44 = vld [vmem:[%s14939_s29 + $0x124] ss:$16 sps:$4 sm:$0xff]  }
 0x1fc   : > { %3263 = vmatpush1.bf16.msra.mxu1 %v13605_v45  ;;  %3122 = vmatprep.subr.bf16.mxu0 %v13610_v7  ;;  %v14723_v45 = vld [vmem:[%s14939_s29 + $0x108] ss:$16 sps:$4 sm:$0xff]   ;;  %v14724_v7 = vld [vmem:[%s14939_s29 + $0x12c] ss:$16 sps:$4 sm:$0xff]  }
 0x1fd   : > { %3264 = vmatprep.subr.bf16.mxu1 %v13613_v48  ;;  %v14725_v48 = vld [vmem:[%s14939_s29 + $0x120] ss:$16 sps:$4 sm:$0xff]  }
 0x1ff   : > { %3123 = vmatpush1.bf16.msra.mxu0 %v13608_v54  ;;  %v14726_v54 = vld [vmem:[%s14939_s29 + $0x128] ss:$16 sps:$4 sm:$0xff]  }
 0x200   : > { %3265 = vmatpush1.bf16.msra.mxu1 %v13611_v55  ;;  %3124 = vmatprep.subr.bf16.mxu0 %v13616_v1  ;;  %v13638_v55 = vld [vmem:[%s18906_s3 + $0x70] ss:$8 sps:$4 sm:$0xff]  }
 0x201   : > { %3266 = vmatprep.subr.bf16.mxu1 %v13619_v56 }
 0x203   : > { %3125 = vmatpush1.bf16.msra.mxu0 %v13614_v57  ;;  %v13641_v57 = vld [vmem:[%s18906_s3 + $0x84] ss:$8 sps:$4 sm:$0xff]  }
 0x204   : > { %3267 = vmatpush1.bf16.msra.mxu1 %v13617_v58  ;;  %3126 = vmatprep.subr.bf16.mxu0 %v13622_v30 }
 0x205   : > { %3268 = vmatprep.subr.bf16.mxu1 %v13625_v59 }
 0x207   : > { %3127 = vmatpush1.bf16.msra.mxu0 %v13620_v60 }
 0x208   : > { %3269 = vmatpush1.bf16.msra.mxu1 %v13623_v61  ;;  %3128 = vmatprep.subr.bf16.mxu0 %v13628_v46  ;;  %v13651_v61 = vld [vmem:[%s18904_s1 + $0x804] ss:$16 sps:$4 sm:$0xff]   ;;  %v13654_v46 = vld [vmem:[%s18904_s1 + $0x80c] ss:$16 sps:$4 sm:$0xff]  }
 0x209   : > { %3270 = vmatprep.subr.bf16.mxu1 %v13631_v62  ;;  %v13657_v62 = vld [vmem:[%s18904_s1 + $0x824] ss:$16 sps:$4 sm:$0xff]  }
 0x20b   : > { %3129 = vmatpush1.bf16.msra.mxu0 %v13626_v23  ;;  %v13660_v23 = vld [vmem:[%s18904_s1 + $0x82c] ss:$16 sps:$4 sm:$0xff]  }
 0x20c   : > { %3271 = vmatpush1.bf16.msra.mxu1 %v13629_v63  ;;  %3130 = vmatprep.subr.bf16.mxu0 %v13634_v0  ;;  %v13643_v63 = vld [vmem:[%s18906_s3 + $0x80] ss:$8 sps:$4 sm:$0xff]   ;;  %v13644_v0 = vld [vmem:[%s18906_s3 + $0x94] ss:$8 sps:$4 sm:$0xff]  }
 0x20d   : > { %3272 = vmatprep.subr.bf16.mxu1 %v13637_v11  ;;  %v13655_v11 = vld [vmem:[%s18904_s1 + $0x820] ss:$16 sps:$4 sm:$0xff]  }
 0x20f   : > { %3131 = vmatpush1.bf16.msra.mxu0 %v13632_v2  ;;  %v13658_v2 = vld [vmem:[%s18904_s1 + $0x828] ss:$16 sps:$4 sm:$0xff]  }
 0x210   : > { %3273 = vmatpush1.bf16.msra.mxu1 %v13635_v43  ;;  %3366 = vmatprep.subr.bf16.mxu0 %v14687_v19  ;;  %v13663_v43 = vld [vmem:[%s18904_s1 + $0x844] ss:$16 sps:$4 sm:$0xff]   ;;  %v13666_v19 = vld [vmem:[%s18904_s1 + $0x84c] ss:$16 sps:$4 sm:$0xff]  }
 0x211   : > { %3437 = vmatprep.subr.bf16.mxu1 %v14688_v3  ;;  %v11309_v3 = vld [vmem:[%s18906_s3 + $0xa0] sm:$0x77] }
 0x212   : > { %3133 = vmatmul.mubr.bf16.vlgmr.msra.gmra.mrb[32].mxu0 %v15424_v25 }
 0x213   : > { %3275 = vmatmul.mubr.bf16.vlgmr.msra.gmra.mrb[32].mxu1 %v15424_v25  ;;  %3142 = vmatprep.mubr.bf16.mxu0 %v15438_v42  ;;  %v14695_v25 = vld [vmem:[%s14939_s29 + $0x28] ss:$16 sps:$4 sm:$0xff]  }
 0x214   : > { %3284 = vmatprep.mubr.bf16.mxu1 %v15438_v42  ;;  %3367 = vmatpush1.bf16.msra.mxu0 %v14689_v4  ;;  %v14696_v42 = vld [vmem:[%s14939_s29 + $0x4c] ss:$16 sps:$4 sm:$0xff]   ;;  %v13661_v4 = vld [vmem:[%s18904_s1 + $0x840] ss:$16 sps:$4 sm:$0xff]  }
 0x215   : > { %3368 = vmatprep.subr.bf16.mxu0 %v14690_v5  ;;  %3438 = vmatpush1.bf16.msra.mxu1 %v14691_v6  ;;  %v13664_v5 = vld [vmem:[%s18904_s1 + $0x848] ss:$16 sps:$4 sm:$0xff]   ;;  %v13669_v6 = vld [vmem:[%s18904_s1 + $0x864] ss:$16 sps:$4 sm:$0xff]  }
 0x216   : > { %3439 = vmatprep.subr.bf16.mxu1 %v14692_v17  ;;  %v13646_v17 = vld [vmem:[%s18906_s3 + $0x90] ss:$8 sps:$4 sm:$0xff]  }
 0x218   : > { %3369 = vmatpush1.bf16.msra.mxu0 %v14693_v8  ;;  %v13672_v8 = vld [vmem:[%s18904_s1 + $0x86c] ss:$16 sps:$4 sm:$0xff]  }
 0x219   : > { %3370 = vmatprep.subr.bf16.mxu0 %v14694_v9  ;;  %3440 = vmatpush1.bf16.msra.mxu1 %v14695_v25  ;;  %v11317_v9 = vcombine.high %v11309_v3, %v11309_v3  ;;  %v13667_v25 = vld [vmem:[%s18904_s1 + $0x860] ss:$16 sps:$4 sm:$0xff]  }
 0x21a   : > { %3143 = vmatmul.mubr.bf16.gmra.mrb[36].mxu0 %v15436_v38  ;;  %3441 = vmatprep.subr.bf16.mxu1 %v14696_v42  ;;  %v13670_v42 = vld [vmem:[%s18904_s1 + $0x868] ss:$16 sps:$4 sm:$0xff]  }
 0x21b   : > { %3285 = vmatmul.mubr.bf16.gmra.mrb[36].mxu1 %v15436_v38  ;;  %3152 = vmatprep.mubr.bf16.mxu0 %v15442_v49  ;;  %v996_v38 = vpack.c.bf16 %v15446_v52, %v15446_v52  ;;  %v14706_v52 = vld [vmem:[%s14939_s29 + $0xa4] ss:$16 sps:$4 sm:$0xff]  }
 0x21c   : > { %3294 = vmatprep.mubr.bf16.mxu1 %v15442_v49  ;;  %3371 = vmatpush1.bf16.msra.mxu0 %v14697_v31  ;;  %v14703_v49 = vld [vmem:[%s14939_s29 + $0x68] ss:$16 sps:$4 sm:$0xff]   ;;  %v13675_v31 = vld [vmem:[%s18904_s1 + $0x884] ss:$16 sps:$4 sm:$0xff]  }
 0x21d   : > { %3372 = vmatprep.subr.bf16.mxu0 %v14698_v10  ;;  %3442 = vmatpush1.bf16.msra.mxu1 %v14699_v13  ;;  %v13678_v10 = vld [vmem:[%s18904_s1 + $0x88c] ss:$16 sps:$4 sm:$0xff]   ;;  %v13673_v13 = vld [vmem:[%s18904_s1 + $0x880] ss:$16 sps:$4 sm:$0xff]  }
 0x21e   : > { %3443 = vmatprep.subr.bf16.mxu1 %v14700_v12  ;;  %v13676_v12 = vld [vmem:[%s18904_s1 + $0x888] ss:$16 sps:$4 sm:$0xff]  }
 0x220   : > { %3373 = vmatpush1.bf16.msra.mxu0 %v14701_v37  ;;  %v13681_v37 = vld [vmem:[%s18904_s1 + $0x8a4] ss:$16 sps:$4 sm:$0xff]  }
 0x221   : > { %3374 = vmatprep.subr.bf16.mxu0 %v14702_v14  ;;  %3444 = vmatpush1.bf16.msra.mxu1 %v14703_v49  ;;  %v13684_v14 = vld [vmem:[%s18904_s1 + $0x8ac] ss:$16 sps:$4 sm:$0xff]   ;;  %v13679_v49 = vld [vmem:[%s18904_s1 + $0x8a0] ss:$16 sps:$4 sm:$0xff]  }
 0x222   : > { %3153 = vmatmul.mubr.bf16.gmra.mrb[40].mxu0 %v15440_v47  ;;  %3445 = vmatprep.subr.bf16.mxu1 %v14704_v29  ;;  %v13682_v29 = vld [vmem:[%s18904_s1 + $0x8a8] ss:$16 sps:$4 sm:$0xff]  }
 0x223   : > { %3295 = vmatmul.mubr.bf16.gmra.mrb[40].mxu1 %v15440_v47  ;;  %3162 = vmatprep.mubr.bf16.mxu0 %v996_v38  ;;  %v995_v47 = vpack.c.bf16 %v15444_v51, %v15444_v51  ;;  %v14714_v51 = vld [vmem:[%s14939_s29 + $0xe4] ss:$16 sps:$4 sm:$0xff]   ;;  %s12720_s29 = sshll.u32 %s14902_s15, 6  ;;  %s14795_s15 = smov [#allocation2]  }
 0x224   : > { %3304 = vmatprep.mubr.bf16.mxu1 %v996_v38  ;;  %3375 = vmatpush1.bf16.msra.mxu0 %v14705_v15  ;;  %v11316_v38 = vcombine.low %v11309_v3, %v11309_v3  ;;  %v13687_v15 = vld [vmem:[%s18904_s1 + $0x8c4] ss:$16 sps:$4 sm:$0xff]   ;;  %v13733_v3 = vld [vmem:[%s18904_s1 + $0x9c0] ss:$16 sps:$4 sm:$0xff]   ;;  %s18861_s19 = scalar_lea.hbm %s18919_s16, %s12720_s29  ;;  %s14731_s0 = sshll.u32 %s14795_s15, 4  ;;  %s14732_s0 = int_to_ptr.vmem [resolvable:$false] %s14731_s0 }
 0x225   : > { %3376 = vmatprep.subr.bf16.mxu0 %v14706_v52  ;;  %3446 = vmatpush1.bf16.msra.mxu1 %v14707_v16  ;;  %v13690_v52 = vld [vmem:[%s18904_s1 + $0x8cc] ss:$16 sps:$4 sm:$0xff]   ;;  %v13685_v16 = vld [vmem:[%s18904_s1 + $0x8c0] ss:$16 sps:$4 sm:$0xff]   ;;  %s14733_s25 = scalar_lea.vmem %s14732_s0, 128  ;;  %p14734_p0 = scmp.lt.s32.totalorder %s18863_s17, %s14732_s0 }
 0x226   : > { %3447 = vmatprep.subr.bf16.mxu1 %v14708_v18  ;;  %v13688_v18 = vld [vmem:[%s18904_s1 + $0x8c8] ss:$16 sps:$4 sm:$0xff]   ;;  %p14735_p1 = scmp.lt.s32.totalorder %s14733_s25, %s14727_s26 }
 0x228   : > { %3377 = vmatpush1.bf16.msra.mxu0 %v14709_v21  ;;  %v13691_v21 = vld [vmem:[%s18904_s1 + $0x8e0] ss:$16 sps:$4 sm:$0xff]   ;;  %p14736_p2 = por %p14735_p1, %p14734_p0 }
 0x229   : > { %3378 = vmatprep.subr.bf16.mxu0 %v14710_v34  ;;  %3448 = vmatpush1.bf16.msra.mxu1 %v14711_v22  ;;  %v13694_v34 = vld [vmem:[%s18904_s1 + $0x8e8] ss:$16 sps:$4 sm:$0xff]   ;;  %v13699_v22 = vld [vmem:[%s18904_s1 + $0x904] ss:$16 sps:$4 sm:$0xff]  }
 0x22a   : > { %3163 = vmatmul.mubr.bf16.gmra.mrb[56].mxu0 %v995_v47  ;;  %3449 = vmatprep.subr.bf16.mxu1 %v14712_v24  ;;  %v13702_v24 = vld [vmem:[%s18904_s1 + $0x90c] ss:$16 sps:$4 sm:$0xff]   ;;  %p14737_p3 = pnand %p14736_p2, %p14730_p13 }
 0x22b   : > { %3305 = vmatmul.mubr.bf16.gmra.mrb[56].mxu1 %v995_v47  ;;  %11319 = vmatprep.mubr.msk.bf16.mxu0 %vm813_vm0, %v13640_v20  ;;  %v13696_v47 = vld [vmem:[%s18904_s1 + $0x8ec] ss:$16 sps:$4 sm:$0xff]  }
 0x22c   : > { %3379 = vmatpush1.bf16.msra.mxu0 %v14713_v26  ;;  %11324 = vmatprep.mubr.msk.bf16.mxu1 %vm813_vm0, %v13640_v20  ;;  %v13693_v20 = vld [vmem:[%s18904_s1 + $0x8e4] ss:$16 sps:$4 sm:$0xff]   ;;  %v13697_v26 = vld [vmem:[%s18904_s1 + $0x900] ss:$16 sps:$4 sm:$0xff]  }
 0x22d   : > { %3380 = vmatprep.subr.bf16.mxu0 %v14714_v51  ;;  %3450 = vmatpush1.bf16.msra.mxu1 %v14715_v27  ;;  %v13700_v51 = vld [vmem:[%s18904_s1 + $0x908] ss:$16 sps:$4 sm:$0xff]   ;;  %v13705_v27 = vld [vmem:[%s18904_s1 + $0x924] ss:$16 sps:$4 sm:$0xff]  }
 0x22e   : > { %3451 = vmatprep.subr.bf16.mxu1 %v14716_v32  ;;  %v13708_v32 = vld [vmem:[%s18904_s1 + $0x92c] ss:$16 sps:$4 sm:$0xff]  }
 0x230   : > { %3381 = vmatpush1.bf16.msra.mxu0 %v14717_v28  ;;  %v13703_v28 = vld [vmem:[%s18904_s1 + $0x920] ss:$16 sps:$4 sm:$0xff]  }
 0x231   : > { %3382 = vmatprep.subr.bf16.mxu0 %v14718_v36  ;;  %3452 = vmatpush1.bf16.msra.mxu1 %v14719_v39  ;;  %v13706_v36 = vld [vmem:[%s18904_s1 + $0x928] ss:$16 sps:$4 sm:$0xff]  }
 0x232   : > { %3453 = vmatprep.subr.bf16.mxu1 %v14720_v33 }
 0x234   : > { %3383 = vmatpush1.bf16.msra.mxu0 %v14721_v41 }
 0x235   : > { %3384 = vmatprep.subr.bf16.mxu0 %v14722_v44  ;;  %3454 = vmatpush1.bf16.msra.mxu1 %v14723_v45 }
 0x236   : > { %3455 = vmatprep.subr.bf16.mxu1 %v14724_v7 }
 0x238   : > { %3385 = vmatpush1.bf16.msra.mxu0 %v14725_v48 }
 0x239   : > { %11318 = vmatprep.subr.msk.bf16.mxu0 %vm826_vm1, %v15071_v35  ;;  %3456 = vmatpush1.bf16.msra.mxu1 %v14726_v54 }
 0x23a   : > { %11323 = vmatprep.subr.msk.bf16.mxu1 %vm826_vm1, %v15126_v50 }
 0x23c   : > { %3387 = vmatpush1.bf16.msra.mxu0 %v15088_v40  ;;  %v16131_v1 = vpop.f32.mrb[44].mxu0  ;;  %v16133_v56 = vpop.f32.mrb[44].mxu1  ;;  %v13649_v40 = vld [vmem:[%s18904_s1 + $0x800] ss:$16 sps:$4 sm:$0xff]  }
 0x23d   : > { %v16138_v35 = vpop.f32.mrb[45].mxu0  ;;  %v16140_v58 = vpop.f32.mrb[45].mxu1  ;;  %3458 = vmatpush1.bf16.msra.mxu1 %v15137_v53  ;;  %v13652_v53 = vld [vmem:[%s18904_s1 + $0x808] ss:$16 sps:$4 sm:$0xff]   ;;  %4293 = vmatprep.subr.bf16.mxu0 %v13651_v61  ;;  %v13720_v61 = vld [vmem:[%s18904_s1 + $0x96c] ss:$16 sps:$4 sm:$0xff]  }
 0x23e   : > { %v2173_v50 = vpop.f32.mrb[46].mxu0  ;;  %v2315_v30 = vpop.f32.mrb[46].mxu1  ;;  %4435 = vmatprep.subr.bf16.mxu1 %v13654_v46  ;;  %v13726_v46 = vld [vmem:[%s18904_s1 + $0x98c] ss:$16 sps:$4 sm:$0xff]  }
 0x23f   : > { %3399 = vmatmul.mubr.bf16.vlgmr.msra.gmra.mrb[60].mxu0 %v13638_v55  ;;  %v2174_v59 = vpop.f32.mrb[47].mxu0  ;;  %v2316_v60 = vpop.f32.mrb[47].mxu1  ;;  %v13711_v50 = vld [vmem:[%s18904_s1 + $0x944] ss:$16 sps:$4 sm:$0xff]  }
 0x240   : > { %11320 = vmatprep.mubr.msk.bf16.mxu0 %vm813_vm0, %v13641_v57  ;;  %3470 = vmatmul.mubr.bf16.vlgmr.msra.gmra.mrb[60].mxu1 %v13638_v55  ;;  %v13715_v59 = vld [vmem:[%s18904_s1 + $0x960] ss:$16 sps:$4 sm:$0xff]   ;;  %v13717_v60 = vld [vmem:[%s18904_s1 + $0x964] ss:$16 sps:$4 sm:$0xff]  }
 0x241   : > { %11325 = vmatprep.mubr.msk.bf16.mxu1 %vm813_vm0, %v13641_v57  ;;  %4294 = vmatpush1.bf16.msra.mxu0 %v13649_v40  ;;  %v13718_v40 = vld [vmem:[%s18904_s1 + $0x968] ss:$16 sps:$4 sm:$0xff]  }
 0x242   : > { %4436 = vmatpush1.bf16.msra.mxu1 %v13652_v53  ;;  %4295 = vmatprep.subr.bf16.mxu0 %v13657_v62  ;;  %v13723_v53 = vld [vmem:[%s18904_s1 + $0x984] ss:$16 sps:$4 sm:$0xff]   ;;  %v13721_v62 = vld [vmem:[%s18904_s1 + $0x980] ss:$16 sps:$4 sm:$0xff]  }
 0x243   : > { %4437 = vmatprep.subr.bf16.mxu1 %v13660_v23  ;;  %v13724_v23 = vld [vmem:[%s18904_s1 + $0x988] ss:$16 sps:$4 sm:$0xff]  }
 0x245   : > { %4296 = vmatpush1.bf16.msra.mxu0 %v13655_v11  ;;  %v13727_v11 = vld [vmem:[%s18904_s1 + $0x9a0] ss:$16 sps:$4 sm:$0xff]  }
 0x246   : > { %4438 = vmatpush1.bf16.msra.mxu1 %v13658_v2  ;;  %4297 = vmatprep.subr.bf16.mxu0 %v13663_v43  ;;  %v13730_v2 = vld [vmem:[%s18904_s1 + $0x9a8] ss:$16 sps:$4 sm:$0xff]   ;;  %v13735_v43 = vld [vmem:[%s18904_s1 + $0x9c4] ss:$16 sps:$4 sm:$0xff]  }
 0x247   : > { %3409 = vmatmul.mubr.bf16.gmra.mrb[64].mxu0 %v13643_v63  ;;  %4439 = vmatprep.subr.bf16.mxu1 %v13666_v19  ;;  %v13738_v19 = vld [vmem:[%s18904_s1 + $0x9cc] ss:$16 sps:$4 sm:$0xff]  }
 0x248   : > { %11321 = vmatprep.mubr.msk.bf16.mxu0 %vm813_vm0, %v13644_v0  ;;  %3480 = vmatmul.mubr.bf16.gmra.mrb[64].mxu1 %v13643_v63  ;;  %v13729_v63 = vld [vmem:[%s18904_s1 + $0x9a4] ss:$16 sps:$4 sm:$0xff]  }
 0x249   : > { %11326 = vmatprep.mubr.msk.bf16.mxu1 %vm813_vm0, %v13644_v0  ;;  %4298 = vmatpush1.bf16.msra.mxu0 %v13661_v4  ;;  %v13732_v0 = vld [vmem:[%s18904_s1 + $0x9ac] ss:$16 sps:$4 sm:$0xff]   ;;  %v13736_v4 = vld [vmem:[%s18904_s1 + $0x9c8] ss:$16 sps:$4 sm:$0xff]  }
 0x24a   : > { %4440 = vmatpush1.bf16.msra.mxu1 %v13664_v5  ;;  %4299 = vmatprep.subr.bf16.mxu0 %v13669_v6  ;;  %v13741_v5 = vld [vmem:[%s18904_s1 + $0x9e4] ss:$16 sps:$4 sm:$0xff]   ;;  %v13744_v6 = vld [vmem:[%s18904_s1 + $0x9ec] ss:$16 sps:$4 sm:$0xff]  }
 0x24b   : > { %4441 = vmatprep.subr.bf16.mxu1 %v13672_v8  ;;  %v13742_v8 = vld [vmem:[%s18904_s1 + $0x9e8] ss:$16 sps:$4 sm:$0xff]  }
 0x24d   : > { %4300 = vmatpush1.bf16.msra.mxu0 %v13667_v25  ;;  %v13750_v25 = vld [vmem:[%s18904_s1 + $0xa0c] ss:$16 sps:$4 sm:$0xff]  }
 0x24e   : > { %4442 = vmatpush1.bf16.msra.mxu1 %v13670_v42  ;;  %4301 = vmatprep.subr.bf16.mxu0 %v13675_v31 }
 0x24f   : > { %3419 = vmatmul.mubr.bf16.gmra.mrb[68].mxu0 %v13646_v17  ;;  %4443 = vmatprep.subr.bf16.mxu1 %v13678_v10 }
 0x250   : > { %11322 = vmatprep.mubr.msk.bf16.mxu0 %vm813_vm0, %v11317_v9  ;;  %3490 = vmatmul.mubr.bf16.gmra.mrb[68].mxu1 %v13646_v17  ;;  %v13739_v17 = vld [vmem:[%s18904_s1 + $0x9e0] ss:$16 sps:$4 sm:$0xff]  }
 0x251   : > { %11327 = vmatprep.mubr.msk.bf16.mxu1 %vm813_vm0, %v11317_v9  ;;  %4302 = vmatpush1.bf16.msra.mxu0 %v13673_v13  ;;  %v13747_v9 = vld [vmem:[%s18904_s1 + $0xa04] ss:$16 sps:$4 sm:$0xff]  }
 0x252   : > { %4444 = vmatpush1.bf16.msra.mxu1 %v13676_v12  ;;  %4303 = vmatprep.subr.bf16.mxu0 %v13681_v37 }
 0x253   : > { %4445 = vmatprep.subr.bf16.mxu1 %v13684_v14 }
 0x255   : > { %4304 = vmatpush1.bf16.msra.mxu0 %v13679_v49 }
 0x256   : > { %4446 = vmatpush1.bf16.msra.mxu1 %v13682_v29  ;;  %4305 = vmatprep.subr.bf16.mxu0 %v13687_v15 }
 0x257   : > { %3429 = vmatmul.mubr.bf16.gmra.mrb[72].mxu0 %v11316_v38  ;;  %4447 = vmatprep.subr.bf16.mxu1 %v13690_v52 }
 0x258   : > { %3500 = vmatmul.mubr.bf16.gmra.mrb[72].mxu1 %v11316_v38 }
 0x259   : > { %4306 = vmatpush1.bf16.msra.mxu0 %v13685_v16 }
 0x25a   : > { %4448 = vmatpush1.bf16.msra.mxu1 %v13688_v18  ;;  %4307 = vmatprep.subr.bf16.mxu0 %v13693_v20 }
 0x25b   : > { %4449 = vmatprep.subr.bf16.mxu1 %v13696_v47 }
 0x25d   : > { %4308 = vmatpush1.bf16.msra.mxu0 %v13691_v21 }
 0x25e   : > { %4450 = vmatpush1.bf16.msra.mxu1 %v13694_v34  ;;  %4309 = vmatprep.subr.bf16.mxu0 %v13699_v22 }
 0x25f   : > { %4451 = vmatprep.subr.bf16.mxu1 %v13702_v24 }
 0x261   : > { %4310 = vmatpush1.bf16.msra.mxu0 %v13697_v26 }
 0x262   : > { %4452 = vmatpush1.bf16.msra.mxu1 %v13700_v51  ;;  %4311 = vmatprep.subr.bf16.mxu0 %v13705_v27 }
 0x263   : > { %4453 = vmatprep.subr.bf16.mxu1 %v13708_v32 }
 0x265   : > { %4312 = vmatpush1.bf16.msra.mxu0 %v13703_v28 }
 0x266   : > { %4454 = vmatpush1.bf16.msra.mxu1 %v13706_v36  ;;  %4313 = vmatprep.subr.bf16.mxu0 %v13711_v50 }
 0x27c   : > { %v2240_v39 = vpop.f32.mrb[48].mxu0  ;;  %v2382_v33 = vpop.f32.mrb[48].mxu1 }
 0x27d   : > { %v16282_v41 = vadd.f32 %v2240_v39, %v16131_v1  ;;  %v16285_v44 = vadd.f32 %v2382_v33, %v16133_v56  ;;  %v2242_v45 = vpop.f32.mrb[49].mxu0  ;;  %v2384_v7 = vpop.f32.mrb[49].mxu1  ;;  %v13714_v1 = vld [vmem:[%s18904_s1 + $0x94c] ss:$16 sps:$4 sm:$0xff]  }
 0x27e   : > { %v16288_v48 = vadd.f32 %v2242_v45, %v16138_v35  ;;  %v16291_v54 = vadd.f32 %v2384_v7, %v16140_v58  ;;  %v2244_v55 = vpop.f32.mrb[50].mxu0  ;;  %v2386_v57 = vpop.f32.mrb[50].mxu1  ;;  %v13709_v35 = vld [vmem:[%s18904_s1 + $0x940] ss:$16 sps:$4 sm:$0xff]   ;;  %v13712_v58 = vld [vmem:[%s18904_s1 + $0x948] ss:$16 sps:$4 sm:$0xff]   ;;  %4455 = vmatprep.subr.bf16.mxu1 %v13714_v1 }
 0x27f   : > { %v2245_v56 = vpop.f32.mrb[51].mxu0  ;;  %v2387_v30 = vpop.f32.mrb[51].mxu1  ;;  %4314 = vmatpush1.bf16.msra.mxu0 %v13709_v35  ;;  %4456 = vmatpush1.bf16.msra.mxu1 %v13712_v58  ;;  %v13748_v55 = vld [vmem:[%s18904_s1 + $0xa08] ss:$16 sps:$4 sm:$0xff]   ;;  %v13753_v1 = vld [vmem:[%s18904_s1 + $0xa24] ss:$16 sps:$4 sm:$0xff]  }
 0x280   : > { %4315 = vmatprep.subr.bf16.mxu0 %v13717_v60  ;;  %4457 = vmatprep.subr.bf16.mxu1 %v13720_v61  ;;  %v13756_v56 = vld [vmem:[%s18904_s1 + $0xa2c] ss:$16 sps:$4 sm:$0xff]   ;;  %v13751_v35 = vld [vmem:[%s18904_s1 + $0xa20] ss:$16 sps:$4 sm:$0xff]   ;;  %v13754_v58 = vld [vmem:[%s18904_s1 + $0xa28] ss:$16 sps:$4 sm:$0xff]  }
 0x281   : > { %v13759_v60 = vld [vmem:[%s18904_s1 + $0xa44] ss:$16 sps:$4 sm:$0xff]  }
 0x283   : > { %4316 = vmatpush1.bf16.msra.mxu0 %v13715_v59  ;;  %4458 = vmatpush1.bf16.msra.mxu1 %v13718_v40  ;;  %v13762_v40 = vld [vmem:[%s18904_s1 + $0xa4c] ss:$16 sps:$4 sm:$0xff]  }
 0x284   : > { %4317 = vmatprep.subr.bf16.mxu0 %v13723_v53  ;;  %4459 = vmatprep.subr.bf16.mxu1 %v13726_v46 }
 0x287   : > { %4318 = vmatpush1.bf16.msra.mxu0 %v13721_v62  ;;  %4460 = vmatpush1.bf16.msra.mxu1 %v13724_v23 }
 0x288   : > { %4319 = vmatprep.subr.bf16.mxu0 %v13729_v63  ;;  %4461 = vmatprep.subr.bf16.mxu1 %v13732_v0 }
 0x28b   : > { %4320 = vmatpush1.bf16.msra.mxu0 %v13727_v11  ;;  %4462 = vmatpush1.bf16.msra.mxu1 %v13730_v2  ;;  %v13757_v11 = vld [vmem:[%s18904_s1 + $0xa40] ss:$16 sps:$4 sm:$0xff]   ;;  %v13760_v2 = vld [vmem:[%s18904_s1 + $0xa48] ss:$16 sps:$4 sm:$0xff]  }
 0x28c   : > { %4321 = vmatprep.subr.bf16.mxu0 %v13735_v43  ;;  %4463 = vmatprep.subr.bf16.mxu1 %v13738_v19 }
 0x28f   : > { %4322 = vmatpush1.bf16.msra.mxu0 %v13733_v3  ;;  %4464 = vmatpush1.bf16.msra.mxu1 %v13736_v4  ;;  %v13765_v4 = vld [vmem:[%s18904_s1 + $0xa64] ss:$16 sps:$4 sm:$0xff]  }
 0x290   : > { %4323 = vmatprep.subr.bf16.mxu0 %v13741_v5  ;;  %4465 = vmatprep.subr.bf16.mxu1 %v13744_v6  ;;  %v13768_v5 = vld [vmem:[%s18904_s1 + $0xa6c] ss:$16 sps:$4 sm:$0xff]  }
 0x293   : > { %4324 = vmatpush1.bf16.msra.mxu0 %v13739_v17  ;;  %4466 = vmatpush1.bf16.msra.mxu1 %v13742_v8  ;;  %v13763_v17 = vld [vmem:[%s18904_s1 + $0xa60] ss:$16 sps:$4 sm:$0xff]   ;;  %v13766_v8 = vld [vmem:[%s18904_s1 + $0xa68] ss:$16 sps:$4 sm:$0xff]  }
 0x294   : > { %4364 = vmatprep.subr.bf16.mxu0 %v13747_v9  ;;  %4506 = vmatprep.subr.bf16.mxu1 %v13750_v25  ;;  %v13771_v25 = vld [vmem:[%s18904_s1 + $0xa84] ss:$16 sps:$4 sm:$0xff]  }
 0x2bc   : > { %v3093_v42 = vpop.f32.mrb[52].mxu0 }
 0x2bd   : > { %v3094_v31 = vadd.f32 %v3093_v42, %v16282_v41  ;;  %v3235_v10 = vpop.f32.mrb[52].mxu1  ;;  %v3095_v13 = vpop.f32.mrb[53].mxu0  ;;  %v13774_v42 = vld [vmem:[%s18904_s1 + $0xa8c] ss:$16 sps:$4 sm:$0xff]  }
 0x2be   : > { %v3236_v12 = vadd.f32 %v3235_v10, %v16285_v44  ;;  %v3096_v37 = vadd.f32 %v3095_v13, %v16288_v48  ;;  %v3237_v38 = vpop.f32.mrb[53].mxu1  ;;  %v3097_v14 = vpop.f32.mrb[54].mxu0 }
 0x2bf   : > { %v3238_v49 = vadd.f32 %v3237_v38, %v16291_v54  ;;  %v3239_v29 = vpop.f32.mrb[54].mxu1  ;;  %v3098_v15 = vpop.f32.mrb[55].mxu0  ;;  %v13745_v54 = vld [vmem:[%s18904_s1 + $0xa00] ss:$16 sps:$4 sm:$0xff]  }
 0x2c0   : > { %v3240_v52 = vpop.f32.mrb[55].mxu1  ;;  %v13772_v29 = vld [vmem:[%s18904_s1 + $0xa88] ss:$16 sps:$4 sm:$0xff]  }
 0x2fd   : > { %v3164_v16 = vpop.f32.mrb[56].mxu0 }
 0x2fe   : > { %v16375_v18 = vadd.f32 %v3164_v16, %v3094_v31  ;;  %v3306_v20 = vpop.f32.mrb[56].mxu1  ;;  %v3166_v47 = vpop.f32.mrb[57].mxu0 }
 0x2ff   : > { %v16377_v21 = vadd.f32 %v3306_v20, %v3236_v12  ;;  %v16379_v34 = vadd.f32 %v3166_v47, %v3096_v37  ;;  %v3308_v22 = vpop.f32.mrb[57].mxu1  ;;  %v3168_v24 = vpop.f32.mrb[58].mxu0  ;;  %v13777_v20 = vld [vmem:[%s18904_s1 + $0xaa4] ss:$16 sps:$4 sm:$0xff]   ;;  %v13780_v47 = vld [vmem:[%s18904_s1 + $0xaac] ss:$16 sps:$4 sm:$0xff]  }
 0x300   : > { %v16381_v26 = vadd.f32 %v3308_v22, %v3238_v49  ;;  %v3310_v51 = vpop.f32.mrb[58].mxu1  ;;  %v3169_v27 = vpop.f32.mrb[59].mxu0  ;;  %v13769_v49 = vld [vmem:[%s18904_s1 + $0xa80] ss:$16 sps:$4 sm:$0xff]  }
 0x301   : > { %v3311_v32 = vpop.f32.mrb[59].mxu1  ;;  %v13775_v24 = vld [vmem:[%s18904_s1 + $0xaa0] ss:$16 sps:$4 sm:$0xff]   ;;  %v13778_v51 = vld [vmem:[%s18904_s1 + $0xaa8] ss:$16 sps:$4 sm:$0xff]  }
 0x302   : > { %v13783_v32 = vld [vmem:[%s18904_s1 + $0xac4] ss:$16 sps:$4 sm:$0xff]  }
 0x312   : > { %v3400_v28 = vpop.f32.mrb[60].mxu0 }
 0x313   : > { %v3402_v36 = vpop.f32.mrb[61].mxu0  ;;  %v3471_v39 = vpop.f32.mrb[60].mxu1 }
 0x314   : > { %v3404_v33 = vpop.f32.mrb[62].mxu0  ;;  %v3473_v41 = vpop.f32.mrb[61].mxu1 }
 0x315   : > { %v3508_v44 = vpack.c.bf16 %v3404_v33, %v3400_v28  ;;  %v3406_v45 = vpop.f32.mrb[63].mxu0  ;;  %v3475_v7 = vpop.f32.mrb[62].mxu1  ;;  %v13786_v28 = vld [vmem:[%s18904_s1 + $0xacc] ss:$16 sps:$4 sm:$0xff]  }
 0x316   : > { %v3509_v48 = vpack.c.bf16 %v3406_v45, %v3402_v36  ;;  %v16389_v57 = vpack.c.bf16 %v3475_v7, %v3471_v39  ;;  %v3477_v50 = vpop.f32.mrb[63].mxu1 }
 0x317   : > { %v16397_v30 = vpack.c.bf16 %v3477_v50, %v3473_v41 }
 0x318   : > { %4325 = vmatprep.mubr.bf16.mxu0 %v3509_v48  ;;  %4467 = vmatprep.mubr.bf16.mxu1 %v3509_v48 }
 0x319   : > { %4326 = vmatmul.mubr.bf16.vlgmr.msra.gmra.mrb[32].mxu0 %v3508_v44  ;;  %4468 = vmatmul.mubr.bf16.vlgmr.msra.gmra.mrb[32].mxu1 %v3508_v44 }
 0x31a   : > { %4365 = vmatpush1.bf16.msra.mxu0 %v13745_v54  ;;  %4507 = vmatpush1.bf16.msra.mxu1 %v13748_v55  ;;  %v3410_v59 = vpop.f32.mrb[64].mxu0  ;;  %v13781_v54 = vld [vmem:[%s18904_s1 + $0xac0] ss:$16 sps:$4 sm:$0xff]   ;;  %v13784_v55 = vld [vmem:[%s18904_s1 + $0xac8] ss:$16 sps:$4 sm:$0xff]  }
 0x31b   : > { %4366 = vmatprep.subr.bf16.mxu0 %v13753_v1  ;;  %4508 = vmatprep.subr.bf16.mxu1 %v13756_v56  ;;  %v3412_v61 = vpop.f32.mrb[65].mxu0  ;;  %v3481_v53 = vpop.f32.mrb[64].mxu1  ;;  %v13789_v1 = vld [vmem:[%s18904_s1 + $0xae4] ss:$16 sps:$4 sm:$0xff]   ;;  %v13792_v56 = vld [vmem:[%s18904_s1 + $0xaec] ss:$16 sps:$4 sm:$0xff]  }
 0x31c   : > { %v3414_v46 = vpop.f32.mrb[66].mxu0  ;;  %v3483_v62 = vpop.f32.mrb[65].mxu1 }
 0x31d   : > { %v3512_v23 = vpack.c.bf16 %v3414_v46, %v3410_v59  ;;  %v3416_v63 = vpop.f32.mrb[67].mxu0  ;;  %v3485_v0 = vpop.f32.mrb[66].mxu1  ;;  %v13795_v59 = vld [vmem:[%s18904_s1 + $0xb04] ss:$16 sps:$4 sm:$0xff]   ;;  %v13799_v46 = vld [vmem:[%s18904_s1 + $0xb20] ss:$16 sps:$4 sm:$0xff]  }
 0x31e   : > { %4367 = vmatpush1.bf16.msra.mxu0 %v13751_v35  ;;  %4509 = vmatpush1.bf16.msra.mxu1 %v13754_v58  ;;  %v3513_v43 = vpack.c.bf16 %v3416_v63, %v3412_v61  ;;  %v16417_v19 = vpack.c.bf16 %v3485_v0, %v3481_v53  ;;  %v3487_v3 = vpop.f32.mrb[67].mxu1  ;;  %v13787_v35 = vld [vmem:[%s18904_s1 + $0xae0] ss:$16 sps:$4 sm:$0xff]   ;;  %v13790_v58 = vld [vmem:[%s18904_s1 + $0xae8] ss:$16 sps:$4 sm:$0xff]  }
 0x31f   : > { %4368 = vmatprep.subr.bf16.mxu0 %v13759_v60  ;;  %4510 = vmatprep.subr.bf16.mxu1 %v13762_v40  ;;  %v16425_v6 = vpack.c.bf16 %v3487_v3, %v3483_v62  ;;  %v13798_v60 = vld [vmem:[%s18904_s1 + $0xb0c] ss:$16 sps:$4 sm:$0xff]   ;;  %v13793_v40 = vld [vmem:[%s18904_s1 + $0xb00] ss:$16 sps:$4 sm:$0xff]   ;;  %v13796_v61 = vld [vmem:[%s18904_s1 + $0xb08] ss:$16 sps:$4 sm:$0xff]  }
 0x320   : > { %4335 = vmatprep.mubr.bf16.mxu0 %v3513_v43  ;;  %4477 = vmatprep.mubr.bf16.mxu1 %v3513_v43  ;;  %v13801_v53 = vld [vmem:[%s18904_s1 + $0xb24] ss:$16 sps:$4 sm:$0xff]   ;;  %v13802_v62 = vld [vmem:[%s18904_s1 + $0xb28] ss:$16 sps:$4 sm:$0xff]   ;;  %v13810_v63 = vld [vmem:[%s18904_s1 + $0xb4c] ss:$16 sps:$4 sm:$0xff]  }
 0x321   : > { %4336 = vmatmul.mubr.bf16.gmra.mrb[36].mxu0 %v3512_v23  ;;  %4478 = vmatmul.mubr.bf16.gmra.mrb[36].mxu1 %v3512_v23  ;;  %v13807_v23 = vld [vmem:[%s18904_s1 + $0xb44] ss:$16 sps:$4 sm:$0xff]   ;;  %v13805_v0 = vld [vmem:[%s18904_s1 + $0xb40] ss:$16 sps:$4 sm:$0xff]   ;;  %v13816_v43 = vld [vmem:[%s18904_s1 + $0xb6c] ss:$16 sps:$4 sm:$0xff]  }
 0x322   : > { %4369 = vmatpush1.bf16.msra.mxu0 %v13757_v11  ;;  %4511 = vmatpush1.bf16.msra.mxu1 %v13760_v2  ;;  %v3420_v9 = vpop.f32.mrb[68].mxu0  ;;  %v13808_v11 = vld [vmem:[%s18904_s1 + $0xb48] ss:$16 sps:$4 sm:$0xff]   ;;  %v13813_v2 = vld [vmem:[%s18904_s1 + $0xb64] ss:$16 sps:$4 sm:$0xff]  }
 0x323   : > { %4370 = vmatprep.subr.bf16.mxu0 %v13765_v4  ;;  %4512 = vmatprep.subr.bf16.mxu1 %v13768_v5  ;;  %v3422_v31 = vpop.f32.mrb[69].mxu0  ;;  %v3491_v10 = vpop.f32.mrb[68].mxu1  ;;  %v13811_v3 = vld [vmem:[%s18904_s1 + $0xb60] ss:$16 sps:$4 sm:$0xff]   ;;  %v13814_v4 = vld [vmem:[%s18904_s1 + $0xb68] ss:$16 sps:$4 sm:$0xff]  }
 0x324   : > { %v3424_v13 = vpop.f32.mrb[70].mxu0  ;;  %v3493_v12 = vpop.f32.mrb[69].mxu1  ;;  %v13819_v5 = vld [vmem:[%s18904_s1 + $0xb84] ss:$16 sps:$4 sm:$0xff]  }
 0x325   : > { %v3516_v37 = vpack.c.bf16 %v3424_v13, %v3420_v9  ;;  %v3426_v38 = vpop.f32.mrb[71].mxu0  ;;  %v3495_v14 = vpop.f32.mrb[70].mxu1  ;;  %v13820_v9 = vld [vmem:[%s18904_s1 + $0xb88] ss:$16 sps:$4 sm:$0xff]   ;;  %v13831_v13 = vld [vmem:[%s18904_s1 + $0xbc4] ss:$16 sps:$4 sm:$0xff]  }
 0x326   : > { %4371 = vmatpush1.bf16.msra.mxu0 %v13763_v17  ;;  %4513 = vmatpush1.bf16.msra.mxu1 %v13766_v8  ;;  %v3517_v15 = vpack.c.bf16 %v3426_v38, %v3422_v31  ;;  %v16445_v52 = vpack.c.bf16 %v3495_v14, %v3491_v10  ;;  %v3497_v16 = vpop.f32.mrb[71].mxu1  ;;  %v13822_v17 = vld [vmem:[%s18904_s1 + $0xb8c] ss:$16 sps:$4 sm:$0xff]   ;;  %v13817_v8 = vld [vmem:[%s18904_s1 + $0xb80] ss:$16 sps:$4 sm:$0xff]  }
 0x327   : > { %4372 = vmatprep.subr.bf16.mxu0 %v13771_v25  ;;  %4514 = vmatprep.subr.bf16.mxu1 %v13774_v42  ;;  %v16453_v22 = vpack.c.bf16 %v3497_v16, %v3493_v12  ;;  %v13825_v25 = vld [vmem:[%s18904_s1 + $0xba4] ss:$16 sps:$4 sm:$0xff]   ;;  %v13828_v42 = vld [vmem:[%s18904_s1 + $0xbac] ss:$16 sps:$4 sm:$0xff]   ;;  %v13823_v31 = vld [vmem:[%s18904_s1 + $0xba0] ss:$16 sps:$4 sm:$0xff]  }
 0x328   : > { %4345 = vmatprep.mubr.bf16.mxu0 %v3517_v15  ;;  %4487 = vmatprep.mubr.bf16.mxu1 %v3517_v15  ;;  %v13826_v10 = vld [vmem:[%s18904_s1 + $0xba8] ss:$16 sps:$4 sm:$0xff]   ;;  %v13834_v12 = vld [vmem:[%s18904_s1 + $0xbcc] ss:$16 sps:$4 sm:$0xff]   ;;  %v13837_v14 = vld [vmem:[%s18904_s1 + $0xbe4] ss:$16 sps:$4 sm:$0xff]  }
 0x329   : > { %4346 = vmatmul.mubr.bf16.gmra.mrb[40].mxu0 %v3516_v37  ;;  %4488 = vmatmul.mubr.bf16.gmra.mrb[40].mxu1 %v3516_v37  ;;  %v13829_v37 = vld [vmem:[%s18904_s1 + $0xbc0] ss:$16 sps:$4 sm:$0xff]   ;;  %v13832_v38 = vld [vmem:[%s18904_s1 + $0xbc8] ss:$16 sps:$4 sm:$0xff]  }
 0x32a   : > { %4373 = vmatpush1.bf16.msra.mxu0 %v13769_v49  ;;  %4515 = vmatpush1.bf16.msra.mxu1 %v13772_v29  ;;  %v3430_v27 = vpop.f32.mrb[72].mxu0  ;;  %v13840_v49 = vld [vmem:[%s18904_s1 + $0xbec] ss:$16 sps:$4 sm:$0xff]   ;;  %v13835_v29 = vld [vmem:[%s18904_s1 + $0xbe0] ss:$16 sps:$4 sm:$0xff]  }
 0x32b   : > { %4374 = vmatprep.subr.bf16.mxu0 %v13777_v20  ;;  %4516 = vmatprep.subr.bf16.mxu1 %v13780_v47  ;;  %v3432_v36 = vpop.f32.mrb[73].mxu0  ;;  %v16467_v39 = vpop.f32.mrb[72].mxu1  ;;  %v3520_v45 = vpack.c.bf16 %v3430_v27, %v3430_v27  ;;  %v13838_v15 = vld [vmem:[%s18904_s1 + $0xbe8] ss:$16 sps:$4 sm:$0xff]  }
 0x32c   : > { %v3521_v33 = vpack.c.bf16 %v3432_v36, %v3432_v36  ;;  %v3434_v41 = vpop.f32.mrb[74].mxu0  ;;  %v16469_v44 = vpop.f32.mrb[73].mxu1 }
 0x32d   : > { %v3435_v7 = vpop.f32.mrb[75].mxu0  ;;  %v3505_v48 = vpop.f32.mrb[74].mxu1  ;;  %v3523_v16 = vpack.c.bf16 %v16469_v44, %v16469_v44 }
 0x32e   : > { %4375 = vmatpush1.bf16.msra.mxu0 %v13775_v24  ;;  %4517 = vmatpush1.bf16.msra.mxu1 %v13778_v51  ;;  %v3506_v50 = vpop.f32.mrb[75].mxu1 }
 0x32f   : > { %4376 = vmatprep.subr.bf16.mxu0 %v13783_v32  ;;  %4518 = vmatprep.subr.bf16.mxu1 %v13786_v28  ;;  %v4607_v32 = vlaneseq }
 0x330   : > { %4355 = vmatprep.mubr.bf16.mxu0 %v3521_v33  ;;  %4497 = vmatprep.mubr.bf16.mxu1 %v3521_v33  ;;  %v4605_v33 = vld [vmem:[%s18905_s2] sm:$0xf] }
 0x331   : > { %4356 = vmatmul.mubr.bf16.gmra.mrb[76].mxu0 %v3520_v45  ;;  %4498 = vmatmul.mubr.bf16.gmra.mrb[76].mxu1 %v3520_v45  ;;  %v16612_v28 = vshrl.u32 %v4607_v32, 7  ;;  %vm10749_vm8 = vcmp.lt.s32.totalorder %v4607_v32, 512 }
 0x332   : > { %4377 = vmatpush1.bf16.msra.mxu0 %v13781_v54  ;;  %4519 = vmatpush1.bf16.msra.mxu1 %v13784_v55 }
 0x333   : > { %4378 = vmatprep.subr.bf16.mxu0 %v13789_v1  ;;  %4520 = vmatprep.subr.bf16.mxu1 %v13792_v56  ;;  %v16615_v36 = vsub.s32 0, %v16612_v28  ;;  %v16624_v41 = vsub.s32 1, %v16612_v28  ;;  %v16627_v44 = vsub.s32 3, %v16612_v28 }
 0x334   : > { %4396 = vmatprep.mubr.bf16.mxu0 %v16397_v30  ;;  %4538 = vmatprep.mubr.bf16.mxu1 %v16397_v30  ;;  %v13804_v30 = vld [vmem:[%s18904_s1 + $0xb2c] ss:$16 sps:$4 sm:$0xff]  }
 0x335   : > { %v16630_v45 = vrot.slane %v4605_v33, %v16615_v36  ;;  %v16636_v48 = vrot.slane %v4605_v33, %v16624_v41  ;;  %v16639_v54 = vrot.slane %v4605_v33, %v16627_v44 }
 0x336   : > { %4379 = vmatpush1.bf16.msra.mxu0 %v13787_v35  ;;  %4521 = vmatpush1.bf16.msra.mxu1 %v13790_v58 }
 0x337   : > { %4380 = vmatprep.subr.bf16.mxu0 %v13795_v59  ;;  %4522 = vmatprep.subr.bf16.mxu1 %v13798_v60 }
 0x33a   : > { %4381 = vmatpush1.bf16.msra.mxu0 %v13793_v40  ;;  %4523 = vmatpush1.bf16.msra.mxu1 %v13796_v61 }
 0x33b   : > { %4382 = vmatprep.subr.bf16.mxu0 %v13801_v53  ;;  %4524 = vmatprep.subr.bf16.mxu1 %v13804_v30 }
 0x33e   : > { %4383 = vmatpush1.bf16.msra.mxu0 %v13799_v46  ;;  %4525 = vmatpush1.bf16.msra.mxu1 %v13802_v62 }
 0x33f   : > { %4384 = vmatprep.subr.bf16.mxu0 %v13807_v23  ;;  %4526 = vmatprep.subr.bf16.mxu1 %v13810_v63 }
 0x342   : > { %4385 = vmatpush1.bf16.msra.mxu0 %v13805_v0  ;;  %4527 = vmatpush1.bf16.msra.mxu1 %v13808_v11 }
 0x343   : > { %4386 = vmatprep.subr.bf16.mxu0 %v13813_v2  ;;  %4528 = vmatprep.subr.bf16.mxu1 %v13816_v43 }
 0x346   : > { %4387 = vmatpush1.bf16.msra.mxu0 %v13811_v3  ;;  %4529 = vmatpush1.bf16.msra.mxu1 %v13814_v4 }
 0x347   : > { %4388 = vmatprep.subr.bf16.mxu0 %v13819_v5  ;;  %4530 = vmatprep.subr.bf16.mxu1 %v13822_v17 }
 0x34a   : > { %4389 = vmatpush1.bf16.msra.mxu0 %v13817_v8  ;;  %4531 = vmatpush1.bf16.msra.mxu1 %v13820_v9 }
 0x34b   : > { %4390 = vmatprep.subr.bf16.mxu0 %v13825_v25  ;;  %4532 = vmatprep.subr.bf16.mxu1 %v13828_v42 }
 0x34e   : > { %4391 = vmatpush1.bf16.msra.mxu0 %v13823_v31  ;;  %4533 = vmatpush1.bf16.msra.mxu1 %v13826_v10 }
 0x34f   : > { %4392 = vmatprep.subr.bf16.mxu0 %v13831_v13  ;;  %4534 = vmatprep.subr.bf16.mxu1 %v13834_v12 }
 0x352   : > { %4393 = vmatpush1.bf16.msra.mxu0 %v13829_v37  ;;  %4535 = vmatpush1.bf16.msra.mxu1 %v13832_v38 }
 0x353   : > { %4394 = vmatprep.subr.bf16.mxu0 %v13837_v14  ;;  %4536 = vmatprep.subr.bf16.mxu1 %v13840_v49 }
 0x356   : > { %4395 = vmatpush1.bf16.msra.mxu0 %v13835_v29  ;;  %4537 = vmatpush1.bf16.msra.mxu1 %v13838_v15 }
 0x359   : > { %4397 = vmatmul.mubr.bf16.vlgmr.msra.gmra.mrb[32].mxu0 %v16389_v57  ;;  %4539 = vmatmul.mubr.bf16.vlgmr.msra.gmra.mrb[32].mxu1 %v16389_v57  ;;  %v3522_v57 = vpack.c.bf16 %v16467_v39, %v16467_v39  ;;  %v16618_v39 = vsub.s32 2, %v16612_v28 }
 0x35a   : > { %4406 = vmatprep.mubr.bf16.mxu0 %v16425_v6  ;;  %4548 = vmatprep.mubr.bf16.mxu1 %v16425_v6  ;;  %v14791_v6 = vmov 0  }
 0x35b   : > { %v16633_v7 = vrot.slane %v4605_v33, %v16618_v39 }
 0x361   : > { %4407 = vmatmul.mubr.bf16.gmra.mrb[36].mxu0 %v16417_v19  ;;  %4549 = vmatmul.mubr.bf16.gmra.mrb[36].mxu1 %v16417_v19 }
 0x362   : > { %4416 = vmatprep.mubr.bf16.mxu0 %v16453_v22  ;;  %4558 = vmatprep.mubr.bf16.mxu1 %v16453_v22 }
 0x369   : > { %4417 = vmatmul.mubr.bf16.gmra.mrb[40].mxu0 %v16445_v52  ;;  %4559 = vmatmul.mubr.bf16.gmra.mrb[40].mxu1 %v16445_v52 }
 0x36a   : > { %4426 = vmatprep.mubr.bf16.mxu0 %v3523_v16  ;;  %4568 = vmatprep.mubr.bf16.mxu1 %v3523_v16 }
 0x371   : > { %4427 = vmatmul.mubr.bf16.gmra.mrb[80].mxu0 %v3522_v57  ;;  %4569 = vmatmul.mubr.bf16.gmra.mrb[80].mxu1 %v3522_v57 }
 0x372   : > { %4762 = vmatprep.mubr.bf16.mxu0 %v14791_v6  ;;  %5069 = vmatprep.mubr.bf16.mxu1 %v14791_v6 }
 0x404   : > { %v16603_v19 = vpop.f32.mrb[76].mxu0  ;;  %v16605_v20 = vpop.f32.mrb[76].mxu1 }
 0x405   : > { %v16607_v47 = vpop.f32.mrb[77].mxu0  ;;  %v16609_v22 = vpop.f32.mrb[77].mxu1 }
 0x406   : > { %v4361_v52 = vpop.f32.mrb[78].mxu0  ;;  %v4503_v24 = vpop.f32.mrb[78].mxu1 }
 0x407   : > { %v4362_v51 = vpop.f32.mrb[79].mxu0  ;;  %v4504_v27 = vpop.f32.mrb[79].mxu1 }
 0x42c   : > { %v4398_v55 = vpop.f32.mrb[32].mxu0  ;;  %v4540_v50 = vpop.f32.mrb[32].mxu1 }
 0x42d   : > { %v4627_v1 = vadd.f32 %v16630_v45, %v4398_v55  ;;  %v4629_v56 = vadd.f32 %v16633_v7, %v4540_v50  ;;  %v4400_v35 = vpop.f32.mrb[33].mxu0  ;;  %v4542_v58 = vpop.f32.mrb[33].mxu1 }
 0x42e   : > { %v4628_v59 = vadd.f32 %v16636_v48, %v4400_v35  ;;  %v4630_v60 = vadd.f32 %v16639_v54, %v4542_v58  ;;  %v4402_v40 = vpop.f32.mrb[34].mxu0  ;;  %v4544_v61 = vpop.f32.mrb[34].mxu1 }
 0x42f   : > { %v4631_v53 = vadd.f32 %v16630_v45, %v4402_v40  ;;  %v4633_v30 = vadd.f32 %v16633_v7, %v4544_v61  ;;  %v4404_v46 = vpop.f32.mrb[35].mxu0  ;;  %v4546_v62 = vpop.f32.mrb[35].mxu1  ;;  %v4655_v0 = vmax.f32 %v4627_v1, 0.0  ;;  %v4657_v11 = vmax.f32 %v4629_v56, 0.0 }
 0x430   : > { %v4632_v23 = vadd.f32 %v16636_v48, %v4404_v46  ;;  %v4634_v63 = vadd.f32 %v16639_v54, %v4546_v62  ;;  %v4656_v3 = vmax.f32 %v4628_v59, 0.0  ;;  %v4658_v4 = vmax.f32 %v4630_v60, 0.0 }
 0x431   : > { %v4659_v2 = vmax.f32 %v4631_v53, 0.0  ;;  %v4661_v43 = vmax.f32 %v4633_v30, 0.0 }
 0x432   : > { %v4660_v5 = vmax.f32 %v4632_v23, 0.0  ;;  %v4662_v17 = vmax.f32 %v4634_v63, 0.0 }
 0x433   : > { %v16649_v8 = vpack.c.bf16 %v4659_v2, %v4655_v0  ;;  %v16651_v9 = vpack.c.bf16 %v4661_v43, %v4657_v11 }
 0x434   : > { %v16653_v25 = vpack.c.bf16 %v4660_v5, %v4656_v3  ;;  %v16655_v42 = vpack.c.bf16 %v4662_v17, %v4658_v4  ;;  %v4408_v31 = vpop.f32.mrb[36].mxu0  ;;  %v4550_v10 = vpop.f32.mrb[36].mxu1 }
 0x435   : > { %v4635_v13 = vadd.f32 %v16630_v45, %v4408_v31  ;;  %v4637_v12 = vadd.f32 %v16633_v7, %v4550_v10  ;;  %v4410_v37 = vpop.f32.mrb[37].mxu0  ;;  %v4552_v38 = vpop.f32.mrb[37].mxu1 }
 0x436   : > { %v4636_v14 = vadd.f32 %v16636_v48, %v4410_v37  ;;  %v4638_v49 = vadd.f32 %v16639_v54, %v4552_v38  ;;  %v4412_v29 = vpop.f32.mrb[38].mxu0  ;;  %v4554_v15 = vpop.f32.mrb[38].mxu1  ;;  %4730 = vmatprep.subr.bf16.mxu0 %v16653_v25  ;;  %5037 = vmatprep.subr.bf16.mxu1 %v16655_v42 }
 0x437   : > { %v4639_v16 = vadd.f32 %v16630_v45, %v4412_v29  ;;  %v4641_v57 = vadd.f32 %v16633_v7, %v4554_v15  ;;  %v4414_v52 = vpop.f32.mrb[39].mxu0  ;;  %v4556_v24 = vpop.f32.mrb[39].mxu1  ;;  %4731 = vmatpush1.bf16.msra.mxu0 %v16649_v8  ;;  %5038 = vmatpush1.bf16.msra.mxu1 %v16651_v9  ;;  %v4663_v33 = vmax.f32 %v4635_v13, 0.0  ;;  %v4665_v55 = vmax.f32 %v4637_v12, 0.0 }
 0x438   : > { %v4640_v51 = vadd.f32 %v16636_v48, %v4414_v52  ;;  %v4642_v27 = vadd.f32 %v16639_v54, %v4556_v24  ;;  %v4664_v56 = vmax.f32 %v4636_v14, 0.0  ;;  %v4666_v35 = vmax.f32 %v4638_v49, 0.0 }
 0x439   : > { %v4667_v50 = vmax.f32 %v4639_v16, 0.0  ;;  %v4669_v1 = vmax.f32 %v4641_v57, 0.0 }
 0x43a   : > { %v4668_v58 = vmax.f32 %v4640_v51, 0.0  ;;  %v4670_v59 = vmax.f32 %v4642_v27, 0.0 }
 0x43b   : > { %v16669_v60 = vpack.c.bf16 %v4667_v50, %v4663_v33  ;;  %v16671_v40 = vpack.c.bf16 %v4669_v1, %v4665_v55 }
 0x43c   : > { %v16673_v61 = vpack.c.bf16 %v4668_v58, %v4664_v56  ;;  %v16675_v53 = vpack.c.bf16 %v4670_v59, %v4666_v35  ;;  %v4418_v30 = vpop.f32.mrb[40].mxu0  ;;  %v4560_v46 = vpop.f32.mrb[40].mxu1 }
 0x43d   : > { %v4643_v62 = vadd.f32 %v16630_v45, %v4418_v30  ;;  %v4645_v23 = vadd.f32 %v16633_v7, %v4560_v46  ;;  %v4420_v63 = vpop.f32.mrb[41].mxu0  ;;  %v4562_v0 = vpop.f32.mrb[41].mxu1 }
 0x43e   : > { %v4644_v11 = vadd.f32 %v16636_v48, %v4420_v63  ;;  %v4646_v2 = vadd.f32 %v16639_v54, %v4562_v0  ;;  %v4422_v43 = vpop.f32.mrb[42].mxu0  ;;  %v4564_v3 = vpop.f32.mrb[42].mxu1  ;;  %4732 = vmatprep.subr.bf16.mxu0 %v16673_v61  ;;  %5039 = vmatprep.subr.bf16.mxu1 %v16675_v53 }
 0x43f   : > { %v4647_v4 = vadd.f32 %v16630_v45, %v4422_v43  ;;  %v4649_v5 = vadd.f32 %v16633_v7, %v4564_v3  ;;  %v4424_v17 = vpop.f32.mrb[43].mxu0  ;;  %v4566_v31 = vpop.f32.mrb[43].mxu1  ;;  %4733 = vmatpush1.bf16.msra.mxu0 %v16669_v60  ;;  %5040 = vmatpush1.bf16.msra.mxu1 %v16671_v40  ;;  %v4671_v12 = vmax.f32 %v4643_v62, 0.0  ;;  %v4673_v37 = vmax.f32 %v4645_v23, 0.0 }
 0x440   : > { %v4648_v10 = vadd.f32 %v16636_v48, %v4424_v17  ;;  %v4650_v13 = vadd.f32 %v16639_v54, %v4566_v31  ;;  %v4672_v49 = vmax.f32 %v4644_v11, 0.0  ;;  %v4674_v29 = vmax.f32 %v4646_v2, 0.0  ;;  %v13848_v17 = vld [vmem:[%s18907_s4 + $0x408] ss:$16 sps:$4 sm:$0xff]   ;;  %v13856_v31 = vld [vmem:[%s18907_s4 + $0x42c] ss:$16 sps:$4 sm:$0xff]  }
 0x441   : > { %v4675_v38 = vmax.f32 %v4647_v4, 0.0  ;;  %v4677_v14 = vmax.f32 %v4649_v5, 0.0 }
 0x442   : > { %v4676_v15 = vmax.f32 %v4648_v10, 0.0  ;;  %v4678_v16 = vmax.f32 %v4650_v13, 0.0  ;;  %v13854_v10 = vld [vmem:[%s18907_s4 + $0x428] ss:$16 sps:$4 sm:$0xff]  }
 0x443   : > { %v16689_v57 = vpack.c.bf16 %v4675_v38, %v4671_v12  ;;  %v16691_v52 = vpack.c.bf16 %v4677_v14, %v4673_v37  ;;  %v13842_v13 = vld [vmem:[%s18909_s6 + $0x8] ss:$0 sps:$4 sm:$0x11]   ;;  %v13844_v12 = vld [vmem:[%s18909_s6 + $0x14] ss:$0 sps:$4 sm:$0x11]  }
 0x444   : > { %v16693_v24 = vpack.c.bf16 %v4676_v15, %v4672_v49  ;;  %v16695_v51 = vpack.c.bf16 %v4678_v16, %v4674_v29  ;;  %v4428_v27 = vpop.f32.mrb[80].mxu0  ;;  %v4570_v33 = vpop.f32.mrb[80].mxu1  ;;  %v13862_v37 = vld [vmem:[%s18907_s4 + $0x44c] ss:$16 sps:$4 sm:$0xff]   ;;  %v13860_v38 = vld [vmem:[%s18907_s4 + $0x448] ss:$16 sps:$4 sm:$0xff]  }
 0x445   : > { %v4429_v55 = vadd.f32 %v4428_v27, %v16603_v19  ;;  %v4571_v50 = vadd.f32 %v4570_v33, %v16605_v20  ;;  %v4430_v1 = vpop.f32.mrb[81].mxu0  ;;  %v4572_v56 = vpop.f32.mrb[81].mxu1  ;;  %v13868_v14 = vld [vmem:[%s18907_s4 + $0x46c] ss:$16 sps:$4 sm:$0xff]   ;;  %v13866_v49 = vld [vmem:[%s18907_s4 + $0x468] ss:$16 sps:$4 sm:$0xff]  }
 0x446   : > { %v4431_v35 = vadd.f32 %v4430_v1, %v16607_v47  ;;  %v4573_v58 = vadd.f32 %v4572_v56, %v16609_v22  ;;  %v4432_v59 = vpop.f32.mrb[82].mxu0  ;;  %v4574_v30 = vpop.f32.mrb[82].mxu1  ;;  %4734 = vmatprep.subr.bf16.mxu0 %v16693_v24  ;;  %5041 = vmatprep.subr.bf16.mxu1 %v16695_v51  ;;  %v13874_v29 = vld [vmem:[%s18907_s4 + $0x48c] ss:$16 sps:$4 sm:$0xff]   ;;  %v13872_v15 = vld [vmem:[%s18907_s4 + $0x488] ss:$16 sps:$4 sm:$0xff]  }
 0x447   : > { %v4601_v46 = vadd.f32 %v4429_v55, %v16375_v18  ;;  %v4603_v62 = vadd.f32 %v4571_v50, %v16377_v21  ;;  %v4433_v23 = vpop.f32.mrb[83].mxu0  ;;  %v4575_v19 = vpop.f32.mrb[83].mxu1  ;;  %4735 = vmatpush1.bf16.msra.mxu0 %v16689_v57  ;;  %5042 = vmatpush1.bf16.msra.mxu1 %v16691_v52  ;;  %v13880_v16 = vld [vmem:[%s18907_s4 + $0x4ac] ss:$16 sps:$4 sm:$0xff]   ;;  %v13878_v27 = vld [vmem:[%s18907_s4 + $0x4a8] ss:$16 sps:$4 sm:$0xff]  }
 0x448   : > { %v4602_v20 = vadd.f32 %v4431_v35, %v16379_v34  ;;  %v4604_v47 = vadd.f32 %v4573_v58, %v16381_v26  ;;  %v13850_v26 = vld [vmem:[%s18907_s4 + $0x40c] ss:$16 sps:$4 sm:$0xff]   ;;  %v13884_v55 = vld [vmem:[%s18907_s4 + $0x4c8] ss:$16 sps:$4 sm:$0xff]   ;;  %v13847_v50 = vld [vmem:[%s18907_s4 + $0x404] ss:$16 sps:$4 sm:$0xff]  }
 0x449   : > { %v4651_v22 = vadd.f32 %v16630_v45, %v4601_v46  ;;  %v4653_v63 = vadd.f32 %v16633_v7, %v4603_v62  ;;  %v13886_v33 = vld [vmem:[%s18907_s4 + $0x4cc] ss:$16 sps:$4 sm:$0xff]   ;;  %v13845_v1 = vld [vmem:[%s18907_s4 + $0x400] ss:$16 sps:$4 sm:$0xff]   ;;  %v13853_v56 = vld [vmem:[%s18907_s4 + $0x424] ss:$16 sps:$4 sm:$0xff]  }
 0x44a   : > { %v4652_v0 = vadd.f32 %v16636_v48, %v4602_v20  ;;  %v4654_v18 = vadd.f32 %v16639_v54, %v4604_v47  ;;  %v13841_v48 = vld [vmem:[%s18909_s6] sm:$0xff]   ;;  %v13843_v54 = vld [vmem:[%s18909_s6 + $0xc] sm:$0xff]  }
 0x44b   : > { %v4679_v11 = vmax.f32 %v4651_v22, 0.0  ;;  %v4681_v21 = vmax.f32 %v4653_v63, 0.0  ;;  %v13851_v35 = vld [vmem:[%s18907_s4 + $0x420] ss:$16 sps:$4 sm:$0xff]   ;;  %v13859_v58 = vld [vmem:[%s18907_s4 + $0x444] ss:$16 sps:$4 sm:$0xff]  }
 0x44c   : > { %v4680_v2 = vmax.f32 %v4652_v0, 0.0  ;;  %v4682_v43 = vmax.f32 %v4654_v18, 0.0  ;;  %v13857_v59 = vld [vmem:[%s18907_s4 + $0x440] ss:$16 sps:$4 sm:$0xff]   ;;  %v13865_v30 = vld [vmem:[%s18907_s4 + $0x464] ss:$16 sps:$4 sm:$0xff]  }
 0x44d   : > { %v4695_v3 = vpack.c.bf16 %v4679_v11, %v4679_v11  ;;  %v4697_v4 = vpack.c.bf16 %v4681_v21, %v4681_v21  ;;  %v13863_v46 = vld [vmem:[%s18907_s4 + $0x460] ss:$16 sps:$4 sm:$0xff]   ;;  %v13871_v62 = vld [vmem:[%s18907_s4 + $0x484] ss:$16 sps:$4 sm:$0xff]   ;;  %v13892_v0 = vld [vmem:[%s18907_s4 + $0x4ec] ss:$16 sps:$4 sm:$0xff]  }
 0x44e   : > { %v16713_v5 = vpack.c.bf16 %v4680_v2, %v4680_v2  ;;  %v16715_v34 = vpack.c.bf16 %v4682_v43, %v4682_v43  ;;  %v13869_v23 = vld [vmem:[%s18907_s4 + $0x480] ss:$16 sps:$4 sm:$0xff]   ;;  %v13877_v19 = vld [vmem:[%s18907_s4 + $0x4a4] ss:$16 sps:$4 sm:$0xff]   ;;  %v13890_v11 = vld [vmem:[%s18907_s4 + $0x4e8] ss:$16 sps:$4 sm:$0xff]  }
 0x44f   : > { %v16721_v45 = vsel %vm4717_vm2, %v4695_v3, 0  ;;  %v16724_v7 = vsel %vm4717_vm2, %v4697_v4, 0  ;;  %v13875_v20 = vld [vmem:[%s18907_s4 + $0x4a0] ss:$16 sps:$4 sm:$0xff]   ;;  %v13883_v47 = vld [vmem:[%s18907_s4 + $0x4c4] ss:$16 sps:$4 sm:$0xff]  }
 0x450   : > { %11586 = vmatprep.subr.msk.bf16.mxu0 %vm4717_vm2, %v16713_v5  ;;  %11600 = vmatprep.subr.msk.bf16.mxu1 %vm4717_vm2, %v16715_v34  ;;  %v13881_v22 = vld [vmem:[%s18907_s4 + $0x4c0] ss:$16 sps:$4 sm:$0xff]   ;;  %v13889_v63 = vld [vmem:[%s18907_s4 + $0x4e4] ss:$16 sps:$4 sm:$0xff]   ;;  %v13896_v43 = vld [vmem:[%s18907_s4 + $0x508] ss:$16 sps:$4 sm:$0xff]  }
 0x451   : > { %4737 = vmatpush1.bf16.msra.mxu0 %v16721_v45  ;;  %5044 = vmatpush1.bf16.msra.mxu1 %v16724_v7  ;;  %v13887_v18 = vld [vmem:[%s18907_s4 + $0x4e0] ss:$16 sps:$4 sm:$0xff]   ;;  %v13895_v2 = vld [vmem:[%s18907_s4 + $0x504] ss:$16 sps:$4 sm:$0xff]   ;;  %v13898_v3 = vld [vmem:[%s18907_s4 + $0x50c] ss:$16 sps:$4 sm:$0xff]  }
 0x452   : > { %4781 = vmatprep.subr.bf16.mxu0 %v16655_v42  ;;  %5967 = vmatprep.subr.bf16.mxu1 %v13850_v26  ;;  %v13893_v21 = vld [vmem:[%s18907_s4 + $0x500] ss:$16 sps:$4 sm:$0xff]   ;;  %v13901_v4 = vld [vmem:[%s18907_s4 + $0x524] ss:$16 sps:$4 sm:$0xff]   ;;  %v13904_v26 = vld [vmem:[%s18907_s4 + $0x52c] ss:$16 sps:$4 sm:$0xff]  }
 0x454   : > { %11587 = vmatmul.mubr.msk.bf16.vlgmr.msra.gmra.mrb[84].mxu0 %vm4710_vm3, %v13841_v48  ;;  %11601 = vmatmul.mubr.msk.bf16.vlgmr.msra.gmra.mrb[84].mxu1 %vm4710_vm3, %v13843_v54 }
 0x455   : > { %4782 = vmatpush1.bf16.msra.mxu0 %v16651_v9  ;;  %4772 = vmatprep.mubr.bf16.mxu0 %v14791_v6 }
 0x456   : > { %4783 = vmatprep.subr.bf16.mxu0 %v16675_v53  ;;  %5079 = vmatprep.mubr.bf16.mxu1 %v14791_v6 }
 0x457   : > { %5968 = vmatpush1.bf16.msra.mxu1 %v13848_v17  ;;  %v13905_v17 = vld [vmem:[%s18907_s4 + $0x540] ss:$16 sps:$4 sm:$0xff]  }
 0x458   : > { %5969 = vmatprep.subr.bf16.mxu1 %v13856_v31  ;;  %v13907_v31 = vld [vmem:[%s18907_s4 + $0x544] ss:$16 sps:$4 sm:$0xff]  }
 0x459   : > { %4784 = vmatpush1.bf16.msra.mxu0 %v16671_v40 }
 0x45a   : > { %4785 = vmatprep.subr.bf16.mxu0 %v16695_v51 }
 0x45b   : > { %5970 = vmatpush1.bf16.msra.mxu1 %v13854_v10  ;;  %v13908_v10 = vld [vmem:[%s18907_s4 + $0x548] ss:$16 sps:$4 sm:$0xff]  }
 0x45c   : > { %11588 = vmatmul.mubr.msk.bf16.gmra.mrb[88].mxu0 %vm4710_vm3, %v13842_v13  ;;  %11602 = vmatmul.mubr.msk.bf16.gmra.mrb[88].mxu1 %vm4710_vm3, %v13844_v12 }
 0x45d   : > { %4786 = vmatpush1.bf16.msra.mxu0 %v16691_v52  ;;  %4813 = vmatprep.mubr.bf16.mxu0 %v14791_v6 }
 0x45e   : > { %11589 = vmatprep.subr.msk.bf16.mxu0 %vm4717_vm2, %v16715_v34  ;;  %5971 = vmatprep.subr.bf16.mxu1 %v13862_v37  ;;  %v13916_v37 = vld [vmem:[%s18907_s4 + $0x56c] ss:$16 sps:$4 sm:$0xff]  }
 0x45f   : > { %5972 = vmatpush1.bf16.msra.mxu1 %v13860_v38  ;;  %v13911_v38 = vld [vmem:[%s18907_s4 + $0x560] ss:$16 sps:$4 sm:$0xff]  }
 0x460   : > { %5973 = vmatprep.subr.bf16.mxu1 %v13868_v14  ;;  %v13914_v14 = vld [vmem:[%s18907_s4 + $0x568] ss:$16 sps:$4 sm:$0xff]  }
 0x461   : > { %4788 = vmatpush1.bf16.msra.mxu0 %v16724_v7 }
 0x462   : > { %4986 = vmatprep.subr.bf16.mxu0 %v16653_v25 }
 0x463   : > { %5974 = vmatpush1.bf16.msra.mxu1 %v13866_v49  ;;  %v13917_v49 = vld [vmem:[%s18907_s4 + $0x580] ss:$16 sps:$4 sm:$0xff]  }
 0x464   : > { %11590 = vmatmul.mubr.msk.bf16.vlgmr.msra.gmra.mrb[92].mxu0 %vm4710_vm3, %v13841_v48  ;;  %5975 = vmatprep.subr.bf16.mxu1 %v13874_v29  ;;  %v13899_v48 = vld [vmem:[%s18907_s4 + $0x520] ss:$16 sps:$4 sm:$0xff]   ;;  %v13919_v29 = vld [vmem:[%s18907_s4 + $0x584] ss:$16 sps:$4 sm:$0xff]  }
 0x465   : > { %4987 = vmatpush1.bf16.msra.mxu0 %v16649_v8  ;;  %4823 = vmatprep.mubr.bf16.mxu0 %v14791_v6 }
 0x466   : > { %4988 = vmatprep.subr.bf16.mxu0 %v16673_v61 }
 0x467   : > { %5976 = vmatpush1.bf16.msra.mxu1 %v13872_v15  ;;  %v13920_v15 = vld [vmem:[%s18907_s4 + $0x588] ss:$16 sps:$4 sm:$0xff]  }
 0x468   : > { %5977 = vmatprep.subr.bf16.mxu1 %v13880_v16  ;;  %v13922_v16 = vld [vmem:[%s18907_s4 + $0x58c] ss:$16 sps:$4 sm:$0xff]  }
 0x469   : > { %4989 = vmatpush1.bf16.msra.mxu0 %v16669_v60 }
 0x46a   : > { %4990 = vmatprep.subr.bf16.mxu0 %v16693_v24 }
 0x46b   : > { %5978 = vmatpush1.bf16.msra.mxu1 %v13878_v27  ;;  %v13925_v27 = vld [vmem:[%s18907_s4 + $0x5a4] ss:$16 sps:$4 sm:$0xff]  }
 0x46c   : > { %11591 = vmatmul.mubr.msk.bf16.gmra.mrb[96].mxu0 %vm4710_vm3, %v13842_v13  ;;  %5979 = vmatprep.subr.bf16.mxu1 %v13886_v33  ;;  %v13910_v13 = vld [vmem:[%s18907_s4 + $0x54c] ss:$16 sps:$4 sm:$0xff]  }
 0x46d   : > { %4991 = vmatpush1.bf16.msra.mxu0 %v16689_v57  ;;  %5018 = vmatprep.mubr.bf16.mxu0 %v14791_v6  ;;  %v13928_v33 = vld [vmem:[%s18907_s4 + $0x5ac] ss:$16 sps:$4 sm:$0xff]  }
 0x46e   : > { %11597 = vmatprep.subr.msk.bf16.mxu0 %vm4717_vm2, %v16713_v5 }
 0x46f   : > { %5980 = vmatpush1.bf16.msra.mxu1 %v13884_v55  ;;  %v13923_v55 = vld [vmem:[%s18907_s4 + $0x5a0] ss:$16 sps:$4 sm:$0xff]  }
 0x470   : > { %5981 = vmatprep.subr.bf16.mxu1 %v13892_v0 }
 0x471   : > { %4993 = vmatpush1.bf16.msra.mxu0 %v16721_v45 }
 0x472   : > { %5865 = vmatprep.subr.bf16.mxu0 %v13847_v50  ;;  %v13926_v50 = vld [vmem:[%s18907_s4 + $0x5a8] ss:$16 sps:$4 sm:$0xff]  }
 0x473   : > { %5982 = vmatpush1.bf16.msra.mxu1 %v13890_v11 }
 0x474   : > { %11598 = vmatmul.mubr.msk.bf16.vlgmr.msra.gmra.mrb[100].mxu0 %vm4710_vm3, %v13843_v54  ;;  %5983 = vmatprep.subr.bf16.mxu1 %v13898_v3  ;;  %v13902_v54 = vld [vmem:[%s18907_s4 + $0x528] ss:$16 sps:$4 sm:$0xff]  }
 0x475   : > { %5028 = vmatprep.mubr.bf16.mxu0 %v14791_v6  ;;  %5866 = vmatpush1.bf16.msra.mxu0 %v13845_v1  ;;  %v13929_v1 = vld [vmem:[%s18907_s4 + $0x5c0] ss:$16 sps:$4 sm:$0xff]  }
 0x476   : > { %5867 = vmatprep.subr.bf16.mxu0 %v13853_v56  ;;  %v13931_v56 = vld [vmem:[%s18907_s4 + $0x5c4] ss:$16 sps:$4 sm:$0xff]  }
 0x477   : > { %5984 = vmatpush1.bf16.msra.mxu1 %v13896_v43 }
 0x478   : > { %5985 = vmatprep.subr.bf16.mxu1 %v13904_v26 }
 0x479   : > { %5868 = vmatpush1.bf16.msra.mxu0 %v13851_v35  ;;  %v13932_v35 = vld [vmem:[%s18907_s4 + $0x5c8] ss:$16 sps:$4 sm:$0xff]  }
 0x47a   : > { %5869 = vmatprep.subr.bf16.mxu0 %v13859_v58  ;;  %v13934_v58 = vld [vmem:[%s18907_s4 + $0x5cc] ss:$16 sps:$4 sm:$0xff]  }
 0x47b   : > { %5986 = vmatpush1.bf16.msra.mxu1 %v13902_v54 }
 0x47c   : > { %11599 = vmatmul.mubr.msk.bf16.gmra.mrb[104].mxu0 %vm4710_vm3, %v13844_v12  ;;  %5987 = vmatprep.subr.bf16.mxu1 %v13910_v13  ;;  %v13913_v12 = vld [vmem:[%s18907_s4 + $0x564] ss:$16 sps:$4 sm:$0xff]  }
 0x47d   : > { %5870 = vmatpush1.bf16.msra.mxu0 %v13857_v59  ;;  %v13937_v59 = vld [vmem:[%s18907_s4 + $0x5e4] ss:$16 sps:$4 sm:$0xff]  }
 0x47e   : > { %5871 = vmatprep.subr.bf16.mxu0 %v13865_v30  ;;  %v13940_v30 = vld [vmem:[%s18907_s4 + $0x5ec] ss:$16 sps:$4 sm:$0xff]  }
 0x47f   : > { %5988 = vmatpush1.bf16.msra.mxu1 %v13908_v10 }
 0x480   : > { %5989 = vmatprep.subr.bf16.mxu1 %v13916_v37 }
 0x481   : > { %5872 = vmatpush1.bf16.msra.mxu0 %v13863_v46  ;;  %v13935_v46 = vld [vmem:[%s18907_s4 + $0x5e0] ss:$16 sps:$4 sm:$0xff]  }
 0x482   : > { %5873 = vmatprep.subr.bf16.mxu0 %v13871_v62  ;;  %v13938_v62 = vld [vmem:[%s18907_s4 + $0x5e8] ss:$16 sps:$4 sm:$0xff]  }
 0x483   : > { %5990 = vmatpush1.bf16.msra.mxu1 %v13914_v14 }
 0x484   : > { %5991 = vmatprep.subr.bf16.mxu1 %v13922_v16 }
 0x485   : > { %5874 = vmatpush1.bf16.msra.mxu0 %v13869_v23  ;;  %v13943_v23 = vld [vmem:[%s18907_s4 + $0x604] ss:$16 sps:$4 sm:$0xff]  }
 0x486   : > { %5875 = vmatprep.subr.bf16.mxu0 %v13877_v19  ;;  %v13946_v19 = vld [vmem:[%s18907_s4 + $0x60c] ss:$16 sps:$4 sm:$0xff]  }
 0x487   : > { %5992 = vmatpush1.bf16.msra.mxu1 %v13920_v15 }
 0x488   : > { %5993 = vmatprep.subr.bf16.mxu1 %v13928_v33 }
 0x489   : > { %5876 = vmatpush1.bf16.msra.mxu0 %v13875_v20 }
 0x48a   : > { %5877 = vmatprep.subr.bf16.mxu0 %v13883_v47 }
 0x48b   : > { %5994 = vmatpush1.bf16.msra.mxu1 %v13926_v50 }
 0x48c   : > { %5995 = vmatprep.subr.bf16.mxu1 %v13934_v58 }
 0x48d   : > { %5878 = vmatpush1.bf16.msra.mxu0 %v13881_v22 }
 0x48e   : > { %5879 = vmatprep.subr.bf16.mxu0 %v13889_v63 }
 0x48f   : > { %5996 = vmatpush1.bf16.msra.mxu1 %v13932_v35 }
 0x490   : > { %5997 = vmatprep.subr.bf16.mxu1 %v13940_v30  ;;  %v13941_v30 = vld [vmem:[%s18907_s4 + $0x600] ss:$16 sps:$4 sm:$0xff]  }
 0x491   : > { %5880 = vmatpush1.bf16.msra.mxu0 %v13887_v18 }
 0x492   : > { %5881 = vmatprep.subr.bf16.mxu0 %v13895_v2 }
 0x493   : > { %5998 = vmatpush1.bf16.msra.mxu1 %v13938_v62  ;;  %v13949_v62 = vld [vmem:[%s18907_s4 + $0x624] ss:$16 sps:$4 sm:$0xff]  }
 0x494   : > { %6018 = vmatprep.subr.bf16.mxu1 %v13946_v19  ;;  %v13947_v19 = vld [vmem:[%s18907_s4 + $0x620] ss:$16 sps:$4 sm:$0xff]  }
 0x495   : > { %5882 = vmatpush1.bf16.msra.mxu0 %v13893_v21 }
 0x496   : > { %5883 = vmatprep.subr.bf16.mxu0 %v13901_v4 }
 0x499   : > { %5884 = vmatpush1.bf16.msra.mxu0 %v13899_v48 }
 0x49a   : > { %5885 = vmatprep.subr.bf16.mxu0 %v13907_v31 }
 0x49d   : > { %5886 = vmatpush1.bf16.msra.mxu0 %v13905_v17 }
 0x49e   : > { %5887 = vmatprep.subr.bf16.mxu0 %v13913_v12 }
 0x4a1   : > { %5888 = vmatpush1.bf16.msra.mxu0 %v13911_v38 }
 0x4a2   : > { %5889 = vmatprep.subr.bf16.mxu0 %v13919_v29 }
 0x4a5   : > { %5890 = vmatpush1.bf16.msra.mxu0 %v13917_v49 }
 0x4a6   : > { %5891 = vmatprep.subr.bf16.mxu0 %v13925_v27 }
 0x4a9   : > { %5892 = vmatpush1.bf16.msra.mxu0 %v13923_v55 }
 0x4aa   : > { %5893 = vmatprep.subr.bf16.mxu0 %v13931_v56 }
 0x4ad   : > { %5894 = vmatpush1.bf16.msra.mxu0 %v13929_v1 }
 0x4ae   : > { %5895 = vmatprep.subr.bf16.mxu0 %v13937_v59 }
 0x4b1   : > { %5896 = vmatpush1.bf16.msra.mxu0 %v13935_v46  ;;  %v13944_v46 = vld [vmem:[%s18907_s4 + $0x608] ss:$16 sps:$4 sm:$0xff]  }
 0x4b2   : > { %5916 = vmatprep.subr.bf16.mxu0 %v13943_v23  ;;  %v13952_v23 = vld [vmem:[%s18907_s4 + $0x62c] ss:$16 sps:$4 sm:$0xff]  }
 0x527   : > { %v4764_v20 = vpop.f32.mrb[84].mxu0  ;;  %v5071_v47 = vpop.f32.mrb[84].mxu1 }
 0x528   : > { %v4766_v22 = vpop.f32.mrb[85].mxu0  ;;  %v5073_v63 = vpop.f32.mrb[85].mxu1 }
 0x529   : > { %v4768_v0 = vpop.f32.mrb[86].mxu0  ;;  %v5075_v18 = vpop.f32.mrb[86].mxu1 }
 0x52a   : > { %v16971_v11 = vpack.c.bf16 %v4768_v0, %v4764_v20  ;;  %v4770_v21 = vpop.f32.mrb[87].mxu0  ;;  %v16973_v2 = vpack.c.bf16 %v5075_v18, %v5071_v47  ;;  %v5077_v43 = vpop.f32.mrb[87].mxu1  ;;  %v13950_v20 = vld [vmem:[%s18907_s4 + $0x628] ss:$16 sps:$4 sm:$0xff]  }
 0x52b   : > { %v16975_v3 = vpack.c.bf16 %v4770_v21, %v4766_v22  ;;  %v16977_v4 = vpack.c.bf16 %v5077_v43, %v5073_v63  ;;  %v13955_v22 = vld [vmem:[%s18907_s4 + $0x644] ss:$16 sps:$4 sm:$0xff]   ;;  %v13958_v63 = vld [vmem:[%s18907_s4 + $0x64c] ss:$16 sps:$4 sm:$0xff]  }
 0x52f   : > { %v16979_v26 = vpop.f32.mrb[88].mxu0  ;;  %v16981_v48 = vpop.f32.mrb[88].mxu1 }
 0x530   : > { %v16983_v54 = vpop.f32.mrb[89].mxu0  ;;  %v16985_v17 = vpop.f32.mrb[89].mxu1 }
 0x531   : > { %v4778_v31 = vpop.f32.mrb[90].mxu0  ;;  %v5085_v10 = vpop.f32.mrb[90].mxu1 }
 0x532   : > { %v4779_v13 = vpop.f32.mrb[91].mxu0  ;;  %v5086_v12 = vpop.f32.mrb[91].mxu1  ;;  %v13953_v10 = vld [vmem:[%s18907_s4 + $0x640] ss:$16 sps:$4 sm:$0xff]  }
 0x533   : > { %v13956_v13 = vld [vmem:[%s18907_s4 + $0x648] ss:$16 sps:$4 sm:$0xff]   ;;  %v13961_v12 = vld [vmem:[%s18907_s4 + $0x664] ss:$16 sps:$4 sm:$0xff]  }
 0x537   : > { %v4815_v37 = vpop.f32.mrb[92].mxu0 }
 0x538   : > { %v4817_v38 = vpop.f32.mrb[93].mxu0 }
 0x539   : > { %v4819_v14 = vpop.f32.mrb[94].mxu0 }
 0x53a   : > { %v16987_v49 = vpack.c.bf16 %v4819_v14, %v4815_v37  ;;  %v4821_v29 = vpop.f32.mrb[95].mxu0  ;;  %v13964_v37 = vld [vmem:[%s18907_s4 + $0x66c] ss:$16 sps:$4 sm:$0xff]   ;;  %v13962_v14 = vld [vmem:[%s18907_s4 + $0x668] ss:$16 sps:$4 sm:$0xff]  }
 0x53b   : > { %v16989_v15 = vpack.c.bf16 %v4821_v29, %v4817_v38  ;;  %v13959_v38 = vld [vmem:[%s18907_s4 + $0x660] ss:$16 sps:$4 sm:$0xff]   ;;  %v13967_v29 = vld [vmem:[%s18907_s4 + $0x684] ss:$16 sps:$4 sm:$0xff]  }
 0x53f   : > { %v16991_v16 = vpop.f32.mrb[96].mxu0 }
 0x540   : > { %v16993_v27 = vpop.f32.mrb[97].mxu0 }
 0x541   : > { %v4829_v33 = vpop.f32.mrb[98].mxu0 }
 0x542   : > { %v4830_v55 = vpop.f32.mrb[99].mxu0  ;;  %v13970_v33 = vld [vmem:[%s18907_s4 + $0x68c] ss:$16 sps:$4 sm:$0xff]  }
 0x543   : > { %v13965_v55 = vld [vmem:[%s18907_s4 + $0x680] ss:$16 sps:$4 sm:$0xff]  }
 0x547   : > { %v5020_v50 = vpop.f32.mrb[100].mxu0 }
 0x548   : > { %v5022_v1 = vpop.f32.mrb[101].mxu0 }
 0x549   : > { %v5024_v56 = vpop.f32.mrb[102].mxu0 }
 0x54a   : > { %v5088_v35 = vpack.c.bf16 %v5024_v56, %v5020_v50  ;;  %v5026_v58 = vpop.f32.mrb[103].mxu0  ;;  %v13968_v50 = vld [vmem:[%s18907_s4 + $0x688] ss:$16 sps:$4 sm:$0xff]   ;;  %v13971_v56 = vld [vmem:[%s18907_s4 + $0x6a0] ss:$16 sps:$4 sm:$0xff]  }
 0x54b   : > { %v5089_v59 = vpack.c.bf16 %v5026_v58, %v5022_v1  ;;  %v13973_v1 = vld [vmem:[%s18907_s4 + $0x6a4] ss:$16 sps:$4 sm:$0xff]  }
 0x54c   : > { %v13979_v58 = vld [vmem:[%s18907_s4 + $0x6c4] ss:$16 sps:$4 sm:$0xff]  }
 0x54d   : > { %5897 = vmatprep.mubr.bf16.mxu0 %v5089_v59  ;;  %5999 = vmatprep.mubr.bf16.mxu1 %v5089_v59  ;;  %v13982_v59 = vld [vmem:[%s18907_s4 + $0x6cc] ss:$16 sps:$4 sm:$0xff]  }
 0x54e   : > { %5898 = vmatmul.mubr.bf16.vlgmr.msra.gmra.mrb[108].mxu0 %v5088_v35  ;;  %6000 = vmatmul.mubr.bf16.vlgmr.msra.gmra.mrb[92].mxu1 %v5088_v35  ;;  %v13974_v35 = vld [vmem:[%s18907_s4 + $0x6a8] ss:$16 sps:$4 sm:$0xff]  }
 0x54f   : > { %5917 = vmatpush1.bf16.msra.mxu0 %v13941_v30  ;;  %6019 = vmatpush1.bf16.msra.mxu1 %v13944_v46  ;;  %v5030_v47 = vpop.f32.mrb[104].mxu0  ;;  %v13977_v30 = vld [vmem:[%s18907_s4 + $0x6c0] ss:$16 sps:$4 sm:$0xff]   ;;  %v13980_v46 = vld [vmem:[%s18907_s4 + $0x6c8] ss:$16 sps:$4 sm:$0xff]  }
 0x550   : > { %5918 = vmatprep.subr.bf16.mxu0 %v13949_v62  ;;  %6020 = vmatprep.subr.bf16.mxu1 %v13952_v23  ;;  %v5032_v0 = vpop.f32.mrb[105].mxu0  ;;  %v5092_v43 = vpack.c.bf16 %v5030_v47, %v5030_v47  ;;  %v13985_v62 = vld [vmem:[%s18907_s4 + $0x6e4] ss:$16 sps:$4 sm:$0xff]   ;;  %v13988_v23 = vld [vmem:[%s18907_s4 + $0x6ec] ss:$16 sps:$4 sm:$0xff]  }
 0x551   : > { %v5093_v18 = vpack.c.bf16 %v5032_v0, %v5032_v0  ;;  %v5034_v21 = vpop.f32.mrb[106].mxu0  ;;  %v13991_v47 = vld [vmem:[%s18907_s4 + $0x704] ss:$16 sps:$4 sm:$0xff]   ;;  %v13992_v0 = vld [vmem:[%s18907_s4 + $0x708] ss:$16 sps:$4 sm:$0xff]  }
 0x552   : > { %v5035_v31 = vpop.f32.mrb[107].mxu0  ;;  %v14000_v21 = vld [vmem:[%s18907_s4 + $0x72c] ss:$16 sps:$4 sm:$0xff]  }
 0x553   : > { %5919 = vmatpush1.bf16.msra.mxu0 %v13947_v19  ;;  %6021 = vmatpush1.bf16.msra.mxu1 %v13950_v20  ;;  %v13983_v19 = vld [vmem:[%s18907_s4 + $0x6e0] ss:$16 sps:$4 sm:$0xff]   ;;  %v13986_v20 = vld [vmem:[%s18907_s4 + $0x6e8] ss:$16 sps:$4 sm:$0xff]  }
 0x554   : > { %5920 = vmatprep.subr.bf16.mxu0 %v13955_v22  ;;  %6022 = vmatprep.subr.bf16.mxu1 %v13958_v63  ;;  %v13994_v22 = vld [vmem:[%s18907_s4 + $0x70c] ss:$16 sps:$4 sm:$0xff]   ;;  %v13989_v63 = vld [vmem:[%s18907_s4 + $0x700] ss:$16 sps:$4 sm:$0xff]   ;;  %v13998_v31 = vld [vmem:[%s18907_s4 + $0x728] ss:$16 sps:$4 sm:$0xff]  }
 0x555   : > { %5907 = vmatprep.mubr.bf16.mxu0 %v5093_v18  ;;  %6009 = vmatprep.mubr.bf16.mxu1 %v5093_v18  ;;  %v13997_v18 = vld [vmem:[%s18907_s4 + $0x724] ss:$16 sps:$4 sm:$0xff]  }
 0x556   : > { %5908 = vmatmul.mubr.bf16.gmra.mrb[112].mxu0 %v5092_v43  ;;  %6010 = vmatmul.mubr.bf16.gmra.mrb[96].mxu1 %v5092_v43  ;;  %v13995_v43 = vld [vmem:[%s18907_s4 + $0x720] ss:$16 sps:$4 sm:$0xff]  }
 0x557   : > { %5921 = vmatpush1.bf16.msra.mxu0 %v13953_v10  ;;  %6023 = vmatpush1.bf16.msra.mxu1 %v13956_v13  ;;  %v14003_v10 = vld [vmem:[%s18907_s4 + $0x744] ss:$16 sps:$4 sm:$0xff]   ;;  %v14006_v13 = vld [vmem:[%s18907_s4 + $0x74c] ss:$16 sps:$4 sm:$0xff]  }
 0x558   : > { %5922 = vmatprep.subr.bf16.mxu0 %v13961_v12  ;;  %6024 = vmatprep.subr.bf16.mxu1 %v13964_v37  ;;  %v14001_v12 = vld [vmem:[%s18907_s4 + $0x740] ss:$16 sps:$4 sm:$0xff]   ;;  %v14004_v37 = vld [vmem:[%s18907_s4 + $0x748] ss:$16 sps:$4 sm:$0xff]  }
 0x559   : > { %5948 = vmatprep.mubr.bf16.mxu0 %v16977_v4  ;;  %6050 = vmatprep.mubr.bf16.mxu1 %v16977_v4  ;;  %v13976_v4 = vld [vmem:[%s18907_s4 + $0x6ac] ss:$16 sps:$4 sm:$0xff]  }
 0x55b   : > { %5923 = vmatpush1.bf16.msra.mxu0 %v13959_v38  ;;  %6025 = vmatpush1.bf16.msra.mxu1 %v13962_v14  ;;  %v14009_v38 = vld [vmem:[%s18907_s4 + $0x764] ss:$16 sps:$4 sm:$0xff]   ;;  %v14012_v14 = vld [vmem:[%s18907_s4 + $0x76c] ss:$16 sps:$4 sm:$0xff]  }
 0x55c   : > { %5924 = vmatprep.subr.bf16.mxu0 %v13967_v29  ;;  %6026 = vmatprep.subr.bf16.mxu1 %v13970_v33  ;;  %v14007_v29 = vld [vmem:[%s18907_s4 + $0x760] ss:$16 sps:$4 sm:$0xff]   ;;  %v14010_v33 = vld [vmem:[%s18907_s4 + $0x768] ss:$16 sps:$4 sm:$0xff]  }
 0x55f   : > { %5925 = vmatpush1.bf16.msra.mxu0 %v13965_v55  ;;  %6027 = vmatpush1.bf16.msra.mxu1 %v13968_v50  ;;  %v14015_v55 = vld [vmem:[%s18907_s4 + $0x784] ss:$16 sps:$4 sm:$0xff]   ;;  %v14018_v50 = vld [vmem:[%s18907_s4 + $0x78c] ss:$16 sps:$4 sm:$0xff]  }
 0x560   : > { %5926 = vmatprep.subr.bf16.mxu0 %v13973_v1  ;;  %6028 = vmatprep.subr.bf16.mxu1 %v13976_v4  ;;  %v14013_v1 = vld [vmem:[%s18907_s4 + $0x780] ss:$16 sps:$4 sm:$0xff]   ;;  %v14016_v4 = vld [vmem:[%s18907_s4 + $0x788] ss:$16 sps:$4 sm:$0xff]  }
 0x563   : > { %5927 = vmatpush1.bf16.msra.mxu0 %v13971_v56  ;;  %6029 = vmatpush1.bf16.msra.mxu1 %v13974_v35  ;;  %v14021_v56 = vld [vmem:[%s18907_s4 + $0x7a4] ss:$16 sps:$4 sm:$0xff]   ;;  %v14024_v35 = vld [vmem:[%s18907_s4 + $0x7ac] ss:$16 sps:$4 sm:$0xff]  }
 0x564   : > { %5928 = vmatprep.subr.bf16.mxu0 %v13979_v58  ;;  %6030 = vmatprep.subr.bf16.mxu1 %v13982_v59  ;;  %v14019_v58 = vld [vmem:[%s18907_s4 + $0x7a0] ss:$16 sps:$4 sm:$0xff]   ;;  %v14022_v59 = vld [vmem:[%s18907_s4 + $0x7a8] ss:$16 sps:$4 sm:$0xff]  }
 0x567   : > { %5929 = vmatpush1.bf16.msra.mxu0 %v13977_v30  ;;  %6031 = vmatpush1.bf16.msra.mxu1 %v13980_v46  ;;  %v14027_v30 = vld [vmem:[%s18907_s4 + $0x7c4] ss:$16 sps:$4 sm:$0xff]   ;;  %v14030_v46 = vld [vmem:[%s18907_s4 + $0x7cc] ss:$16 sps:$4 sm:$0xff]  }
 0x568   : > { %5930 = vmatprep.subr.bf16.mxu0 %v13985_v62  ;;  %6032 = vmatprep.subr.bf16.mxu1 %v13988_v23  ;;  %v14025_v62 = vld [vmem:[%s18907_s4 + $0x7c0] ss:$16 sps:$4 sm:$0xff]   ;;  %v14028_v23 = vld [vmem:[%s18907_s4 + $0x7c8] ss:$16 sps:$4 sm:$0xff]  }
 0x56b   : > { %5931 = vmatpush1.bf16.msra.mxu0 %v13983_v19  ;;  %6033 = vmatpush1.bf16.msra.mxu1 %v13986_v20  ;;  %v14033_v19 = vld [vmem:[%s18907_s4 + $0x7e4] ss:$16 sps:$4 sm:$0xff]   ;;  %v14036_v20 = vld [vmem:[%s18907_s4 + $0x7ec] ss:$16 sps:$4 sm:$0xff]  }
 0x56c   : > { %5932 = vmatprep.subr.bf16.mxu0 %v13991_v47  ;;  %6034 = vmatprep.subr.bf16.mxu1 %v13994_v22  ;;  %v14031_v47 = vld [vmem:[%s18907_s4 + $0x7e0] ss:$16 sps:$4 sm:$0xff]   ;;  %v14034_v22 = vld [vmem:[%s18907_s4 + $0x7e8] ss:$16 sps:$4 sm:$0xff]  }
 0x56f   : > { %5933 = vmatpush1.bf16.msra.mxu0 %v13989_v63  ;;  %6035 = vmatpush1.bf16.msra.mxu1 %v13992_v0  ;;  %v14039_v63 = vld [vmem:[%s18907_s4 + $0x4] ss:$16 sps:$4 sm:$0xff]   ;;  %v14042_v0 = vld [vmem:[%s18907_s4 + $0xc] ss:$16 sps:$4 sm:$0xff]  }
 0x570   : > { %5934 = vmatprep.subr.bf16.mxu0 %v13997_v18  ;;  %6036 = vmatprep.subr.bf16.mxu1 %v14000_v21  ;;  %v14037_v18 = vld [vmem:[%s18907_s4] ss:$16 sps:$4 sm:$0xff]   ;;  %v14040_v21 = vld [vmem:[%s18907_s4 + $0x8] ss:$16 sps:$4 sm:$0xff]  }
 0x573   : > { %5935 = vmatpush1.bf16.msra.mxu0 %v13995_v43  ;;  %6037 = vmatpush1.bf16.msra.mxu1 %v13998_v31  ;;  %v14045_v43 = vld [vmem:[%s18907_s4 + $0x24] ss:$16 sps:$4 sm:$0xff]   ;;  %v14048_v31 = vld [vmem:[%s18907_s4 + $0x2c] ss:$16 sps:$4 sm:$0xff]  }
 0x574   : > { %5936 = vmatprep.subr.bf16.mxu0 %v14003_v10  ;;  %6038 = vmatprep.subr.bf16.mxu1 %v14006_v13  ;;  %v5095_v10 = vpack.c.bf16 %v16985_v17, %v16985_v17  ;;  %v14043_v13 = vld [vmem:[%s18907_s4 + $0x20] ss:$16 sps:$4 sm:$0xff]   ;;  %v14051_v17 = vld [vmem:[%s18907_s4 + $0x44] ss:$16 sps:$4 sm:$0xff]  }
 0x577   : > { %5937 = vmatpush1.bf16.msra.mxu0 %v14001_v12  ;;  %6039 = vmatpush1.bf16.msra.mxu1 %v14004_v37  ;;  %v14046_v12 = vld [vmem:[%s18907_s4 + $0x28] ss:$16 sps:$4 sm:$0xff]   ;;  %v5094_v37 = vpack.c.bf16 %v16981_v48, %v16981_v48  ;;  %v14060_v48 = vld [vmem:[%s18907_s4 + $0x6c] ss:$16 sps:$4 sm:$0xff]  }
 0x578   : > { %5938 = vmatprep.subr.bf16.mxu0 %v14009_v38  ;;  %6040 = vmatprep.subr.bf16.mxu1 %v14012_v14  ;;  %v14049_v38 = vld [vmem:[%s18907_s4 + $0x40] ss:$16 sps:$4 sm:$0xff]   ;;  %v14052_v14 = vld [vmem:[%s18907_s4 + $0x48] ss:$16 sps:$4 sm:$0xff]  }
 0x57b   : > { %5939 = vmatpush1.bf16.msra.mxu0 %v14007_v29  ;;  %6041 = vmatpush1.bf16.msra.mxu1 %v14010_v33  ;;  %v14057_v29 = vld [vmem:[%s18907_s4 + $0x64] ss:$16 sps:$4 sm:$0xff]   ;;  %v14055_v33 = vld [vmem:[%s18907_s4 + $0x60] ss:$16 sps:$4 sm:$0xff]  }
 0x57c   : > { %5940 = vmatprep.subr.bf16.mxu0 %v14015_v55  ;;  %6042 = vmatprep.subr.bf16.mxu1 %v14018_v50  ;;  %v14058_v55 = vld [vmem:[%s18907_s4 + $0x68] ss:$16 sps:$4 sm:$0xff]   ;;  %v14063_v50 = vld [vmem:[%s18907_s4 + $0x84] ss:$16 sps:$4 sm:$0xff]  }
 0x57f   : > { %5941 = vmatpush1.bf16.msra.mxu0 %v14013_v1  ;;  %6043 = vmatpush1.bf16.msra.mxu1 %v14016_v4  ;;  %v14066_v1 = vld [vmem:[%s18907_s4 + $0x8c] ss:$16 sps:$4 sm:$0xff]   ;;  %v14061_v4 = vld [vmem:[%s18907_s4 + $0x80] ss:$16 sps:$4 sm:$0xff]  }
 0x580   : > { %5942 = vmatprep.subr.bf16.mxu0 %v14021_v56  ;;  %6044 = vmatprep.subr.bf16.mxu1 %v14024_v35  ;;  %v14069_v56 = vld [vmem:[%s18907_s4 + $0xa4] ss:$16 sps:$4 sm:$0xff]   ;;  %v14072_v35 = vld [vmem:[%s18907_s4 + $0xac] ss:$16 sps:$4 sm:$0xff]  }
 0x583   : > { %5943 = vmatpush1.bf16.msra.mxu0 %v14019_v58  ;;  %6045 = vmatpush1.bf16.msra.mxu1 %v14022_v59  ;;  %v14067_v58 = vld [vmem:[%s18907_s4 + $0xa0] ss:$16 sps:$4 sm:$0xff]   ;;  %v14070_v59 = vld [vmem:[%s18907_s4 + $0xa8] ss:$16 sps:$4 sm:$0xff]  }
 0x584   : > { %5944 = vmatprep.subr.bf16.mxu0 %v14027_v30  ;;  %6046 = vmatprep.subr.bf16.mxu1 %v14030_v46  ;;  %v14075_v30 = vld [vmem:[%s18907_s4 + $0xc4] ss:$16 sps:$4 sm:$0xff]   ;;  %v14078_v46 = vld [vmem:[%s18907_s4 + $0xcc] ss:$16 sps:$4 sm:$0xff]  }
 0x587   : > { %5945 = vmatpush1.bf16.msra.mxu0 %v14025_v62  ;;  %6047 = vmatpush1.bf16.msra.mxu1 %v14028_v23  ;;  %v14073_v62 = vld [vmem:[%s18907_s4 + $0xc0] ss:$16 sps:$4 sm:$0xff]   ;;  %v14076_v23 = vld [vmem:[%s18907_s4 + $0xc8] ss:$16 sps:$4 sm:$0xff]  }
 0x588   : > { %5946 = vmatprep.subr.bf16.mxu0 %v14033_v19  ;;  %6048 = vmatprep.subr.bf16.mxu1 %v14036_v20  ;;  %v14081_v19 = vld [vmem:[%s18907_s4 + $0xe4] ss:$16 sps:$4 sm:$0xff]   ;;  %v14084_v20 = vld [vmem:[%s18907_s4 + $0xec] ss:$16 sps:$4 sm:$0xff]  }
 0x58b   : > { %5947 = vmatpush1.bf16.msra.mxu0 %v14031_v47  ;;  %6049 = vmatpush1.bf16.msra.mxu1 %v14034_v22  ;;  %v14079_v47 = vld [vmem:[%s18907_s4 + $0xe0] ss:$16 sps:$4 sm:$0xff]   ;;  %v14082_v22 = vld [vmem:[%s18907_s4 + $0xe8] ss:$16 sps:$4 sm:$0xff]  }
 0x58c   : > { %6709 = vmatprep.subr.bf16.mxu0 %v14039_v63  ;;  %6811 = vmatprep.subr.bf16.mxu1 %v14042_v0  ;;  %v14087_v63 = vld [vmem:[%s18907_s4 + $0x104] ss:$16 sps:$4 sm:$0xff]   ;;  %v14090_v0 = vld [vmem:[%s18907_s4 + $0x10c] ss:$16 sps:$4 sm:$0xff]  }
 0x58e   : > { %5949 = vmatmul.mubr.bf16.vlgmr.msra.gmra.mrb[108].mxu0 %v16973_v2  ;;  %6051 = vmatmul.mubr.bf16.vlgmr.msra.gmra.mrb[92].mxu1 %v16973_v2  ;;  %v14054_v2 = vld [vmem:[%s18907_s4 + $0x4c] ss:$16 sps:$4 sm:$0xff]  }
 0x58f   : > { %6710 = vmatpush1.bf16.msra.mxu0 %v14037_v18  ;;  %6812 = vmatpush1.bf16.msra.mxu1 %v14040_v21  ;;  %v14085_v18 = vld [vmem:[%s18907_s4 + $0x100] ss:$16 sps:$4 sm:$0xff]   ;;  %v14088_v21 = vld [vmem:[%s18907_s4 + $0x108] ss:$16 sps:$4 sm:$0xff]  }
 0x590   : > { %6711 = vmatprep.subr.bf16.mxu0 %v14045_v43  ;;  %6813 = vmatprep.subr.bf16.mxu1 %v14048_v31  ;;  %v14093_v43 = vld [vmem:[%s18907_s4 + $0x124] ss:$16 sps:$4 sm:$0xff]   ;;  %v14096_v31 = vld [vmem:[%s18907_s4 + $0x12c] ss:$16 sps:$4 sm:$0xff]  }
 0x591   : > { %5958 = vmatprep.mubr.bf16.mxu0 %v5095_v10  ;;  %6060 = vmatprep.mubr.bf16.mxu1 %v5095_v10  ;;  %v14091_v10 = vld [vmem:[%s18907_s4 + $0x120] ss:$16 sps:$4 sm:$0xff]  }
 0x593   : > { %6712 = vmatpush1.bf16.msra.mxu0 %v14043_v13  ;;  %6814 = vmatpush1.bf16.msra.mxu1 %v14046_v12  ;;  %v14094_v13 = vld [vmem:[%s18907_s4 + $0x128] ss:$16 sps:$4 sm:$0xff]   ;;  %v14099_v12 = vld [vmem:[%s18907_s4 + $0x144] ss:$16 sps:$4 sm:$0xff]  }
 0x594   : > { %6713 = vmatprep.subr.bf16.mxu0 %v14051_v17  ;;  %6815 = vmatprep.subr.bf16.mxu1 %v14054_v2  ;;  %v14102_v17 = vld [vmem:[%s18907_s4 + $0x14c] ss:$16 sps:$4 sm:$0xff]   ;;  %v14097_v2 = vld [vmem:[%s18907_s4 + $0x140] ss:$16 sps:$4 sm:$0xff]  }
 0x596   : > { %5959 = vmatmul.mubr.bf16.gmra.mrb[116].mxu0 %v5094_v37  ;;  %6061 = vmatmul.mubr.bf16.gmra.mrb[100].mxu1 %v5094_v37  ;;  %v14100_v37 = vld [vmem:[%s18907_s4 + $0x148] ss:$16 sps:$4 sm:$0xff]  }
 0x597   : > { %6714 = vmatpush1.bf16.msra.mxu0 %v14049_v38  ;;  %6741 = vmatprep.mubr.bf16.mxu0 %v16975_v3  ;;  %v14105_v38 = vld [vmem:[%s18907_s4 + $0x164] ss:$16 sps:$4 sm:$0xff]  }
 0x598   : > { %6816 = vmatpush1.bf16.msra.mxu1 %v14052_v14  ;;  %6843 = vmatprep.mubr.bf16.mxu1 %v16975_v3  ;;  %v14064_v3 = vld [vmem:[%s18907_s4 + $0x88] ss:$16 sps:$4 sm:$0xff]   ;;  %v14108_v14 = vld [vmem:[%s18907_s4 + $0x16c] ss:$16 sps:$4 sm:$0xff]  }
 0x599   : > { %6715 = vmatprep.subr.bf16.mxu0 %v14057_v29  ;;  %6817 = vmatprep.subr.bf16.mxu1 %v14060_v48  ;;  %v14103_v29 = vld [vmem:[%s18907_s4 + $0x160] ss:$16 sps:$4 sm:$0xff]   ;;  %v14106_v48 = vld [vmem:[%s18907_s4 + $0x168] ss:$16 sps:$4 sm:$0xff]  }
 0x59b   : > { %6716 = vmatpush1.bf16.msra.mxu0 %v14055_v33  ;;  %v14111_v33 = vld [vmem:[%s18907_s4 + $0x184] ss:$16 sps:$4 sm:$0xff]  }
 0x59c   : > { %6818 = vmatpush1.bf16.msra.mxu1 %v14058_v55  ;;  %6717 = vmatprep.subr.bf16.mxu0 %v14063_v50  ;;  %v14114_v55 = vld [vmem:[%s18907_s4 + $0x18c] ss:$16 sps:$4 sm:$0xff]   ;;  %v14109_v50 = vld [vmem:[%s18907_s4 + $0x180] ss:$16 sps:$4 sm:$0xff]  }
 0x59d   : > { %6819 = vmatprep.subr.bf16.mxu1 %v14066_v1  ;;  %v14112_v1 = vld [vmem:[%s18907_s4 + $0x188] ss:$16 sps:$4 sm:$0xff]  }
 0x59f   : > { %6718 = vmatpush1.bf16.msra.mxu0 %v14061_v4  ;;  %v14117_v4 = vld [vmem:[%s18907_s4 + $0x1a4] ss:$16 sps:$4 sm:$0xff]  }
 0x5a0   : > { %6820 = vmatpush1.bf16.msra.mxu1 %v14064_v3  ;;  %6719 = vmatprep.subr.bf16.mxu0 %v14069_v56  ;;  %v14120_v3 = vld [vmem:[%s18907_s4 + $0x1ac] ss:$16 sps:$4 sm:$0xff]   ;;  %v14115_v56 = vld [vmem:[%s18907_s4 + $0x1a0] ss:$16 sps:$4 sm:$0xff]  }
 0x5a1   : > { %6821 = vmatprep.subr.bf16.mxu1 %v14072_v35  ;;  %v14118_v35 = vld [vmem:[%s18907_s4 + $0x1a8] ss:$16 sps:$4 sm:$0xff]  }
 0x5a3   : > { %6720 = vmatpush1.bf16.msra.mxu0 %v14067_v58  ;;  %v14123_v58 = vld [vmem:[%s18907_s4 + $0x1c4] ss:$16 sps:$4 sm:$0xff]  }
 0x5a4   : > { %6822 = vmatpush1.bf16.msra.mxu1 %v14070_v59  ;;  %6721 = vmatprep.subr.bf16.mxu0 %v14075_v30  ;;  %v14126_v59 = vld [vmem:[%s18907_s4 + $0x1cc] ss:$16 sps:$4 sm:$0xff]   ;;  %v14121_v30 = vld [vmem:[%s18907_s4 + $0x1c0] ss:$16 sps:$4 sm:$0xff]  }
 0x5a5   : > { %6823 = vmatprep.subr.bf16.mxu1 %v14078_v46  ;;  %v14124_v46 = vld [vmem:[%s18907_s4 + $0x1c8] ss:$16 sps:$4 sm:$0xff]  }
 0x5a7   : > { %6722 = vmatpush1.bf16.msra.mxu0 %v14073_v62  ;;  %v14129_v62 = vld [vmem:[%s18907_s4 + $0x1e4] ss:$16 sps:$4 sm:$0xff]  }
 0x5a8   : > { %6824 = vmatpush1.bf16.msra.mxu1 %v14076_v23  ;;  %6723 = vmatprep.subr.bf16.mxu0 %v14081_v19  ;;  %v14132_v23 = vld [vmem:[%s18907_s4 + $0x1ec] ss:$16 sps:$4 sm:$0xff]   ;;  %v14127_v19 = vld [vmem:[%s18907_s4 + $0x1e0] ss:$16 sps:$4 sm:$0xff]  }
 0x5a9   : > { %6825 = vmatprep.subr.bf16.mxu1 %v14084_v20  ;;  %v14130_v20 = vld [vmem:[%s18907_s4 + $0x1e8] ss:$16 sps:$4 sm:$0xff]  }
 0x5ab   : > { %6724 = vmatpush1.bf16.msra.mxu0 %v14079_v47  ;;  %v14135_v47 = vld [vmem:[%s18907_s4 + $0x204] ss:$16 sps:$4 sm:$0xff]  }
 0x5ac   : > { %6826 = vmatpush1.bf16.msra.mxu1 %v14082_v22  ;;  %6725 = vmatprep.subr.bf16.mxu0 %v14087_v63  ;;  %v14138_v22 = vld [vmem:[%s18907_s4 + $0x20c] ss:$16 sps:$4 sm:$0xff]   ;;  %v14133_v63 = vld [vmem:[%s18907_s4 + $0x200] ss:$16 sps:$4 sm:$0xff]  }
 0x5ad   : > { %6827 = vmatprep.subr.bf16.mxu1 %v14090_v0  ;;  %v4837_v0 = vpack.c.bf16 %v16983_v54, %v16983_v54  ;;  %v14139_v54 = vld [vmem:[%s18907_s4 + $0x220] ss:$16 sps:$4 sm:$0xff]  }
 0x5af   : > { %6726 = vmatpush1.bf16.msra.mxu0 %v14085_v18  ;;  %v14136_v18 = vld [vmem:[%s18907_s4 + $0x208] ss:$16 sps:$4 sm:$0xff]  }
 0x5b0   : > { %6828 = vmatpush1.bf16.msra.mxu1 %v14088_v21  ;;  %6727 = vmatprep.subr.bf16.mxu0 %v14093_v43  ;;  %v14141_v21 = vld [vmem:[%s18907_s4 + $0x224] ss:$16 sps:$4 sm:$0xff]   ;;  %v14144_v43 = vld [vmem:[%s18907_s4 + $0x22c] ss:$16 sps:$4 sm:$0xff]  }
 0x5b1   : > { %6829 = vmatprep.subr.bf16.mxu1 %v14096_v31  ;;  %v14142_v31 = vld [vmem:[%s18907_s4 + $0x228] ss:$16 sps:$4 sm:$0xff]  }
 0x5b3   : > { %6728 = vmatpush1.bf16.msra.mxu0 %v14091_v10  ;;  %v14147_v10 = vld [vmem:[%s18907_s4 + $0x244] ss:$16 sps:$4 sm:$0xff]  }
 0x5b4   : > { %6830 = vmatpush1.bf16.msra.mxu1 %v14094_v13  ;;  %6729 = vmatprep.subr.bf16.mxu0 %v14099_v12  ;;  %v4836_v13 = vpack.c.bf16 %v16979_v26, %v16979_v26  ;;  %v14145_v12 = vld [vmem:[%s18907_s4 + $0x240] ss:$16 sps:$4 sm:$0xff]   ;;  %v14156_v26 = vld [vmem:[%s18907_s4 + $0x26c] ss:$16 sps:$4 sm:$0xff]  }
 0x5b5   : > { %6831 = vmatprep.subr.bf16.mxu1 %v14102_v17  ;;  %v14148_v17 = vld [vmem:[%s18907_s4 + $0x248] ss:$16 sps:$4 sm:$0xff]  }
 0x5b7   : > { %6730 = vmatpush1.bf16.msra.mxu0 %v14097_v2  ;;  %v14153_v2 = vld [vmem:[%s18907_s4 + $0x264] ss:$16 sps:$4 sm:$0xff]  }
 0x5b8   : > { %6832 = vmatpush1.bf16.msra.mxu1 %v14100_v37  ;;  %6731 = vmatprep.subr.bf16.mxu0 %v14105_v38  ;;  %v14151_v37 = vld [vmem:[%s18907_s4 + $0x260] ss:$16 sps:$4 sm:$0xff]   ;;  %v14154_v38 = vld [vmem:[%s18907_s4 + $0x268] ss:$16 sps:$4 sm:$0xff]  }
 0x5b9   : > { %6833 = vmatprep.subr.bf16.mxu1 %v14108_v14  ;;  %v14159_v14 = vld [vmem:[%s18907_s4 + $0x284] ss:$16 sps:$4 sm:$0xff]  }
 0x5bb   : > { %6732 = vmatpush1.bf16.msra.mxu0 %v14103_v29  ;;  %v14162_v29 = vld [vmem:[%s18907_s4 + $0x28c] ss:$16 sps:$4 sm:$0xff]  }
 0x5bc   : > { %6834 = vmatpush1.bf16.msra.mxu1 %v14106_v48  ;;  %6733 = vmatprep.subr.bf16.mxu0 %v14111_v33  ;;  %v14160_v48 = vld [vmem:[%s18907_s4 + $0x288] ss:$16 sps:$4 sm:$0xff]   ;;  %v14165_v33 = vld [vmem:[%s18907_s4 + $0x2a4] ss:$16 sps:$4 sm:$0xff]  }
 0x5bd   : > { %6835 = vmatprep.subr.bf16.mxu1 %v14114_v55  ;;  %v14168_v55 = vld [vmem:[%s18907_s4 + $0x2ac] ss:$16 sps:$4 sm:$0xff]  }
 0x5bf   : > { %6734 = vmatpush1.bf16.msra.mxu0 %v14109_v50  ;;  %v14163_v50 = vld [vmem:[%s18907_s4 + $0x2a0] ss:$16 sps:$4 sm:$0xff]  }
 0x5c0   : > { %6836 = vmatpush1.bf16.msra.mxu1 %v14112_v1  ;;  %6735 = vmatprep.subr.bf16.mxu0 %v14117_v4  ;;  %v14166_v1 = vld [vmem:[%s18907_s4 + $0x2a8] ss:$16 sps:$4 sm:$0xff]   ;;  %v14171_v4 = vld [vmem:[%s18907_s4 + $0x2c4] ss:$16 sps:$4 sm:$0xff]  }
 0x5c1   : > { %6837 = vmatprep.subr.bf16.mxu1 %v14120_v3  ;;  %v14174_v3 = vld [vmem:[%s18907_s4 + $0x2cc] ss:$16 sps:$4 sm:$0xff]  }
 0x5c3   : > { %6736 = vmatpush1.bf16.msra.mxu0 %v14115_v56  ;;  %v14169_v56 = vld [vmem:[%s18907_s4 + $0x2c0] ss:$16 sps:$4 sm:$0xff]  }
 0x5c4   : > { %6838 = vmatpush1.bf16.msra.mxu1 %v14118_v35  ;;  %6737 = vmatprep.subr.bf16.mxu0 %v14123_v58  ;;  %v14172_v35 = vld [vmem:[%s18907_s4 + $0x2c8] ss:$16 sps:$4 sm:$0xff]   ;;  %v14177_v58 = vld [vmem:[%s18907_s4 + $0x2e4] ss:$16 sps:$4 sm:$0xff]  }
 0x5c5   : > { %6839 = vmatprep.subr.bf16.mxu1 %v14126_v59  ;;  %v14180_v59 = vld [vmem:[%s18907_s4 + $0x2ec] ss:$16 sps:$4 sm:$0xff]  }
 0x5c7   : > { %6738 = vmatpush1.bf16.msra.mxu0 %v14121_v30  ;;  %v14175_v30 = vld [vmem:[%s18907_s4 + $0x2e0] ss:$16 sps:$4 sm:$0xff]  }
 0x5c8   : > { %6840 = vmatpush1.bf16.msra.mxu1 %v14124_v46  ;;  %6739 = vmatprep.subr.bf16.mxu0 %v14129_v62  ;;  %v14178_v46 = vld [vmem:[%s18907_s4 + $0x2e8] ss:$16 sps:$4 sm:$0xff]   ;;  %v14183_v62 = vld [vmem:[%s18907_s4 + $0x304] ss:$16 sps:$4 sm:$0xff]  }
 0x5c9   : > { %6841 = vmatprep.subr.bf16.mxu1 %v14132_v23  ;;  %v14186_v23 = vld [vmem:[%s18907_s4 + $0x30c] ss:$16 sps:$4 sm:$0xff]  }
 0x5cb   : > { %6740 = vmatpush1.bf16.msra.mxu0 %v14127_v19  ;;  %v14181_v19 = vld [vmem:[%s18907_s4 + $0x300] ss:$16 sps:$4 sm:$0xff]  }
 0x5cc   : > { %6842 = vmatpush1.bf16.msra.mxu1 %v14130_v20  ;;  %6760 = vmatprep.subr.bf16.mxu0 %v14135_v47  ;;  %v14184_v20 = vld [vmem:[%s18907_s4 + $0x308] ss:$16 sps:$4 sm:$0xff]   ;;  %v14189_v47 = vld [vmem:[%s18907_s4 + $0x324] ss:$16 sps:$4 sm:$0xff]  }
 0x5cd   : > { %6862 = vmatprep.subr.bf16.mxu1 %v14138_v22  ;;  %v14192_v22 = vld [vmem:[%s18907_s4 + $0x32c] ss:$16 sps:$4 sm:$0xff]  }
 0x5ce   : > { %6742 = vmatmul.mubr.bf16.vlgmr.msra.gmra.mrb[108].mxu0 %v16971_v11 }
 0x5cf   : > { %6844 = vmatmul.mubr.bf16.vlgmr.msra.gmra.mrb[92].mxu1 %v16971_v11  ;;  %6751 = vmatprep.mubr.bf16.mxu0 %v4837_v0  ;;  %v14150_v11 = vld [vmem:[%s18907_s4 + $0x24c] ss:$16 sps:$4 sm:$0xff]  }
 0x5d0   : > { %6761 = vmatpush1.bf16.msra.mxu0 %v14133_v63  ;;  %6853 = vmatprep.mubr.bf16.mxu1 %v4837_v0  ;;  %v14187_v63 = vld [vmem:[%s18907_s4 + $0x320] ss:$16 sps:$4 sm:$0xff]   ;;  %v14190_v0 = vld [vmem:[%s18907_s4 + $0x328] ss:$16 sps:$4 sm:$0xff]  }
 0x5d1   : > { %6863 = vmatpush1.bf16.msra.mxu1 %v14136_v18  ;;  %6762 = vmatprep.subr.bf16.mxu0 %v14141_v21  ;;  %v14195_v18 = vld [vmem:[%s18907_s4 + $0x344] ss:$16 sps:$4 sm:$0xff]   ;;  %v14198_v21 = vld [vmem:[%s18907_s4 + $0x34c] ss:$16 sps:$4 sm:$0xff]  }
 0x5d2   : > { %6864 = vmatprep.subr.bf16.mxu1 %v14144_v43  ;;  %v14193_v43 = vld [vmem:[%s18907_s4 + $0x340] ss:$16 sps:$4 sm:$0xff]  }
 0x5d4   : > { %6763 = vmatpush1.bf16.msra.mxu0 %v14139_v54  ;;  %v14196_v54 = vld [vmem:[%s18907_s4 + $0x348] ss:$16 sps:$4 sm:$0xff]  }
 0x5d5   : > { %6865 = vmatpush1.bf16.msra.mxu1 %v14142_v31  ;;  %6764 = vmatprep.subr.bf16.mxu0 %v14147_v10  ;;  %v14201_v31 = vld [vmem:[%s18907_s4 + $0x364] ss:$16 sps:$4 sm:$0xff]   ;;  %v14204_v10 = vld [vmem:[%s18907_s4 + $0x36c] ss:$16 sps:$4 sm:$0xff]  }
 0x5d6   : > { %6752 = vmatmul.mubr.bf16.gmra.mrb[120].mxu0 %v4836_v13  ;;  %6866 = vmatprep.subr.bf16.mxu1 %v14150_v11  ;;  %v14199_v11 = vld [vmem:[%s18907_s4 + $0x360] ss:$16 sps:$4 sm:$0xff]  }
 0x5d7   : > { %6854 = vmatmul.mubr.bf16.gmra.mrb[104].mxu1 %v4836_v13  ;;  %6792 = vmatprep.mubr.bf16.mxu0 %v16989_v15  ;;  %v14202_v13 = vld [vmem:[%s18907_s4 + $0x368] ss:$16 sps:$4 sm:$0xff]  }
 0x5d8   : > { %6765 = vmatpush1.bf16.msra.mxu0 %v14145_v12  ;;  %6894 = vmatprep.mubr.bf16.mxu1 %v16989_v15  ;;  %v14157_v15 = vld [vmem:[%s18907_s4 + $0x280] ss:$16 sps:$4 sm:$0xff]   ;;  %v14207_v12 = vld [vmem:[%s18907_s4 + $0x384] ss:$16 sps:$4 sm:$0xff]  }
 0x5d9   : > { %6867 = vmatpush1.bf16.msra.mxu1 %v14148_v17  ;;  %6766 = vmatprep.subr.bf16.mxu0 %v14153_v2  ;;  %v14210_v17 = vld [vmem:[%s18907_s4 + $0x38c] ss:$16 sps:$4 sm:$0xff]   ;;  %v14205_v2 = vld [vmem:[%s18907_s4 + $0x380] ss:$16 sps:$4 sm:$0xff]  }
 0x5da   : > { %6868 = vmatprep.subr.bf16.mxu1 %v14156_v26  ;;  %v14208_v26 = vld [vmem:[%s18907_s4 + $0x388] ss:$16 sps:$4 sm:$0xff]  }
 0x5dc   : > { %6767 = vmatpush1.bf16.msra.mxu0 %v14151_v37  ;;  %v14213_v37 = vld [vmem:[%s18907_s4 + $0x3a4] ss:$16 sps:$4 sm:$0xff]  }
 0x5dd   : > { %6869 = vmatpush1.bf16.msra.mxu1 %v14154_v38  ;;  %6768 = vmatprep.subr.bf16.mxu0 %v14159_v14  ;;  %v14216_v38 = vld [vmem:[%s18907_s4 + $0x3ac] ss:$16 sps:$4 sm:$0xff]   ;;  %v14211_v14 = vld [vmem:[%s18907_s4 + $0x3a0] ss:$16 sps:$4 sm:$0xff]  }
 0x5de   : > { %6870 = vmatprep.subr.bf16.mxu1 %v14162_v29  ;;  %v14214_v29 = vld [vmem:[%s18907_s4 + $0x3a8] ss:$16 sps:$4 sm:$0xff]  }
 0x5e0   : > { %6769 = vmatpush1.bf16.msra.mxu0 %v14157_v15  ;;  %v14219_v15 = vld [vmem:[%s18907_s4 + $0x3c4] ss:$16 sps:$4 sm:$0xff]  }
 0x5e1   : > { %6871 = vmatpush1.bf16.msra.mxu1 %v14160_v48  ;;  %6770 = vmatprep.subr.bf16.mxu0 %v14165_v33  ;;  %v14222_v48 = vld [vmem:[%s18907_s4 + $0x3cc] ss:$16 sps:$4 sm:$0xff]   ;;  %v14217_v33 = vld [vmem:[%s18907_s4 + $0x3c0] ss:$16 sps:$4 sm:$0xff]  }
 0x5e2   : > { %6872 = vmatprep.subr.bf16.mxu1 %v14168_v55  ;;  %v14220_v55 = vld [vmem:[%s18907_s4 + $0x3c8] ss:$16 sps:$4 sm:$0xff]  }
 0x5e4   : > { %6771 = vmatpush1.bf16.msra.mxu0 %v14163_v50  ;;  %v14225_v50 = vld [vmem:[%s18907_s4 + $0x3e4] ss:$16 sps:$4 sm:$0xff]  }
 0x5e5   : > { %6873 = vmatpush1.bf16.msra.mxu1 %v14166_v1  ;;  %6772 = vmatprep.subr.bf16.mxu0 %v14171_v4  ;;  %v14228_v1 = vld [vmem:[%s18907_s4 + $0x3ec] ss:$16 sps:$4 sm:$0xff]   ;;  %v14223_v4 = vld [vmem:[%s18907_s4 + $0x3e0] ss:$16 sps:$4 sm:$0xff]  }
 0x5e6   : > { %6874 = vmatprep.subr.bf16.mxu1 %v14174_v3  ;;  %v14226_v3 = vld [vmem:[%s18907_s4 + $0x3e8] ss:$16 sps:$4 sm:$0xff]  }
 0x5e8   : > { %6773 = vmatpush1.bf16.msra.mxu0 %v14169_v56  ;;  %v4839_v56 = vpack.c.bf16 %v16993_v27, %v16993_v27  ;;  %v14240_v27 = vld [vmem:[%s18907_s4 + $0x828] ss:$16 sps:$4 sm:$0xff]  }
 0x5e9   : > { %6875 = vmatpush1.bf16.msra.mxu1 %v14172_v35  ;;  %6774 = vmatprep.subr.bf16.mxu0 %v14177_v58  ;;  %v14245_v35 = vld [vmem:[%s18907_s4 + $0x844] ss:$16 sps:$4 sm:$0xff]   ;;  %v14248_v58 = vld [vmem:[%s18907_s4 + $0x84c] ss:$16 sps:$4 sm:$0xff]  }
 0x5ea   : > { %6876 = vmatprep.subr.bf16.mxu1 %v14180_v59  ;;  %v14243_v59 = vld [vmem:[%s18907_s4 + $0x840] ss:$16 sps:$4 sm:$0xff]  }
 0x5ec   : > { %6775 = vmatpush1.bf16.msra.mxu0 %v14175_v30  ;;  %v14246_v30 = vld [vmem:[%s18907_s4 + $0x848] ss:$16 sps:$4 sm:$0xff]  }
 0x5ed   : > { %6877 = vmatpush1.bf16.msra.mxu1 %v14178_v46  ;;  %6776 = vmatprep.subr.bf16.mxu0 %v14183_v62  ;;  %v14251_v46 = vld [vmem:[%s18907_s4 + $0x864] ss:$16 sps:$4 sm:$0xff]   ;;  %v14254_v62 = vld [vmem:[%s18907_s4 + $0x86c] ss:$16 sps:$4 sm:$0xff]  }
 0x5ee   : > { %6878 = vmatprep.subr.bf16.mxu1 %v14186_v23  ;;  %v14249_v23 = vld [vmem:[%s18907_s4 + $0x860] ss:$16 sps:$4 sm:$0xff]  }
 0x5f0   : > { %6777 = vmatpush1.bf16.msra.mxu0 %v14181_v19  ;;  %v14252_v19 = vld [vmem:[%s18907_s4 + $0x868] ss:$16 sps:$4 sm:$0xff]  }
 0x5f1   : > { %6879 = vmatpush1.bf16.msra.mxu1 %v14184_v20  ;;  %6778 = vmatprep.subr.bf16.mxu0 %v14189_v47  ;;  %v14257_v20 = vld [vmem:[%s18907_s4 + $0x884] ss:$16 sps:$4 sm:$0xff]   ;;  %v14260_v47 = vld [vmem:[%s18907_s4 + $0x88c] ss:$16 sps:$4 sm:$0xff]  }
 0x5f2   : > { %6880 = vmatprep.subr.bf16.mxu1 %v14192_v22  ;;  %v14255_v22 = vld [vmem:[%s18907_s4 + $0x880] ss:$16 sps:$4 sm:$0xff]  }
 0x5f4   : > { %6779 = vmatpush1.bf16.msra.mxu0 %v14187_v63  ;;  %v14258_v63 = vld [vmem:[%s18907_s4 + $0x888] ss:$16 sps:$4 sm:$0xff]  }
 0x5f5   : > { %6881 = vmatpush1.bf16.msra.mxu1 %v14190_v0  ;;  %6780 = vmatprep.subr.bf16.mxu0 %v14195_v18  ;;  %v14263_v0 = vld [vmem:[%s18907_s4 + $0x8a4] ss:$16 sps:$4 sm:$0xff]   ;;  %v14266_v18 = vld [vmem:[%s18907_s4 + $0x8ac] ss:$16 sps:$4 sm:$0xff]  }
 0x5f6   : > { %6882 = vmatprep.subr.bf16.mxu1 %v14198_v21  ;;  %v14261_v21 = vld [vmem:[%s18907_s4 + $0x8a0] ss:$16 sps:$4 sm:$0xff]  }
 0x5f8   : > { %6781 = vmatpush1.bf16.msra.mxu0 %v14193_v43  ;;  %v14264_v43 = vld [vmem:[%s18907_s4 + $0x8a8] ss:$16 sps:$4 sm:$0xff]  }
 0x5f9   : > { %6883 = vmatpush1.bf16.msra.mxu1 %v14196_v54  ;;  %6782 = vmatprep.subr.bf16.mxu0 %v14201_v31  ;;  %v14269_v54 = vld [vmem:[%s18907_s4 + $0x8c4] ss:$16 sps:$4 sm:$0xff]   ;;  %v14272_v31 = vld [vmem:[%s18907_s4 + $0x8cc] ss:$16 sps:$4 sm:$0xff]  }
 0x5fa   : > { %6884 = vmatprep.subr.bf16.mxu1 %v14204_v10  ;;  %v14267_v10 = vld [vmem:[%s18907_s4 + $0x8c0] ss:$16 sps:$4 sm:$0xff]  }
 0x5fc   : > { %6783 = vmatpush1.bf16.msra.mxu0 %v14199_v11  ;;  %v14270_v11 = vld [vmem:[%s18907_s4 + $0x8c8] ss:$16 sps:$4 sm:$0xff]  }
 0x5fd   : > { %6885 = vmatpush1.bf16.msra.mxu1 %v14202_v13  ;;  %6784 = vmatprep.subr.bf16.mxu0 %v14207_v12  ;;  %v14275_v13 = vld [vmem:[%s18907_s4 + $0x8e4] ss:$16 sps:$4 sm:$0xff]   ;;  %v14278_v12 = vld [vmem:[%s18907_s4 + $0x8ec] ss:$16 sps:$4 sm:$0xff]  }
 0x5fe   : > { %6886 = vmatprep.subr.bf16.mxu1 %v14210_v17  ;;  %v14273_v17 = vld [vmem:[%s18907_s4 + $0x8e0] ss:$16 sps:$4 sm:$0xff]  }
 0x600   : > { %6785 = vmatpush1.bf16.msra.mxu0 %v14205_v2  ;;  %v14276_v2 = vld [vmem:[%s18907_s4 + $0x8e8] ss:$16 sps:$4 sm:$0xff]  }
 0x601   : > { %6887 = vmatpush1.bf16.msra.mxu1 %v14208_v26  ;;  %6786 = vmatprep.subr.bf16.mxu0 %v14213_v37  ;;  %v14281_v26 = vld [vmem:[%s18907_s4 + $0x904] ss:$16 sps:$4 sm:$0xff]   ;;  %v14284_v37 = vld [vmem:[%s18907_s4 + $0x90c] ss:$16 sps:$4 sm:$0xff]  }
 0x602   : > { %6888 = vmatprep.subr.bf16.mxu1 %v14216_v38  ;;  %v14279_v38 = vld [vmem:[%s18907_s4 + $0x900] ss:$16 sps:$4 sm:$0xff]  }
 0x604   : > { %6787 = vmatpush1.bf16.msra.mxu0 %v14211_v14  ;;  %v14282_v14 = vld [vmem:[%s18907_s4 + $0x908] ss:$16 sps:$4 sm:$0xff]  }
 0x605   : > { %6889 = vmatpush1.bf16.msra.mxu1 %v14214_v29  ;;  %6788 = vmatprep.subr.bf16.mxu0 %v14219_v15  ;;  %v14287_v29 = vld [vmem:[%s18907_s4 + $0x924] ss:$16 sps:$4 sm:$0xff]   ;;  %v14290_v15 = vld [vmem:[%s18907_s4 + $0x92c] ss:$16 sps:$4 sm:$0xff]  }
 0x606   : > { %6890 = vmatprep.subr.bf16.mxu1 %v14222_v48  ;;  %v14285_v48 = vld [vmem:[%s18907_s4 + $0x920] ss:$16 sps:$4 sm:$0xff]  }
 0x608   : > { %6789 = vmatpush1.bf16.msra.mxu0 %v14217_v33  ;;  %v14288_v33 = vld [vmem:[%s18907_s4 + $0x928] ss:$16 sps:$4 sm:$0xff]  }
 0x609   : > { %6891 = vmatpush1.bf16.msra.mxu1 %v14220_v55  ;;  %6790 = vmatprep.subr.bf16.mxu0 %v14225_v50  ;;  %v14293_v55 = vld [vmem:[%s18907_s4 + $0x944] ss:$16 sps:$4 sm:$0xff]   ;;  %v14296_v50 = vld [vmem:[%s18907_s4 + $0x94c] ss:$16 sps:$4 sm:$0xff]  }
 0x60a   : > { %6892 = vmatprep.subr.bf16.mxu1 %v14228_v1  ;;  %v14291_v1 = vld [vmem:[%s18907_s4 + $0x940] ss:$16 sps:$4 sm:$0xff]  }
 0x60c   : > { %6791 = vmatpush1.bf16.msra.mxu0 %v14223_v4  ;;  %v14294_v4 = vld [vmem:[%s18907_s4 + $0x948] ss:$16 sps:$4 sm:$0xff]  }
 0x60d   : > { %6893 = vmatpush1.bf16.msra.mxu1 %v14226_v3  ;;  %6931 = vmatprep.subr.bf16.mxu0 %v16653_v25  ;;  %v4838_v25 = vpack.c.bf16 %v16991_v16, %v16991_v16  ;;  %v14237_v16 = vld [vmem:[%s18907_s4 + $0x820] ss:$16 sps:$4 sm:$0xff]   ;;  %v14299_v3 = vld [vmem:[%s18907_s4 + $0x964] ss:$16 sps:$4 sm:$0xff]  }
 0x60e   : > { %6982 = vmatprep.subr.bf16.mxu1 %v16655_v42 }
 0x60f   : > { %6793 = vmatmul.mubr.bf16.vlgmr.msra.gmra.mrb[108].mxu0 %v16987_v49 }
 0x610   : > { %6895 = vmatmul.mubr.bf16.vlgmr.msra.gmra.mrb[92].mxu1 %v16987_v49  ;;  %6802 = vmatprep.mubr.bf16.mxu0 %v4839_v56  ;;  %v14242_v49 = vld [vmem:[%s18907_s4 + $0x82c] ss:$16 sps:$4 sm:$0xff]  }
 0x611   : > { %6904 = vmatprep.mubr.bf16.mxu1 %v4839_v56  ;;  %6932 = vmatpush1.bf16.msra.mxu0 %v16649_v8  ;;  %v14229_v8 = vld [vmem:[%s18909_s6 + $0x18] sm:$0xff]  }
 0x612   : > { %6983 = vmatpush1.bf16.msra.mxu1 %v16651_v9  ;;  %6933 = vmatprep.subr.bf16.mxu0 %v16673_v61  ;;  %v14230_v9 = vld [vmem:[%s18909_s6 + $0x20] ss:$0 sps:$4 sm:$0x11]   ;;  %v14302_v56 = vld [vmem:[%s18907_s4 + $0x96c] ss:$16 sps:$4 sm:$0xff]  }
 0x613   : > { %6984 = vmatprep.subr.bf16.mxu1 %v16675_v53 }
 0x615   : > { %6934 = vmatpush1.bf16.msra.mxu0 %v16669_v60 }
 0x616   : > { %6985 = vmatpush1.bf16.msra.mxu1 %v16671_v40  ;;  %6935 = vmatprep.subr.bf16.mxu0 %v16693_v24 }
 0x617   : > { %6986 = vmatprep.subr.bf16.mxu1 %v16695_v51  ;;  %6803 = vmatmul.mubr.bf16.gmra.mrb[124].mxu0 %v4838_v25  ;;  %v14231_v51 = vld [vmem:[%s18907_s4 + $0x800] ss:$16 sps:$4 sm:$0xff]  }
 0x618   : > { %6905 = vmatmul.mubr.bf16.gmra.mrb[108].mxu1 %v4838_v25  ;;  %6963 = vmatprep.mubr.bf16.mxu0 %v14791_v6  ;;  %v14297_v25 = vld [vmem:[%s18907_s4 + $0x960] ss:$16 sps:$4 sm:$0xff]  }
 0x619   : > { %6936 = vmatpush1.bf16.msra.mxu0 %v16689_v57  ;;  %7014 = vmatprep.mubr.bf16.mxu1 %v14791_v6 }
 0x61a   : > { %6987 = vmatpush1.bf16.msra.mxu1 %v16691_v52  ;;  %11992 = vmatprep.subr.msk.bf16.mxu0 %vm4717_vm2, %v16713_v5  ;;  %v14233_v5 = vld [vmem:[%s18907_s4 + $0x804] ss:$16 sps:$4 sm:$0xff]  }
 0x61b   : > { %11995 = vmatprep.subr.msk.bf16.mxu1 %vm4717_vm2, %v16715_v34  ;;  %v14234_v34 = vld [vmem:[%s18907_s4 + $0x808] ss:$16 sps:$4 sm:$0xff]  }
 0x61d   : > { %6938 = vmatpush1.bf16.msra.mxu0 %v16721_v45  ;;  %v14236_v45 = vld [vmem:[%s18907_s4 + $0x80c] ss:$16 sps:$4 sm:$0xff]  }
 0x61e   : > { %6989 = vmatpush1.bf16.msra.mxu1 %v16724_v7  ;;  %v14239_v7 = vld [vmem:[%s18907_s4 + $0x824] ss:$16 sps:$4 sm:$0xff]   ;;  %7810 = vmatprep.subr.bf16.mxu0 %v14233_v5 }
 0x61f   : > { %7912 = vmatprep.subr.bf16.mxu1 %v14236_v45 }
 0x620   : > { %11993 = vmatmul.mubr.msk.bf16.vlgmr.msra.gmra.mrb[128].mxu0 %vm4710_vm3, %v14229_v8 }
 0x621   : > { %6973 = vmatprep.mubr.bf16.mxu0 %v14791_v6  ;;  %11996 = vmatmul.mubr.msk.bf16.vlgmr.msra.gmra.mrb[112].mxu1 %vm4710_vm3, %v14229_v8  ;;  %v14300_v8 = vld [vmem:[%s18907_s4 + $0x968] ss:$16 sps:$4 sm:$0xff]  }
 0x622   : > { %7024 = vmatprep.mubr.bf16.mxu1 %v14791_v6  ;;  %7811 = vmatpush1.bf16.msra.mxu0 %v14231_v51 }
 0x623   : > { %7913 = vmatpush1.bf16.msra.mxu1 %v14234_v34  ;;  %7812 = vmatprep.subr.bf16.mxu0 %v14239_v7 }
 0x624   : > { %7914 = vmatprep.subr.bf16.mxu1 %v14242_v49 }
 0x626   : > { %7813 = vmatpush1.bf16.msra.mxu0 %v14237_v16 }
 0x627   : > { %7915 = vmatpush1.bf16.msra.mxu1 %v14240_v27  ;;  %7814 = vmatprep.subr.bf16.mxu0 %v14245_v35 }
 0x628   : > { %11994 = vmatmul.mubr.msk.bf16.gmra.mrb[132].mxu0 %vm4710_vm3, %v14230_v9  ;;  %7916 = vmatprep.subr.bf16.mxu1 %v14248_v58 }
 0x629   : > { %v17620_v42 = vpop.f32.mrb[112].mxu0  ;;  %v17622_v60 = vpop.f32.mrb[96].mxu1  ;;  %11997 = vmatmul.mubr.msk.bf16.gmra.mrb[116].mxu1 %vm4710_vm3, %v14230_v9  ;;  %v14305_v9 = vld [vmem:[%s18907_s4 + $0x984] ss:$16 sps:$4 sm:$0xff]  }
 0x62a   : > { %v17625_v40 = vpop.f32.mrb[113].mxu0  ;;  %v17627_v61 = vpop.f32.mrb[97].mxu1  ;;  %7815 = vmatpush1.bf16.msra.mxu0 %v14243_v59 }
 0x62b   : > { %v5913_v53 = vpop.f32.mrb[114].mxu0  ;;  %v6015_v57 = vpop.f32.mrb[98].mxu1  ;;  %7917 = vmatpush1.bf16.msra.mxu1 %v14246_v30  ;;  %7816 = vmatprep.subr.bf16.mxu0 %v14251_v46  ;;  %v14311_v30 = vld [vmem:[%s18907_s4 + $0x9a4] ss:$16 sps:$4 sm:$0xff]   ;;  %v14315_v46 = vld [vmem:[%s18907_s4 + $0x9c0] ss:$16 sps:$4 sm:$0xff]  }
 0x62c   : > { %v5914_v52 = vpop.f32.mrb[115].mxu0  ;;  %v6016_v24 = vpop.f32.mrb[99].mxu1  ;;  %7918 = vmatprep.subr.bf16.mxu1 %v14254_v62  ;;  %v14308_v53 = vld [vmem:[%s18907_s4 + $0x98c] ss:$16 sps:$4 sm:$0xff]   ;;  %v14303_v57 = vld [vmem:[%s18907_s4 + $0x980] ss:$16 sps:$4 sm:$0xff]  }
 0x62d   : > { %v14306_v52 = vld [vmem:[%s18907_s4 + $0x988] ss:$16 sps:$4 sm:$0xff]  }
 0x62e   : > { %7817 = vmatpush1.bf16.msra.mxu0 %v14249_v23  ;;  %v14318_v62 = vld [vmem:[%s18907_s4 + $0x9c8] ss:$16 sps:$4 sm:$0xff]   ;;  %v14320_v23 = vld [vmem:[%s18907_s4 + $0x9cc] ss:$16 sps:$4 sm:$0xff]  }
 0x62f   : > { %7919 = vmatpush1.bf16.msra.mxu1 %v14252_v19  ;;  %7818 = vmatprep.subr.bf16.mxu0 %v14257_v20  ;;  %v14323_v19 = vld [vmem:[%s18907_s4 + $0x9e4] ss:$16 sps:$4 sm:$0xff]   ;;  %v14326_v20 = vld [vmem:[%s18907_s4 + $0x9ec] ss:$16 sps:$4 sm:$0xff]  }
 0x630   : > { %7920 = vmatprep.subr.bf16.mxu1 %v14260_v47  ;;  %v14321_v47 = vld [vmem:[%s18907_s4 + $0x9e0] ss:$16 sps:$4 sm:$0xff]  }
 0x632   : > { %7819 = vmatpush1.bf16.msra.mxu0 %v14255_v22  ;;  %v14324_v22 = vld [vmem:[%s18907_s4 + $0x9e8] ss:$16 sps:$4 sm:$0xff]  }
 0x633   : > { %7921 = vmatpush1.bf16.msra.mxu1 %v14258_v63  ;;  %7820 = vmatprep.subr.bf16.mxu0 %v14263_v0  ;;  %v14329_v63 = vld [vmem:[%s18907_s4 + $0xa04] ss:$16 sps:$4 sm:$0xff]   ;;  %v14332_v0 = vld [vmem:[%s18907_s4 + $0xa0c] ss:$16 sps:$4 sm:$0xff]  }
 0x634   : > { %7922 = vmatprep.subr.bf16.mxu1 %v14266_v18 }
 0x636   : > { %7821 = vmatpush1.bf16.msra.mxu0 %v14261_v21 }
 0x637   : > { %7923 = vmatpush1.bf16.msra.mxu1 %v14264_v43  ;;  %7822 = vmatprep.subr.bf16.mxu0 %v14269_v54 }
 0x638   : > { %7924 = vmatprep.subr.bf16.mxu1 %v14272_v31 }
 0x63a   : > { %7823 = vmatpush1.bf16.msra.mxu0 %v14267_v10 }
 0x63b   : > { %7925 = vmatpush1.bf16.msra.mxu1 %v14270_v11  ;;  %7824 = vmatprep.subr.bf16.mxu0 %v14275_v13 }
 0x63c   : > { %7926 = vmatprep.subr.bf16.mxu1 %v14278_v12 }
 0x63e   : > { %7825 = vmatpush1.bf16.msra.mxu0 %v14273_v17 }
 0x63f   : > { %7927 = vmatpush1.bf16.msra.mxu1 %v14276_v2  ;;  %7826 = vmatprep.subr.bf16.mxu0 %v14281_v26 }
 0x640   : > { %7928 = vmatprep.subr.bf16.mxu1 %v14284_v37 }
 0x642   : > { %7827 = vmatpush1.bf16.msra.mxu0 %v14279_v38 }
 0x643   : > { %7929 = vmatpush1.bf16.msra.mxu1 %v14282_v14  ;;  %7828 = vmatprep.subr.bf16.mxu0 %v14287_v29 }
 0x644   : > { %7930 = vmatprep.subr.bf16.mxu1 %v14290_v15 }
 0x646   : > { %7829 = vmatpush1.bf16.msra.mxu0 %v14285_v48 }
 0x647   : > { %7931 = vmatpush1.bf16.msra.mxu1 %v14288_v33  ;;  %7830 = vmatprep.subr.bf16.mxu0 %v14293_v55 }
 0x648   : > { %7932 = vmatprep.subr.bf16.mxu1 %v14296_v50 }
 0x64a   : > { %7831 = vmatpush1.bf16.msra.mxu0 %v14291_v1 }
 0x64b   : > { %7933 = vmatpush1.bf16.msra.mxu1 %v14294_v4  ;;  %7832 = vmatprep.subr.bf16.mxu0 %v14299_v3 }
 0x64c   : > { %7934 = vmatprep.subr.bf16.mxu1 %v14302_v56 }
 0x64e   : > { %7833 = vmatpush1.bf16.msra.mxu0 %v14297_v25 }
 0x64f   : > { %7935 = vmatpush1.bf16.msra.mxu1 %v14300_v8  ;;  %7834 = vmatprep.subr.bf16.mxu0 %v14305_v9 }
 0x650   : > { %7936 = vmatprep.subr.bf16.mxu1 %v14308_v53 }
 0x652   : > { %7835 = vmatpush1.bf16.msra.mxu0 %v14303_v57 }
 0x653   : > { %7937 = vmatpush1.bf16.msra.mxu1 %v14306_v52  ;;  %7836 = vmatprep.subr.bf16.mxu0 %v14311_v30  ;;  %v14341_v30 = vld [vmem:[%s18907_s4 + $0xa44] ss:$16 sps:$4 sm:$0xff]  }
 0x669   : > { %v5960_v24 = vpop.f32.mrb[116].mxu0  ;;  %v6062_v51 = vpop.f32.mrb[100].mxu1 }
 0x66a   : > { %v5961_v5 = vadd.f32 %v5960_v24, %v17620_v42  ;;  %v6063_v34 = vadd.f32 %v6062_v51, %v17622_v60  ;;  %v5962_v45 = vpop.f32.mrb[117].mxu0  ;;  %v6064_v7 = vpop.f32.mrb[101].mxu1  ;;  %v14314_v42 = vld [vmem:[%s18907_s4 + $0x9ac] ss:$16 sps:$4 sm:$0xff]   ;;  %v14309_v60 = vld [vmem:[%s18907_s4 + $0x9a0] ss:$16 sps:$4 sm:$0xff]  }
 0x66b   : > { %v5963_v49 = vadd.f32 %v5962_v45, %v17625_v40  ;;  %v6065_v16 = vadd.f32 %v6064_v7, %v17627_v61  ;;  %v5964_v27 = vpop.f32.mrb[118].mxu0  ;;  %v6066_v35 = vpop.f32.mrb[102].mxu1  ;;  %v14312_v40 = vld [vmem:[%s18907_s4 + $0x9a8] ss:$16 sps:$4 sm:$0xff]   ;;  %7938 = vmatprep.subr.bf16.mxu1 %v14314_v42  ;;  %v14317_v61 = vld [vmem:[%s18907_s4 + $0x9c4] ss:$16 sps:$4 sm:$0xff]   ;;  %7837 = vmatpush1.bf16.msra.mxu0 %v14309_v60 }
 0x66c   : > { %v5965_v58 = vpop.f32.mrb[119].mxu0  ;;  %v6067_v59 = vpop.f32.mrb[103].mxu1  ;;  %7939 = vmatpush1.bf16.msra.mxu1 %v14312_v40  ;;  %7838 = vmatprep.subr.bf16.mxu0 %v14317_v61  ;;  %v14333_v35 = vld [vmem:[%s18907_s4 + $0xa20] ss:$16 sps:$4 sm:$0xff]   ;;  %v14344_v42 = vld [vmem:[%s18907_s4 + $0xa4c] ss:$16 sps:$4 sm:$0xff]  }
 0x66d   : > { %7940 = vmatprep.subr.bf16.mxu1 %v14320_v23  ;;  %v14336_v58 = vld [vmem:[%s18907_s4 + $0xa28] ss:$16 sps:$4 sm:$0xff]  }
 0x66f   : > { %7839 = vmatpush1.bf16.msra.mxu0 %v14315_v46 }
 0x670   : > { %7941 = vmatpush1.bf16.msra.mxu1 %v14318_v62  ;;  %7840 = vmatprep.subr.bf16.mxu0 %v14323_v19 }
 0x671   : > { %7942 = vmatprep.subr.bf16.mxu1 %v14326_v20 }
 0x673   : > { %7841 = vmatpush1.bf16.msra.mxu0 %v14321_v47  ;;  %v14339_v47 = vld [vmem:[%s18907_s4 + $0xa40] ss:$16 sps:$4 sm:$0xff]  }
 0x674   : > { %7943 = vmatpush1.bf16.msra.mxu1 %v14324_v22  ;;  %7861 = vmatprep.subr.bf16.mxu0 %v14329_v63  ;;  %v14342_v22 = vld [vmem:[%s18907_s4 + $0xa48] ss:$16 sps:$4 sm:$0xff]  }
 0x675   : > { %7963 = vmatprep.subr.bf16.mxu1 %v14332_v0  ;;  %v14347_v0 = vld [vmem:[%s18907_s4 + $0xa64] ss:$16 sps:$4 sm:$0xff]  }
 0x6a9   : > { %v6753_v18 = vpop.f32.mrb[120].mxu0 }
 0x6aa   : > { %v6754_v21 = vadd.f32 %v6753_v18, %v5961_v5  ;;  %v6855_v43 = vpop.f32.mrb[104].mxu1  ;;  %v6755_v54 = vpop.f32.mrb[121].mxu0  ;;  %v14327_v5 = vld [vmem:[%s18907_s4 + $0xa00] ss:$16 sps:$4 sm:$0xff]   ;;  %v14350_v18 = vld [vmem:[%s18907_s4 + $0xa6c] ss:$16 sps:$4 sm:$0xff]  }
 0x6ab   : > { %v6856_v31 = vadd.f32 %v6855_v43, %v6063_v34  ;;  %v6756_v10 = vadd.f32 %v6755_v54, %v5963_v49  ;;  %v6857_v11 = vpop.f32.mrb[105].mxu1  ;;  %v6757_v13 = vpop.f32.mrb[122].mxu0  ;;  %v14330_v34 = vld [vmem:[%s18907_s4 + $0xa08] ss:$16 sps:$4 sm:$0xff]   ;;  %v14335_v49 = vld [vmem:[%s18907_s4 + $0xa24] ss:$16 sps:$4 sm:$0xff]  }
 0x6ac   : > { %v6858_v12 = vadd.f32 %v6857_v11, %v6065_v16  ;;  %v6859_v17 = vpop.f32.mrb[106].mxu1  ;;  %v6758_v2 = vpop.f32.mrb[123].mxu0  ;;  %v14338_v16 = vld [vmem:[%s18907_s4 + $0xa2c] ss:$16 sps:$4 sm:$0xff]   ;;  %v14348_v43 = vld [vmem:[%s18907_s4 + $0xa68] ss:$16 sps:$4 sm:$0xff]  }
 0x6ad   : > { %v6860_v26 = vpop.f32.mrb[107].mxu1  ;;  %v14353_v54 = vld [vmem:[%s18907_s4 + $0xa84] ss:$16 sps:$4 sm:$0xff]   ;;  %v14354_v11 = vld [vmem:[%s18907_s4 + $0xa88] ss:$16 sps:$4 sm:$0xff]  }
 0x6ae   : > { %v14359_v13 = vld [vmem:[%s18907_s4 + $0xaa4] ss:$16 sps:$4 sm:$0xff]   ;;  %v14357_v17 = vld [vmem:[%s18907_s4 + $0xaa0] ss:$16 sps:$4 sm:$0xff]   ;;  %v14360_v2 = vld [vmem:[%s18907_s4 + $0xaa8] ss:$16 sps:$4 sm:$0xff]  }
 0x6af   : > { %v14365_v26 = vld [vmem:[%s18907_s4 + $0xac4] ss:$16 sps:$4 sm:$0xff]  }
 0x6ea   : > { %v6804_v37 = vpop.f32.mrb[124].mxu0 }
 0x6eb   : > { %v17831_v38 = vadd.f32 %v6804_v37, %v6754_v21  ;;  %v6906_v14 = vpop.f32.mrb[108].mxu1  ;;  %v6806_v29 = vpop.f32.mrb[125].mxu0  ;;  %v14345_v21 = vld [vmem:[%s18907_s4 + $0xa60] ss:$16 sps:$4 sm:$0xff]   ;;  %v14368_v37 = vld [vmem:[%s18907_s4 + $0xacc] ss:$16 sps:$4 sm:$0xff]  }
 0x6ec   : > { %v17833_v15 = vadd.f32 %v6906_v14, %v6856_v31  ;;  %v17835_v48 = vadd.f32 %v6806_v29, %v6756_v10  ;;  %v6908_v33 = vpop.f32.mrb[109].mxu1  ;;  %v6808_v55 = vpop.f32.mrb[126].mxu0  ;;  %v14356_v31 = vld [vmem:[%s18907_s4 + $0xa8c] ss:$16 sps:$4 sm:$0xff]   ;;  %v14351_v10 = vld [vmem:[%s18907_s4 + $0xa80] ss:$16 sps:$4 sm:$0xff]  }
 0x6ed   : > { %v17837_v50 = vadd.f32 %v6908_v33, %v6858_v12  ;;  %v6910_v1 = vpop.f32.mrb[110].mxu1  ;;  %v6809_v4 = vpop.f32.mrb[127].mxu0  ;;  %v14362_v12 = vld [vmem:[%s18907_s4 + $0xaac] ss:$16 sps:$4 sm:$0xff]   ;;  %v14363_v14 = vld [vmem:[%s18907_s4 + $0xac0] ss:$16 sps:$4 sm:$0xff]  }
 0x6ee   : > { %v6911_v3 = vpop.f32.mrb[111].mxu1  ;;  %v14366_v29 = vld [vmem:[%s18907_s4 + $0xac8] ss:$16 sps:$4 sm:$0xff]   ;;  %v14371_v33 = vld [vmem:[%s18907_s4 + $0xae4] ss:$16 sps:$4 sm:$0xff]  }
 0x6ef   : > { %v14374_v55 = vld [vmem:[%s18907_s4 + $0xaec] ss:$16 sps:$4 sm:$0xff]   ;;  %v14369_v1 = vld [vmem:[%s18907_s4 + $0xae0] ss:$16 sps:$4 sm:$0xff]   ;;  %v14372_v4 = vld [vmem:[%s18907_s4 + $0xae8] ss:$16 sps:$4 sm:$0xff]  }
 0x6f0   : > { %v14377_v3 = vld [vmem:[%s18907_s4 + $0xb04] ss:$16 sps:$4 sm:$0xff]  }
 0x6f3   : > { %v6965_v56 = vpop.f32.mrb[128].mxu0 }
 0x6f4   : > { %v6967_v25 = vpop.f32.mrb[129].mxu0  ;;  %v7016_v8 = vpop.f32.mrb[112].mxu1 }
 0x6f5   : > { %v6969_v9 = vpop.f32.mrb[130].mxu0  ;;  %v7018_v53 = vpop.f32.mrb[113].mxu1 }
 0x6f6   : > { %v7033_v57 = vpack.c.bf16 %v6969_v9, %v6965_v56  ;;  %v6971_v52 = vpop.f32.mrb[131].mxu0  ;;  %v7020_v24 = vpop.f32.mrb[114].mxu1  ;;  %v14380_v56 = vld [vmem:[%s18907_s4 + $0xb0c] ss:$16 sps:$4 sm:$0xff]   ;;  %v14383_v9 = vld [vmem:[%s18907_s4 + $0xb24] ss:$16 sps:$4 sm:$0xff]  }
 0x6f7   : > { %v7034_v51 = vpack.c.bf16 %v6971_v52, %v6967_v25  ;;  %v17845_v45 = vpack.c.bf16 %v7020_v24, %v7016_v8  ;;  %v7022_v7 = vpop.f32.mrb[115].mxu1  ;;  %v14375_v25 = vld [vmem:[%s18907_s4 + $0xb00] ss:$16 sps:$4 sm:$0xff]   ;;  %v14378_v8 = vld [vmem:[%s18907_s4 + $0xb08] ss:$16 sps:$4 sm:$0xff]  }
 0x6f8   : > { %v7036_v27 = vpack.c.bf16 %v7022_v7, %v7018_v53  ;;  %v14386_v53 = vld [vmem:[%s18907_s4 + $0xb2c] ss:$16 sps:$4 sm:$0xff]   ;;  %v14384_v52 = vld [vmem:[%s18907_s4 + $0xb28] ss:$16 sps:$4 sm:$0xff]   ;;  %v14389_v24 = vld [vmem:[%s18907_s4 + $0xb44] ss:$16 sps:$4 sm:$0xff]  }
 0x6f9   : > { %7842 = vmatprep.mubr.bf16.mxu0 %v7034_v51  ;;  %7944 = vmatprep.mubr.bf16.mxu1 %v7034_v51  ;;  %v14392_v51 = vld [vmem:[%s18907_s4 + $0xb4c] ss:$16 sps:$4 sm:$0xff]   ;;  %v14395_v7 = vld [vmem:[%s18907_s4 + $0xb64] ss:$16 sps:$4 sm:$0xff]  }
 0x6fa   : > { %7843 = vmatmul.mubr.bf16.vlgmr.msra.gmra.mrb[108].mxu0 %v7033_v57  ;;  %7945 = vmatmul.mubr.bf16.vlgmr.msra.gmra.mrb[92].mxu1 %v7033_v57  ;;  %v14381_v57 = vld [vmem:[%s18907_s4 + $0xb20] ss:$16 sps:$4 sm:$0xff]  }
 0x6fb   : > { %7862 = vmatpush1.bf16.msra.mxu0 %v14327_v5  ;;  %7964 = vmatpush1.bf16.msra.mxu1 %v14330_v34  ;;  %v6975_v59 = vpop.f32.mrb[132].mxu0  ;;  %v14387_v5 = vld [vmem:[%s18907_s4 + $0xb40] ss:$16 sps:$4 sm:$0xff]   ;;  %v14390_v34 = vld [vmem:[%s18907_s4 + $0xb48] ss:$16 sps:$4 sm:$0xff]  }
 0x6fc   : > { %7863 = vmatprep.subr.bf16.mxu0 %v14335_v49  ;;  %7965 = vmatprep.subr.bf16.mxu1 %v14338_v16  ;;  %v6977_v60 = vpop.f32.mrb[133].mxu0  ;;  %v17865_v40 = vpop.f32.mrb[116].mxu1  ;;  %v7037_v23 = vpack.c.bf16 %v6975_v59, %v6975_v59  ;;  %v14398_v49 = vld [vmem:[%s18907_s4 + $0xb6c] ss:$16 sps:$4 sm:$0xff]   ;;  %v14393_v16 = vld [vmem:[%s18907_s4 + $0xb60] ss:$16 sps:$4 sm:$0xff]  }
 0x6fd   : > { %v7038_v61 = vpack.c.bf16 %v6977_v60, %v6977_v60  ;;  %v6979_v46 = vpop.f32.mrb[134].mxu0  ;;  %v17867_v62 = vpop.f32.mrb[117].mxu1  ;;  %v14399_v59 = vld [vmem:[%s18907_s4 + $0xb80] ss:$16 sps:$4 sm:$0xff]   ;;  %v14410_v60 = vld [vmem:[%s18907_s4 + $0xbac] ss:$16 sps:$4 sm:$0xff]  }
 0x6fe   : > { %v6980_v19 = vpop.f32.mrb[135].mxu0  ;;  %v7030_v20 = vpop.f32.mrb[118].mxu1  ;;  %v14408_v46 = vld [vmem:[%s18907_s4 + $0xba8] ss:$16 sps:$4 sm:$0xff]  }
 0x6ff   : > { %7864 = vmatpush1.bf16.msra.mxu0 %v14333_v35  ;;  %7966 = vmatpush1.bf16.msra.mxu1 %v14336_v58  ;;  %v7031_v63 = vpop.f32.mrb[119].mxu1  ;;  %v14401_v35 = vld [vmem:[%s18907_s4 + $0xb84] ss:$16 sps:$4 sm:$0xff]   ;;  %v14404_v58 = vld [vmem:[%s18907_s4 + $0xb8c] ss:$16 sps:$4 sm:$0xff]  }
 0x700   : > { %7865 = vmatprep.subr.bf16.mxu0 %v14341_v30  ;;  %7967 = vmatprep.subr.bf16.mxu1 %v14344_v42  ;;  %v14402_v30 = vld [vmem:[%s18907_s4 + $0xb88] ss:$16 sps:$4 sm:$0xff]   ;;  %v14407_v42 = vld [vmem:[%s18907_s4 + $0xba4] ss:$16 sps:$4 sm:$0xff]   ;;  %v14416_v19 = vld [vmem:[%s18907_s4 + $0xbcc] ss:$16 sps:$4 sm:$0xff]  }
 0x701   : > { %7852 = vmatprep.mubr.bf16.mxu0 %v7038_v61  ;;  %7954 = vmatprep.mubr.bf16.mxu1 %v7038_v61  ;;  %v14405_v61 = vld [vmem:[%s18907_s4 + $0xba0] ss:$16 sps:$4 sm:$0xff]   ;;  %v14422_v63 = vld [vmem:[%s18907_s4 + $0xbec] ss:$16 sps:$4 sm:$0xff]  }
 0x702   : > { %7853 = vmatmul.mubr.bf16.gmra.mrb[136].mxu0 %v7037_v23  ;;  %7955 = vmatmul.mubr.bf16.gmra.mrb[120].mxu1 %v7037_v23  ;;  %v14413_v23 = vld [vmem:[%s18907_s4 + $0xbc4] ss:$16 sps:$4 sm:$0xff]   ;;  %v14411_v20 = vld [vmem:[%s18907_s4 + $0xbc0] ss:$16 sps:$4 sm:$0xff]  }
 0x703   : > { %7866 = vmatpush1.bf16.msra.mxu0 %v14339_v47  ;;  %7968 = vmatpush1.bf16.msra.mxu1 %v14342_v22  ;;  %v14414_v47 = vld [vmem:[%s18907_s4 + $0xbc8] ss:$16 sps:$4 sm:$0xff]   ;;  %v14419_v22 = vld [vmem:[%s18907_s4 + $0xbe4] ss:$16 sps:$4 sm:$0xff]  }
 0x704   : > { %7867 = vmatprep.subr.bf16.mxu0 %v14347_v0  ;;  %7969 = vmatprep.subr.bf16.mxu1 %v14350_v18  ;;  %v14417_v0 = vld [vmem:[%s18907_s4 + $0xbe0] ss:$16 sps:$4 sm:$0xff]   ;;  %v14420_v18 = vld [vmem:[%s18907_s4 + $0xbe8] ss:$16 sps:$4 sm:$0xff]  }
 0x705   : > { %7893 = vmatprep.mubr.bf16.mxu0 %v7036_v27  ;;  %7995 = vmatprep.mubr.bf16.mxu1 %v7036_v27  ;;  %v14396_v27 = vld [vmem:[%s18907_s4 + $0xb68] ss:$16 sps:$4 sm:$0xff]  }
 0x707   : > { %7868 = vmatpush1.bf16.msra.mxu0 %v14345_v21  ;;  %7970 = vmatpush1.bf16.msra.mxu1 %v14348_v43  ;;  %v7040_v21 = vpack.c.bf16 %v17867_v62, %v17867_v62  ;;  %v7039_v43 = vpack.c.bf16 %v17865_v40, %v17865_v40 }
 0x708   : > { %7869 = vmatprep.subr.bf16.mxu0 %v14353_v54  ;;  %7971 = vmatprep.subr.bf16.mxu1 %v14356_v31 }
 0x70b   : > { %7870 = vmatpush1.bf16.msra.mxu0 %v14351_v10  ;;  %7972 = vmatpush1.bf16.msra.mxu1 %v14354_v11 }
 0x70c   : > { %7871 = vmatprep.subr.bf16.mxu0 %v14359_v13  ;;  %7973 = vmatprep.subr.bf16.mxu1 %v14362_v12 }
 0x70f   : > { %7872 = vmatpush1.bf16.msra.mxu0 %v14357_v17  ;;  %7974 = vmatpush1.bf16.msra.mxu1 %v14360_v2 }
 0x710   : > { %7873 = vmatprep.subr.bf16.mxu0 %v14365_v26  ;;  %7975 = vmatprep.subr.bf16.mxu1 %v14368_v37 }
 0x713   : > { %7874 = vmatpush1.bf16.msra.mxu0 %v14363_v14  ;;  %7976 = vmatpush1.bf16.msra.mxu1 %v14366_v29 }
 0x714   : > { %7875 = vmatprep.subr.bf16.mxu0 %v14371_v33  ;;  %7977 = vmatprep.subr.bf16.mxu1 %v14374_v55 }
 0x717   : > { %7876 = vmatpush1.bf16.msra.mxu0 %v14369_v1  ;;  %7978 = vmatpush1.bf16.msra.mxu1 %v14372_v4 }
 0x718   : > { %7877 = vmatprep.subr.bf16.mxu0 %v14377_v3  ;;  %7979 = vmatprep.subr.bf16.mxu1 %v14380_v56 }
 0x71b   : > { %7878 = vmatpush1.bf16.msra.mxu0 %v14375_v25  ;;  %7980 = vmatpush1.bf16.msra.mxu1 %v14378_v8 }
 0x71c   : > { %7879 = vmatprep.subr.bf16.mxu0 %v14383_v9  ;;  %7981 = vmatprep.subr.bf16.mxu1 %v14386_v53 }
 0x71f   : > { %7880 = vmatpush1.bf16.msra.mxu0 %v14381_v57  ;;  %7982 = vmatpush1.bf16.msra.mxu1 %v14384_v52 }
 0x720   : > { %7881 = vmatprep.subr.bf16.mxu0 %v14389_v24  ;;  %7983 = vmatprep.subr.bf16.mxu1 %v14392_v51 }
 0x723   : > { %7882 = vmatpush1.bf16.msra.mxu0 %v14387_v5  ;;  %7984 = vmatpush1.bf16.msra.mxu1 %v14390_v34 }
 0x724   : > { %7883 = vmatprep.subr.bf16.mxu0 %v14395_v7  ;;  %7985 = vmatprep.subr.bf16.mxu1 %v14398_v49 }
 0x727   : > { %7884 = vmatpush1.bf16.msra.mxu0 %v14393_v16  ;;  %7986 = vmatpush1.bf16.msra.mxu1 %v14396_v27 }
 0x728   : > { %7885 = vmatprep.subr.bf16.mxu0 %v14401_v35  ;;  %7987 = vmatprep.subr.bf16.mxu1 %v14404_v58 }
 0x72b   : > { %7886 = vmatpush1.bf16.msra.mxu0 %v14399_v59  ;;  %7988 = vmatpush1.bf16.msra.mxu1 %v14402_v30 }
 0x72c   : > { %7887 = vmatprep.subr.bf16.mxu0 %v14407_v42  ;;  %7989 = vmatprep.subr.bf16.mxu1 %v14410_v60 }
 0x72f   : > { %7888 = vmatpush1.bf16.msra.mxu0 %v14405_v61  ;;  %7990 = vmatpush1.bf16.msra.mxu1 %v14408_v46 }
 0x730   : > { %7889 = vmatprep.subr.bf16.mxu0 %v14413_v23  ;;  %7991 = vmatprep.subr.bf16.mxu1 %v14416_v19 }
 0x733   : > { %7890 = vmatpush1.bf16.msra.mxu0 %v14411_v20  ;;  %7992 = vmatpush1.bf16.msra.mxu1 %v14414_v47 }
 0x734   : > { %7891 = vmatprep.subr.bf16.mxu0 %v14419_v22  ;;  %7993 = vmatprep.subr.bf16.mxu1 %v14422_v63 }
 0x737   : > { %7892 = vmatpush1.bf16.msra.mxu0 %v14417_v0  ;;  %7994 = vmatpush1.bf16.msra.mxu1 %v14420_v18 }
 0x73a   : > { %7894 = vmatmul.mubr.bf16.vlgmr.msra.gmra.mrb[108].mxu0 %v17845_v45  ;;  %7996 = vmatmul.mubr.bf16.vlgmr.msra.gmra.mrb[92].mxu1 %v17845_v45  ;;  %v8026_v45 = vld [vmem:[%s18908_s5] sm:$0xf] }
 0x73b   : > { %7903 = vmatprep.mubr.bf16.mxu0 %v7040_v21  ;;  %8005 = vmatprep.mubr.bf16.mxu1 %v7040_v21  ;;  %v8031_v40 = vrot.slane %v8026_v45, %v16615_v36  ;;  %v8039_v2 = vrot.slane %v8026_v45, %v16618_v39  ;;  %v8035_v26 = vrot.slane %v8026_v45, %v16624_v41 }
 0x73c   : > { %v8043_v37 = vrot.slane %v8026_v45, %v16627_v44 }
 0x742   : > { %7904 = vmatmul.mubr.bf16.gmra.mrb[140].mxu0 %v7039_v43  ;;  %8006 = vmatmul.mubr.bf16.gmra.mrb[124].mxu1 %v7039_v43 }
 0x743   : > { %8129 = vmatprep.mubr.bf16.mxu0 %v14791_v6  ;;  %8170 = vmatprep.mubr.bf16.mxu1 %v14791_v6 }
 0x7d5   : > { %v7854_v54 = vpop.f32.mrb[136].mxu0  ;;  %v7956_v31 = vpop.f32.mrb[120].mxu1 }
 0x7d6   : > { %v7856_v10 = vpop.f32.mrb[137].mxu0  ;;  %v7958_v11 = vpop.f32.mrb[121].mxu1 }
 0x7d7   : > { %v7858_v62 = vpop.f32.mrb[138].mxu0  ;;  %v7960_v13 = vpop.f32.mrb[122].mxu1 }
 0x7d8   : > { %v7859_v12 = vpop.f32.mrb[139].mxu0  ;;  %v7961_v17 = vpop.f32.mrb[123].mxu1 }
 0x80d   : > { %v7895_v14 = vpop.f32.mrb[108].mxu0  ;;  %v7997_v29 = vpop.f32.mrb[92].mxu1 }
 0x80e   : > { %v8048_v33 = vadd.f32 %v8031_v40, %v7895_v14  ;;  %v8050_v55 = vadd.f32 %v8039_v2, %v7997_v29  ;;  %v7897_v1 = vpop.f32.mrb[109].mxu0  ;;  %v7999_v4 = vpop.f32.mrb[93].mxu1 }
 0x80f   : > { %v8049_v3 = vadd.f32 %v8035_v26, %v7897_v1  ;;  %v8051_v56 = vadd.f32 %v8043_v37, %v7999_v4  ;;  %v7899_v25 = vpop.f32.mrb[110].mxu0  ;;  %v8001_v8 = vpop.f32.mrb[94].mxu1 }
 0x810   : > { %v8052_v9 = vadd.f32 %v8031_v40, %v7899_v25  ;;  %v8054_v53 = vadd.f32 %v8039_v2, %v8001_v8  ;;  %v7901_v57 = vpop.f32.mrb[111].mxu0  ;;  %v8003_v52 = vpop.f32.mrb[95].mxu1  ;;  %v8060_v5 = vmax.f32 %v8048_v33, 0.0  ;;  %v8062_v34 = vmax.f32 %v8050_v55, 0.0  ;;  %v14428_v25 = vld [vmem:[%s18910_s7 + $0x1c8] sm:$0xff]  }
 0x811   : > { %v8053_v24 = vadd.f32 %v8035_v26, %v7901_v57  ;;  %v8055_v51 = vadd.f32 %v8043_v37, %v8003_v52  ;;  %v8061_v16 = vmax.f32 %v8049_v3, 0.0  ;;  %v8063_v27 = vmax.f32 %v8051_v56, 0.0  ;;  %v14426_v3 = vld [vmem:[%s18910_s7 + $0x180] sm:$0xff]   ;;  %v14427_v56 = vld [vmem:[%s18910_s7 + $0x148] sm:$0xff]   ;;  %v14432_v57 = vld [vmem:[%s18910_s7 + $0x1d0] sm:$0xff]  }
 0x812   : > { %v8064_v7 = vmax.f32 %v8052_v9, 0.0  ;;  %v8066_v49 = vmax.f32 %v8054_v53, 0.0  ;;  %v14429_v8 = vld [vmem:[%s18910_s7 + $0x108] sm:$0xff]   ;;  %v14431_v53 = vld [vmem:[%s18910_s7 + $0x150] sm:$0xff]  }
 0x813   : > { %v8065_v35 = vmax.f32 %v8053_v24, 0.0  ;;  %v8067_v58 = vmax.f32 %v8055_v51, 0.0  ;;  %v14430_v9 = vld [vmem:[%s18910_s7 + $0x188] sm:$0xff]   ;;  %v14433_v52 = vld [vmem:[%s18910_s7 + $0x110] sm:$0xff]   ;;  %v14435_v51 = vld [vmem:[%s18910_s7 + $0x158] sm:$0xff]  }
 0x814   : > { %v18046_v59 = vpack.c.bf16 %v8064_v7, %v8060_v5  ;;  %v18048_v30 = vpack.c.bf16 %v8066_v49, %v8062_v34  ;;  %v14434_v24 = vld [vmem:[%s18910_s7 + $0x190] sm:$0xff]   ;;  %v14436_v5 = vld [vmem:[%s18910_s7 + $0x1d8] sm:$0xff]   ;;  %v14439_v49 = vld [vmem:[%s18910_s7 + $0x160] sm:$0xff]  }
 0x815   : > { %v18050_v42 = vpack.c.bf16 %v8065_v35, %v8061_v16  ;;  %v18052_v60 = vpack.c.bf16 %v8067_v58, %v8063_v27  ;;  %v7905_v61 = vpop.f32.mrb[140].mxu0  ;;  %v8007_v46 = vpop.f32.mrb[124].mxu1  ;;  %v14437_v34 = vld [vmem:[%s18910_s7 + $0x118] sm:$0xff]   ;;  %v14440_v16 = vld [vmem:[%s18910_s7 + $0x1e0] sm:$0xff]   ;;  %v14443_v58 = vld [vmem:[%s18910_s7 + $0x168] sm:$0xff]  }
 0x816   : > { %v7906_v23 = vadd.f32 %v7905_v61, %v7854_v54  ;;  %v8008_v19 = vadd.f32 %v8007_v46, %v7956_v31  ;;  %v7907_v20 = vpop.f32.mrb[141].mxu0  ;;  %v8009_v47 = vpop.f32.mrb[125].mxu1  ;;  %v14438_v7 = vld [vmem:[%s18910_s7 + $0x198] sm:$0xff]   ;;  %v14441_v27 = vld [vmem:[%s18910_s7 + $0x120] sm:$0xff]   ;;  %v14444_v61 = vld [vmem:[%s18910_s7 + $0x1e8] sm:$0xff]  }
 0x817   : > { %v7908_v22 = vadd.f32 %v7907_v20, %v7856_v10  ;;  %v8010_v63 = vadd.f32 %v8009_v47, %v7958_v11  ;;  %v7909_v0 = vpop.f32.mrb[142].mxu0  ;;  %v8011_v18 = vpop.f32.mrb[126].mxu1  ;;  %8097 = vmatprep.subr.bf16.mxu0 %v18050_v42  ;;  %8138 = vmatprep.subr.bf16.mxu1 %v18052_v60  ;;  %v14442_v35 = vld [vmem:[%s18910_s7 + $0x1a0] sm:$0xff]   ;;  %v14445_v46 = vld [vmem:[%s18910_s7 + $0x128] sm:$0xff]   ;;  %v14448_v20 = vld [vmem:[%s18910_s7 + $0x1f0] sm:$0xff]  }
 0x818   : > { %v8022_v21 = vadd.f32 %v7906_v23, %v17831_v38  ;;  %v8024_v43 = vadd.f32 %v8008_v19, %v17833_v15  ;;  %v7910_v62 = vpop.f32.mrb[143].mxu0  ;;  %v8012_v13 = vpop.f32.mrb[127].mxu1  ;;  %8098 = vmatpush1.bf16.msra.mxu0 %v18046_v59  ;;  %8139 = vmatpush1.bf16.msra.mxu1 %v18048_v30  ;;  %v14446_v23 = vld [vmem:[%s18910_s7 + $0x1a8] sm:$0xff]   ;;  %v14447_v19 = vld [vmem:[%s18910_s7 + $0x170] sm:$0xff]   ;;  %v14452_v0 = vld [vmem:[%s18910_s7 + $0x1f8] sm:$0xff]  }
 0x819   : > { %v8023_v54 = vadd.f32 %v7908_v22, %v17835_v48  ;;  %v8025_v31 = vadd.f32 %v8010_v63, %v17837_v50  ;;  %v8080_v50 = vld [vmem:[%s18912_s9] sm:$0xf]  ;;  %v14449_v47 = vld [vmem:[%s18910_s7 + $0x130] sm:$0xff]   ;;  %v14451_v63 = vld [vmem:[%s18910_s7 + $0x178] sm:$0xff]  }
 0x81a   : > { %v8056_v10 = vadd.f32 %v8031_v40, %v8022_v21  ;;  %v8058_v11 = vadd.f32 %v8039_v2, %v8024_v43  ;;  %v14423_v40 = vld [vmem:[%s18910_s7 + $0x140] sm:$0xff]   ;;  %v14450_v22 = vld [vmem:[%s18910_s7 + $0x1b0] sm:$0xff]   ;;  %v14453_v18 = vld [vmem:[%s18910_s7 + $0x138] sm:$0xff]  }
 0x81b   : > { %v8057_v12 = vadd.f32 %v8035_v26, %v8023_v54  ;;  %v8059_v17 = vadd.f32 %v8043_v37, %v8025_v31  ;;  %v14424_v2 = vld [vmem:[%s18910_s7 + $0x1c0] sm:$0xff]   ;;  %v14454_v21 = vld [vmem:[%s18910_s7 + $0x1b8] sm:$0xff]  }
 0x81c   : > { %v8068_v45 = vmax.f32 %v8056_v10, 0.0  ;;  %v8070_v14 = vmax.f32 %v8058_v11, 0.0  ;;  %v12258_v26 = vld [vmem:[%s18912_s9 + $0x4] sm:$0xf] }
 0x81d   : > { %v8069_v29 = vmax.f32 %v8057_v12, 0.0  ;;  %v8071_v38 = vmax.f32 %v8059_v17, 0.0  ;;  %v14425_v37 = vld [vmem:[%s18910_s7 + $0x100] sm:$0xff]  }
 0x81e   : > { %v8076_v33 = vpack.c.bf16 %v8068_v45, %v8068_v45  ;;  %v8078_v15 = vpack.c.bf16 %v8070_v14, %v8070_v14  ;;  %v14455_v43 = vld [vmem:[%s18910_s7 + $0x40] sm:$0xff]  }
 0x81f   : > { %v18062_v55 = vpack.c.bf16 %v8069_v29, %v8069_v29  ;;  %v18064_v1 = vpack.c.bf16 %v8071_v38, %v8071_v38  ;;  %v14456_v62 = vld [vmem:[%s18910_s7 + $0xc0] sm:$0xff]  }
 0x820   : > { %v18067_v4 = vsel %vm826_vm1, %v8076_v33, 0  ;;  %v18070_v48 = vsel %vm826_vm1, %v8078_v15, 0 }
 0x821   : > { %12254 = vmatprep.subr.msk.bf16.mxu0 %vm826_vm1, %v18062_v55  ;;  %12256 = vmatprep.subr.msk.bf16.mxu1 %vm826_vm1, %v18064_v1 }
 0x822   : > { %8100 = vmatpush1.bf16.msra.mxu0 %v18067_v4  ;;  %8141 = vmatpush1.bf16.msra.mxu1 %v18070_v48 }
 0x823   : > { %8252 = vmatprep.subr.bf16.mxu0 %v18050_v42  ;;  %8293 = vmatprep.subr.bf16.mxu1 %v18052_v60 }
 0x825   : > { %12255 = vmatmul.mubr.msk.bf16.vlgmr.msra.gmra.mrb[144].mxu0 %vm8081_vm4, %v8080_v50  ;;  %12257 = vmatmul.mubr.msk.bf16.vlgmr.msra.gmra.mrb[128].mxu1 %vm8081_vm4, %v8080_v50 }
 0x826   : > { %8253 = vmatpush1.bf16.msra.mxu0 %v18046_v59  ;;  %8294 = vmatpush1.bf16.msra.mxu1 %v18048_v30 }
 0x827   : > { %12259 = vmatprep.subr.msk.bf16.mxu0 %vm826_vm1, %v18062_v55  ;;  %12261 = vmatprep.subr.msk.bf16.mxu1 %vm826_vm1, %v18064_v1 }
 0x828   : > { %8284 = vmatprep.mubr.bf16.mxu0 %v14791_v6  ;;  %8325 = vmatprep.mubr.bf16.mxu1 %v14791_v6 }
 0x82a   : > { %8255 = vmatpush1.bf16.msra.mxu0 %v18067_v4  ;;  %8296 = vmatpush1.bf16.msra.mxu1 %v18070_v48 }
 0x82b   : > { %12721 = vmatprep.subr.bf16.mxu0 %v14423_v40  ;;  %12743 = vmatprep.subr.bf16.mxu1 %v14424_v2 }
 0x82d   : > { %12260 = vmatmul.mubr.msk.bf16.vlgmr.msra.gmra.mrb[148].mxu0 %vm8081_vm4, %v12258_v26  ;;  %12262 = vmatmul.mubr.msk.bf16.vlgmr.msra.gmra.mrb[132].mxu1 %vm8081_vm4, %v12258_v26  ;;  %v14457_v26 = vld [vmem:[%s18910_s7] sm:$0xff]  }
 0x82e   : > { %12722 = vmatpush3.bf16.msra.mxu0 %v14425_v37  ;;  %12744 = vmatpush3.bf16.msra.mxu1 %v14426_v3  ;;  %v14458_v37 = vld [vmem:[%s18910_s7 + $0x80] sm:$0xff]  }
 0x82f   : > { %12723 = vmatprep.subr.bf16.mxu0 %v14427_v56  ;;  %12745 = vmatprep.subr.bf16.mxu1 %v14428_v25 }
 0x832   : > { %12724 = vmatpush3.bf16.msra.mxu0 %v14429_v8  ;;  %12746 = vmatpush3.bf16.msra.mxu1 %v14430_v9  ;;  %v14459_v9 = vld [vmem:[%s18910_s7 + $0x48] sm:$0xff]  }
 0x833   : > { %12725 = vmatprep.subr.bf16.mxu0 %v14431_v53  ;;  %12747 = vmatprep.subr.bf16.mxu1 %v14432_v57  ;;  %v14460_v53 = vld [vmem:[%s18910_s7 + $0xc8] sm:$0xff]  }
 0x836   : > { %12726 = vmatpush3.bf16.msra.mxu0 %v14433_v52  ;;  %12748 = vmatpush3.bf16.msra.mxu1 %v14434_v24  ;;  %v14461_v24 = vld [vmem:[%s18910_s7 + $0x8] sm:$0xff]  }
 0x837   : > { %12727 = vmatprep.subr.bf16.mxu0 %v14435_v51  ;;  %12749 = vmatprep.subr.bf16.mxu1 %v14436_v5  ;;  %v14462_v51 = vld [vmem:[%s18910_s7 + $0x88] sm:$0xff]   ;;  %v14463_v5 = vld [vmem:[%s18910_s7 + $0x50] sm:$0xff]  }
 0x83a   : > { %12728 = vmatpush3.bf16.msra.mxu0 %v14437_v34  ;;  %12750 = vmatpush3.bf16.msra.mxu1 %v14438_v7  ;;  %v14464_v34 = vld [vmem:[%s18910_s7 + $0xd0] sm:$0xff]  }
 0x83b   : > { %12729 = vmatprep.subr.bf16.mxu0 %v14439_v49  ;;  %12751 = vmatprep.subr.bf16.mxu1 %v14440_v16  ;;  %v14465_v7 = vld [vmem:[%s18910_s7 + $0x10] sm:$0xff]   ;;  %v14467_v16 = vld [vmem:[%s18910_s7 + $0x58] sm:$0xff]  }
 0x83c   : > { %v14466_v49 = vld [vmem:[%s18910_s7 + $0x90] sm:$0xff]  }
 0x83e   : > { %12730 = vmatpush3.bf16.msra.mxu0 %v14441_v27  ;;  %12752 = vmatpush3.bf16.msra.mxu1 %v14442_v35  ;;  %v14468_v27 = vld [vmem:[%s18910_s7 + $0xd8] sm:$0xff]  }
 0x83f   : > { %12731 = vmatprep.subr.bf16.mxu0 %v14443_v58  ;;  %12753 = vmatprep.subr.bf16.mxu1 %v14444_v61  ;;  %v14469_v35 = vld [vmem:[%s18910_s7 + $0x18] sm:$0xff]   ;;  %v14471_v61 = vld [vmem:[%s18910_s7 + $0x60] sm:$0xff]  }
 0x840   : > { %v14470_v58 = vld [vmem:[%s18910_s7 + $0x98] sm:$0xff]  }
 0x842   : > { %12732 = vmatpush3.bf16.msra.mxu0 %v14445_v46  ;;  %12754 = vmatpush3.bf16.msra.mxu1 %v14446_v23  ;;  %v14472_v46 = vld [vmem:[%s18910_s7 + $0xe0] sm:$0xff]  }
 0x843   : > { %12733 = vmatprep.subr.bf16.mxu0 %v14447_v19  ;;  %12755 = vmatprep.subr.bf16.mxu1 %v14448_v20  ;;  %v14473_v23 = vld [vmem:[%s18910_s7 + $0x20] sm:$0xff]   ;;  %v14475_v20 = vld [vmem:[%s18910_s7 + $0x68] sm:$0xff]  }
 0x844   : > { %v14474_v19 = vld [vmem:[%s18910_s7 + $0xa0] sm:$0xff]  }
 0x846   : > { %12734 = vmatpush3.bf16.msra.mxu0 %v14449_v47  ;;  %12756 = vmatpush3.bf16.msra.mxu1 %v14450_v22  ;;  %v14476_v47 = vld [vmem:[%s18910_s7 + $0xe8] sm:$0xff]  }
 0x847   : > { %12735 = vmatprep.subr.bf16.mxu0 %v14451_v63  ;;  %12757 = vmatprep.subr.bf16.mxu1 %v14452_v0  ;;  %v14477_v22 = vld [vmem:[%s18910_s7 + $0x28] sm:$0xff]   ;;  %v14479_v0 = vld [vmem:[%s18910_s7 + $0x70] sm:$0xff]  }
 0x848   : > { %v14478_v63 = vld [vmem:[%s18910_s7 + $0xa8] sm:$0xff]  }
 0x84a   : > { %12736 = vmatpush3.bf16.msra.mxu0 %v14453_v18  ;;  %12758 = vmatpush3.bf16.msra.mxu1 %v14454_v21  ;;  %v14480_v18 = vld [vmem:[%s18910_s7 + $0xf0] sm:$0xff]  }
 0x84b   : > { %12765 = vmatprep.subr.bf16.mxu0 %v14455_v43  ;;  %12787 = vmatprep.subr.bf16.mxu1 %v14456_v62  ;;  %v14481_v21 = vld [vmem:[%s18910_s7 + $0x30] sm:$0xff]   ;;  %v14483_v62 = vld [vmem:[%s18910_s7 + $0x78] sm:$0xff]  }
 0x84c   : > { %v14482_v43 = vld [vmem:[%s18910_s7 + $0xb0] sm:$0xff]  }
 0x8f8   : > { %v18202_v13 = vpop.f32.mrb[144].mxu0  ;;  %v18204_v54 = vpop.f32.mrb[128].mxu1 }
 0x8f9   : > { %v8133_v31 = vpop.f32.mrb[145].mxu0  ;;  %v8174_v10 = vpop.f32.mrb[129].mxu1 }
 0x8fa   : > { %v8135_v11 = vpop.f32.mrb[146].mxu0  ;;  %v8176_v12 = vpop.f32.mrb[130].mxu1  ;;  %v8180_v57 = vpack.c.bf16 %v8133_v31, %v8133_v31  ;;  %v8182_v52 = vpack.c.bf16 %v8174_v10, %v8174_v10  ;;  %v14484_v31 = vld [vmem:[%s18910_s7 + $0xf8] sm:$0xff]  }
 0x8fb   : > { %v8136_v17 = vpop.f32.mrb[147].mxu0  ;;  %v8177_v45 = vpop.f32.mrb[131].mxu1  ;;  %v14485_v10 = vld [vmem:[%s18910_s7 + $0x38] sm:$0xff]   ;;  %v8179_v12 = vpack.c.bf16 %v18202_v13, %v18202_v13  ;;  %v14494_v13 = vld [vmem:[%s18910_s7 + $0x288] sm:$0xff]  }
 0x8fc   : > { %v14486_v11 = vld [vmem:[%s18910_s7 + $0xb8] sm:$0xff]   ;;  %v8181_v17 = vpack.c.bf16 %v18204_v54, %v18204_v54  ;;  %v14495_v54 = vld [vmem:[%s18910_s7 + $0x250] sm:$0xff]  }
 0x8fd   : > { %v14496_v45 = vld [vmem:[%s18910_s7 + $0x2d0] sm:$0xff]  }
 0x900   : > { %v8286_v14 = vpop.f32.mrb[148].mxu0  ;;  %v8327_v29 = vpop.f32.mrb[132].mxu1 }
 0x901   : > { %v8288_v38 = vpop.f32.mrb[149].mxu0  ;;  %v8329_v33 = vpop.f32.mrb[133].mxu1  ;;  %v8334_v3 = vpack.c.bf16 %v8286_v14, %v8286_v14  ;;  %v8336_v56 = vpack.c.bf16 %v8327_v29, %v8327_v29  ;;  %v14497_v14 = vld [vmem:[%s18910_s7 + $0x210] sm:$0xff]  }
 0x902   : > { %v8335_v15 = vpack.c.bf16 %v8288_v38, %v8288_v38  ;;  %v8337_v50 = vpack.c.bf16 %v8329_v33, %v8329_v33  ;;  %v8290_v40 = vpop.f32.mrb[150].mxu0  ;;  %v8331_v2 = vpop.f32.mrb[134].mxu1  ;;  %v14498_v29 = vld [vmem:[%s18910_s7 + $0x290] sm:$0xff]   ;;  %v14499_v38 = vld [vmem:[%s18910_s7 + $0x258] sm:$0xff]  }
 0x903   : > { %v8291_v25 = vpop.f32.mrb[151].mxu0  ;;  %v8332_v8 = vpop.f32.mrb[135].mxu1  ;;  %v14500_v33 = vld [vmem:[%s18910_s7 + $0x2d8] sm:$0xff]   ;;  %v14503_v40 = vld [vmem:[%s18910_s7 + $0x260] sm:$0xff]  }
 0x904   : > { %8627 = vmatprep.mubr.bf16.mxu0 %v8335_v15  ;;  %8667 = vmatprep.mubr.bf16.mxu1 %v8337_v50  ;;  %v14501_v15 = vld [vmem:[%s18910_s7 + $0x218] sm:$0xff]   ;;  %v14504_v2 = vld [vmem:[%s18910_s7 + $0x2e0] sm:$0xff]   ;;  %v14509_v25 = vld [vmem:[%s18910_s7 + $0x228] sm:$0xff]  }
 0x905   : > { %8628 = vmatmul.mubr.bf16.vlgmr.msra.gmra.mrb[152].mxu0 %v8334_v3  ;;  %8668 = vmatmul.mubr.bf16.vlgmr.msra.gmra.mrb[136].mxu1 %v8336_v56  ;;  %v14502_v50 = vld [vmem:[%s18910_s7 + $0x298] sm:$0xff]   ;;  %v14507_v3 = vld [vmem:[%s18910_s7 + $0x268] sm:$0xff]  }
 0x906   : > { %12766 = vmatpush3.bf16.msra.mxu0 %v14457_v26  ;;  %12788 = vmatpush3.bf16.msra.mxu1 %v14458_v37  ;;  %v14505_v26 = vld [vmem:[%s18910_s7 + $0x220] sm:$0xff]   ;;  %v14508_v56 = vld [vmem:[%s18910_s7 + $0x2e8] sm:$0xff]  }
 0x907   : > { %8899 = vmatprep.mubr.bf16.mxu0 %v8180_v57  ;;  %8939 = vmatprep.mubr.bf16.mxu1 %v8182_v52  ;;  %v14506_v37 = vld [vmem:[%s18910_s7 + $0x2a0] sm:$0xff]   ;;  %v14510_v8 = vld [vmem:[%s18910_s7 + $0x2a8] sm:$0xff]   ;;  %v14513_v57 = vld [vmem:[%s18910_s7 + $0x230] sm:$0xff]  }
 0x908   : > { %12767 = vmatprep.subr.bf16.mxu0 %v14459_v9  ;;  %12789 = vmatprep.subr.bf16.mxu1 %v14460_v53  ;;  %v14511_v9 = vld [vmem:[%s18910_s7 + $0x270] sm:$0xff]  }
 0x909   : > { %v14512_v53 = vld [vmem:[%s18910_s7 + $0x2f0] sm:$0xff]  }
 0x90a   : > { %12768 = vmatpush3.bf16.msra.mxu0 %v14461_v24  ;;  %12790 = vmatpush3.bf16.msra.mxu1 %v14462_v51  ;;  %v14514_v52 = vld [vmem:[%s18910_s7 + $0x2b0] sm:$0xff]   ;;  %v14515_v24 = vld [vmem:[%s18910_s7 + $0x278] sm:$0xff]  }
 0x90b   : > { %12769 = vmatprep.subr.bf16.mxu0 %v14463_v5  ;;  %12791 = vmatprep.subr.bf16.mxu1 %v14464_v34  ;;  %v14516_v51 = vld [vmem:[%s18910_s7 + $0x2f8] sm:$0xff]  }
 0x90c   : > { %v14517_v5 = vld [vmem:[%s18910_s7 + $0x238] sm:$0xff]  }
 0x90d   : > { %v14518_v34 = vld [vmem:[%s18910_s7 + $0x2b8] sm:$0xff]  }
 0x90e   : > { %12770 = vmatpush3.bf16.msra.mxu0 %v14465_v7  ;;  %12792 = vmatpush3.bf16.msra.mxu1 %v14466_v49 }
 0x90f   : > { %12771 = vmatprep.subr.bf16.mxu0 %v14467_v16  ;;  %12793 = vmatprep.subr.bf16.mxu1 %v14468_v27 }
 0x912   : > { %12772 = vmatpush3.bf16.msra.mxu0 %v14469_v35  ;;  %12794 = vmatpush3.bf16.msra.mxu1 %v14470_v58 }
 0x913   : > { %12773 = vmatprep.subr.bf16.mxu0 %v14471_v61  ;;  %12795 = vmatprep.subr.bf16.mxu1 %v14472_v46 }
 0x916   : > { %12774 = vmatpush3.bf16.msra.mxu0 %v14473_v23  ;;  %12796 = vmatpush3.bf16.msra.mxu1 %v14474_v19 }
 0x917   : > { %12775 = vmatprep.subr.bf16.mxu0 %v14475_v20  ;;  %12797 = vmatprep.subr.bf16.mxu1 %v14476_v47 }
 0x91a   : > { %12776 = vmatpush3.bf16.msra.mxu0 %v14477_v22  ;;  %12798 = vmatpush3.bf16.msra.mxu1 %v14478_v63 }
 0x91b   : > { %12777 = vmatprep.subr.bf16.mxu0 %v14479_v0  ;;  %12799 = vmatprep.subr.bf16.mxu1 %v14480_v18 }
 0x91e   : > { %12778 = vmatpush3.bf16.msra.mxu0 %v14481_v21  ;;  %12800 = vmatpush3.bf16.msra.mxu1 %v14482_v43 }
 0x91f   : > { %12779 = vmatprep.subr.bf16.mxu0 %v14483_v62  ;;  %12801 = vmatprep.subr.bf16.mxu1 %v14484_v31 }
 0x922   : > { %12780 = vmatpush3.bf16.msra.mxu0 %v14485_v10  ;;  %12802 = vmatpush3.bf16.msra.mxu1 %v14486_v11 }
 0x923   : > { %8952 = vmatprep.subr.bf16.mxu0 %v18050_v42  ;;  %8993 = vmatprep.subr.bf16.mxu1 %v18052_v60  ;;  %v14488_v42 = vld [vmem:[%s18910_s7 + $0x2c0] sm:$0xff]  }
 0x924   : > { %v14489_v60 = vld [vmem:[%s18910_s7 + $0x200] sm:$0xff]  }
 0x925   : > { %8900 = vmatmul.mubr.bf16.vlgmr.msra.gmra.mrb[156].mxu0 %v8179_v12  ;;  %8940 = vmatmul.mubr.bf16.vlgmr.msra.gmra.mrb[140].mxu1 %v8181_v17 }
 0x926   : > { %8953 = vmatpush1.bf16.msra.mxu0 %v18046_v59  ;;  %8994 = vmatpush1.bf16.msra.mxu1 %v18048_v30  ;;  %v12391_v59 = vld [vmem:[%s18912_s9 + $0x8] sm:$0xf]  ;;  %v14487_v30 = vld [vmem:[%s18910_s7 + $0x240] sm:$0xff]  }
 0x927   : > { %12392 = vmatprep.subr.msk.bf16.mxu0 %vm826_vm1, %v18062_v55  ;;  %12394 = vmatprep.subr.msk.bf16.mxu1 %vm826_vm1, %v18064_v1  ;;  %v14490_v55 = vld [vmem:[%s18910_s7 + $0x280] sm:$0xff]   ;;  %v14491_v1 = vld [vmem:[%s18910_s7 + $0x248] sm:$0xff]  }
 0x928   : > { %8984 = vmatprep.mubr.bf16.mxu0 %v14791_v6  ;;  %9025 = vmatprep.mubr.bf16.mxu1 %v14791_v6 }
 0x92a   : > { %8955 = vmatpush1.bf16.msra.mxu0 %v18067_v4  ;;  %8996 = vmatpush1.bf16.msra.mxu1 %v18070_v48  ;;  %v14492_v4 = vld [vmem:[%s18910_s7 + $0x2c8] sm:$0xff]  }
 0x92b   : > { %12809 = vmatprep.subr.bf16.mxu0 %v14487_v30  ;;  %12831 = vmatprep.subr.bf16.mxu1 %v14488_v42  ;;  %v14493_v48 = vld [vmem:[%s18910_s7 + $0x208] sm:$0xff]  }
 0x92d   : > { %12393 = vmatmul.mubr.msk.bf16.vlgmr.msra.gmra.mrb[160].mxu0 %vm8081_vm4, %v12391_v59  ;;  %12395 = vmatmul.mubr.msk.bf16.vlgmr.msra.gmra.mrb[144].mxu1 %vm8081_vm4, %v12391_v59 }
 0x92e   : > { %12810 = vmatpush3.bf16.msra.mxu0 %v14489_v60  ;;  %12832 = vmatpush3.bf16.msra.mxu1 %v14490_v55 }
 0x92f   : > { %12811 = vmatprep.subr.bf16.mxu0 %v14491_v1  ;;  %12833 = vmatprep.subr.bf16.mxu1 %v14492_v4 }
 0x932   : > { %12812 = vmatpush3.bf16.msra.mxu0 %v14493_v48  ;;  %12834 = vmatpush3.bf16.msra.mxu1 %v14494_v13 }
 0x933   : > { %12813 = vmatprep.subr.bf16.mxu0 %v14495_v54  ;;  %12835 = vmatprep.subr.bf16.mxu1 %v14496_v45 }
 0x936   : > { %12814 = vmatpush3.bf16.msra.mxu0 %v14497_v14  ;;  %12836 = vmatpush3.bf16.msra.mxu1 %v14498_v29  ;;  %v14792_v14 = vmov 0.0  }
 0x937   : > { %12815 = vmatprep.subr.bf16.mxu0 %v14499_v38  ;;  %12837 = vmatprep.subr.bf16.mxu1 %v14500_v33 }
 0x93a   : > { %12816 = vmatpush3.bf16.msra.mxu0 %v14501_v15  ;;  %12838 = vmatpush3.bf16.msra.mxu1 %v14502_v50 }
 0x93b   : > { %12817 = vmatprep.subr.bf16.mxu0 %v14503_v40  ;;  %12839 = vmatprep.subr.bf16.mxu1 %v14504_v2 }
 0x93e   : > { %12818 = vmatpush3.bf16.msra.mxu0 %v14505_v26  ;;  %12840 = vmatpush3.bf16.msra.mxu1 %v14506_v37 }
 0x93f   : > { %12819 = vmatprep.subr.bf16.mxu0 %v14507_v3  ;;  %12841 = vmatprep.subr.bf16.mxu1 %v14508_v56 }
 0x942   : > { %12820 = vmatpush3.bf16.msra.mxu0 %v14509_v25  ;;  %12842 = vmatpush3.bf16.msra.mxu1 %v14510_v8  ;;  %v12492_v25 = vld [vmem:[%s18911_s8] ss:$0 sm:$0xff] }
 0x943   : > { %12821 = vmatprep.subr.bf16.mxu0 %v14511_v9  ;;  %12843 = vmatprep.subr.bf16.mxu1 %v14512_v53 }
 0x946   : > { %12822 = vmatpush3.bf16.msra.mxu0 %v14513_v57  ;;  %12844 = vmatpush3.bf16.msra.mxu1 %v14514_v52 }
 0x947   : > { %12823 = vmatprep.subr.bf16.mxu0 %v14515_v24  ;;  %12845 = vmatprep.subr.bf16.mxu1 %v14516_v51  ;;  %v12494_v24 = vld [vmem:[%s18915_s12 + $0x2] sm:$0x3]  ;;  %v9386_v51 = vld [vmem:[%s18915_s12] sm:$0x3] }
 0x94a   : > { %12824 = vmatpush3.bf16.msra.mxu0 %v14517_v5  ;;  %12846 = vmatpush3.bf16.msra.mxu1 %v14518_v34  ;;  %v14519_v5 = vld [vmem:[%s18913_s10 + $0x40] sm:$0xff]  }
 0x94b   : > { %12886 = vmatprep.subr.bf16.mxu0 %v14792_v14  ;;  %12892 = vmatprep.subr.bf16.mxu1 %v14792_v14  ;;  %v14521_v34 = vld [vmem:[%s18913_s10] sm:$0xff]  }
 0x9d8   : > { %v12737_v7 = vpop.f32.mrb[152].mxu0  ;;  %v12759_v49 = vpop.f32.mrb[136].mxu1 }
 0x9d9   : > { %v12738_v16 = vpop.f32.mrb[153].mxu0  ;;  %v12760_v27 = vpop.f32.mrb[137].mxu1 }
 0x9da   : > { %v12739_v35 = vadd.f32 %v12738_v16, %v12737_v7  ;;  %v12761_v58 = vadd.f32 %v12760_v27, %v12759_v49  ;;  %v12740_v61 = vpop.f32.mrb[154].mxu0  ;;  %v12762_v46 = vpop.f32.mrb[138].mxu1  ;;  %v14520_v7 = vld [vmem:[%s18913_s10 + $0x48] sm:$0xff]   ;;  %v14522_v16 = vld [vmem:[%s18913_s10 + $0x50] sm:$0xff]  }
 0x9db   : > { %v12741_v23 = vpop.f32.mrb[155].mxu0  ;;  %v12763_v19 = vpop.f32.mrb[139].mxu1  ;;  %v14523_v49 = vld [vmem:[%s18913_s10 + $0x8] sm:$0xff]   ;;  %v14525_v27 = vld [vmem:[%s18913_s10 + $0x10] sm:$0xff]   ;;  %v14526_v61 = vld [vmem:[%s18913_s10 + $0x60] sm:$0xff]  }
 0x9dc   : > { %v8670_v20 = vadd.f32 %v12761_v58, %v12739_v35  ;;  %v14524_v35 = vld [vmem:[%s18913_s10 + $0x58] sm:$0xff]   ;;  %v14529_v46 = vld [vmem:[%s18913_s10 + $0x20] sm:$0xff]   ;;  %v14528_v23 = vld [vmem:[%s18913_s10 + $0x68] sm:$0xff]  }
 0x9dd   : > { %v14527_v58 = vld [vmem:[%s18913_s10 + $0x18] sm:$0xff]   ;;  %v14531_v19 = vld [vmem:[%s18913_s10 + $0x28] sm:$0xff]  }
 0x9f8   : > { %v12781_v47 = vpop.f32.mrb[156].mxu0  ;;  %v12803_v22 = vpop.f32.mrb[140].mxu1 }
 0x9f9   : > { %v12782_v63 = vpop.f32.mrb[157].mxu0  ;;  %v12804_v0 = vpop.f32.mrb[141].mxu1 }
 0x9fa   : > { %v12783_v18 = vadd.f32 %v12782_v63, %v12781_v47  ;;  %v12805_v21 = vadd.f32 %v12804_v0, %v12803_v22  ;;  %v12784_v43 = vpop.f32.mrb[158].mxu0  ;;  %v12806_v62 = vpop.f32.mrb[142].mxu1  ;;  %v14532_v47 = vld [vmem:[%s18913_s10 + $0x78] sm:$0xff]   ;;  %v14533_v22 = vld [vmem:[%s18913_s10 + $0x30] sm:$0xff]  }
 0x9fb   : > { %v12785_v31 = vpop.f32.mrb[159].mxu0  ;;  %v12807_v10 = vpop.f32.mrb[143].mxu1  ;;  %v14534_v63 = vld [vmem:[%s18913_s10 + $0x38] sm:$0xff]  }
 0x9fc   : > { %v8902_v11 = vadd.f32 %v12783_v18, %v8670_v20  ;;  %v14530_v20 = vld [vmem:[%s18913_s10 + $0x70] sm:$0xff]   ;;  %v14535_v10 = vld [vmem:[%s18913_s10 + $0x80] sm:$0xff]  }
 0x9fe   : > { %v8942_v12 = vadd.f32 %v12805_v21, %v8902_v11 }
 0xa00   : > { %v8986_v17 = vpop.f32.mrb[160].mxu0  ;;  %v9027_v59 = vpop.f32.mrb[144].mxu1 }
 0xa01   : > { %v8988_v30 = vpop.f32.mrb[161].mxu0  ;;  %v9029_v42 = vpop.f32.mrb[145].mxu1  ;;  %v9034_v48 = vpack.c.bf16 %v8986_v17, %v8986_v17  ;;  %v9036_v13 = vpack.c.bf16 %v9027_v59, %v9027_v59 }
 0xa02   : > { %v9035_v60 = vpack.c.bf16 %v8988_v30, %v8988_v30  ;;  %v9037_v55 = vpack.c.bf16 %v9029_v42, %v9029_v42  ;;  %v8990_v1 = vpop.f32.mrb[162].mxu0  ;;  %v9031_v4 = vpop.f32.mrb[146].mxu1  ;;  %v14536_v30 = vld [vmem:[%s18913_s10 + $0x88] sm:$0xff]   ;;  %v12528_v42 = vld [vmem:[%s18915_s12 + $0x4] sm:$0x3] }
 0xa03   : > { %v8991_v54 = vpop.f32.mrb[163].mxu0  ;;  %v9032_v45 = vpop.f32.mrb[147].mxu1  ;;  %v14539_v1 = vld [vmem:[%s18913_s10 + $0xa0] sm:$0xff]   ;;  %v14540_v4 = vld [vmem:[%s18913_s10 + $0xa8] sm:$0xff]  }
 0xa04   : > { %9327 = vmatprep.mubr.bf16.mxu0 %v9035_v60  ;;  %9367 = vmatprep.mubr.bf16.mxu1 %v9037_v55  ;;  %v14537_v60 = vld [vmem:[%s18913_s10 + $0x90] sm:$0xff]   ;;  %v14538_v55 = vld [vmem:[%s18913_s10 + $0x98] sm:$0xff]  }
 0xa05   : > { %9328 = vmatmul.mubr.bf16.vlgmr.msra.gmra.mrb[164].mxu0 %v9034_v48  ;;  %9368 = vmatmul.mubr.bf16.vlgmr.msra.gmra.mrb[148].mxu1 %v9036_v13  ;;  %v14541_v48 = vld [vmem:[%s18913_s10 + $0xb0] sm:$0xff]   ;;  %v14542_v13 = vld [vmem:[%s18913_s10 + $0xb8] sm:$0xff]  }
 0xa06   : > { %12894 = vmatprep.mubr.msk.bf16.mxu1 %vm14793_vm5, %v14792_v14  ;;  %12888 = vmatprep.mubr.msk.bf16.mxu0 %vm14793_vm5, %v14792_v14  ;;  %v14543_v54 = vld [vmem:[%s18916_s13 + $0x100] ss:$16 sps:$4 sm:$0xff]   ;;  %v14545_v45 = vld [vmem:[%s18916_s13 + $0x104] ss:$16 sps:$4 sm:$0xff]  }
 0xad8   : > { %v12825_v29 = vpop.f32.mrb[164].mxu0  ;;  %v12847_v38 = vpop.f32.mrb[148].mxu1 }
 0xad9   : > { %v12826_v33 = vpop.f32.mrb[165].mxu0  ;;  %v12848_v15 = vpop.f32.mrb[149].mxu1 }
 0xada   : > { %v12827_v50 = vadd.f32 %v12826_v33, %v12825_v29  ;;  %v12849_v40 = vadd.f32 %v12848_v15, %v12847_v38  ;;  %v12828_v2 = vpop.f32.mrb[166].mxu0  ;;  %v12850_v26 = vpop.f32.mrb[150].mxu1  ;;  %v14548_v29 = vld [vmem:[%s18916_s13 + $0x10c] ss:$16 sps:$4 sm:$0xff]   ;;  %v14549_v38 = vld [vmem:[%s18916_s13 + $0x120] ss:$16 sps:$4 sm:$0xff]  }
 0xadb   : > { %v12829_v37 = vpop.f32.mrb[167].mxu0  ;;  %v12851_v3 = vpop.f32.mrb[151].mxu1  ;;  %v14557_v33 = vld [vmem:[%s18916_s13 + $0x144] ss:$16 sps:$4 sm:$0xff]   ;;  %v14555_v15 = vld [vmem:[%s18916_s13 + $0x140] ss:$16 sps:$4 sm:$0xff]  }
 0xadc   : > { %v9370_v56 = vadd.f32 %v12849_v40, %v12827_v50  ;;  %v14563_v50 = vld [vmem:[%s18916_s13 + $0x164] ss:$16 sps:$4 sm:$0xff]   ;;  %v14561_v40 = vld [vmem:[%s18916_s13 + $0x160] ss:$16 sps:$4 sm:$0xff]  }
 0xadd   : > { %v14569_v2 = vld [vmem:[%s18916_s13 + $0x184] ss:$16 sps:$4 sm:$0xff]   ;;  %v14567_v26 = vld [vmem:[%s18916_s13 + $0x180] ss:$16 sps:$4 sm:$0xff]  }
 0xade   : > { %v9375_v8 = vadd.f32 %v9370_v56, %v8942_v12  ;;  %v14575_v37 = vld [vmem:[%s18916_s13 + $0x1a4] ss:$16 sps:$4 sm:$0xff]   ;;  %v14573_v3 = vld [vmem:[%s18916_s13 + $0x1a0] ss:$16 sps:$4 sm:$0xff]  }
 0xae0   : > { %v9383_v9 = vadd.f32 %v12492_v25, %v9375_v8 }
 0xae2   : > { %v9384_v53 = vmax.f32 %v9383_v9, 0.0 }
 0xae4   : > { %v9385_v57 = vpack.c.bf16 %v9384_v53, %v9384_v53 }
 0xae6   : > { %v18422_v52 = vsel %vm9391_vm6, %v9385_v57, 0 }
 0xae7   : > { %12887 = vmatpush3.bf16.msra.mxu0 %v18422_v52  ;;  %12893 = vmatpush3.bf16.msra.mxu1 %v18422_v52 }
 0xae8   : > { %12898 = vmatprep.subr.bf16.mxu0 %v14792_v14  ;;  %12918 = vmatprep.subr.bf16.mxu1 %v14792_v14 }
 0xaea   : > { %12895 = vmatmul.mubr.msk.bf16.vlgmr.msra.gmra.mrb[152].mxu1 %vm9387_vm7, %v12494_v24  ;;  %12889 = vmatmul.mubr.msk.bf16.vlgmr.msra.gmra.mrb[168].mxu0 %vm9387_vm7, %v9386_v51 }
 0xaeb   : > { %12899 = vmatpush3.bf16.msra.mxu0 %v14519_v5  ;;  %12919 = vmatpush3.bf16.msra.mxu1 %v14521_v34  ;;  %v14546_v34 = vld [vmem:[%s18916_s13 + $0x108] ss:$16 sps:$4 sm:$0xff]  }
 0xaec   : > { %12900 = vmatprep.subr.bf16.mxu0 %v14792_v14  ;;  %12920 = vmatprep.subr.bf16.mxu1 %v14792_v14 }
 0xaed   : > { %12914 = vmatprep.mubr.msk.bf16.mxu0 %vm14793_vm5, %v14792_v14  ;;  %12934 = vmatprep.mubr.msk.bf16.mxu1 %vm14793_vm5, %v14792_v14 }
 0xaef   : > { %12901 = vmatpush3.bf16.msra.mxu0 %v14520_v7  ;;  %12921 = vmatpush3.bf16.msra.mxu1 %v14523_v49 }
 0xaf0   : > { %12902 = vmatprep.subr.bf16.mxu0 %v14792_v14  ;;  %12922 = vmatprep.subr.bf16.mxu1 %v14792_v14 }
 0xaf3   : > { %12903 = vmatpush3.bf16.msra.mxu0 %v14522_v16  ;;  %12923 = vmatpush3.bf16.msra.mxu1 %v14525_v27  ;;  %v14554_v16 = vld [vmem:[%s18916_s13 + $0x12c] ss:$16 sps:$4 sm:$0xff]  }
 0xaf4   : > { %12904 = vmatprep.subr.bf16.mxu0 %v14792_v14  ;;  %12924 = vmatprep.subr.bf16.mxu1 %v14792_v14 }
 0xaf7   : > { %12905 = vmatpush3.bf16.msra.mxu0 %v14524_v35  ;;  %12925 = vmatpush3.bf16.msra.mxu1 %v14527_v58  ;;  %v14552_v58 = vld [vmem:[%s18916_s13 + $0x128] ss:$16 sps:$4 sm:$0xff]  }
 0xaf8   : > { %12906 = vmatprep.subr.bf16.mxu0 %v14792_v14  ;;  %12926 = vmatprep.subr.bf16.mxu1 %v14792_v14 }
 0xafb   : > { %12907 = vmatpush3.bf16.msra.mxu0 %v14526_v61  ;;  %12927 = vmatpush3.bf16.msra.mxu1 %v14529_v46  ;;  %v14560_v61 = vld [vmem:[%s18916_s13 + $0x14c] ss:$16 sps:$4 sm:$0xff]   ;;  %v14558_v46 = vld [vmem:[%s18916_s13 + $0x148] ss:$16 sps:$4 sm:$0xff]  }
 0xafc   : > { %12908 = vmatprep.subr.bf16.mxu0 %v14792_v14  ;;  %12928 = vmatprep.subr.bf16.mxu1 %v14792_v14 }
 0xaff   : > { %12909 = vmatpush3.bf16.msra.mxu0 %v14528_v23  ;;  %12929 = vmatpush3.bf16.msra.mxu1 %v14531_v19  ;;  %v14566_v23 = vld [vmem:[%s18916_s13 + $0x16c] ss:$16 sps:$4 sm:$0xff]   ;;  %v14564_v19 = vld [vmem:[%s18916_s13 + $0x168] ss:$16 sps:$4 sm:$0xff]  }
 0xb00   : > { %12910 = vmatprep.subr.bf16.mxu0 %v14792_v14  ;;  %12930 = vmatprep.subr.bf16.mxu1 %v14792_v14 }
 0xb03   : > { %12911 = vmatpush3.bf16.msra.mxu0 %v14530_v20  ;;  %12931 = vmatpush3.bf16.msra.mxu1 %v14533_v22  ;;  %v14572_v20 = vld [vmem:[%s18916_s13 + $0x18c] ss:$16 sps:$4 sm:$0xff]  }
 0xb04   : > { %12912 = vmatprep.subr.bf16.mxu0 %v14792_v14  ;;  %12932 = vmatprep.subr.bf16.mxu1 %v14792_v14  ;;  %v14578_v22 = vld [vmem:[%s18916_s13 + $0x1ac] ss:$16 sps:$4 sm:$0xff]  }
 0xb07   : > { %12913 = vmatpush3.bf16.msra.mxu0 %v14532_v47  ;;  %12933 = vmatpush3.bf16.msra.mxu1 %v14534_v63  ;;  %v14570_v47 = vld [vmem:[%s18916_s13 + $0x188] ss:$16 sps:$4 sm:$0xff]  }
 0xb08   : > { %12938 = vmatprep.subr.bf16.mxu0 %v14792_v14  ;;  %12944 = vmatprep.subr.bf16.mxu1 %v14792_v14  ;;  %v14576_v63 = vld [vmem:[%s18916_s13 + $0x1a8] ss:$16 sps:$4 sm:$0xff]  }
 0xbbd   : > { %v9491_v0 = vpop.f32.mrb[152].mxu1  ;;  %v9429_v18 = vpop.f32.mrb[168].mxu0 }
 0xbbe   : > { %v9497_v21 = vpack.c.bf16 %v9491_v0, %v9491_v0  ;;  %v12896_v43 = vpop.f32.mrb[153].mxu1  ;;  %v9435_v62 = vpack.c.bf16 %v9429_v18, %v9429_v18  ;;  %v12890_v31 = vpop.f32.mrb[169].mxu0  ;;  %v14581_v0 = vld [vmem:[%s18916_s13 + $0x1c4] ss:$16 sps:$4 sm:$0xff]   ;;  %v14584_v18 = vld [vmem:[%s18916_s13 + $0x1cc] ss:$16 sps:$4 sm:$0xff]  }
 0xbbf   : > { %v9494_v11 = vpop.f32.mrb[154].mxu1  ;;  %v9432_v12 = vpop.f32.mrb[170].mxu0  ;;  %v14582_v43 = vld [vmem:[%s18916_s13 + $0x1c8] ss:$16 sps:$4 sm:$0xff]   ;;  %v14590_v31 = vld [vmem:[%s18916_s13 + $0x1ec] ss:$16 sps:$4 sm:$0xff]  }
 0xbc0   : > { %12915 = vmatmul.mubr.bf16.vlgmr.msra.gmra.mrb[172].mxu0 %v9497_v21  ;;  %v12897_v17 = vpop.f32.mrb[155].mxu1  ;;  %12935 = vmatmul.mubr.bf16.vlgmr.msra.gmra.mrb[156].mxu1 %v9435_v62  ;;  %v12891_v59 = vpop.f32.mrb[171].mxu0  ;;  %v14579_v21 = vld [vmem:[%s18916_s13 + $0x1c0] ss:$16 sps:$4 sm:$0xff]   ;;  %v14587_v62 = vld [vmem:[%s18916_s13 + $0x1e4] ss:$16 sps:$4 sm:$0xff]  }
 0xbc1   : > { %12939 = vmatpush3.bf16.msra.mxu0 %v18422_v52  ;;  %12940 = vmatprep.mubr.msk.bf16.mxu0 %vm14793_vm5, %v14792_v14  ;;  %v14588_v11 = vld [vmem:[%s18916_s13 + $0x1e8] ss:$16 sps:$4 sm:$0xff]   ;;  %v14593_v12 = vld [vmem:[%s18916_s13 + $0x4] ss:$16 sps:$4 sm:$0xff]   ;;  %v14596_v17 = vld [vmem:[%s18916_s13 + $0xc] ss:$16 sps:$4 sm:$0xff]  }
 0xbc2   : > { %12945 = vmatpush3.bf16.msra.mxu1 %v14535_v10  ;;  %12960 = vmatprep.mubr.msk.bf16.mxu1 %vm14793_vm5, %v14792_v14  ;;  %v14585_v10 = vld [vmem:[%s18916_s13 + $0x1e0] ss:$16 sps:$4 sm:$0xff]  }
 0xbc3   : > { %12946 = vmatprep.subr.bf16.mxu1 %v14792_v14  ;;  %10082 = vmatprep.subr.bf16.mxu0 %v14545_v45  ;;  %v14594_v45 = vld [vmem:[%s18916_s13 + $0x8] ss:$16 sps:$4 sm:$0xff]  }
 0xbc6   : > { %12947 = vmatpush3.bf16.msra.mxu1 %v14536_v30  ;;  %v12554_v30 = vld [vmem:[%s18914_s11] ss:$0 sm:$0xff] }
 0xbc7   : > { %12948 = vmatprep.subr.bf16.mxu1 %v14792_v14 }
 0xbc8   : > { %12941 = vmatmul.mubr.msk.bf16.vlgmr.msra.gmra.mrb[176].mxu0 %vm9387_vm7, %v12528_v42 }
 0xbc9   : > { %10114 = vmatprep.mubr.bf16.mxu0 %v14791_v6  ;;  %10083 = vmatpush1.bf16.msra.mxu0 %v14543_v54  ;;  %v14591_v54 = vld [vmem:[%s18916_s13] ss:$16 sps:$4 sm:$0xff]  }
 0xbca   : > { %12949 = vmatpush3.bf16.msra.mxu1 %v14537_v60 }
 0xbcb   : > { %12950 = vmatprep.subr.bf16.mxu1 %v14792_v14 }
 0xbce   : > { %12951 = vmatpush3.bf16.msra.mxu1 %v14538_v55 }
 0xbcf   : > { %12952 = vmatprep.subr.bf16.mxu1 %v14792_v14 }
 0xbd2   : > { %12953 = vmatpush3.bf16.msra.mxu1 %v14539_v1 }
 0xbd3   : > { %12954 = vmatprep.subr.bf16.mxu1 %v14792_v14 }
 0xbd6   : > { %12955 = vmatpush3.bf16.msra.mxu1 %v14540_v4 }
 0xbd7   : > { %12956 = vmatprep.subr.bf16.mxu1 %v14792_v14 }
 0xbda   : > { %12957 = vmatpush3.bf16.msra.mxu1 %v14541_v48 }
 0xbdb   : > { %12958 = vmatprep.subr.bf16.mxu1 %v14792_v14  ;;  %v14551_v14 = vld [vmem:[%s18916_s13 + $0x124] ss:$16 sps:$4 sm:$0xff]  }
 0xbdc   : > { %10084 = vmatprep.subr.bf16.mxu0 %v14551_v14  ;;  %v14599_v14 = vld [vmem:[%s18916_s13 + $0x24] ss:$16 sps:$4 sm:$0xff]  }
 0xbdd   : > { %10085 = vmatpush1.bf16.msra.mxu0 %v14549_v38  ;;  %v14602_v38 = vld [vmem:[%s18916_s13 + $0x2c] ss:$16 sps:$4 sm:$0xff]  }
 0xbde   : > { %12959 = vmatpush3.bf16.msra.mxu1 %v14542_v13  ;;  %10086 = vmatprep.subr.bf16.mxu0 %v14557_v33  ;;  %v14597_v33 = vld [vmem:[%s18916_s13 + $0x20] ss:$16 sps:$4 sm:$0xff]  }
 0xbdf   : > { %10123 = vmatprep.subr.bf16.mxu1 %v14548_v29 }
 0xbe1   : > { %10087 = vmatpush1.bf16.msra.mxu0 %v14555_v15  ;;  %v14600_v15 = vld [vmem:[%s18916_s13 + $0x28] ss:$16 sps:$4 sm:$0xff]  }
 0xbe2   : > { %10088 = vmatprep.subr.bf16.mxu0 %v14563_v50  ;;  %v14605_v50 = vld [vmem:[%s18916_s13 + $0x44] ss:$16 sps:$4 sm:$0xff]  }
 0xbe5   : > { %10089 = vmatpush1.bf16.msra.mxu0 %v14561_v40  ;;  %v14608_v40 = vld [vmem:[%s18916_s13 + $0x4c] ss:$16 sps:$4 sm:$0xff]  }
 0xbe6   : > { %10090 = vmatprep.subr.bf16.mxu0 %v14569_v2  ;;  %v14603_v2 = vld [vmem:[%s18916_s13 + $0x40] ss:$16 sps:$4 sm:$0xff]  }
 0xbe9   : > { %10091 = vmatpush1.bf16.msra.mxu0 %v14567_v26  ;;  %v14606_v26 = vld [vmem:[%s18916_s13 + $0x48] ss:$16 sps:$4 sm:$0xff]  }
 0xbea   : > { %10092 = vmatprep.subr.bf16.mxu0 %v14575_v37  ;;  %v14611_v37 = vld [vmem:[%s18916_s13 + $0x64] ss:$16 sps:$4 sm:$0xff]  }
 0xbed   : > { %10093 = vmatpush1.bf16.msra.mxu0 %v14573_v3  ;;  %v14614_v3 = vld [vmem:[%s18916_s13 + $0x6c] ss:$16 sps:$4 sm:$0xff]  }
 0xbee   : > { %10094 = vmatprep.subr.bf16.mxu0 %v14581_v0  ;;  %v14648_v0 = vld [vmem:[%s18916_s13 + $0x228] ss:$16 sps:$4 sm:$0xff]  }
 0xbf1   : > { %10095 = vmatpush1.bf16.msra.mxu0 %v14579_v21  ;;  %v14656_v21 = vld [vmem:[%s18916_s13 + $0x24c] ss:$16 sps:$4 sm:$0xff]  }
 0xbf2   : > { %10096 = vmatprep.subr.bf16.mxu0 %v14587_v62  ;;  %v14654_v62 = vld [vmem:[%s18916_s13 + $0x248] ss:$16 sps:$4 sm:$0xff]  }
 0xbf5   : > { %10097 = vmatpush1.bf16.msra.mxu0 %v14585_v10  ;;  %v14657_v10 = vld [vmem:[%s18916_s13 + $0x260] ss:$16 sps:$4 sm:$0xff]  }
 0xbf6   : > { %10324 = vmatprep.subr.bf16.mxu0 %v14593_v12  ;;  %v14665_v12 = vld [vmem:[%s18916_s13 + $0x284] ss:$16 sps:$4 sm:$0xff]  }
 0xc93   : > { %v9597_v56 = vpop.f32.mrb[172].mxu0  ;;  %v9685_v25 = vpop.f32.mrb[156].mxu1 }
 0xc94   : > { %v12916_v8 = vpop.f32.mrb[173].mxu0  ;;  %v9686_v9 = vadd.f32 %v9685_v25, %v9597_v56  ;;  %v12936_v53 = vpop.f32.mrb[157].mxu1  ;;  %v14609_v56 = vld [vmem:[%s18916_s13 + $0x60] ss:$16 sps:$4 sm:$0xff]   ;;  %v14612_v25 = vld [vmem:[%s18916_s13 + $0x68] ss:$16 sps:$4 sm:$0xff]  }
 0xc95   : > { %v9600_v57 = vpop.f32.mrb[174].mxu0  ;;  %v9688_v52 = vpop.f32.mrb[158].mxu1  ;;  %v14617_v8 = vld [vmem:[%s18916_s13 + $0x84] ss:$16 sps:$4 sm:$0xff]   ;;  %v14615_v53 = vld [vmem:[%s18916_s13 + $0x80] ss:$16 sps:$4 sm:$0xff]  }
 0xc96   : > { %v12917_v24 = vpop.f32.mrb[175].mxu0  ;;  %v12937_v51 = vpop.f32.mrb[159].mxu1  ;;  %v14618_v57 = vld [vmem:[%s18916_s13 + $0x88] ss:$16 sps:$4 sm:$0xff]   ;;  %v14623_v52 = vld [vmem:[%s18916_s13 + $0xa4] ss:$16 sps:$4 sm:$0xff]  }
 0xc97   : > { %v14626_v24 = vld [vmem:[%s18916_s13 + $0xac] ss:$16 sps:$4 sm:$0xff]   ;;  %v14621_v51 = vld [vmem:[%s18916_s13 + $0xa0] ss:$16 sps:$4 sm:$0xff]  }
 0xc9b   : > { %v9730_v5 = vpop.f32.mrb[176].mxu0 }
 0xc9c   : > { %v9736_v7 = vpack.c.bf16 %v9730_v5, %v9730_v5  ;;  %v12942_v49 = vpop.f32.mrb[177].mxu0  ;;  %v14624_v5 = vld [vmem:[%s18916_s13 + $0xa8] ss:$16 sps:$4 sm:$0xff]  }
 0xc9d   : > { %v9733_v27 = vpop.f32.mrb[178].mxu0  ;;  %v14627_v49 = vld [vmem:[%s18916_s13 + $0xc0] ss:$16 sps:$4 sm:$0xff]  }
 0xc9e   : > { %12961 = vmatmul.mubr.bf16.vlgmr.msra.gmra.mrb[160].mxu1 %v9736_v7  ;;  %v12943_v35 = vpop.f32.mrb[179].mxu0  ;;  %v14632_v7 = vld [vmem:[%s18916_s13 + $0xcc] ss:$16 sps:$4 sm:$0xff]   ;;  %v14635_v27 = vld [vmem:[%s18916_s13 + $0xe4] ss:$16 sps:$4 sm:$0xff]  }
 0xc9f   : > { %10124 = vmatpush1.bf16.msra.mxu1 %v14546_v34  ;;  %10155 = vmatprep.mubr.bf16.mxu1 %v14791_v6  ;;  %v14629_v34 = vld [vmem:[%s18916_s13 + $0xc4] ss:$16 sps:$4 sm:$0xff]   ;;  %v14638_v35 = vld [vmem:[%s18916_s13 + $0xec] ss:$16 sps:$4 sm:$0xff]  }
 0xca0   : > { %10125 = vmatprep.subr.bf16.mxu1 %v14554_v16  ;;  %v14630_v16 = vld [vmem:[%s18916_s13 + $0xc8] ss:$16 sps:$4 sm:$0xff]  }
 0xca3   : > { %10126 = vmatpush1.bf16.msra.mxu1 %v14552_v58  ;;  %v14633_v58 = vld [vmem:[%s18916_s13 + $0xe0] ss:$16 sps:$4 sm:$0xff]  }
 0xca4   : > { %10127 = vmatprep.subr.bf16.mxu1 %v14560_v61  ;;  %v14636_v61 = vld [vmem:[%s18916_s13 + $0xe8] ss:$16 sps:$4 sm:$0xff]  }
 0xca7   : > { %10128 = vmatpush1.bf16.msra.mxu1 %v14558_v46  ;;  %v14641_v46 = vld [vmem:[%s18916_s13 + $0x204] ss:$16 sps:$4 sm:$0xff]  }
 0xca8   : > { %10129 = vmatprep.subr.bf16.mxu1 %v14566_v23  ;;  %v14644_v23 = vld [vmem:[%s18916_s13 + $0x20c] ss:$16 sps:$4 sm:$0xff]  }
 0xcab   : > { %10130 = vmatpush1.bf16.msra.mxu1 %v14564_v19  ;;  %v14639_v19 = vld [vmem:[%s18916_s13 + $0x200] ss:$16 sps:$4 sm:$0xff]  }
 0xcac   : > { %10131 = vmatprep.subr.bf16.mxu1 %v14572_v20  ;;  %v14642_v20 = vld [vmem:[%s18916_s13 + $0x208] ss:$16 sps:$4 sm:$0xff]  }
 0xcaf   : > { %10132 = vmatpush1.bf16.msra.mxu1 %v14570_v47  ;;  %v14647_v47 = vld [vmem:[%s18916_s13 + $0x224] ss:$16 sps:$4 sm:$0xff]  }
 0xcb0   : > { %10133 = vmatprep.subr.bf16.mxu1 %v14578_v22  ;;  %v14650_v22 = vld [vmem:[%s18916_s13 + $0x22c] ss:$16 sps:$4 sm:$0xff]  }
 0xcb3   : > { %10134 = vmatpush1.bf16.msra.mxu1 %v14576_v63  ;;  %v14645_v63 = vld [vmem:[%s18916_s13 + $0x220] ss:$16 sps:$4 sm:$0xff]  }
 0xcb4   : > { %10135 = vmatprep.subr.bf16.mxu1 %v14584_v18  ;;  %v14653_v18 = vld [vmem:[%s18916_s13 + $0x244] ss:$16 sps:$4 sm:$0xff]  }
 0xcb7   : > { %10136 = vmatpush1.bf16.msra.mxu1 %v14582_v43  ;;  %v14651_v43 = vld [vmem:[%s18916_s13 + $0x240] ss:$16 sps:$4 sm:$0xff]  }
 0xcb8   : > { %10137 = vmatprep.subr.bf16.mxu1 %v14590_v31  ;;  %v14659_v31 = vld [vmem:[%s18916_s13 + $0x264] ss:$16 sps:$4 sm:$0xff]  }
 0xcbb   : > { %10138 = vmatpush1.bf16.msra.mxu1 %v14588_v11  ;;  %v14660_v11 = vld [vmem:[%s18916_s13 + $0x268] ss:$16 sps:$4 sm:$0xff]  }
 0xcbc   : > { %10365 = vmatprep.subr.bf16.mxu1 %v14596_v17  ;;  %v14668_v17 = vld [vmem:[%s18916_s13 + $0x28c] ss:$16 sps:$4 sm:$0xff]  }
 0xd71   : > { %v9836_v59 = vpop.f32.mrb[160].mxu1 }
 0xd72   : > { %v9842_v42 = vadd.f32 %v9836_v59, %v9686_v9  ;;  %v12962_v60 = vpop.f32.mrb[161].mxu1  ;;  %v14620_v9 = vld [vmem:[%s18916_s13 + $0x8c] ss:$16 sps:$4 sm:$0xff]   ;;  %v14663_v59 = vld [vmem:[%s18916_s13 + $0x280] ss:$16 sps:$4 sm:$0xff]  }
 0xd73   : > { %v9839_v55 = vpop.f32.mrb[162].mxu1  ;;  %v14674_v60 = vld [vmem:[%s18916_s13 + $0x2ac] ss:$16 sps:$4 sm:$0xff]  }
 0xd74   : > { %v9850_v1 = vadd.f32 %v12554_v30, %v9842_v42  ;;  %v12963_v4 = vpop.f32.mrb[163].mxu1  ;;  %v14666_v30 = vld [vmem:[%s18916_s13 + $0x288] ss:$16 sps:$4 sm:$0xff]   ;;  %v14671_v42 = vld [vmem:[%s18916_s13 + $0x2a4] ss:$16 sps:$4 sm:$0xff]  }
 0xd75   : > { %v14669_v55 = vld [vmem:[%s18916_s13 + $0x2a0] ss:$16 sps:$4 sm:$0xff]   ;;  %v14677_v4 = vld [vmem:[%s18916_s13 + $0x2c4] ss:$16 sps:$4 sm:$0xff]  }
 0xd76   : > { %v9851_v48 = vmax.f32 %v9850_v1, 0.0  ;;  %v14672_v1 = vld [vmem:[%s18916_s13 + $0x2a8] ss:$16 sps:$4 sm:$0xff]  }
 0xd78   : > { %v18651_v13 = vpack.c.bf16 %v9851_v48, %v9851_v48  ;;  %v14680_v48 = vld [vmem:[%s18916_s13 + $0x2cc] ss:$16 sps:$4 sm:$0xff]  }
 0xd7a   : > { %v9919_v29 = vshrl.u32 %v18651_v13, 16 }
 0xd7c   : > { %10115 = vmatmul.mubr.bf16.vlgmr.msra.gmra.mrb[180].mxu0 %v9919_v29  ;;  %10156 = vmatmul.mubr.bf16.vlgmr.msra.gmra.mrb[164].mxu1 %v9919_v29  ;;  %v14683_v29 = vld [vmem:[%s18916_s13 + $0x2e4] ss:$16 sps:$4 sm:$0xff]  }
 0xd7d   : > { %10325 = vmatpush1.bf16.msra.mxu0 %v14591_v54  ;;  %10366 = vmatpush1.bf16.msra.mxu1 %v14594_v45  ;;  %v14675_v54 = vld [vmem:[%s18916_s13 + $0x2c0] ss:$16 sps:$4 sm:$0xff]   ;;  %v14678_v45 = vld [vmem:[%s18916_s13 + $0x2c8] ss:$16 sps:$4 sm:$0xff]  }
 0xd7e   : > { %10326 = vmatprep.subr.bf16.mxu0 %v14599_v14  ;;  %10367 = vmatprep.subr.bf16.mxu1 %v14602_v38  ;;  %v14686_v14 = vld [vmem:[%s18916_s13 + $0x2ec] ss:$16 sps:$4 sm:$0xff]   ;;  %v14681_v38 = vld [vmem:[%s18916_s13 + $0x2e0] ss:$16 sps:$4 sm:$0xff]  }
 0xd7f   : > { %10356 = vmatprep.mubr.bf16.mxu0 %v14791_v6  ;;  %10397 = vmatprep.mubr.bf16.mxu1 %v14791_v6 }
 0xd81   : > { %10327 = vmatpush1.bf16.msra.mxu0 %v14597_v33  ;;  %10368 = vmatpush1.bf16.msra.mxu1 %v14600_v15  ;;  %v14684_v33 = vld [vmem:[%s18916_s13 + $0x2e8] ss:$16 sps:$4 sm:$0xff]   ;;  %v10440_v15 = vrot.slane %v18651_v13, 1 }
 0xd82   : > { %10328 = vmatprep.subr.bf16.mxu0 %v14605_v50  ;;  %10369 = vmatprep.subr.bf16.mxu1 %v14608_v40 }
 0xd85   : > { %10329 = vmatpush1.bf16.msra.mxu0 %v14603_v2  ;;  %10370 = vmatpush1.bf16.msra.mxu1 %v14606_v26 }
 0xd86   : > { %10330 = vmatprep.subr.bf16.mxu0 %v14611_v37  ;;  %10371 = vmatprep.subr.bf16.mxu1 %v14614_v3 }
 0xd89   : > { %10331 = vmatpush1.bf16.msra.mxu0 %v14609_v56  ;;  %10372 = vmatpush1.bf16.msra.mxu1 %v14612_v25 }
 0xd8a   : > { %10332 = vmatprep.subr.bf16.mxu0 %v14617_v8  ;;  %10373 = vmatprep.subr.bf16.mxu1 %v14620_v9 }
 0xd8d   : > { %10333 = vmatpush1.bf16.msra.mxu0 %v14615_v53  ;;  %10374 = vmatpush1.bf16.msra.mxu1 %v14618_v57 }
 0xd8e   : > { %10334 = vmatprep.subr.bf16.mxu0 %v14623_v52  ;;  %10375 = vmatprep.subr.bf16.mxu1 %v14626_v24 }
 0xd91   : > { %10335 = vmatpush1.bf16.msra.mxu0 %v14621_v51  ;;  %10376 = vmatpush1.bf16.msra.mxu1 %v14624_v5 }
 0xd92   : > { %10336 = vmatprep.subr.bf16.mxu0 %v14629_v34  ;;  %10377 = vmatprep.subr.bf16.mxu1 %v14632_v7 }
 0xd95   : > { %10337 = vmatpush1.bf16.msra.mxu0 %v14627_v49  ;;  %10378 = vmatpush1.bf16.msra.mxu1 %v14630_v16  ;;  %v10688_v16 = vld [vmem:[%s18917_s14] sm:$0xf] }
 0xd96   : > { %10338 = vmatprep.subr.bf16.mxu0 %v14635_v27  ;;  %10379 = vmatprep.subr.bf16.mxu1 %v14638_v35  ;;  %v14794_v27 = vmov 1966171168  }
 0xd97   : > { %v10725_v35 = vunpack.c.l.s4 %v14794_v27 }
 0xd99   : > { %10339 = vmatpush1.bf16.msra.mxu0 %v14633_v58  ;;  %10380 = vmatpush1.bf16.msra.mxu1 %v14636_v61  ;;  %v10693_v58 = vrot.slane %v10688_v16, %v16615_v36  ;;  %v10701_v61 = vrot.slane %v10688_v16, %v16618_v39 }
 0xd9a   : > { %10602 = vmatprep.subr.bf16.mxu0 %v14641_v46  ;;  %10643 = vmatprep.subr.bf16.mxu1 %v14644_v23 }
 0xd9c   : > { %10357 = vmatmul.mubr.bf16.vlgmr.msra.gmra.mrb[184].mxu0 %v18651_v13  ;;  %10398 = vmatmul.mubr.bf16.vlgmr.msra.gmra.mrb[168].mxu1 %v18651_v13 }
 0xd9d   : > { %10603 = vmatpush1.bf16.msra.mxu0 %v14639_v19  ;;  %10644 = vmatpush1.bf16.msra.mxu1 %v14642_v20  ;;  %v10697_v19 = vrot.slane %v10688_v16, %v16624_v41  ;;  %v10705_v20 = vrot.slane %v10688_v16, %v16627_v44 }
 0xd9e   : > { %10604 = vmatprep.subr.bf16.mxu0 %v14647_v47  ;;  %10645 = vmatprep.subr.bf16.mxu1 %v14650_v22 }
 0xd9f   : > { %10634 = vmatprep.mubr.bf16.mxu0 %v14791_v6  ;;  %10675 = vmatprep.mubr.bf16.mxu1 %v14791_v6  ;;  %v14662_v6 = vld [vmem:[%s18916_s13 + $0x26c] ss:$16 sps:$4 sm:$0xff]  }
 0xda1   : > { %10605 = vmatpush1.bf16.msra.mxu0 %v14645_v63  ;;  %10646 = vmatpush1.bf16.msra.mxu1 %v14648_v0 }
 0xda2   : > { %10606 = vmatprep.subr.bf16.mxu0 %v14653_v18  ;;  %10647 = vmatprep.subr.bf16.mxu1 %v14656_v21  ;;  %v10726_v21 = vunpack.c.0.s8 %v10725_v35 }
 0xda5   : > { %10607 = vmatpush1.bf16.msra.mxu0 %v14651_v43  ;;  %10648 = vmatpush1.bf16.msra.mxu1 %v14654_v62 }
 0xda6   : > { %10608 = vmatprep.subr.bf16.mxu0 %v14659_v31  ;;  %10649 = vmatprep.subr.bf16.mxu1 %v14662_v6 }
 0xda9   : > { %10609 = vmatpush1.bf16.msra.mxu0 %v14657_v10  ;;  %10650 = vmatpush1.bf16.msra.mxu1 %v14660_v11 }
 0xdaa   : > { %10610 = vmatprep.subr.bf16.mxu0 %v14665_v12  ;;  %10651 = vmatprep.subr.bf16.mxu1 %v14668_v17 }
 0xdad   : > { %10611 = vmatpush1.bf16.msra.mxu0 %v14663_v59  ;;  %10652 = vmatpush1.bf16.msra.mxu1 %v14666_v30  ;;  %v10729_v59 = vsub.s32 %v10726_v21, %v16612_v28 }
 0xdae   : > { %10612 = vmatprep.subr.bf16.mxu0 %v14671_v42  ;;  %10653 = vmatprep.subr.bf16.mxu1 %v14674_v60 }
 0xdb1   : > { %10613 = vmatpush1.bf16.msra.mxu0 %v14669_v55  ;;  %10654 = vmatpush1.bf16.msra.mxu1 %v14672_v1 }
 0xdb2   : > { %10614 = vmatprep.subr.bf16.mxu0 %v14677_v4  ;;  %10655 = vmatprep.subr.bf16.mxu1 %v14680_v48 }
 0xdb5   : > { %10615 = vmatpush1.bf16.msra.mxu0 %v14675_v54  ;;  %10656 = vmatpush1.bf16.msra.mxu1 %v14678_v45 }
 0xdb6   : > { %10616 = vmatprep.subr.bf16.mxu0 %v14683_v29  ;;  %10657 = vmatprep.subr.bf16.mxu1 %v14686_v14 }
 0xdb9   : > { %10617 = vmatpush1.bf16.msra.mxu0 %v14681_v38  ;;  %10658 = vmatpush1.bf16.msra.mxu1 %v14684_v33 }
 0xdbc   : > { %10635 = vmatmul.mubr.bf16.vlgmr.msra.gmra.mrb[188].mxu0 %v10440_v15  ;;  %10676 = vmatmul.mubr.bf16.vlgmr.msra.gmra.mrb[172].mxu1 %v10440_v15 }
 0xe4f   : > { %v10116_v50 = vpop.f32.mrb[180].mxu0  ;;  %v10157_v40 = vpop.f32.mrb[164].mxu1 }
 0xe50   : > { %v10118_v2 = vpop.f32.mrb[181].mxu0  ;;  %v10159_v26 = vpop.f32.mrb[165].mxu1 }
 0xe51   : > { %v10120_v37 = vpop.f32.mrb[182].mxu0  ;;  %v10161_v3 = vpop.f32.mrb[166].mxu1 }
 0xe52   : > { %v10121_v56 = vpop.f32.mrb[183].mxu0  ;;  %v10162_v25 = vpop.f32.mrb[167].mxu1 }
 0xe6f   : > { %v10358_v8 = vpop.f32.mrb[184].mxu0  ;;  %v10399_v9 = vpop.f32.mrb[168].mxu1 }
 0xe70   : > { %v10359_v53 = vadd.f32 %v10358_v8, %v10116_v50  ;;  %v10400_v57 = vadd.f32 %v10399_v9, %v10157_v40  ;;  %v10360_v52 = vpop.f32.mrb[185].mxu0  ;;  %v10401_v24 = vpop.f32.mrb[169].mxu1 }
 0xe71   : > { %v10361_v51 = vadd.f32 %v10360_v52, %v10118_v2  ;;  %v10402_v5 = vadd.f32 %v10401_v24, %v10159_v26  ;;  %v10362_v34 = vpop.f32.mrb[186].mxu0  ;;  %v10403_v13 = vpop.f32.mrb[170].mxu1 }
 0xe72   : > { %v10363_v7 = vpop.f32.mrb[187].mxu0  ;;  %v10404_v49 = vpop.f32.mrb[171].mxu1 }
 0xe8f   : > { %v10636_v46 = vpop.f32.mrb[188].mxu0  ;;  %v10677_v23 = vpop.f32.mrb[172].mxu1 }
 0xe90   : > { %v10684_v47 = vadd.f32 %v10636_v46, %v10359_v53  ;;  %v10686_v22 = vadd.f32 %v10677_v23, %v10400_v57  ;;  %v10638_v63 = vpop.f32.mrb[189].mxu0  ;;  %v10679_v0 = vpop.f32.mrb[173].mxu1 }
 0xe91   : > { %v10685_v18 = vadd.f32 %v10638_v63, %v10361_v51  ;;  %v10687_v43 = vadd.f32 %v10679_v0, %v10402_v5  ;;  %v10640_v62 = vpop.f32.mrb[190].mxu0  ;;  %v10681_v31 = vpop.f32.mrb[174].mxu1 }
 0xe92   : > { %v10710_v6 = vadd.f32 %v10693_v58, %v10684_v47  ;;  %v10712_v36 = vadd.f32 %v10701_v61, %v10686_v22  ;;  %v10641_v39 = vpop.f32.mrb[191].mxu0  ;;  %v10682_v10 = vpop.f32.mrb[175].mxu1 }
 0xe93   : > { %v10711_v11 = vadd.f32 %v10697_v19, %v10685_v18  ;;  %v10713_v12 = vadd.f32 %v10705_v20, %v10687_v43 }
 0xe94   : > { %v10714_v41 = vmax.f32 %v10710_v6, 0.0  ;;  %v10716_v17 = vmax.f32 %v10712_v36, 0.0 }
 0xe95   : > { %v10715_v44 = vmax.f32 %v10711_v11, 0.0  ;;  %v10717_v30 = vmax.f32 %v10713_v12, 0.0 }
 0xe97   : > { %v10722_v42 = vcombine.low %v10714_v41, %v10715_v44  ;;  %v10723_v60 = vcombine.low %v10716_v17, %v10717_v30 }
 0xe99   : > { %v10730_v55 = vrot.slane %v10722_v42, %v10729_v59  ;;  %v10737_v1 = vrot.slane %v10723_v60, %v10729_v59 }
 0xe9b   : > { %v10738_v4 = vcombine.low %v10730_v55, %v10737_v1 }
 0xe9d   : > { %v10745_v48 = vrot.slane %v10738_v4, %v10729_v59 }
 0xe9f   : > { %10751 = vst.msk [vmem:[%s514_s28] sm:$0xf] %vm10749_vm8, %v10745_v48 }
 0xea0   : > { %14740 = shalt.err (!%p14737_p3)
}
 0xea1   : > { %s14741_s27 = scalar_lea.hbm %s18861_s19, 64  ;;  %s14745_s28 = scalar_lea.hbm %s18919_s16, 128 }
 0xea2   : > { %p14742_p4 = scmp.ne.s32.totalorder %s18861_s19, %s14741_s27  ;;  %p14746_p9 = scmp.lt.u32.totalorder %s18861_s19, %s18919_s16 }
 0xea3   : > { %p14747_p10 = scmp.lt.u32.totalorder %s14745_s28, %s14741_s27  ;;  %p14749_p12 = scmp.lt.u32.totalorder %s14741_s27, %s18861_s19 }
 0xea4   : > { %p14743_p7 = pnand %p14742_p4, %p14919_p5 }
 0xea5   : > { %p14748_p11 = por %p14747_p10, %p14746_p9 }
 0xea6   : > { %p14744_p8 = pneg %p14743_p7 }
 0xea7   : > { %p14750_p13 = por %p14749_p12, %p14748_p11 }
 0xea9   : > { %p14751_p0 = pnand %p14750_p13, %p14744_p8 }
 0xeab   : > { %14754 = shalt.err (!%p14751_p0)
}
 0xeac   : > { %13125 = dma.vmem_to_hbm [thread:$0]  (%p14919_p5), %s18863_s17, 64, %s18861_s19, %s10753_s20  }
 0xead PF: > { %s18934_s26 = sld [smem:[#allocation5_spill]]  ;;  %p13131_p1 = scmp.ge.s32.totalorder %s14789_s24, 2 }
 0xeaf   : > { %p13128_p2 = pnand %p13131_p1, %p14923_p6 }
 0xeb3   : > { %s10779_s0 = sand.u32 1, %s18934_s26  }
 0xeb4   : > { %s10780_s25 = scalar_lea.sflag [#allocation3], %s10779_s0 }
 0xeb5   : > { %14772 = dma.done.wait (!%p13128_p2), %s10780_s25, 64  }
 0xeb6   : > { %14774 = vsyncadd (!%p13128_p2), %s10780_s25, 4294967232  ;;  %s18936_s24 = sld [smem:[#allocation7_spill]]  ;;  %s18937_s27 = sld [smem:[#allocation6_spill]] }
 0xeb7   : > { %s18938_s23 = sld [smem:[#allocation8_spill]]  ;;  %s18939_s21 = smov %s14781_s22 }
 0xebc   : > { %p26_p3 = scmp.ge.s32.totalorder %s18936_s24, 4   ;;  %s18940_s22 = smov %s18937_s27 }
 0xebe   :  { %28 = sbr.rel (!%p26_p3) target bundleno = 5 (0x5), region = 137 }
 0xec5   :  { %10785 = vsyncpa [#allocation3], 1 }
 0xec6   :  { %10787 = vsyncpa [#allocation3 + $0x1], 1 }

</bundles_post_ra>
